<compile_context>
chip_gen: v6e
topology: v6e:2x2x1
jax: 0.10.0
libtpu: 0.0.40
codegen_flags: <defaults>
</compile_context>

<pallas_src>
import math

import jax
import jax.numpy as jnp
from jax.experimental import pallas as pl
from jax.experimental.pallas import tpu as pltpu

HEAD1 = 2   # args.head1
HEAD2 = 2   # args.head2
HEAD3 = 2   # args.head3
T_DFF = 1   # args.t_dff

BF16 = jnp.bfloat16

# Fused/padded weight keys per layer (order == pallas_call argument order).
L1_KEYS = ('WQ', 'WK', 'Wvrg', 'Wfc', 'Wff1', 'Wff2', 'Wga', 'bg')
L2_KEYS = ('Wqk', 'Wvrg', 'Wfc', 'Wff1', 'Wff2', 'Wga', 'bg')
L3_KEYS = ('Wqk', 'Wvr', 'Wfc', 'Wff1', 'Wff2')   # layer3 forget gate is dead code


# ----------------------------------------------------------------------------
# Shared math: used both inside the Pallas kernel and by the pure-JAX reference,
# so the correctness check compares identical numerics with different lowering.
# ----------------------------------------------------------------------------

def _mm(a, w):
    """Matmul with MXU-friendly inputs and f32 accumulation.
    astype is a no-op when the activation was already cast to w.dtype once."""
    return jnp.dot(a.astype(w.dtype), w, preferred_element_type=jnp.float32)


def _heads_context(Q, K, V, n_heads, d_head):
    """SelfAttention2 context: per-row softmax of each query head's scores against
    every key head; scale 1/sqrt(d_head) is pre-folded into WQ."""
    if n_heads == 2:
        Q0, Q1 = Q[:, :d_head], Q[:, d_head:]
        K0, K1 = K[:, :d_head], K[:, d_head:]
        V0, V1 = V[:, :d_head], V[:, d_head:]
        dV = V1 - V0
        s00 = jnp.sum(Q0 * K0, axis=-1, keepdims=True)
        s01 = jnp.sum(Q0 * K1, axis=-1, keepdims=True)
        s10 = jnp.sum(Q1 * K0, axis=-1, keepdims=True)
        s11 = jnp.sum(Q1 * K1, axis=-1, keepdims=True)
        # softmax over 2 scores == sigmoid of their difference (exact identity);
        # sigmoid goes to the EUP slot, which is idle next to the MXU work.
        p0 = jax.nn.sigmoid(s01 - s00)   # weight of V1 for query head 0
        p1 = jax.nn.sigmoid(s11 - s10)   # weight of V1 for query head 1
        return jnp.concatenate([V0 + p0 * dV, V0 + p1 * dV], axis=-1)

    # general n_heads fallback (not used for head1/2/3 = 2)
    Ks = [K[:, j * d_head:(j + 1) * d_head] for j in range(n_heads)]
    Vs = [V[:, j * d_head:(j + 1) * d_head] for j in range(n_heads)]
    parts = []
    for i in range(n_heads):
        Qi = Q[:, i * d_head:(i + 1) * d_head]
        s = jnp.concatenate(
            [jnp.sum(Qi * Kj, axis=-1, keepdims=True) for Kj in Ks], axis=-1)
        s = s - jnp.max(s, axis=-1, keepdims=True)
        e = jnp.exp(s)
        p = e / jnp.sum(e, axis=-1, keepdims=True)
        ctx = p[:, 0:1] * Vs[0]
        for j in range(1, n_heads):
            ctx = ctx + p[:, j:j + 1] * Vs[j]
        parts.append(ctx)
    return parts[0] if n_heads == 1 else jnp.concatenate(parts, axis=-1)


def _ffn(attn, w):
    """PoswiseFeedForwardNet2 (no LayerNorm): relu(x W1) W2 + x."""
    h = jnp.maximum(_mm(attn, w['Wff1']), 0.0)
    return _mm(h, w['Wff2']) + attn


def _run_layers(x_f32, w1, w2, w3, heads):
    """Whole SemAttention2 forward on one row tile, with fused/padded weights."""
    h1, h2, h3 = heads
    xb = x_f32.astype(BF16)                         # cast x once (tm, 1024)

    # ---------------- layer 1: BasicStageAttention 1024 -> 256 ----------------
    half = xb.shape[-1] // 2
    vrg = _mm(xb, w1['Wvrg'])                       # fused [V | res | gate_b]
    nh1 = h1 * 256
    V, res, gbt = vrg[:, :nh1], vrg[:, nh1:nh1 + 256], vrg[:, nh1 + 256:]
    Q = _mm(xb[:, :half], w1['WQ'])
    K = _mm(xb[:, half:], w1['WK'])
    ctx = _heads_context(Q, K, V, h1, 256)
    attn = _mm(ctx, w1['Wfc']) + res
    out = _ffn(attn, w1)                            # (tm, 256) f32
    out_b = out.astype(BF16)
    forget = out * jax.nn.sigmoid(_mm(out_b, w1['Wga']) + gbt + w1['bg'])
    forget_b = forget.astype(BF16)

    # ---------------- layer 2: BasicSemAttention 256 -> 128 -------------------
    nh2 = h2 * 128
    qk = _mm(out_b, w2['Wqk'])                      # fused [Q | K]
    Q, K = qk[:, :nh2], qk[:, nh2:]
    vrg = _mm(forget_b, w2['Wvrg'])                 # fused [V | res | gate_b]
    V, res, gbt = vrg[:, :nh2], vrg[:, nh2:nh2 + 128], vrg[:, nh2 + 128:]
    ctx = _heads_context(Q, K, V, h2, 128)
    attn = _mm(ctx, w2['Wfc']) + res
    out = _ffn(attn, w2)                            # (tm, 128) f32
    out_b = out.astype(BF16)
    forget = out * jax.nn.sigmoid(_mm(out_b, w2['Wga']) + gbt + w2['bg'])
    forget_b = forget.astype(BF16)

    # ---------------- layer 3: BasicSemAttention 128 -> 64 --------------------
    # Per-head width (64) and all outputs are zero-padded to 128 in the weights,
    # so every slice is 128-lane aligned and the result is a lane-dense (tm,128)
    # slab whose columns 64: are exactly zero.  Forget gate not computed (dead).
    nh3p = h3 * 128
    qk = _mm(out_b, w3['Wqk'])                      # (tm, 2*nh3p): padded [Q | K]
    Q, K = qk[:, :nh3p], qk[:, nh3p:]
    vr = _mm(forget_b, w3['Wvr'])                   # (tm, nh3p+128): padded [V | res]
    V, res = vr[:, :nh3p], vr[:, nh3p:]
    ctx = _heads_context(Q, K, V, h3, 128)
    attn = _mm(ctx, w3['Wfc']) + res                # (tm, 128), cols 64: zero
    return _ffn(attn, w3)                           # (tm, 128), cols 64: zero


# ----------------------------------------------------------------------------
# Fused Pallas kernel: one grid step runs a (tm, 1024) row tile through all
# three layers back-to-back; weights are grid-invariant full blocks in VMEM.
# ----------------------------------------------------------------------------

def _make_fused_kernel(heads):
    n1, n2, n3 = len(L1_KEYS), len(L2_KEYS), len(L3_KEYS)

    def kernel(x_ref, *refs):
        w_refs, out_ref = refs[:-1], refs[-1]
        assert len(w_refs) == n1 + n2 + n3
        w1 = {k: r[...] for k, r in zip(L1_KEYS, w_refs[:n1])}
        w2 = {k: r[...] for k, r in zip(L2_KEYS, w_refs[n1:n1 + n2])}
        w3 = {k: r[...] for k, r in zip(L3_KEYS, w_refs[n1 + n2:])}
        out_ref[...] = _run_layers(x_ref[...], w1, w2, w3, heads).astype(out_ref.dtype)

    return kernel


def _vmem_limit_bytes():
    # ~75% of physical VMEM: ~96 MiB on v5e/v6e (128 MiB), ~48 MiB on v7x (64 MiB)
    try:
        return int(pltpu.get_tpu_info().vmem_capacity_bytes) * 3 // 4
    except Exception:
        return 48 * 1024 * 1024


def _choose_tm(B):
    """Row-tile heuristic: single tile for small B; otherwise the largest tile
    (<=512) that divides B into >=2 tiles so both v7x TensorCores get work."""
    if B <= 256:
        return B
    for tm in (512, 384, 256, 128, 64, 32, 16, 8):
        if B % tm == 0 and B // tm >= 2:
            return tm
    return B


def sem_attention2_pallas(x, params, *, tm=None):
    B, d_in = x.shape
    assert d_in == 1024, "SemAttention2 expects 1024 input features"
    if tm is None:
        tm = _choose_tm(B)
    assert B % tm == 0 and (tm == B or tm % 8 == 0), \
        "row tile must divide the batch (and be a multiple of 8 when tiling)"
    grid = (B // tm,)

    weights = ([params['layer1'][k] for k in L1_KEYS]
               + [params['layer2'][k] for k in L2_KEYS]
               + [params['layer3'][k] for k in L3_KEYS])

    in_specs = [pl.BlockSpec((tm, d_in), lambda i: (i, 0))]
    # grid-invariant weights: full block, constant index map (DMA'd once);
    # default buffering kept -- VMEM headroom makes Buffered(1) unnecessary.
    in_specs += [pl.BlockSpec(w.shape, lambda i: (0, 0)) for w in weights]

    out_specs = pl.BlockSpec((tm, 128), lambda i: (i, 0))   # lane-dense slab
    out_shape = jax.ShapeDtypeStruct((B, 128), jnp.float32)

    # Use both v7x TensorCores whenever there are >= 2 row tiles (weights are
    # only ~4.7 MB bf16, so duplicating residency per core is cheap).
    semantics = ("parallel",) if grid[0] >= 2 else ("arbitrary",)

    fn = pl.pallas_call(
        _make_fused_kernel((HEAD1, HEAD2, HEAD3)),
        out_shape=out_shape,
        grid_spec=pltpu.PrefetchScalarGridSpec(
            num_scalar_prefetch=0, grid=grid,
            in_specs=in_specs, out_specs=out_specs),
        compiler_params=pltpu.CompilerParams(
            dimension_semantics=semantics,
            vmem_limit_bytes=_vmem_limit_bytes()),
    )
    return fn(x, *weights)[:, :64]


# ----------------------------------------------------------------------------
# Deterministic parameters (shapes follow SemAttention2.__init__)
# ----------------------------------------------------------------------------

def _lin(key, fan_in, fan_out):
    return jax.random.normal(key, (fan_in, fan_out), jnp.float32) / math.sqrt(fan_in)


def _bias(key, fan_out):
    return 0.01 * jax.random.normal(key, (1, fan_out), jnp.float32)


def init_stage_layer(key, d_in, d_out, n_heads, d_ff):
    d_half = d_in // 2
    ks = jax.random.split(key, 10)
    return {
        'WQ': _lin(ks[0], d_half, n_heads * d_out),
        'WK': _lin(ks[1], d_half, n_heads * d_out),
        'WV': _lin(ks[2], d_in, n_heads * d_out),
        'Wfc': _lin(ks[3], n_heads * d_out, d_out),
        'Wres': _lin(ks[4], d_in, d_out),
        'Wff1': _lin(ks[5], d_out, d_ff * d_out),
        'Wff2': _lin(ks[6], d_ff * d_out, d_out),
        'Wga': _lin(ks[7], d_out, d_out),
        'Wgb': _lin(ks[8], d_in, d_out),
        'bg': _bias(ks[9], d_out),
    }


def init_sem_layer(key, d_in, d_out, n_heads, d_ff):
    ks = jax.random.split(key, 10)
    return {
        'WQ': _lin(ks[0], d_in, n_heads * d_out),
        'WK': _lin(ks[1], d_in, n_heads * d_out),
        'WV': _lin(ks[2], d_in, n_heads * d_out),
        'Wfc': _lin(ks[3], n_heads * d_out, d_out),
        'Wres': _lin(ks[4], d_in, d_out),
        'Wff1': _lin(ks[5], d_out, d_ff * d_out),
        'Wff2': _lin(ks[6], d_ff * d_out, d_out),
        'Wga': _lin(ks[7], d_out, d_out),
        'Wgb': _lin(ks[8], d_in, d_out),
        'bg': _bias(ks[9], d_out),
    }


def init_sem_attention2(key):
    k1, k2, k3 = jax.random.split(key, 3)
    return {
        'layer1': init_stage_layer(k1, 1024, 256, HEAD1, T_DFF),
        'layer2': init_sem_layer(k2, 256, 128, HEAD2, T_DFF),
        'layer3': init_sem_layer(k3, 128, 64, HEAD3, T_DFF),
    }


# ----------------------------------------------------------------------------
# Host-side weight preparation: scale fold, same-input fusion, layer3 padding.
# All transforms are exact (concatenation / zero-padding), except the bf16 cast.
# ----------------------------------------------------------------------------

def _pad_to(w, rows, cols):
    return jnp.pad(w, ((0, rows - w.shape[0]), (0, cols - w.shape[1])))


def _pad_head_cols(w, n_heads, d_head, d_pad):
    """(d_in, H*d_head) -> (d_in, H*d_pad): zero-pad each head's output block."""
    blocks = [jnp.pad(w[:, h * d_head:(h + 1) * d_head], ((0, 0), (0, d_pad - d_head)))
              for h in range(n_heads)]
    return jnp.concatenate(blocks, axis=1)


def _pad_head_rows(w, n_heads, d_head, d_pad):
    """(H*d_head, d_out) -> (H*d_pad, d_out): zero-pad each head's input block."""
    blocks = [jnp.pad(w[h * d_head:(h + 1) * d_head, :], ((0, d_pad - d_head), (0, 0)))
              for h in range(n_heads)]
    return jnp.concatenate(blocks, axis=0)


def prepare_params(raw, weight_dtype=jnp.bfloat16):
    p1, p2, p3 = raw['layer1'], raw['layer2'], raw['layer3']
    cast = lambda w: w.astype(weight_dtype)

    # layer1 (1024->256, d_head=256): fuse [WV|Wres|Wgb]; WQ/WK stay separate
    s1 = 1.0 / math.sqrt(256)
    l1 = {
        'WQ': cast(p1['WQ'] * s1),
        'WK': cast(p1['WK']),
        'Wvrg': cast(jnp.concatenate([p1['WV'], p1['Wres'], p1['Wgb']], axis=1)),
        'Wfc': cast(p1['Wfc']),
        'Wff1': cast(p1['Wff1']),
        'Wff2': cast(p1['Wff2']),
        'Wga': cast(p1['Wga']),
        'bg': p1['bg'].astype(jnp.float32),
    }

    # layer2 (256->128, d_head=128): fuse [WQ|WK] and [WV|Wres|Wgb]
    s2 = 1.0 / math.sqrt(128)
    l2 = {
        'Wqk': cast(jnp.concatenate([p2['WQ'] * s2, p2['WK']], axis=1)),
        'Wvrg': cast(jnp.concatenate([p2['WV'], p2['Wres'], p2['Wgb']], axis=1)),
        'Wfc': cast(p2['Wfc']),
        'Wff1': cast(p2['Wff1']),
        'Wff2': cast(p2['Wff2']),
        'Wga': cast(p2['Wga']),
        'bg': p2['bg'].astype(jnp.float32),
    }

    # layer3 (128->64, d_head=64, gate unused): pad per-head width and all
    # outputs to 128 lanes so every in-kernel slice/result is lane-dense.
    s3 = 1.0 / math.sqrt(64)
    WQp = _pad_head_cols(p3['WQ'] * s3, HEAD3, 64, 128)     # (128, 256)
    WKp = _pad_head_cols(p3['WK'], HEAD3, 64, 128)          # (128, 256)
    WVp = _pad_head_cols(p3['WV'], HEAD3, 64, 128)          # (128, 256)
    Wresp = _pad_to(p3['Wres'], 128, 128)                   # (128, 128)
    Wfcp = _pad_to(_pad_head_rows(p3['Wfc'], HEAD3, 64, 128), HEAD3 * 128, 128)
    dff3 = p3['Wff1'].shape[1]
    dff3_pad = max(128, ((dff3 + 127) // 128) * 128)
    Wff1p = _pad_to(p3['Wff1'], 128, dff3_pad)
    Wff2p = _pad_to(p3['Wff2'], dff3_pad, 128)
    l3 = {
        'Wqk': cast(jnp.concatenate([WQp, WKp], axis=1)),   # (128, 512)
        'Wvr': cast(jnp.concatenate([WVp, Wresp], axis=1)), # (128, 384)
        'Wfc': cast(Wfcp),                                  # (256, 128)
        'Wff1': cast(Wff1p),                                # (128, 128)
        'Wff2': cast(Wff2p),                                # (128, 128)
    }
    return {'layer1': l1, 'layer2': l2, 'layer3': l3}


# ----------------------------------------------------------------------------
# Pure-JAX reference (same math / same prepared params -> tight tolerance)
# ----------------------------------------------------------------------------

def sem_attention2_ref(x, params):
    out = _run_layers(x, params['layer1'], params['layer2'], params['layer3'],
                      (HEAD1, HEAD2, HEAD3))
    return out[:, :64]


# ----------------------------------------------------------------------------

if __name__ == "__main__":
    key = jax.random.PRNGKey(0)
    pkey, xkey = jax.random.split(key)

    raw_params = init_sem_attention2(pkey)
    params = prepare_params(raw_params)     # bf16 fused weights, scale folded into WQ

    B = 16                                   # small batch; feature dims fixed by module
    x = jax.random.normal(xkey, (B, 1024), jnp.float32)

    out = jax.block_until_ready(sem_attention2_pallas(x, params))
    assert out.shape == (B, 64) and out.dtype == jnp.float32

    ref = jax.block_until_ready(sem_attention2_ref(x, params))
    max_err = float(jnp.max(jnp.abs(out - ref)))
    assert jnp.allclose(out, ref, rtol=5e-3, atol=5e-3), \
        f"Pallas kernel mismatch vs reference (max|err|={max_err:.2e})"

    print("KERNEL_OK")
</pallas_src>

<mosaic_0001>
module attributes {stable_mosaic.version = 11 : i64} {
  func.func @kernel(%arg0: i32, %arg1: memref<16x1024xf32, #tpu.memory_space<vmem>>, %arg2: memref<512x512xbf16, #tpu.memory_space<vmem>>, %arg3: memref<512x512xbf16, #tpu.memory_space<vmem>>, %arg4: memref<1024x1024xbf16, #tpu.memory_space<vmem>>, %arg5: memref<512x256xbf16, #tpu.memory_space<vmem>>, %arg6: memref<256x256xbf16, #tpu.memory_space<vmem>>, %arg7: memref<256x256xbf16, #tpu.memory_space<vmem>>, %arg8: memref<256x256xbf16, #tpu.memory_space<vmem>>, %arg9: memref<1x256xf32, #tpu.memory_space<vmem>>, %arg10: memref<256x512xbf16, #tpu.memory_space<vmem>>, %arg11: memref<256x512xbf16, #tpu.memory_space<vmem>>, %arg12: memref<256x128xbf16, #tpu.memory_space<vmem>>, %arg13: memref<128x128xbf16, #tpu.memory_space<vmem>>, %arg14: memref<128x128xbf16, #tpu.memory_space<vmem>>, %arg15: memref<128x128xbf16, #tpu.memory_space<vmem>>, %arg16: memref<1x128xf32, #tpu.memory_space<vmem>>, %arg17: memref<128x512xbf16, #tpu.memory_space<vmem>>, %arg18: memref<128x384xbf16, #tpu.memory_space<vmem>>, %arg19: memref<256x128xbf16, #tpu.memory_space<vmem>>, %arg20: memref<128x128xbf16, #tpu.memory_space<vmem>>, %arg21: memref<128x128xbf16, #tpu.memory_space<vmem>>, %arg22: memref<16x128xf32, #tpu.memory_space<vmem>>) attributes {dimension_semantics = [#tpu.dimension_semantics<arbitrary>], iteration_bounds = array<i64: 1>, scalar_prefetch = 0 : i64, scratch_operands = 0 : i64, tpu.core_type = #tpu.core_type<tc>, window_params = [{transform_indices = @transform_0, window_bounds = array<i64: 16, 1024>}, {pipeline_mode = #tpu.pipeline_mode<synchronous>, transform_indices = @transform_1, window_bounds = array<i64: 512, 512>}, {pipeline_mode = #tpu.pipeline_mode<synchronous>, transform_indices = @transform_2, window_bounds = array<i64: 512, 512>}, {pipeline_mode = #tpu.pipeline_mode<synchronous>, transform_indices = @transform_3, window_bounds = array<i64: 1024, 1024>}, {pipeline_mode = #tpu.pipeline_mode<synchronous>, transform_indices = @transform_4, window_bounds = array<i64: 512, 256>}, {pipeline_mode = #tpu.pipeline_mode<synchronous>, transform_indices = @transform_5, window_bounds = array<i64: 256, 256>}, {pipeline_mode = #tpu.pipeline_mode<synchronous>, transform_indices = @transform_6, window_bounds = array<i64: 256, 256>}, {pipeline_mode = #tpu.pipeline_mode<synchronous>, transform_indices = @transform_7, window_bounds = array<i64: 256, 256>}, {pipeline_mode = #tpu.pipeline_mode<synchronous>, transform_indices = @transform_8, window_bounds = array<i64: 1, 256>}, {pipeline_mode = #tpu.pipeline_mode<synchronous>, transform_indices = @transform_9, window_bounds = array<i64: 256, 512>}, {pipeline_mode = #tpu.pipeline_mode<synchronous>, transform_indices = @transform_10, window_bounds = array<i64: 256, 512>}, {pipeline_mode = #tpu.pipeline_mode<synchronous>, transform_indices = @transform_11, window_bounds = array<i64: 256, 128>}, {pipeline_mode = #tpu.pipeline_mode<synchronous>, transform_indices = @transform_12, window_bounds = array<i64: 128, 128>}, {pipeline_mode = #tpu.pipeline_mode<synchronous>, transform_indices = @transform_13, window_bounds = array<i64: 128, 128>}, {pipeline_mode = #tpu.pipeline_mode<synchronous>, transform_indices = @transform_14, window_bounds = array<i64: 128, 128>}, {pipeline_mode = #tpu.pipeline_mode<synchronous>, transform_indices = @transform_15, window_bounds = array<i64: 1, 128>}, {pipeline_mode = #tpu.pipeline_mode<synchronous>, transform_indices = @transform_16, window_bounds = array<i64: 128, 512>}, {pipeline_mode = #tpu.pipeline_mode<synchronous>, transform_indices = @transform_17, window_bounds = array<i64: 128, 384>}, {pipeline_mode = #tpu.pipeline_mode<synchronous>, transform_indices = @transform_18, window_bounds = array<i64: 256, 128>}, {pipeline_mode = #tpu.pipeline_mode<synchronous>, transform_indices = @transform_19, window_bounds = array<i64: 128, 128>}, {pipeline_mode = #tpu.pipeline_mode<synchronous>, transform_indices = @transform_20, window_bounds = array<i64: 128, 128>}, {transform_indices = @transform_21, window_bounds = array<i64: 16, 128>}]} {
    %c0 = arith.constant 0 : index
    %c0_0 = arith.constant 0 : index
    %0 = vector.load %arg2[%c0, %c0_0] : memref<512x512xbf16, #tpu.memory_space<vmem>>, vector<512x512xbf16>
    %c0_1 = arith.constant 0 : index
    %c0_2 = arith.constant 0 : index
    %1 = vector.load %arg3[%c0_1, %c0_2] : memref<512x512xbf16, #tpu.memory_space<vmem>>, vector<512x512xbf16>
    %c0_3 = arith.constant 0 : index
    %c0_4 = arith.constant 0 : index
    %2 = vector.load %arg4[%c0_3, %c0_4] : memref<1024x1024xbf16, #tpu.memory_space<vmem>>, vector<1024x1024xbf16>
    %c0_5 = arith.constant 0 : index
    %c0_6 = arith.constant 0 : index
    %3 = vector.load %arg5[%c0_5, %c0_6] : memref<512x256xbf16, #tpu.memory_space<vmem>>, vector<512x256xbf16>
    %c0_7 = arith.constant 0 : index
    %c0_8 = arith.constant 0 : index
    %4 = vector.load %arg6[%c0_7, %c0_8] : memref<256x256xbf16, #tpu.memory_space<vmem>>, vector<256x256xbf16>
    %c0_9 = arith.constant 0 : index
    %c0_10 = arith.constant 0 : index
    %5 = vector.load %arg7[%c0_9, %c0_10] : memref<256x256xbf16, #tpu.memory_space<vmem>>, vector<256x256xbf16>
    %c0_11 = arith.constant 0 : index
    %c0_12 = arith.constant 0 : index
    %6 = vector.load %arg8[%c0_11, %c0_12] : memref<256x256xbf16, #tpu.memory_space<vmem>>, vector<256x256xbf16>
    %c0_13 = arith.constant 0 : index
    %c0_14 = arith.constant 0 : index
    %7 = vector.load %arg9[%c0_13, %c0_14] : memref<1x256xf32, #tpu.memory_space<vmem>>, vector<1x256xf32>
    %c0_15 = arith.constant 0 : index
    %c0_16 = arith.constant 0 : index
    %8 = vector.load %arg10[%c0_15, %c0_16] : memref<256x512xbf16, #tpu.memory_space<vmem>>, vector<256x512xbf16>
    %c0_17 = arith.constant 0 : index
    %c0_18 = arith.constant 0 : index
    %9 = vector.load %arg11[%c0_17, %c0_18] : memref<256x512xbf16, #tpu.memory_space<vmem>>, vector<256x512xbf16>
    %c0_19 = arith.constant 0 : index
    %c0_20 = arith.constant 0 : index
    %10 = vector.load %arg12[%c0_19, %c0_20] : memref<256x128xbf16, #tpu.memory_space<vmem>>, vector<256x128xbf16>
    %c0_21 = arith.constant 0 : index
    %c0_22 = arith.constant 0 : index
    %11 = vector.load %arg13[%c0_21, %c0_22] : memref<128x128xbf16, #tpu.memory_space<vmem>>, vector<128x128xbf16>
    %c0_23 = arith.constant 0 : index
    %c0_24 = arith.constant 0 : index
    %12 = vector.load %arg14[%c0_23, %c0_24] : memref<128x128xbf16, #tpu.memory_space<vmem>>, vector<128x128xbf16>
    %c0_25 = arith.constant 0 : index
    %c0_26 = arith.constant 0 : index
    %13 = vector.load %arg15[%c0_25, %c0_26] : memref<128x128xbf16, #tpu.memory_space<vmem>>, vector<128x128xbf16>
    %c0_27 = arith.constant 0 : index
    %c0_28 = arith.constant 0 : index
    %14 = vector.load %arg16[%c0_27, %c0_28] : memref<1x128xf32, #tpu.memory_space<vmem>>, vector<1x128xf32>
    %c0_29 = arith.constant 0 : index
    %c0_30 = arith.constant 0 : index
    %15 = vector.load %arg17[%c0_29, %c0_30] : memref<128x512xbf16, #tpu.memory_space<vmem>>, vector<128x512xbf16>
    %c0_31 = arith.constant 0 : index
    %c0_32 = arith.constant 0 : index
    %16 = vector.load %arg18[%c0_31, %c0_32] : memref<128x384xbf16, #tpu.memory_space<vmem>>, vector<128x384xbf16>
    %c0_33 = arith.constant 0 : index
    %c0_34 = arith.constant 0 : index
    %17 = vector.load %arg19[%c0_33, %c0_34] : memref<256x128xbf16, #tpu.memory_space<vmem>>, vector<256x128xbf16>
    %c0_35 = arith.constant 0 : index
    %c0_36 = arith.constant 0 : index
    %18 = vector.load %arg20[%c0_35, %c0_36] : memref<128x128xbf16, #tpu.memory_space<vmem>>, vector<128x128xbf16>
    %c0_37 = arith.constant 0 : index
    %c0_38 = arith.constant 0 : index
    %19 = vector.load %arg21[%c0_37, %c0_38] : memref<128x128xbf16, #tpu.memory_space<vmem>>, vector<128x128xbf16>
    %c0_39 = arith.constant 0 : index
    %c0_40 = arith.constant 0 : index
    %20 = vector.load %arg1[%c0_39, %c0_40] : memref<16x1024xf32, #tpu.memory_space<vmem>>, vector<16x1024xf32>
    %21 = arith.truncf %20 : vector<16x1024xf32> to vector<16x1024xbf16>
    %cst = arith.constant dense<0.000000e+00> : vector<16x1024xf32>
    %22 = tpu.matmul %21, %2, %cst {dimension_numbers = #tpu.dot_dimension_numbers<[1], [0], [0], [1], [0, 0, 1, 1], [], []>} : vector<16x1024xbf16>, vector<1024x1024xbf16>, vector<16x1024xf32> -> vector<16x1024xf32>
    %23 = vector.extract_strided_slice %22 {offsets = [0, 0], sizes = [16, 512], strides = [1, 1]} : vector<16x1024xf32> to vector<16x512xf32>
    %24 = vector.extract_strided_slice %22 {offsets = [0, 512], sizes = [16, 256], strides = [1, 1]} : vector<16x1024xf32> to vector<16x256xf32>
    %25 = vector.extract_strided_slice %22 {offsets = [0, 768], sizes = [16, 256], strides = [1, 1]} : vector<16x1024xf32> to vector<16x256xf32>
    %26 = vector.extract_strided_slice %21 {offsets = [0, 0], sizes = [16, 512], strides = [1, 1]} : vector<16x1024xbf16> to vector<16x512xbf16>
    %cst_41 = arith.constant dense<0.000000e+00> : vector<16x512xf32>
    %27 = tpu.matmul %26, %0, %cst_41 {dimension_numbers = #tpu.dot_dimension_numbers<[1], [0], [0], [1], [0, 0, 1, 1], [], []>} : vector<16x512xbf16>, vector<512x512xbf16>, vector<16x512xf32> -> vector<16x512xf32>
    %28 = vector.extract_strided_slice %21 {offsets = [0, 512], sizes = [16, 512], strides = [1, 1]} : vector<16x1024xbf16> to vector<16x512xbf16>
    %cst_42 = arith.constant dense<0.000000e+00> : vector<16x512xf32>
    %29 = tpu.matmul %28, %1, %cst_42 {dimension_numbers = #tpu.dot_dimension_numbers<[1], [0], [0], [1], [0, 0, 1, 1], [], []>} : vector<16x512xbf16>, vector<512x512xbf16>, vector<16x512xf32> -> vector<16x512xf32>
    %30 = vector.extract_strided_slice %27 {offsets = [0, 0], sizes = [16, 256], strides = [1, 1]} : vector<16x512xf32> to vector<16x256xf32>
    %31 = vector.extract_strided_slice %27 {offsets = [0, 256], sizes = [16, 256], strides = [1, 1]} : vector<16x512xf32> to vector<16x256xf32>
    %32 = vector.extract_strided_slice %29 {offsets = [0, 0], sizes = [16, 256], strides = [1, 1]} : vector<16x512xf32> to vector<16x256xf32>
    %33 = vector.extract_strided_slice %29 {offsets = [0, 256], sizes = [16, 256], strides = [1, 1]} : vector<16x512xf32> to vector<16x256xf32>
    %34 = vector.extract_strided_slice %23 {offsets = [0, 0], sizes = [16, 256], strides = [1, 1]} : vector<16x512xf32> to vector<16x256xf32>
    %35 = vector.extract_strided_slice %23 {offsets = [0, 256], sizes = [16, 256], strides = [1, 1]} : vector<16x512xf32> to vector<16x256xf32>
    %36 = arith.subf %35, %34 : vector<16x256xf32>
    %37 = arith.mulf %30, %32 : vector<16x256xf32>
    %cst_43 = arith.constant dense<0.000000e+00> : vector<16xf32>
    %38 = vector.multi_reduction <add>, %37, %cst_43 [1] : vector<16x256xf32> to vector<16xf32>
    %39 = vector.shape_cast %38 : vector<16xf32> to vector<16x1xf32>
    %40 = arith.mulf %30, %33 : vector<16x256xf32>
    %cst_44 = arith.constant dense<0.000000e+00> : vector<16xf32>
    %41 = vector.multi_reduction <add>, %40, %cst_44 [1] : vector<16x256xf32> to vector<16xf32>
    %42 = vector.shape_cast %41 : vector<16xf32> to vector<16x1xf32>
    %43 = arith.mulf %31, %32 : vector<16x256xf32>
    %cst_45 = arith.constant dense<0.000000e+00> : vector<16xf32>
    %44 = vector.multi_reduction <add>, %43, %cst_45 [1] : vector<16x256xf32> to vector<16xf32>
    %45 = vector.shape_cast %44 : vector<16xf32> to vector<16x1xf32>
    %46 = arith.mulf %31, %33 : vector<16x256xf32>
    %cst_46 = arith.constant dense<0.000000e+00> : vector<16xf32>
    %47 = vector.multi_reduction <add>, %46, %cst_46 [1] : vector<16x256xf32> to vector<16xf32>
    %48 = vector.shape_cast %47 : vector<16xf32> to vector<16x1xf32>
    %49 = arith.subf %42, %39 : vector<16x1xf32>
    %50 = arith.negf %49 : vector<16x1xf32>
    %51 = math.exp %50 : vector<16x1xf32>
    %cst_47 = arith.constant 1.000000e+00 : f32
    %52 = vector.broadcast %cst_47 : f32 to vector<16x1xf32>
    %53 = arith.addf %52, %51 : vector<16x1xf32>
    %54 = arith.divf %52, %53 : vector<16x1xf32>
    %55 = arith.subf %48, %45 : vector<16x1xf32>
    %56 = arith.negf %55 : vector<16x1xf32>
    %57 = math.exp %56 : vector<16x1xf32>
    %cst_48 = arith.constant 1.000000e+00 : f32
    %58 = vector.broadcast %cst_48 : f32 to vector<16x1xf32>
    %59 = arith.addf %58, %57 : vector<16x1xf32>
    %60 = arith.divf %58, %59 : vector<16x1xf32>
    %61 = vector.broadcast %54 : vector<16x1xf32> to vector<16x256xf32>
    %62 = arith.mulf %61, %36 : vector<16x256xf32>
    %63 = arith.addf %34, %62 : vector<16x256xf32>
    %64 = vector.broadcast %60 : vector<16x1xf32> to vector<16x256xf32>
    %65 = arith.mulf %64, %36 : vector<16x256xf32>
    %66 = arith.addf %34, %65 : vector<16x256xf32>
    %67 = tpu.concatenate %63, %66 in 1 : vector<16x256xf32>, vector<16x256xf32> -> vector<16x512xf32>
    %68 = arith.truncf %67 : vector<16x512xf32> to vector<16x512xbf16>
    %cst_49 = arith.constant dense<0.000000e+00> : vector<16x256xf32>
    %69 = tpu.matmul %68, %3, %cst_49 {dimension_numbers = #tpu.dot_dimension_numbers<[1], [0], [0], [1], [0, 0, 1, 1], [], []>} : vector<16x512xbf16>, vector<512x256xbf16>, vector<16x256xf32> -> vector<16x256xf32>
    %70 = arith.addf %69, %24 : vector<16x256xf32>
    %71 = arith.truncf %70 : vector<16x256xf32> to vector<16x256xbf16>
    %cst_50 = arith.constant dense<0.000000e+00> : vector<16x256xf32>
    %72 = tpu.matmul %71, %4, %cst_50 {dimension_numbers = #tpu.dot_dimension_numbers<[1], [0], [0], [1], [0, 0, 1, 1], [], []>} : vector<16x256xbf16>, vector<256x256xbf16>, vector<16x256xf32> -> vector<16x256xf32>
    %cst_51 = arith.constant 0.000000e+00 : f32
    %73 = vector.broadcast %cst_51 : f32 to vector<16x256xf32>
    %74 = arith.maximumf %72, %73 : vector<16x256xf32>
    %75 = arith.truncf %74 : vector<16x256xf32> to vector<16x256xbf16>
    %cst_52 = arith.constant dense<0.000000e+00> : vector<16x256xf32>
    %76 = tpu.matmul %75, %5, %cst_52 {dimension_numbers = #tpu.dot_dimension_numbers<[1], [0], [0], [1], [0, 0, 1, 1], [], []>} : vector<16x256xbf16>, vector<256x256xbf16>, vector<16x256xf32> -> vector<16x256xf32>
    %77 = arith.addf %76, %70 : vector<16x256xf32>
    %78 = arith.truncf %77 : vector<16x256xf32> to vector<16x256xbf16>
    %cst_53 = arith.constant dense<0.000000e+00> : vector<16x256xf32>
    %79 = tpu.matmul %78, %6, %cst_53 {dimension_numbers = #tpu.dot_dimension_numbers<[1], [0], [0], [1], [0, 0, 1, 1], [], []>} : vector<16x256xbf16>, vector<256x256xbf16>, vector<16x256xf32> -> vector<16x256xf32>
    %80 = arith.addf %79, %25 : vector<16x256xf32>
    %81 = vector.broadcast %7 : vector<1x256xf32> to vector<16x256xf32>
    %82 = arith.addf %80, %81 : vector<16x256xf32>
    %83 = arith.negf %82 : vector<16x256xf32>
    %84 = math.exp %83 : vector<16x256xf32>
    %cst_54 = arith.constant 1.000000e+00 : f32
    %85 = vector.broadcast %cst_54 : f32 to vector<16x256xf32>
    %86 = arith.addf %85, %84 : vector<16x256xf32>
    %87 = arith.divf %85, %86 : vector<16x256xf32>
    %88 = arith.mulf %77, %87 : vector<16x256xf32>
    %89 = arith.truncf %88 : vector<16x256xf32> to vector<16x256xbf16>
    %cst_55 = arith.constant dense<0.000000e+00> : vector<16x512xf32>
    %90 = tpu.matmul %78, %8, %cst_55 {dimension_numbers = #tpu.dot_dimension_numbers<[1], [0], [0], [1], [0, 0, 1, 1], [], []>} : vector<16x256xbf16>, vector<256x512xbf16>, vector<16x512xf32> -> vector<16x512xf32>
    %91 = vector.extract_strided_slice %90 {offsets = [0, 0], sizes = [16, 256], strides = [1, 1]} : vector<16x512xf32> to vector<16x256xf32>
    %92 = vector.extract_strided_slice %90 {offsets = [0, 256], sizes = [16, 256], strides = [1, 1]} : vector<16x512xf32> to vector<16x256xf32>
    %cst_56 = arith.constant dense<0.000000e+00> : vector<16x512xf32>
    %93 = tpu.matmul %89, %9, %cst_56 {dimension_numbers = #tpu.dot_dimension_numbers<[1], [0], [0], [1], [0, 0, 1, 1], [], []>} : vector<16x256xbf16>, vector<256x512xbf16>, vector<16x512xf32> -> vector<16x512xf32>
    %94 = vector.extract_strided_slice %93 {offsets = [0, 0], sizes = [16, 256], strides = [1, 1]} : vector<16x512xf32> to vector<16x256xf32>
    %95 = vector.extract_strided_slice %93 {offsets = [0, 256], sizes = [16, 128], strides = [1, 1]} : vector<16x512xf32> to vector<16x128xf32>
    %96 = vector.extract_strided_slice %93 {offsets = [0, 384], sizes = [16, 128], strides = [1, 1]} : vector<16x512xf32> to vector<16x128xf32>
    %97 = vector.extract_strided_slice %91 {offsets = [0, 0], sizes = [16, 128], strides = [1, 1]} : vector<16x256xf32> to vector<16x128xf32>
    %98 = vector.extract_strided_slice %91 {offsets = [0, 128], sizes = [16, 128], strides = [1, 1]} : vector<16x256xf32> to vector<16x128xf32>
    %99 = vector.extract_strided_slice %92 {offsets = [0, 0], sizes = [16, 128], strides = [1, 1]} : vector<16x256xf32> to vector<16x128xf32>
    %100 = vector.extract_strided_slice %92 {offsets = [0, 128], sizes = [16, 128], strides = [1, 1]} : vector<16x256xf32> to vector<16x128xf32>
    %101 = vector.extract_strided_slice %94 {offsets = [0, 0], sizes = [16, 128], strides = [1, 1]} : vector<16x256xf32> to vector<16x128xf32>
    %102 = vector.extract_strided_slice %94 {offsets = [0, 128], sizes = [16, 128], strides = [1, 1]} : vector<16x256xf32> to vector<16x128xf32>
    %103 = arith.subf %102, %101 : vector<16x128xf32>
    %104 = arith.mulf %97, %99 : vector<16x128xf32>
    %cst_57 = arith.constant dense<0.000000e+00> : vector<16xf32>
    %105 = vector.multi_reduction <add>, %104, %cst_57 [1] : vector<16x128xf32> to vector<16xf32>
    %106 = vector.shape_cast %105 : vector<16xf32> to vector<16x1xf32>
    %107 = arith.mulf %97, %100 : vector<16x128xf32>
    %cst_58 = arith.constant dense<0.000000e+00> : vector<16xf32>
    %108 = vector.multi_reduction <add>, %107, %cst_58 [1] : vector<16x128xf32> to vector<16xf32>
    %109 = vector.shape_cast %108 : vector<16xf32> to vector<16x1xf32>
    %110 = arith.mulf %98, %99 : vector<16x128xf32>
    %cst_59 = arith.constant dense<0.000000e+00> : vector<16xf32>
    %111 = vector.multi_reduction <add>, %110, %cst_59 [1] : vector<16x128xf32> to vector<16xf32>
    %112 = vector.shape_cast %111 : vector<16xf32> to vector<16x1xf32>
    %113 = arith.mulf %98, %100 : vector<16x128xf32>
    %cst_60 = arith.constant dense<0.000000e+00> : vector<16xf32>
    %114 = vector.multi_reduction <add>, %113, %cst_60 [1] : vector<16x128xf32> to vector<16xf32>
    %115 = vector.shape_cast %114 : vector<16xf32> to vector<16x1xf32>
    %116 = arith.subf %109, %106 : vector<16x1xf32>
    %117 = arith.negf %116 : vector<16x1xf32>
    %118 = math.exp %117 : vector<16x1xf32>
    %cst_61 = arith.constant 1.000000e+00 : f32
    %119 = vector.broadcast %cst_61 : f32 to vector<16x1xf32>
    %120 = arith.addf %119, %118 : vector<16x1xf32>
    %121 = arith.divf %119, %120 : vector<16x1xf32>
    %122 = arith.subf %115, %112 : vector<16x1xf32>
    %123 = arith.negf %122 : vector<16x1xf32>
    %124 = math.exp %123 : vector<16x1xf32>
    %cst_62 = arith.constant 1.000000e+00 : f32
    %125 = vector.broadcast %cst_62 : f32 to vector<16x1xf32>
    %126 = arith.addf %125, %124 : vector<16x1xf32>
    %127 = arith.divf %125, %126 : vector<16x1xf32>
    %128 = vector.broadcast %121 : vector<16x1xf32> to vector<16x128xf32>
    %129 = arith.mulf %128, %103 : vector<16x128xf32>
    %130 = arith.addf %101, %129 : vector<16x128xf32>
    %131 = vector.broadcast %127 : vector<16x1xf32> to vector<16x128xf32>
    %132 = arith.mulf %131, %103 : vector<16x128xf32>
    %133 = arith.addf %101, %132 : vector<16x128xf32>
    %134 = tpu.concatenate %130, %133 in 1 : vector<16x128xf32>, vector<16x128xf32> -> vector<16x256xf32>
    %135 = arith.truncf %134 : vector<16x256xf32> to vector<16x256xbf16>
    %cst_63 = arith.constant dense<0.000000e+00> : vector<16x128xf32>
    %136 = tpu.matmul %135, %10, %cst_63 {dimension_numbers = #tpu.dot_dimension_numbers<[1], [0], [0], [1], [0, 0, 1, 1], [], []>} : vector<16x256xbf16>, vector<256x128xbf16>, vector<16x128xf32> -> vector<16x128xf32>
    %137 = arith.addf %136, %95 : vector<16x128xf32>
    %138 = arith.truncf %137 : vector<16x128xf32> to vector<16x128xbf16>
    %cst_64 = arith.constant dense<0.000000e+00> : vector<16x128xf32>
    %139 = tpu.matmul %138, %11, %cst_64 {dimension_numbers = #tpu.dot_dimension_numbers<[1], [0], [0], [1], [0, 0, 1, 1], [], []>} : vector<16x128xbf16>, vector<128x128xbf16>, vector<16x128xf32> -> vector<16x128xf32>
    %cst_65 = arith.constant 0.000000e+00 : f32
    %140 = vector.broadcast %cst_65 : f32 to vector<16x128xf32>
    %141 = arith.maximumf %139, %140 : vector<16x128xf32>
    %142 = arith.truncf %141 : vector<16x128xf32> to vector<16x128xbf16>
    %cst_66 = arith.constant dense<0.000000e+00> : vector<16x128xf32>
    %143 = tpu.matmul %142, %12, %cst_66 {dimension_numbers = #tpu.dot_dimension_numbers<[1], [0], [0], [1], [0, 0, 1, 1], [], []>} : vector<16x128xbf16>, vector<128x128xbf16>, vector<16x128xf32> -> vector<16x128xf32>
    %144 = arith.addf %143, %137 : vector<16x128xf32>
    %145 = arith.truncf %144 : vector<16x128xf32> to vector<16x128xbf16>
    %cst_67 = arith.constant dense<0.000000e+00> : vector<16x128xf32>
    %146 = tpu.matmul %145, %13, %cst_67 {dimension_numbers = #tpu.dot_dimension_numbers<[1], [0], [0], [1], [0, 0, 1, 1], [], []>} : vector<16x128xbf16>, vector<128x128xbf16>, vector<16x128xf32> -> vector<16x128xf32>
    %147 = arith.addf %146, %96 : vector<16x128xf32>
    %148 = vector.broadcast %14 : vector<1x128xf32> to vector<16x128xf32>
    %149 = arith.addf %147, %148 : vector<16x128xf32>
    %150 = arith.negf %149 : vector<16x128xf32>
    %151 = math.exp %150 : vector<16x128xf32>
    %cst_68 = arith.constant 1.000000e+00 : f32
    %152 = vector.broadcast %cst_68 : f32 to vector<16x128xf32>
    %153 = arith.addf %152, %151 : vector<16x128xf32>
    %154 = arith.divf %152, %153 : vector<16x128xf32>
    %155 = arith.mulf %144, %154 : vector<16x128xf32>
    %156 = arith.truncf %155 : vector<16x128xf32> to vector<16x128xbf16>
    %cst_69 = arith.constant dense<0.000000e+00> : vector<16x512xf32>
    %157 = tpu.matmul %145, %15, %cst_69 {dimension_numbers = #tpu.dot_dimension_numbers<[1], [0], [0], [1], [0, 0, 1, 1], [], []>} : vector<16x128xbf16>, vector<128x512xbf16>, vector<16x512xf32> -> vector<16x512xf32>
    %158 = vector.extract_strided_slice %157 {offsets = [0, 0], sizes = [16, 256], strides = [1, 1]} : vector<16x512xf32> to vector<16x256xf32>
    %159 = vector.extract_strided_slice %157 {offsets = [0, 256], sizes = [16, 256], strides = [1, 1]} : vector<16x512xf32> to vector<16x256xf32>
    %cst_70 = arith.constant dense<0.000000e+00> : vector<16x384xf32>
    %160 = tpu.matmul %156, %16, %cst_70 {dimension_numbers = #tpu.dot_dimension_numbers<[1], [0], [0], [1], [0, 0, 1, 1], [], []>} : vector<16x128xbf16>, vector<128x384xbf16>, vector<16x384xf32> -> vector<16x384xf32>
    %161 = vector.extract_strided_slice %160 {offsets = [0, 0], sizes = [16, 256], strides = [1, 1]} : vector<16x384xf32> to vector<16x256xf32>
    %162 = vector.extract_strided_slice %160 {offsets = [0, 256], sizes = [16, 128], strides = [1, 1]} : vector<16x384xf32> to vector<16x128xf32>
    %163 = vector.extract_strided_slice %158 {offsets = [0, 0], sizes = [16, 128], strides = [1, 1]} : vector<16x256xf32> to vector<16x128xf32>
    %164 = vector.extract_strided_slice %158 {offsets = [0, 128], sizes = [16, 128], strides = [1, 1]} : vector<16x256xf32> to vector<16x128xf32>
    %165 = vector.extract_strided_slice %159 {offsets = [0, 0], sizes = [16, 128], strides = [1, 1]} : vector<16x256xf32> to vector<16x128xf32>
    %166 = vector.extract_strided_slice %159 {offsets = [0, 128], sizes = [16, 128], strides = [1, 1]} : vector<16x256xf32> to vector<16x128xf32>
    %167 = vector.extract_strided_slice %161 {offsets = [0, 0], sizes = [16, 128], strides = [1, 1]} : vector<16x256xf32> to vector<16x128xf32>
    %168 = vector.extract_strided_slice %161 {offsets = [0, 128], sizes = [16, 128], strides = [1, 1]} : vector<16x256xf32> to vector<16x128xf32>
    %169 = arith.subf %168, %167 : vector<16x128xf32>
    %170 = arith.mulf %163, %165 : vector<16x128xf32>
    %cst_71 = arith.constant dense<0.000000e+00> : vector<16xf32>
    %171 = vector.multi_reduction <add>, %170, %cst_71 [1] : vector<16x128xf32> to vector<16xf32>
    %172 = vector.shape_cast %171 : vector<16xf32> to vector<16x1xf32>
    %173 = arith.mulf %163, %166 : vector<16x128xf32>
    %cst_72 = arith.constant dense<0.000000e+00> : vector<16xf32>
    %174 = vector.multi_reduction <add>, %173, %cst_72 [1] : vector<16x128xf32> to vector<16xf32>
    %175 = vector.shape_cast %174 : vector<16xf32> to vector<16x1xf32>
    %176 = arith.mulf %164, %165 : vector<16x128xf32>
    %cst_73 = arith.constant dense<0.000000e+00> : vector<16xf32>
    %177 = vector.multi_reduction <add>, %176, %cst_73 [1] : vector<16x128xf32> to vector<16xf32>
    %178 = vector.shape_cast %177 : vector<16xf32> to vector<16x1xf32>
    %179 = arith.mulf %164, %166 : vector<16x128xf32>
    %cst_74 = arith.constant dense<0.000000e+00> : vector<16xf32>
    %180 = vector.multi_reduction <add>, %179, %cst_74 [1] : vector<16x128xf32> to vector<16xf32>
    %181 = vector.shape_cast %180 : vector<16xf32> to vector<16x1xf32>
    %182 = arith.subf %175, %172 : vector<16x1xf32>
    %183 = arith.negf %182 : vector<16x1xf32>
    %184 = math.exp %183 : vector<16x1xf32>
    %cst_75 = arith.constant 1.000000e+00 : f32
    %185 = vector.broadcast %cst_75 : f32 to vector<16x1xf32>
    %186 = arith.addf %185, %184 : vector<16x1xf32>
    %187 = arith.divf %185, %186 : vector<16x1xf32>
    %188 = arith.subf %181, %178 : vector<16x1xf32>
    %189 = arith.negf %188 : vector<16x1xf32>
    %190 = math.exp %189 : vector<16x1xf32>
    %cst_76 = arith.constant 1.000000e+00 : f32
    %191 = vector.broadcast %cst_76 : f32 to vector<16x1xf32>
    %192 = arith.addf %191, %190 : vector<16x1xf32>
    %193 = arith.divf %191, %192 : vector<16x1xf32>
    %194 = vector.broadcast %187 : vector<16x1xf32> to vector<16x128xf32>
    %195 = arith.mulf %194, %169 : vector<16x128xf32>
    %196 = arith.addf %167, %195 : vector<16x128xf32>
    %197 = vector.broadcast %193 : vector<16x1xf32> to vector<16x128xf32>
    %198 = arith.mulf %197, %169 : vector<16x128xf32>
    %199 = arith.addf %167, %198 : vector<16x128xf32>
    %200 = tpu.concatenate %196, %199 in 1 : vector<16x128xf32>, vector<16x128xf32> -> vector<16x256xf32>
    %201 = arith.truncf %200 : vector<16x256xf32> to vector<16x256xbf16>
    %cst_77 = arith.constant dense<0.000000e+00> : vector<16x128xf32>
    %202 = tpu.matmul %201, %17, %cst_77 {dimension_numbers = #tpu.dot_dimension_numbers<[1], [0], [0], [1], [0, 0, 1, 1], [], []>} : vector<16x256xbf16>, vector<256x128xbf16>, vector<16x128xf32> -> vector<16x128xf32>
    %203 = arith.addf %202, %162 : vector<16x128xf32>
    %204 = arith.truncf %203 : vector<16x128xf32> to vector<16x128xbf16>
    %cst_78 = arith.constant dense<0.000000e+00> : vector<16x128xf32>
    %205 = tpu.matmul %204, %18, %cst_78 {dimension_numbers = #tpu.dot_dimension_numbers<[1], [0], [0], [1], [0, 0, 1, 1], [], []>} : vector<16x128xbf16>, vector<128x128xbf16>, vector<16x128xf32> -> vector<16x128xf32>
    %cst_79 = arith.constant 0.000000e+00 : f32
    %206 = vector.broadcast %cst_79 : f32 to vector<16x128xf32>
    %207 = arith.maximumf %205, %206 : vector<16x128xf32>
    %208 = arith.truncf %207 : vector<16x128xf32> to vector<16x128xbf16>
    %cst_80 = arith.constant dense<0.000000e+00> : vector<16x128xf32>
    %209 = tpu.matmul %208, %19, %cst_80 {dimension_numbers = #tpu.dot_dimension_numbers<[1], [0], [0], [1], [0, 0, 1, 1], [], []>} : vector<16x128xbf16>, vector<128x128xbf16>, vector<16x128xf32> -> vector<16x128xf32>
    %210 = arith.addf %209, %203 : vector<16x128xf32>
    %c0_81 = arith.constant 0 : index
    %c0_82 = arith.constant 0 : index
    %211 = vector.load %arg22[%c0_81, %c0_82] : memref<16x128xf32, #tpu.memory_space<vmem>>, vector<16x128xf32>
    tpu.vector_store %arg22[%c0_81, %c0_82], %210 {strides = array<i32>} : memref<16x128xf32, #tpu.memory_space<vmem>>, vector<16x128xf32>,
    return
  }
  func.func @transform_0(%arg0: i32) -> (i32, i32) {
    %c0_i32 = arith.constant 0 : i32
    %c0_i32_0 = arith.constant 0 : i32
    return %arg0, %c0_i32 : i32, i32
  }
  func.func @transform_1(%arg0: i32) -> (i32, i32) {
    %c0_i32 = arith.constant 0 : i32
    %c0_i32_0 = arith.constant 0 : i32
    %c0_i32_1 = arith.constant 0 : i32
    return %c0_i32, %c0_i32_0 : i32, i32
  }
  func.func @transform_2(%arg0: i32) -> (i32, i32) {
    %c0_i32 = arith.constant 0 : i32
    %c0_i32_0 = arith.constant 0 : i32
    %c0_i32_1 = arith.constant 0 : i32
    return %c0_i32, %c0_i32_0 : i32, i32
  }
  func.func @transform_3(%arg0: i32) -> (i32, i32) {
    %c0_i32 = arith.constant 0 : i32
    %c0_i32_0 = arith.constant 0 : i32
    %c0_i32_1 = arith.constant 0 : i32
    return %c0_i32, %c0_i32_0 : i32, i32
  }
  func.func @transform_4(%arg0: i32) -> (i32, i32) {
    %c0_i32 = arith.constant 0 : i32
    %c0_i32_0 = arith.constant 0 : i32
    %c0_i32_1 = arith.constant 0 : i32
    return %c0_i32, %c0_i32_0 : i32, i32
  }
  func.func @transform_5(%arg0: i32) -> (i32, i32) {
    %c0_i32 = arith.constant 0 : i32
    %c0_i32_0 = arith.constant 0 : i32
    %c0_i32_1 = arith.constant 0 : i32
    return %c0_i32, %c0_i32_0 : i32, i32
  }
  func.func @transform_6(%arg0: i32) -> (i32, i32) {
    %c0_i32 = arith.constant 0 : i32
    %c0_i32_0 = arith.constant 0 : i32
    %c0_i32_1 = arith.constant 0 : i32
    return %c0_i32, %c0_i32_0 : i32, i32
  }
  func.func @transform_7(%arg0: i32) -> (i32, i32) {
    %c0_i32 = arith.constant 0 : i32
    %c0_i32_0 = arith.constant 0 : i32
    %c0_i32_1 = arith.constant 0 : i32
    return %c0_i32, %c0_i32_0 : i32, i32
  }
  func.func @transform_8(%arg0: i32) -> (i32, i32) {
    %c0_i32 = arith.constant 0 : i32
    %c0_i32_0 = arith.constant 0 : i32
    %c0_i32_1 = arith.constant 0 : i32
    return %c0_i32, %c0_i32_0 : i32, i32
  }
  func.func @transform_9(%arg0: i32) -> (i32, i32) {
    %c0_i32 = arith.constant 0 : i32
    %c0_i32_0 = arith.constant 0 : i32
    %c0_i32_1 = arith.constant 0 : i32
    return %c0_i32, %c0_i32_0 : i32, i32
  }
  func.func @transform_10(%arg0: i32) -> (i32, i32) {
    %c0_i32 = arith.constant 0 : i32
    %c0_i32_0 = arith.constant 0 : i32
    %c0_i32_1 = arith.constant 0 : i32
    return %c0_i32, %c0_i32_0 : i32, i32
  }
  func.func @transform_11(%arg0: i32) -> (i32, i32) {
    %c0_i32 = arith.constant 0 : i32
    %c0_i32_0 = arith.constant 0 : i32
    %c0_i32_1 = arith.constant 0 : i32
    return %c0_i32, %c0_i32_0 : i32, i32
  }
  func.func @transform_12(%arg0: i32) -> (i32, i32) {
    %c0_i32 = arith.constant 0 : i32
    %c0_i32_0 = arith.constant 0 : i32
    %c0_i32_1 = arith.constant 0 : i32
    return %c0_i32, %c0_i32_0 : i32, i32
  }
  func.func @transform_13(%arg0: i32) -> (i32, i32) {
    %c0_i32 = arith.constant 0 : i32
    %c0_i32_0 = arith.constant 0 : i32
    %c0_i32_1 = arith.constant 0 : i32
    return %c0_i32, %c0_i32_0 : i32, i32
  }
  func.func @transform_14(%arg0: i32) -> (i32, i32) {
    %c0_i32 = arith.constant 0 : i32
    %c0_i32_0 = arith.constant 0 : i32
    %c0_i32_1 = arith.constant 0 : i32
    return %c0_i32, %c0_i32_0 : i32, i32
  }
  func.func @transform_15(%arg0: i32) -> (i32, i32) {
    %c0_i32 = arith.constant 0 : i32
    %c0_i32_0 = arith.constant 0 : i32
    %c0_i32_1 = arith.constant 0 : i32
    return %c0_i32, %c0_i32_0 : i32, i32
  }
  func.func @transform_16(%arg0: i32) -> (i32, i32) {
    %c0_i32 = arith.constant 0 : i32
    %c0_i32_0 = arith.constant 0 : i32
    %c0_i32_1 = arith.constant 0 : i32
    return %c0_i32, %c0_i32_0 : i32, i32
  }
  func.func @transform_17(%arg0: i32) -> (i32, i32) {
    %c0_i32 = arith.constant 0 : i32
    %c0_i32_0 = arith.constant 0 : i32
    %c0_i32_1 = arith.constant 0 : i32
    return %c0_i32, %c0_i32_0 : i32, i32
  }
  func.func @transform_18(%arg0: i32) -> (i32, i32) {
    %c0_i32 = arith.constant 0 : i32
    %c0_i32_0 = arith.constant 0 : i32
    %c0_i32_1 = arith.constant 0 : i32
    return %c0_i32, %c0_i32_0 : i32, i32
  }
  func.func @transform_19(%arg0: i32) -> (i32, i32) {
    %c0_i32 = arith.constant 0 : i32
    %c0_i32_0 = arith.constant 0 : i32
    %c0_i32_1 = arith.constant 0 : i32
    return %c0_i32, %c0_i32_0 : i32, i32
  }
  func.func @transform_20(%arg0: i32) -> (i32, i32) {
    %c0_i32 = arith.constant 0 : i32
    %c0_i32_0 = arith.constant 0 : i32
    %c0_i32_1 = arith.constant 0 : i32
    return %c0_i32, %c0_i32_0 : i32, i32
  }
  func.func @transform_21(%arg0: i32) -> (i32, i32) {
    %c0_i32 = arith.constant 0 : i32
    %c0_i32_0 = arith.constant 0 : i32
    return %arg0, %c0_i32 : i32, i32
  }
}

</mosaic_0001>

<bundles_post_ra>
// kernel: tpu_custom_call.1
= control target key start
LH: loop header
LB: loop body
LE: loop exit
PB: predicated region body
PF: predicated region fallthrough
CT: control target
= control target key end

     0   :  { %s13400_s0 = inlined_call_operand.hbm [shape: f32[16,1024], index: 0, kind: input, shape index: {}]   ;;  %s13401_s1 = inlined_call_operand.hbm [shape: bf16[512,512], index: 1, kind: input, shape index: {}]   ;;  %s13402_s2 = inlined_call_operand.hbm [shape: bf16[512,512], index: 2, kind: input, shape index: {}]   ;;  %s13403_s3 = inlined_call_operand.hbm [shape: bf16[1024,1024], index: 3, kind: input, shape index: {}]   ;;  %s13404_s4 = inlined_call_operand.hbm [shape: bf16[512,256], index: 4, kind: input, shape index: {}]   ;;  %s13405_s5 = inlined_call_operand.hbm [shape: bf16[256,256], index: 5, kind: input, shape index: {}]   ;;  %s13406_s6 = inlined_call_operand.hbm [shape: bf16[256,256], index: 6, kind: input, shape index: {}]   ;;  %s13407_s7 = inlined_call_operand.hbm [shape: bf16[256,256], index: 7, kind: input, shape index: {}]   ;;  %s13408_s8 = inlined_call_operand.hbm [shape: f32[1,256], index: 8, kind: input, shape index: {}]   ;;  %s13409_s9 = inlined_call_operand.hbm [shape: bf16[256,512], index: 9, kind: input, shape index: {}]   ;;  %s13410_s10 = inlined_call_operand.hbm [shape: bf16[256,512], index: 10, kind: input, shape index: {}]   ;;  %s13411_s11 = inlined_call_operand.hbm [shape: bf16[256,128], index: 11, kind: input, shape index: {}]   ;;  %s13412_s12 = inlined_call_operand.hbm [shape: bf16[128,128], index: 12, kind: input, shape index: {}]   ;;  %s13413_s13 = inlined_call_operand.hbm [shape: bf16[128,128], index: 13, kind: input, shape index: {}]   ;;  %s13414_s14 = inlined_call_operand.hbm [shape: bf16[128,128], index: 14, kind: input, shape index: {}]   ;;  %s13415_s15 = inlined_call_operand.hbm [shape: f32[1,128], index: 15, kind: input, shape index: {}]   ;;  %s13416_s16 = inlined_call_operand.hbm [shape: bf16[128,512], index: 16, kind: input, shape index: {}]   ;;  %s13417_s17 = inlined_call_operand.hbm [shape: bf16[128,384], index: 17, kind: input, shape index: {}]   ;;  %s13418_s18 = inlined_call_operand.hbm [shape: bf16[256,128], index: 18, kind: input, shape index: {}]   ;;  %s13419_s19 = inlined_call_operand.hbm [shape: bf16[128,128], index: 19, kind: input, shape index: {}]   ;;  %s13420_s20 = inlined_call_operand.hbm [shape: bf16[128,128], index: 20, kind: input, shape index: {}]   ;;  %s13421_s21 = inlined_call_operand.hbm [shape: f32[16,128], index: 21, kind: output, shape index: {}]  }
   0x1   :  { %13422 = sst [smem:[#allocation48_spill]] %s13400_s0 }
   0x2   :  { %13423 = sst [smem:[#allocation49_spill]] %s13401_s1 }
   0x3   :  { %13424 = sst [smem:[#allocation50_spill]] %s13402_s2 }
   0x4   :  { %13425 = sst [smem:[#allocation51_spill]] %s13403_s3 }
   0x5   :  { %13426 = sst [smem:[#allocation52_spill]] %s13404_s4 }
   0x6   :  { %13427 = sst [smem:[#allocation53_spill]] %s13405_s5 }
   0x7   :  { %13428 = sst [smem:[#allocation54_spill]] %s13421_s21 }
   0x8   :  { %26 = vsyncpa [#allocation3], 0 }
   0x9   :  { %27 = vsyncpa [#allocation6], 0 }
   0xa   :  { %28 = vsyncpa [#allocation9], 0 }
   0xb   :  { %29 = vsyncpa [#allocation12], 0 }
   0xc   :  { %30 = vsyncpa [#allocation15], 0 }
   0xd   :  { %31 = vsyncpa [#allocation18], 0 }
   0xe   :  { %32 = vsyncpa [#allocation21], 0 }
   0xf   :  { %33 = vsyncpa [#allocation24], 0 }
  0x10   :  { %34 = vsyncpa [#allocation27], 0 }
  0x11   :  { %35 = vsyncpa [#allocation30], 0 }
  0x12   :  { %36 = vsyncpa [#allocation33], 0 }
  0x13   :  { %37 = vsyncpa [#allocation4], 0  ;;  %s12813_s2 = smov [#allocation5]  }
  0x14   :  { %s55_s25 = sshll.u32 %s12813_s2, 4  ;;  %s56_s25 = int_to_ptr.vmem [resolvable:$true] %s55_s25 }
  0x15   :  { %s12357_s26 = scalar_lea.vmem %s56_s25, 16384  ;;  %p12362_p1 = scmp.lt.s32.totalorder %s56_s25, %s56_s25 }
  0x16   :  { %p12358_p0 = scmp.ne.s32.totalorder %s56_s25, %s12357_s26  ;;  %p12363_p2 = scmp.lt.s32.totalorder %s12357_s26, %s12357_s26 }
  0x18   :  { %p12364_p3 = por %p12363_p2, %p12362_p1 }
  0x1a   :  { %p12365_p4 = pnand %p12364_p3, %p12358_p0 }
  0x1c   :  { %12368 = shalt.err (!%p12365_p4)
}
  0x1d   :  { %s12814_s27 = smov 256   ;;  %s12815_s3 = smov 16  }
  0x1e   :  { %s13429_s0 = sld [smem:[#allocation49_spill]]  ;;  %s12816_s4 = smov [#allocation8]  }
  0x1f   :  { %s79_s30 = sshll.u32 %s12816_s4, 4  ;;  %s80_s30 = int_to_ptr.vmem [resolvable:$true] %s79_s30 }
  0x20   :  { %s12377_s5 = scalar_lea.vmem %s80_s30, 65536  ;;  %p12382_p6 = scmp.lt.s32.totalorder %s80_s30, %s80_s30 }
  0x21   :  { %p12378_p5 = scmp.ne.s32.totalorder %s80_s30, %s12377_s5  ;;  %p12383_p7 = scmp.lt.s32.totalorder %s12377_s5, %s12377_s5 }
  0x23   :  { %p12384_p8 = por %p12383_p7, %p12382_p6 }
  0x24   :  { %61 = dma.hbm_to_vmem [thread:$0]  %s13429_s0, 16384, %s56_s25, [#allocation6], %s12814_s27, %s12814_s27, %s12815_s3  }
  0x25   :  { %p12385_p9 = pnand %p12384_p8, %p12378_p5 }
  0x27   :  { %12388 = shalt.err (!%p12385_p9)
}
  0x28   :  { %s12817_s22 = smov 512   ;;  %s12818_s23 = smov 32  }
  0x29   :  { %s13430_s2 = sld [smem:[#allocation51_spill]]  ;;  %s12819_s26 = smov [#allocation11]  }
  0x2a   :  { %s103_s21 = sshll.u32 %s12819_s26, 4  ;;  %s12820_s28 = smov [#allocation14]   ;;  %s104_s21 = int_to_ptr.vmem [resolvable:$true] %s103_s21 }
  0x2b   :  { %s127_s25 = sshll.u32 %s12820_s28, 4  ;;  %s12397_s29 = scalar_lea.vmem %s104_s21, 4096  ;;  %s128_s25 = int_to_ptr.vmem [resolvable:$true] %s127_s25 }
  0x2c   :  { %p12398_p10 = scmp.ne.s32.totalorder %s104_s21, %s12397_s29  ;;  %p12402_p11 = scmp.lt.s32.totalorder %s104_s21, %s104_s21 }
  0x2d   :  { %p12403_p12 = scmp.lt.s32.totalorder %s12397_s29, %s12397_s29 }
  0x2f   :  { %85 = dma.hbm_to_vmem [thread:$0]  %s13430_s2, 65536, %s80_s30, [#allocation9], %s12817_s22, %s12817_s22, %s12818_s23  }
  0x30   :  { %p12404_p13 = por %p12403_p12, %p12402_p11 }
  0x32   :  { %p12405_p0 = pnand %p12404_p13, %p12398_p10 }
  0x34   :  { %12408 = shalt.err (!%p12405_p0)
}
  0x35   :  { %s12821_s0 = smov 128   ;;  %s12822_s4 = smov 8  }
  0x36   :  { %s13431_s22 = sld [smem:[#allocation53_spill]]  ;;  %s12417_s23 = scalar_lea.vmem %s128_s25, 4096 }
  0x37   :  { %p12418_p1 = scmp.ne.s32.totalorder %s128_s25, %s12417_s23  ;;  %p12422_p2 = scmp.lt.s32.totalorder %s128_s25, %s128_s25 }
  0x38   :  { %p12423_p3 = scmp.lt.s32.totalorder %s12417_s23, %s12417_s23 }
  0x3a   :  { %p12424_p4 = por %p12423_p3, %p12422_p2 }
  0x3c   :  { %109 = dma.hbm_to_vmem [thread:$0]  %s13431_s22, 4096, %s104_s21, [#allocation12], %s12821_s0, %s12821_s0, %s12822_s4  }
  0x3d   :  { %p12425_p5 = pnand %p12424_p4, %p12418_p1 }
  0x3f   :  { %12428 = shalt.err (!%p12425_p5)
}
  0x40   :  { %133 = dma.hbm_to_vmem [thread:$0]  %s13407_s7, 4096, %s128_s25, [#allocation15], %s12821_s0, %s12821_s0, %s12822_s4  }
  0x41   :  { %s12823_s2 = smov [#allocation17]   ;;  %s12824_s28 = smov [#allocation20]  }
  0x42   :  { %s149_s26 = sshll.u32 %s12823_s2, 4  ;;  %s173_s29 = sshll.u32 %s12824_s28, 4  ;;  %s150_s26 = int_to_ptr.vmem [resolvable:$true] %s149_s26  ;;  %s174_s29 = int_to_ptr.vmem [resolvable:$true] %s173_s29 }
  0x43   :  { %s12437_s21 = scalar_lea.vmem %s150_s26, 8192  ;;  %p12442_p7 = scmp.lt.s32.totalorder %s150_s26, %s150_s26 }
  0x44   :  { %p12438_p6 = scmp.ne.s32.totalorder %s150_s26, %s12437_s21  ;;  %p12443_p8 = scmp.lt.s32.totalorder %s12437_s21, %s12437_s21 }
  0x46   :  { %p12444_p9 = por %p12443_p8, %p12442_p7 }
  0x48   :  { %p12445_p10 = pnand %p12444_p9, %p12438_p6 }
  0x4a   :  { %12448 = shalt.err (!%p12445_p10)
}
  0x4b   :  { %155 = dma.hbm_to_vmem [thread:$0]  %s13409_s9, 8192, %s150_s26, [#allocation18], %s12814_s27, %s12814_s27, %s12815_s3  }
  0x4c   :  { %s12457_s7 = scalar_lea.vmem %s174_s29, 2048  ;;  %p12462_p12 = scmp.lt.s32.totalorder %s174_s29, %s174_s29 }
  0x4d   :  { %p12458_p11 = scmp.ne.s32.totalorder %s174_s29, %s12457_s7  ;;  %p12463_p13 = scmp.lt.s32.totalorder %s12457_s7, %s12457_s7 }
  0x4f   :  { %p12464_p0 = por %p12463_p13, %p12462_p12 }
  0x51   :  { %p12465_p1 = pnand %p12464_p0, %p12458_p11 }
  0x53   :  { %12468 = shalt.err (!%p12465_p1)
}
  0x54   :  { %s12825_s25 = smov 64   ;;  %s12826_s22 = smov 4  }
  0x55   :  { %179 = dma.hbm_to_vmem [thread:$0]  %s13411_s11, 2048, %s174_s29, [#allocation21], %s12825_s25, %s12825_s25, %s12826_s22  }
  0x56   :  { %s12827_s24 = smov [#allocation23]   ;;  %s12828_s9 = smov [#allocation26]  }
  0x57   :  { %s197_s2 = sshll.u32 %s12827_s24, 4  ;;  %s222_s26 = sshll.u32 %s12828_s9, 4  ;;  %s198_s2 = int_to_ptr.vmem [resolvable:$true] %s197_s2  ;;  %s223_s26 = int_to_ptr.vmem [resolvable:$true] %s222_s26 }
  0x58   :  { %s12477_s28 = scalar_lea.vmem %s198_s2, 1024  ;;  %p12482_p3 = scmp.lt.s32.totalorder %s198_s2, %s198_s2 }
  0x59   :  { %p12478_p2 = scmp.ne.s32.totalorder %s198_s2, %s12477_s28  ;;  %p12483_p4 = scmp.lt.s32.totalorder %s12477_s28, %s12477_s28 }
  0x5b   :  { %p12484_p5 = por %p12483_p4, %p12482_p3 }
  0x5d   :  { %p12485_p6 = pnand %p12484_p5, %p12478_p2 }
  0x5f   :  { %12488 = shalt.err (!%p12485_p6)
}
  0x60   :  { %203 = dma.hbm_to_vmem [thread:$0]  %s13413_s13, 1024, %s198_s2, [#allocation24], %s12825_s25, %s12825_s25, %s12826_s22  }
  0x61   :  { %s12497_s11 = scalar_lea.vmem %s223_s26, 16  ;;  %s12501_s29 = scalar_lea.vmem %s223_s26, 32 }
  0x62   :  { %p12498_p7 = scmp.ne.s32.totalorder %s223_s26, %s12497_s11  ;;  %p12502_p8 = scmp.lt.s32.totalorder %s223_s26, %s223_s26 }
  0x63   :  { %p12503_p9 = scmp.lt.s32.totalorder %s12501_s29, %s12497_s11 }
  0x65   :  { %p12504_p10 = por %p12503_p9, %p12502_p8 }
  0x67   :  { %p12505_p11 = pnand %p12504_p10, %p12498_p7 }
  0x69   :  { %12508 = shalt.err (!%p12505_p11)
}
  0x6a   :  { %225 = dma.hbm_to_vmem [thread:$0]  %s13415_s15, 16, %s223_s26, [#allocation27]  }
  0x6b   :  { %s12829_s23 = smov [#allocation29]  }
  0x6c   :  { %s243_s1 = sshll.u32 %s12829_s23, 4  ;;  %s244_s1 = int_to_ptr.vmem [resolvable:$true] %s243_s1 }
  0x6d   :  { %s12517_s24 = scalar_lea.vmem %s244_s1, 3072  ;;  %p12522_p13 = scmp.lt.s32.totalorder %s244_s1, %s244_s1 }
  0x6e   :  { %p12518_p12 = scmp.ne.s32.totalorder %s244_s1, %s12517_s24  ;;  %p12523_p0 = scmp.lt.s32.totalorder %s12517_s24, %s12517_s24 }
  0x70   :  { %p12524_p1 = por %p12523_p0, %p12522_p13 }
  0x72   :  { %p12525_p2 = pnand %p12524_p1, %p12518_p12 }
  0x74   :  { %12528 = shalt.err (!%p12525_p2)
}
  0x75   :  { %s12830_s13 = smov 192   ;;  %s12831_s2 = smov 12  }
  0x76   :  { %249 = dma.hbm_to_vmem [thread:$0]  %s13417_s17, 3072, %s244_s1, [#allocation30], %s12830_s13, %s12830_s13, %s12831_s2  }
  0x77   :  { %s12832_s21 = smov [#allocation32]   ;;  %s12833_s15 = smov [#allocation2]  }
  0x78   :  { %s267_s5 = sshll.u32 %s12832_s21, 4  ;;  %s43_s26 = sshll.u32 %s12833_s15, 4  ;;  %s268_s5 = int_to_ptr.vmem [resolvable:$true] %s267_s5  ;;  %s44_s26 = int_to_ptr.vmem [resolvable:$true] %s43_s26 }
  0x79   :  { %s12537_s11 = scalar_lea.vmem %s268_s5, 1024  ;;  %p12542_p4 = scmp.lt.s32.totalorder %s268_s5, %s268_s5 }
  0x7a   :  { %p12538_p3 = scmp.ne.s32.totalorder %s268_s5, %s12537_s11  ;;  %p12543_p5 = scmp.lt.s32.totalorder %s12537_s11, %s12537_s11 }
  0x7c   :  { %p12544_p6 = por %p12543_p5, %p12542_p4 }
  0x7e   :  { %p12545_p7 = pnand %p12544_p6, %p12538_p3 }
  0x80   :  { %12548 = shalt.err (!%p12545_p7)
}
  0x81   :  { %273 = dma.hbm_to_vmem [thread:$0]  %s13419_s19, 1024, %s268_s5, [#allocation33], %s12825_s25, %s12825_s25, %s12826_s22  }
  0x82   :  { %s12557_s17 = scalar_lea.vmem %s44_s26, 2048  ;;  %p12562_p9 = scmp.lt.s32.totalorder %s44_s26, %s44_s26 }
  0x83   :  { %p12558_p8 = scmp.ne.s32.totalorder %s44_s26, %s12557_s17  ;;  %p12563_p10 = scmp.lt.s32.totalorder %s12557_s17, %s12557_s17 }
  0x85   :  { %p12564_p11 = por %p12563_p10, %p12562_p9 }
  0x87   :  { %p12565_p12 = pnand %p12564_p11, %p12558_p8 }
  0x89   :  { %12568 = shalt.err (!%p12565_p12)
}
  0x8a   :  { %s12834_s7 = smov 1024   ;;  %s13432_s24 = sld [smem:[#allocation48_spill]] }
  0x8b   :  { %s12835_s13 = smov [#allocation7]   ;;  %s12836_s9 = smov [#allocation10]  }
  0x8c   :  { %s67_s2 = sshll.u32 %s12835_s13, 4  ;;  %s91_s28 = sshll.u32 %s12836_s9, 4  ;;  %s68_s2 = int_to_ptr.vmem [resolvable:$true] %s67_s2  ;;  %s92_s28 = int_to_ptr.vmem [resolvable:$true] %s91_s28 }
  0x8d   :  { %s12577_s19 = scalar_lea.vmem %s68_s2, 16384  ;;  %p12582_p0 = scmp.lt.s32.totalorder %s68_s2, %s68_s2 }
  0x8e   :  { %p12578_p13 = scmp.ne.s32.totalorder %s68_s2, %s12577_s19  ;;  %p12583_p1 = scmp.lt.s32.totalorder %s12577_s19, %s12577_s19 }
  0x90   :  { %49 = dma.hbm_to_vmem [thread:$0]  %s13432_s24, 2048, %s44_s26, [#allocation3], %s12834_s7, %s12834_s7, %s12825_s25  }
  0x91   :  { %p12584_p2 = por %p12583_p1, %p12582_p0 }
  0x93   :  { %p12585_p3 = pnand %p12584_p2, %p12578_p13 }
  0x95   :  { %12588 = shalt.err (!%p12585_p3)
}
  0x96   :  { %s13433_s15 = sld [smem:[#allocation50_spill]]  ;;  %s12597_s26 = scalar_lea.vmem %s92_s28, 8192 }
  0x97   :  { %p12598_p4 = scmp.ne.s32.totalorder %s92_s28, %s12597_s26  ;;  %p12602_p5 = scmp.lt.s32.totalorder %s92_s28, %s92_s28 }
  0x98   :  { %p12603_p6 = scmp.lt.s32.totalorder %s12597_s26, %s12597_s26 }
  0x9a   :  { %p12604_p7 = por %p12603_p6, %p12602_p5 }
  0x9c   :  { %73 = dma.hbm_to_vmem [thread:$0]  %s13433_s15, 16384, %s68_s2, [#allocation6], %s12814_s27, %s12814_s27, %s12815_s3  }
  0x9d   :  { %p12605_p8 = pnand %p12604_p7, %p12598_p4 }
  0x9f   :  { %12608 = shalt.err (!%p12605_p8)
}
  0xa0   :  { %s13434_s30 = sld [smem:[#allocation52_spill]]  ;;  %s12837_s17 = smov [#allocation13]  }
  0xa1   :  { %s115_s7 = sshll.u32 %s12837_s17, 4  ;;  %s12838_s23 = smov [#allocation16]   ;;  %s116_s7 = int_to_ptr.vmem [resolvable:$true] %s115_s7 }
  0xa2   :  { %s140_s1 = sshll.u32 %s12838_s23, 4  ;;  %s12617_s24 = scalar_lea.vmem %s116_s7, 4096  ;;  %s141_s1 = int_to_ptr.vmem [resolvable:$true] %s140_s1 }
  0xa3   :  { %p12618_p9 = scmp.ne.s32.totalorder %s116_s7, %s12617_s24  ;;  %p12622_p10 = scmp.lt.s32.totalorder %s116_s7, %s116_s7 }
  0xa4   :  { %p12623_p11 = scmp.lt.s32.totalorder %s12617_s24, %s12617_s24 }
  0xa6   :  { %97 = dma.hbm_to_vmem [thread:$0]  %s13434_s30, 8192, %s92_s28, [#allocation9], %s12821_s0, %s12821_s0, %s12822_s4  }
  0xa7   :  { %p12624_p12 = por %p12623_p11, %p12622_p10 }
  0xa9   :  { %p12625_p13 = pnand %p12624_p12, %p12618_p9 }
  0xab   :  { %12628 = shalt.err (!%p12625_p13)
}
  0xac   :  { %121 = dma.hbm_to_vmem [thread:$0]  %s13406_s6, 4096, %s116_s7, [#allocation12], %s12821_s0, %s12821_s0, %s12822_s4  }
  0xad   :  { %s12637_s9 = scalar_lea.vmem %s141_s1, 32  ;;  %p12642_p1 = scmp.lt.s32.totalorder %s141_s1, %s141_s1 }
  0xae   :  { %p12638_p0 = scmp.ne.s32.totalorder %s141_s1, %s12637_s9  ;;  %p12643_p2 = scmp.lt.s32.totalorder %s12637_s9, %s12637_s9 }
  0xb0   :  { %p12644_p3 = por %p12643_p2, %p12642_p1 }
  0xb2   :  { %p12645_p4 = pnand %p12644_p3, %p12638_p0 }
  0xb4   :  { %12648 = shalt.err (!%p12645_p4)
}
  0xb5   :  { %143 = dma.hbm_to_vmem [thread:$0]  %s13408_s8, 32, %s141_s1, [#allocation15]  }
  0xb6   :  { %s12839_s21 = smov [#allocation19]   ;;  %s12840_s15 = smov [#allocation22]  }
  0xb7   :  { %s161_s5 = sshll.u32 %s12839_s21, 4  ;;  %s185_s26 = sshll.u32 %s12840_s15, 4  ;;  %s162_s5 = int_to_ptr.vmem [resolvable:$true] %s161_s5  ;;  %s186_s26 = int_to_ptr.vmem [resolvable:$true] %s185_s26 }
  0xb8   :  { %s12657_s11 = scalar_lea.vmem %s162_s5, 8192  ;;  %p12662_p6 = scmp.lt.s32.totalorder %s162_s5, %s162_s5 }
  0xb9   :  { %p12658_p5 = scmp.ne.s32.totalorder %s162_s5, %s12657_s11  ;;  %p12663_p7 = scmp.lt.s32.totalorder %s12657_s11, %s12657_s11 }
  0xbb   :  { %p12664_p8 = por %p12663_p7, %p12662_p6 }
  0xbd   :  { %p12665_p9 = pnand %p12664_p8, %p12658_p5 }
  0xbf   :  { %12668 = shalt.err (!%p12665_p9)
}
  0xc0   :  { %167 = dma.hbm_to_vmem [thread:$0]  %s13410_s10, 8192, %s162_s5, [#allocation18], %s12814_s27, %s12814_s27, %s12815_s3  }
  0xc1   :  { %s12677_s8 = scalar_lea.vmem %s186_s26, 1024  ;;  %p12682_p11 = scmp.lt.s32.totalorder %s186_s26, %s186_s26 }
  0xc2   :  { %p12678_p10 = scmp.ne.s32.totalorder %s186_s26, %s12677_s8  ;;  %p12683_p12 = scmp.lt.s32.totalorder %s12677_s8, %s12677_s8 }
  0xc4   :  { %p12684_p13 = por %p12683_p12, %p12682_p11 }
  0xc6   :  { %p12685_p0 = pnand %p12684_p13, %p12678_p10 }
  0xc8   :  { %12688 = shalt.err (!%p12685_p0)
}
  0xc9   :  { %191 = dma.hbm_to_vmem [thread:$0]  %s13412_s12, 1024, %s186_s26, [#allocation21], %s12825_s25, %s12825_s25, %s12826_s22  }
  0xca   :  { %s12841_s7 = smov [#allocation25]   ;;  %s12842_s1 = smov [#allocation28]  }
  0xcb   :  { %s209_s23 = sshll.u32 %s12841_s7, 4  ;;  %s231_s24 = sshll.u32 %s12842_s1, 4  ;;  %s210_s23 = int_to_ptr.vmem [resolvable:$true] %s209_s23  ;;  %s232_s24 = int_to_ptr.vmem [resolvable:$true] %s231_s24 }
  0xcc   :  { %s12697_s10 = scalar_lea.vmem %s210_s23, 1024  ;;  %p12702_p2 = scmp.lt.s32.totalorder %s210_s23, %s210_s23 }
  0xcd   :  { %p12698_p1 = scmp.ne.s32.totalorder %s210_s23, %s12697_s10  ;;  %p12703_p3 = scmp.lt.s32.totalorder %s12697_s10, %s12697_s10 }
  0xcf   :  { %p12704_p4 = por %p12703_p3, %p12702_p2 }
  0xd1   :  { %p12705_p5 = pnand %p12704_p4, %p12698_p1 }
  0xd3   :  { %12708 = shalt.err (!%p12705_p5)
}
  0xd4   :  { %215 = dma.hbm_to_vmem [thread:$0]  %s13414_s14, 1024, %s210_s23, [#allocation24], %s12825_s25, %s12825_s25, %s12826_s22  }
  0xd5   :  { %s12717_s12 = scalar_lea.vmem %s232_s24, 4096  ;;  %p12722_p7 = scmp.lt.s32.totalorder %s232_s24, %s232_s24 }
  0xd6   :  { %p12718_p6 = scmp.ne.s32.totalorder %s232_s24, %s12717_s12  ;;  %p12723_p8 = scmp.lt.s32.totalorder %s12717_s12, %s12717_s12 }
  0xd8   :  { %p12724_p9 = por %p12723_p8, %p12722_p7 }
  0xda   :  { %p12725_p10 = pnand %p12724_p9, %p12718_p6 }
  0xdc   :  { %12728 = shalt.err (!%p12725_p10)
}
  0xdd   :  { %237 = dma.hbm_to_vmem [thread:$0]  %s13416_s16, 4096, %s232_s24, [#allocation27], %s12814_s27, %s12814_s27, %s12815_s3  }
  0xde   :  { %s12843_s19 = smov [#allocation31]   ;;  %s12844_s5 = smov [#allocation34]  }
  0xdf   :  { %s255_s21 = sshll.u32 %s12843_s19, 4  ;;  %s279_s15 = sshll.u32 %s12844_s5, 4  ;;  %s256_s21 = int_to_ptr.vmem [resolvable:$true] %s255_s21  ;;  %s280_s15 = int_to_ptr.vmem [resolvable:$true] %s279_s15 }
  0xe0   :  { %s12737_s14 = scalar_lea.vmem %s256_s21, 2048  ;;  %p12742_p12 = scmp.lt.s32.totalorder %s256_s21, %s256_s21 }
  0xe1   :  { %p12738_p11 = scmp.ne.s32.totalorder %s256_s21, %s12737_s14  ;;  %p12743_p13 = scmp.lt.s32.totalorder %s12737_s14, %s12737_s14 }
  0xe3   :  { %p12744_p0 = por %p12743_p13, %p12742_p12 }
  0xe5   :  { %p12745_p1 = pnand %p12744_p0, %p12738_p11 }
  0xe7   :  { %12748 = shalt.err (!%p12745_p1)
}
  0xe8   :  { %261 = dma.hbm_to_vmem [thread:$0]  %s13418_s18, 2048, %s256_s21, [#allocation30], %s12825_s25, %s12825_s25, %s12826_s22  }
  0xe9   :  { %s12757_s16 = scalar_lea.vmem %s280_s15, 1024  ;;  %p12762_p3 = scmp.lt.s32.totalorder %s280_s15, %s280_s15 }
  0xea   :  { %p12758_p2 = scmp.ne.s32.totalorder %s280_s15, %s12757_s16  ;;  %p12763_p4 = scmp.lt.s32.totalorder %s12757_s16, %s12757_s16 }
  0xec   :  { %p12764_p5 = por %p12763_p4, %p12762_p3 }
  0xee   :  { %p12765_p6 = pnand %p12764_p5, %p12758_p2 }
  0xf0   :  { %12768 = shalt.err (!%p12765_p6)
}
  0xf1   :  { %285 = dma.hbm_to_vmem [thread:$0]  %s13420_s20, 1024, %s280_s15, [#allocation33], %s12825_s25, %s12825_s25, %s12826_s22  }
  0xf2   :  { %12789 = dma.done.wait [#allocation3], 2048  }
  0xf3   :  { %12790 = vsyncadd [#allocation3], 4294965248 }
  0xf4   :  { %12791 = dma.done.wait [#allocation6], 32768  }
  0xf5   :  { %12792 = vsyncadd [#allocation6], 4294934528 }
  0xf6   :  { %12793 = dma.done.wait [#allocation9], 73728  }
  0xf7   :  { %12794 = vsyncadd [#allocation9], 4294893568 }
  0xf8   :  { %12795 = dma.done.wait [#allocation12], 8192  }
  0xf9   :  { %12796 = vsyncadd [#allocation12], 4294959104 }
  0xfa   :  { %12797 = dma.done.wait [#allocation15], 4128  }
  0xfb   :  { %12798 = vsyncadd [#allocation15], 4294963168 }
  0xfc   :  { %12799 = dma.done.wait [#allocation18], 16384  }
  0xfd   :  { %12800 = vsyncadd [#allocation18], 4294950912 }
  0xfe   :  { %12801 = dma.done.wait [#allocation21], 3072  }
  0xff   :  { %12802 = vsyncadd [#allocation21], 4294964224 }
 0x100   :  { %12803 = dma.done.wait [#allocation24], 2048  }
 0x101   :  { %12804 = vsyncadd [#allocation24], 4294965248 }
 0x102   :  { %12805 = dma.done.wait [#allocation27], 4112  }
 0x103   :  { %12806 = vsyncadd [#allocation27], 4294963184 }
 0x104   :  { %12807 = dma.done.wait [#allocation30], 5120  }
 0x105   :  { %12808 = vsyncadd [#allocation30], 4294962176 }
 0x106   :  { %12809 = dma.done.wait [#allocation33], 2048  }
 0x107   :  { %12810 = vsyncadd [#allocation33], 4294965248  ;;  %v662_v0 = vld [vmem:[#allocation8 + $0x1c0] sm:$0xff]  ;;  %v1617_v54 = vld [vmem:[#allocation2 + $0x8] sm:$0xff]  ;;  %vm12846_vm0 = vmmov 0   ;;  %s12848_s18 = smov [#allocation35]  }
 0x108   :  { %v666_v1 = vld [vmem:[#allocation8 + $0x1e0] sm:$0xff]  ;;  %v1625_v55 = vld [vmem:[#allocation2 + $0x48] sm:$0xff]  ;;  %v1619_v59 = vld [vmem:[#allocation2 + $0x18] sm:$0xff]  ;;  %s9830_s20 = sshll.u32 %s12848_s18, 4  ;;  %s9831_s20 = int_to_ptr.vmem [resolvable:$true] %s9830_s20 }
 0x109   :  { %v790_v2 = vld [vmem:[#allocation8 + $0x5c0] sm:$0xff]  ;;  %v9909_v3 = vcombine.high %v662_v0, %v666_v1  ;;  %v9908_v5 = vcombine.low %v662_v0, %v666_v1  ;;  %v13071_v58 = vpack.c.bf16 %v1625_v55, %v1617_v54  ;;  %v1627_v60 = vld [vmem:[#allocation2 + $0x58] sm:$0xff]  ;;  %s12769_s25 = scalar_lea.vmem %s9831_s20, 256  ;;  %p12774_p8 = scmp.lt.s32.totalorder %s9831_s20, %s9831_s20 }
 0x10a   :  { %v794_v4 = vld [vmem:[#allocation8 + $0x5e0] sm:$0xff]  ;;  %v13073_v63 = vpack.c.bf16 %v1627_v60, %v1619_v59  ;;  %p12770_p7 = scmp.ne.s32.totalorder %s9831_s20, %s12769_s25  ;;  %p12775_p9 = scmp.lt.s32.totalorder %s12769_s25, %s12769_s25 }
 0x10b   :  { %v654_v6 = vld [vmem:[#allocation8 + $0x180] sm:$0xff]  ;;  %v10037_v8 = vcombine.high %v790_v2, %v794_v4  ;;  %v10036_v9 = vcombine.low %v790_v2, %v794_v4  ;;  %4200 = vmatprep.subr.bf16.mxu0 %v9909_v3  ;;  %4232 = vmatprep.mubr.bf16.mxu0 %v13071_v58 }
 0x10c   :  { %v658_v7 = vld [vmem:[#allocation8 + $0x1a0] sm:$0xff]  ;;  %4201 = vmatpush1.bf16.msra.mxu0 %v9908_v5  ;;  %4275 = vmatprep.mubr.bf16.mxu1 %v13073_v63  ;;  %p12776_p10 = por %p12775_p9, %p12774_p8 }
 0x10d   :  { %v9901_v10 = vcombine.high %v654_v6, %v658_v7  ;;  %v782_v11 = vld [vmem:[#allocation8 + $0x580] sm:$0xff]  ;;  %4243 = vmatprep.subr.bf16.mxu1 %v10037_v8  ;;  %v9900_v18 = vcombine.low %v654_v6, %v658_v7 }
 0x10e   :  { %v786_v12 = vld [vmem:[#allocation8 + $0x5a0] sm:$0xff]  ;;  %4244 = vmatpush1.bf16.msra.mxu1 %v10036_v9  ;;  %p12777_p11 = pnand %p12776_p10, %p12770_p7 }
 0x10f   :  { %v646_v13 = vld [vmem:[#allocation8 + $0x140] sm:$0xff]  ;;  %v10029_v14 = vcombine.high %v782_v11, %v786_v12  ;;  %4202 = vmatprep.subr.bf16.mxu0 %v9901_v10  ;;  %v10028_v19 = vcombine.low %v782_v11, %v786_v12 }
 0x110   :  { %v650_v15 = vld [vmem:[#allocation8 + $0x160] sm:$0xff]  ;;  %4203 = vmatpush1.bf16.msra.mxu0 %v9900_v18 }
 0x111   :  { %v774_v16 = vld [vmem:[#allocation8 + $0x540] sm:$0xff]  ;;  %v9893_v20 = vcombine.high %v646_v13, %v650_v15  ;;  %4245 = vmatprep.subr.bf16.mxu1 %v10029_v14  ;;  %v9892_v26 = vcombine.low %v646_v13, %v650_v15 }
 0x112   :  { %v778_v17 = vld [vmem:[#allocation8 + $0x560] sm:$0xff]  ;;  %4246 = vmatpush1.bf16.msra.mxu1 %v10028_v19 }
 0x113   :  { %v10021_v21 = vcombine.high %v774_v16, %v778_v17  ;;  %v638_v22 = vld [vmem:[#allocation8 + $0x100] sm:$0xff]  ;;  %4204 = vmatprep.subr.bf16.mxu0 %v9893_v20  ;;  %v10020_v27 = vcombine.low %v774_v16, %v778_v17 }
 0x114   :  { %v642_v23 = vld [vmem:[#allocation8 + $0x120] sm:$0xff]  ;;  %4205 = vmatpush1.bf16.msra.mxu0 %v9892_v26 }
 0x115   :  { %v766_v24 = vld [vmem:[#allocation8 + $0x500] sm:$0xff]  ;;  %v9885_v28 = vcombine.high %v638_v22, %v642_v23  ;;  %4247 = vmatprep.subr.bf16.mxu1 %v10021_v21  ;;  %v9884_v34 = vcombine.low %v638_v22, %v642_v23 }
 0x116   :  { %v770_v25 = vld [vmem:[#allocation8 + $0x520] sm:$0xff]  ;;  %4248 = vmatpush1.bf16.msra.mxu1 %v10020_v27 }
 0x117   :  { %v10013_v29 = vcombine.high %v766_v24, %v770_v25  ;;  %v630_v30 = vld [vmem:[#allocation8 + $0xc0] sm:$0xff]  ;;  %4206 = vmatprep.subr.bf16.mxu0 %v9885_v28  ;;  %v10012_v35 = vcombine.low %v766_v24, %v770_v25 }
 0x118   :  { %v634_v31 = vld [vmem:[#allocation8 + $0xe0] sm:$0xff]  ;;  %4207 = vmatpush1.bf16.msra.mxu0 %v9884_v34 }
 0x119   :  { %v758_v32 = vld [vmem:[#allocation8 + $0x4c0] sm:$0xff]  ;;  %v9877_v36 = vcombine.high %v630_v30, %v634_v31  ;;  %4249 = vmatprep.subr.bf16.mxu1 %v10013_v29  ;;  %v9876_v42 = vcombine.low %v630_v30, %v634_v31 }
 0x11a   :  { %v762_v33 = vld [vmem:[#allocation8 + $0x4e0] sm:$0xff]  ;;  %4250 = vmatpush1.bf16.msra.mxu1 %v10012_v35 }
 0x11b   :  { %v10005_v37 = vcombine.high %v758_v32, %v762_v33  ;;  %v622_v38 = vld [vmem:[#allocation8 + $0x80] sm:$0xff]  ;;  %4208 = vmatprep.subr.bf16.mxu0 %v9877_v36  ;;  %v10004_v43 = vcombine.low %v758_v32, %v762_v33 }
 0x11c   :  { %v626_v39 = vld [vmem:[#allocation8 + $0xa0] sm:$0xff]  ;;  %4209 = vmatpush1.bf16.msra.mxu0 %v9876_v42 }
 0x11d   :  { %v750_v40 = vld [vmem:[#allocation8 + $0x480] sm:$0xff]  ;;  %v9869_v44 = vcombine.high %v622_v38, %v626_v39  ;;  %4251 = vmatprep.subr.bf16.mxu1 %v10005_v37  ;;  %v9868_v50 = vcombine.low %v622_v38, %v626_v39 }
 0x11e   :  { %v754_v41 = vld [vmem:[#allocation8 + $0x4a0] sm:$0xff]  ;;  %4252 = vmatpush1.bf16.msra.mxu1 %v10004_v43 }
 0x11f   :  { %v9997_v45 = vcombine.high %v750_v40, %v754_v41  ;;  %v614_v46 = vld [vmem:[#allocation8 + $0x40] sm:$0xff]  ;;  %4210 = vmatprep.subr.bf16.mxu0 %v9869_v44  ;;  %v9996_v51 = vcombine.low %v750_v40, %v754_v41 }
 0x120   :  { %v618_v47 = vld [vmem:[#allocation8 + $0x60] sm:$0xff]  ;;  %4211 = vmatpush1.bf16.msra.mxu0 %v9868_v50 }
 0x121   :  { %v742_v48 = vld [vmem:[#allocation8 + $0x440] sm:$0xff]  ;;  %v9861_v52 = vcombine.high %v614_v46, %v618_v47  ;;  %4253 = vmatprep.subr.bf16.mxu1 %v9997_v45  ;;  %v9860_v0 = vcombine.low %v614_v46, %v618_v47 }
 0x122   :  { %v746_v49 = vld [vmem:[#allocation8 + $0x460] sm:$0xff]  ;;  %4254 = vmatpush1.bf16.msra.mxu1 %v9996_v51 }
 0x123   :  { %v606_v53 = vld [vmem:[#allocation8] sm:$0xff]  ;;  %v9989_v56 = vcombine.high %v742_v48, %v746_v49  ;;  %4212 = vmatprep.subr.bf16.mxu0 %v9861_v52  ;;  %v9988_v1 = vcombine.low %v742_v48, %v746_v49 }
 0x124   :  { %v610_v57 = vld [vmem:[#allocation8 + $0x20] sm:$0xff]  ;;  %4213 = vmatpush1.bf16.msra.mxu0 %v9860_v0 }
 0x125   :  { %v734_v61 = vld [vmem:[#allocation8 + $0x400] sm:$0xff]  ;;  %v9853_v2 = vcombine.high %v606_v53, %v610_v57  ;;  %4255 = vmatprep.subr.bf16.mxu1 %v9989_v56  ;;  %v9852_v8 = vcombine.low %v606_v53, %v610_v57 }
 0x126   :  { %v738_v62 = vld [vmem:[#allocation8 + $0x420] sm:$0xff]  ;;  %4256 = vmatpush1.bf16.msra.mxu1 %v9988_v1 }
 0x127   :  { %v9981_v3 = vcombine.high %v734_v61, %v738_v62  ;;  %v726_v4 = vld [vmem:[#allocation8 + $0x3c0] sm:$0xff]  ;;  %4214 = vmatprep.subr.bf16.mxu0 %v9853_v2  ;;  %v9980_v9 = vcombine.low %v734_v61, %v738_v62 }
 0x128   :  { %v730_v5 = vld [vmem:[#allocation8 + $0x3e0] sm:$0xff]  ;;  %4215 = vmatpush1.bf16.msra.mxu0 %v9852_v8 }
 0x129   :  { %v854_v6 = vld [vmem:[#allocation8 + $0x7c0] sm:$0xff]  ;;  %v9973_v10 = vcombine.high %v726_v4, %v730_v5  ;;  %4257 = vmatprep.subr.bf16.mxu1 %v9981_v3  ;;  %v9972_v16 = vcombine.low %v726_v4, %v730_v5 }
 0x12a   :  { %v858_v7 = vld [vmem:[#allocation8 + $0x7e0] sm:$0xff]  ;;  %4258 = vmatpush1.bf16.msra.mxu1 %v9980_v9 }
 0x12b   :  { %v10101_v11 = vcombine.high %v854_v6, %v858_v7  ;;  %v718_v12 = vld [vmem:[#allocation8 + $0x380] sm:$0xff]  ;;  %4216 = vmatprep.subr.bf16.mxu0 %v9973_v10  ;;  %v10100_v17 = vcombine.low %v854_v6, %v858_v7 }
 0x12c   :  { %v722_v13 = vld [vmem:[#allocation8 + $0x3a0] sm:$0xff]  ;;  %4217 = vmatpush2.bf16.msra.mxu0 %v9972_v16 }
 0x12d   :  { %v846_v14 = vld [vmem:[#allocation8 + $0x780] sm:$0xff]  ;;  %v9965_v18 = vcombine.high %v718_v12, %v722_v13  ;;  %4259 = vmatprep.subr.bf16.mxu1 %v10101_v11  ;;  %v9964_v24 = vcombine.low %v718_v12, %v722_v13 }
 0x12e   :  { %v850_v15 = vld [vmem:[#allocation8 + $0x7a0] sm:$0xff]  ;;  %4260 = vmatpush2.bf16.msra.mxu1 %v10100_v17 }
 0x12f   :  { %v10093_v19 = vcombine.high %v846_v14, %v850_v15  ;;  %v710_v20 = vld [vmem:[#allocation8 + $0x340] sm:$0xff]  ;;  %4218 = vmatprep.subr.bf16.mxu0 %v9965_v18  ;;  %v10092_v25 = vcombine.low %v846_v14, %v850_v15  ;;  %v1618_v14 = vld [vmem:[#allocation2 + $0x10] sm:$0xff] }
 0x130   :  { %v714_v21 = vld [vmem:[#allocation8 + $0x360] sm:$0xff]  ;;  %4219 = vmatpush2.bf16.msra.mxu0 %v9964_v24  ;;  %v1626_v15 = vld [vmem:[#allocation2 + $0x50] sm:$0xff]  ;;  %v1629_v24 = vld [vmem:[#allocation2 + $0x68] sm:$0xff] }
 0x131   :  { %v838_v22 = vld [vmem:[#allocation8 + $0x740] sm:$0xff]  ;;  %v9957_v26 = vcombine.high %v710_v20, %v714_v21  ;;  %4261 = vmatprep.subr.bf16.mxu1 %v10093_v19  ;;  %v9956_v32 = vcombine.low %v710_v20, %v714_v21 }
 0x132   :  { %v842_v23 = vld [vmem:[#allocation8 + $0x760] sm:$0xff]  ;;  %4262 = vmatpush2.bf16.msra.mxu1 %v10092_v25  ;;  %v13079_v25 = vpack.c.bf16 %v1626_v15, %v1618_v14 }
 0x133   :  { %v10085_v27 = vcombine.high %v838_v22, %v842_v23  ;;  %v702_v28 = vld [vmem:[#allocation8 + $0x300] sm:$0xff]  ;;  %4220 = vmatprep.subr.bf16.mxu0 %v9957_v26  ;;  %v10084_v33 = vcombine.low %v838_v22, %v842_v23  ;;  %v1621_v23 = vld [vmem:[#allocation2 + $0x28] sm:$0xff] }
 0x134   :  { %v706_v29 = vld [vmem:[#allocation8 + $0x320] sm:$0xff]  ;;  %4221 = vmatpush2.bf16.msra.mxu0 %v9956_v32 }
 0x135   :  { %v830_v30 = vld [vmem:[#allocation8 + $0x700] sm:$0xff]  ;;  %v9949_v34 = vcombine.high %v702_v28, %v706_v29  ;;  %4263 = vmatprep.subr.bf16.mxu1 %v10085_v27  ;;  %v9948_v40 = vcombine.low %v702_v28, %v706_v29  ;;  %v1623_v27 = vld [vmem:[#allocation2 + $0x38] sm:$0xff] }
 0x136   :  { %v834_v31 = vld [vmem:[#allocation8 + $0x720] sm:$0xff]  ;;  %4264 = vmatpush2.bf16.msra.mxu1 %v10084_v33  ;;  %v1631_v28 = vld [vmem:[#allocation2 + $0x78] sm:$0xff] }
 0x137   :  { %v10077_v35 = vcombine.high %v830_v30, %v834_v31  ;;  %v694_v36 = vld [vmem:[#allocation8 + $0x2c0] sm:$0xff]  ;;  %4222 = vmatprep.subr.bf16.mxu0 %v9949_v34  ;;  %v10076_v41 = vcombine.low %v830_v30, %v834_v31  ;;  %v13081_v34 = vpack.c.bf16 %v1629_v24, %v1621_v23 }
 0x138   :  { %v698_v37 = vld [vmem:[#allocation8 + $0x2e0] sm:$0xff]  ;;  %4223 = vmatpush2.bf16.msra.mxu0 %v9948_v40 }
 0x139   :  { %v822_v38 = vld [vmem:[#allocation8 + $0x6c0] sm:$0xff]  ;;  %v9941_v42 = vcombine.high %v694_v36, %v698_v37  ;;  %4265 = vmatprep.subr.bf16.mxu1 %v10077_v35  ;;  %v9940_v48 = vcombine.low %v694_v36, %v698_v37  ;;  %v13084_v37 = vpack.c.bf16 %v1631_v28, %v1623_v27 }
 0x13a   :  { %v826_v39 = vld [vmem:[#allocation8 + $0x6e0] sm:$0xff]  ;;  %4266 = vmatpush2.bf16.msra.mxu1 %v10076_v41 }
 0x13b   :  { %v10069_v43 = vcombine.high %v822_v38, %v826_v39  ;;  %v686_v44 = vld [vmem:[#allocation8 + $0x280] sm:$0xff]  ;;  %4224 = vmatprep.subr.bf16.mxu0 %v9941_v42  ;;  %v10068_v49 = vcombine.low %v822_v38, %v826_v39 }
 0x13c   :  { %v690_v45 = vld [vmem:[#allocation8 + $0x2a0] sm:$0xff]  ;;  %4225 = vmatpush2.bf16.msra.mxu0 %v9940_v48 }
 0x13d   :  { %v814_v46 = vld [vmem:[#allocation8 + $0x680] sm:$0xff]  ;;  %v9933_v50 = vcombine.high %v686_v44, %v690_v45  ;;  %4267 = vmatprep.subr.bf16.mxu1 %v10069_v43  ;;  %v9932_v56 = vcombine.low %v686_v44, %v690_v45 }
 0x13e   :  { %v818_v47 = vld [vmem:[#allocation8 + $0x6a0] sm:$0xff]  ;;  %4268 = vmatpush2.bf16.msra.mxu1 %v10068_v49 }
 0x13f   :  { %v10061_v51 = vcombine.high %v814_v46, %v818_v47  ;;  %v678_v52 = vld [vmem:[#allocation8 + $0x240] sm:$0xff]  ;;  %4226 = vmatprep.subr.bf16.mxu0 %v9933_v50  ;;  %v10060_v57 = vcombine.low %v814_v46, %v818_v47 }
 0x140   :  { %v682_v53 = vld [vmem:[#allocation8 + $0x260] sm:$0xff]  ;;  %4227 = vmatpush2.bf16.msra.mxu0 %v9932_v56 }
 0x141   :  { %v806_v54 = vld [vmem:[#allocation8 + $0x640] sm:$0xff]  ;;  %v9925_v59 = vcombine.high %v678_v52, %v682_v53  ;;  %4269 = vmatprep.subr.bf16.mxu1 %v10061_v51  ;;  %v9924_v2 = vcombine.low %v678_v52, %v682_v53 }
 0x142   :  { %v810_v55 = vld [vmem:[#allocation8 + $0x660] sm:$0xff]  ;;  %4270 = vmatpush2.bf16.msra.mxu1 %v10060_v57 }
 0x143   :  { %v10053_v60 = vcombine.high %v806_v54, %v810_v55  ;;  %v670_v61 = vld [vmem:[#allocation8 + $0x200] sm:$0xff]  ;;  %4228 = vmatprep.subr.bf16.mxu0 %v9925_v59  ;;  %v10052_v3 = vcombine.low %v806_v54, %v810_v55 }
 0x144   :  { %v674_v62 = vld [vmem:[#allocation8 + $0x220] sm:$0xff]  ;;  %4229 = vmatpush2.bf16.msra.mxu0 %v9924_v2 }
 0x145   :  { %v798_v0 = vld [vmem:[#allocation8 + $0x600] sm:$0xff]  ;;  %v9917_v4 = vcombine.high %v670_v61, %v674_v62  ;;  %4271 = vmatprep.subr.bf16.mxu1 %v10053_v60  ;;  %v9916_v10 = vcombine.low %v670_v61, %v674_v62 }
 0x146   :  { %v802_v1 = vld [vmem:[#allocation8 + $0x620] sm:$0xff]  ;;  %4272 = vmatpush2.bf16.msra.mxu1 %v10052_v3 }
 0x147   :  { %v10045_v5 = vcombine.high %v798_v0, %v802_v1  ;;  %v918_v6 = vld [vmem:[#allocation8 + $0x9c0] sm:$0xff]  ;;  %4230 = vmatprep.subr.bf16.mxu0 %v9917_v4  ;;  %v10044_v13 = vcombine.low %v798_v0, %v802_v1 }
 0x148   :  { %v922_v7 = vld [vmem:[#allocation8 + $0x9e0] sm:$0xff]  ;;  %4231 = vmatpush2.bf16.msra.mxu0 %v9916_v10 }
 0x149   :  { %v1046_v8 = vld [vmem:[#allocation8 + $0xdc0] sm:$0xff]  ;;  %v10165_v16 = vcombine.high %v918_v6, %v922_v7  ;;  %4273 = vmatprep.subr.bf16.mxu1 %v10045_v5  ;;  %v10164_v26 = vcombine.low %v918_v6, %v922_v7 }
 0x14a   :  { %v1050_v9 = vld [vmem:[#allocation8 + $0xde0] sm:$0xff]  ;;  %4274 = vmatpush2.bf16.msra.mxu1 %v10044_v13 }
 0x14b   :  { %v1616_v11 = vld [vmem:[#allocation2] sm:$0xff]  ;;  %v10293_v17 = vcombine.high %v1046_v8, %v1050_v9  ;;  %4286 = vmatprep.subr.bf16.mxu0 %v10165_v16  ;;  %v10292_v29 = vcombine.low %v1046_v8, %v1050_v9 }
 0x14c   :  { %v1624_v12 = vld [vmem:[#allocation2 + $0x40] sm:$0xff] }
 0x14d   :  { %v910_v18 = vld [vmem:[#allocation8 + $0x980] sm:$0xff]  ;;  %v13077_v21 = vpack.c.bf16 %v1624_v12, %v1616_v11  ;;  %4329 = vmatprep.subr.bf16.mxu1 %v10293_v17  ;;  %4276 = vmatmul.mubr.bf16.vlgmr.msra.gmra.mxu1 %v13079_v25 }
 0x14e   :  { %v914_v19 = vld [vmem:[#allocation8 + $0x9a0] sm:$0xff]  ;;  %4330 = vmatpush1.bf16.msra.mxu1 %v10292_v29  ;;  %4361 = vmatprep.mubr.bf16.mxu1 %v13084_v37 }
 0x14f   :  { %v1038_v20 = vld [vmem:[#allocation8 + $0xd80] sm:$0xff]  ;;  %v10157_v30 = vcombine.high %v910_v18, %v914_v19  ;;  %4233 = vmatmul.mubr.bf16.vlgmr.msra.gmra.mxu0 %v13077_v21  ;;  %v10156_v38 = vcombine.low %v910_v18, %v914_v19 }
 0x150   :  { %v1042_v22 = vld [vmem:[#allocation8 + $0xda0] sm:$0xff]  ;;  %4287 = vmatpush1.bf16.msra.mxu0 %v10164_v26  ;;  %4318 = vmatprep.mubr.bf16.mxu0 %v13081_v34 }
 0x151   :  { %v10285_v31 = vcombine.high %v1038_v20, %v1042_v22  ;;  %v902_v32 = vld [vmem:[#allocation8 + $0x940] sm:$0xff]  ;;  %4288 = vmatprep.subr.bf16.mxu0 %v10157_v30  ;;  %v10284_v39 = vcombine.low %v1038_v20, %v1042_v22 }
 0x152   :  { %v906_v33 = vld [vmem:[#allocation8 + $0x960] sm:$0xff] }
 0x153   :  { %v1030_v35 = vld [vmem:[#allocation8 + $0xd40] sm:$0xff]  ;;  %v10149_v40 = vcombine.high %v902_v32, %v906_v33  ;;  %4331 = vmatprep.subr.bf16.mxu1 %v10285_v31  ;;  %v10148_v46 = vcombine.low %v902_v32, %v906_v33 }
 0x154   :  { %v1034_v36 = vld [vmem:[#allocation8 + $0xd60] sm:$0xff]  ;;  %4289 = vmatpush1.bf16.msra.mxu0 %v10156_v38  ;;  %4332 = vmatpush1.bf16.msra.mxu1 %v10284_v39 }
 0x155   :  { %v10277_v41 = vcombine.high %v1030_v35, %v1034_v36  ;;  %v894_v42 = vld [vmem:[#allocation8 + $0x900] sm:$0xff]  ;;  %4290 = vmatprep.subr.bf16.mxu0 %v10149_v40  ;;  %v10276_v47 = vcombine.low %v1030_v35, %v1034_v36 }
 0x156   :  { %v898_v43 = vld [vmem:[#allocation8 + $0x920] sm:$0xff] }
 0x157   :  { %v1022_v44 = vld [vmem:[#allocation8 + $0xd00] sm:$0xff]  ;;  %v10141_v48 = vcombine.high %v894_v42, %v898_v43  ;;  %4333 = vmatprep.subr.bf16.mxu1 %v10277_v41  ;;  %v10140_v54 = vcombine.low %v894_v42, %v898_v43 }
 0x158   :  { %v1026_v45 = vld [vmem:[#allocation8 + $0xd20] sm:$0xff]  ;;  %4291 = vmatpush1.bf16.msra.mxu0 %v10148_v46  ;;  %4334 = vmatpush1.bf16.msra.mxu1 %v10276_v47 }
 0x159   :  { %v886_v49 = vld [vmem:[#allocation8 + $0x8c0] sm:$0xff]  ;;  %v10269_v52 = vcombine.high %v1022_v44, %v1026_v45  ;;  %4292 = vmatprep.subr.bf16.mxu0 %v10141_v48  ;;  %v10268_v55 = vcombine.low %v1022_v44, %v1026_v45 }
 0x15a   :  { %v890_v50 = vld [vmem:[#allocation8 + $0x8e0] sm:$0xff] }
 0x15b   :  { %v1014_v51 = vld [vmem:[#allocation8 + $0xcc0] sm:$0xff]  ;;  %v10133_v56 = vcombine.high %v886_v49, %v890_v50  ;;  %4335 = vmatprep.subr.bf16.mxu1 %v10269_v52  ;;  %v10132_v0 = vcombine.low %v886_v49, %v890_v50 }
 0x15c   :  { %v1018_v53 = vld [vmem:[#allocation8 + $0xce0] sm:$0xff]  ;;  %4293 = vmatpush1.bf16.msra.mxu0 %v10140_v54  ;;  %4336 = vmatpush1.bf16.msra.mxu1 %v10268_v55 }
 0x15d   :  { %v878_v57 = vld [vmem:[#allocation8 + $0x880] sm:$0xff]  ;;  %v10261_v61 = vcombine.high %v1014_v51, %v1018_v53  ;;  %4294 = vmatprep.subr.bf16.mxu0 %v10133_v56  ;;  %v10260_v1 = vcombine.low %v1014_v51, %v1018_v53 }
 0x15e   :  { %v882_v59 = vld [vmem:[#allocation8 + $0x8a0] sm:$0xff] }
 0x15f   :  { %v1006_v60 = vld [vmem:[#allocation8 + $0xc80] sm:$0xff]  ;;  %v10125_v2 = vcombine.high %v878_v57, %v882_v59  ;;  %4337 = vmatprep.subr.bf16.mxu1 %v10261_v61  ;;  %v10124_v8 = vcombine.low %v878_v57, %v882_v59 }
 0x160   :  { %v1010_v62 = vld [vmem:[#allocation8 + $0xca0] sm:$0xff]  ;;  %4295 = vmatpush1.bf16.msra.mxu0 %v10132_v0  ;;  %4338 = vmatpush1.bf16.msra.mxu1 %v10260_v1 }
 0x161   :  { %v870_v3 = vld [vmem:[#allocation8 + $0x840] sm:$0xff]  ;;  %v10253_v6 = vcombine.high %v1006_v60, %v1010_v62  ;;  %4296 = vmatprep.subr.bf16.mxu0 %v10125_v2  ;;  %v10252_v9 = vcombine.low %v1006_v60, %v1010_v62 }
 0x162   :  { %v874_v4 = vld [vmem:[#allocation8 + $0x860] sm:$0xff] }
 0x163   :  { %v998_v5 = vld [vmem:[#allocation8 + $0xc40] sm:$0xff]  ;;  %v10117_v10 = vcombine.high %v870_v3, %v874_v4  ;;  %4339 = vmatprep.subr.bf16.mxu1 %v10253_v6  ;;  %v10116_v16 = vcombine.low %v870_v3, %v874_v4 }
 0x164   :  { %v1002_v7 = vld [vmem:[#allocation8 + $0xc60] sm:$0xff]  ;;  %4297 = vmatpush1.bf16.msra.mxu0 %v10124_v8  ;;  %4340 = vmatpush1.bf16.msra.mxu1 %v10252_v9 }
 0x165   :  { %v862_v11 = vld [vmem:[#allocation8 + $0x800] sm:$0xff]  ;;  %v10245_v14 = vcombine.high %v998_v5, %v1002_v7  ;;  %4298 = vmatprep.subr.bf16.mxu0 %v10117_v10  ;;  %v10244_v17 = vcombine.low %v998_v5, %v1002_v7 }
 0x166   :  { %v866_v12 = vld [vmem:[#allocation8 + $0x820] sm:$0xff] }
 0x167   :  { %v990_v13 = vld [vmem:[#allocation8 + $0xc00] sm:$0xff]  ;;  %v10109_v18 = vcombine.high %v862_v11, %v866_v12  ;;  %4341 = vmatprep.subr.bf16.mxu1 %v10245_v14  ;;  %v10108_v26 = vcombine.low %v862_v11, %v866_v12 }
 0x168   :  { %v994_v15 = vld [vmem:[#allocation8 + $0xc20] sm:$0xff]  ;;  %4299 = vmatpush1.bf16.msra.mxu0 %v10116_v16  ;;  %4342 = vmatpush1.bf16.msra.mxu1 %v10244_v17 }
 0x169   :  { %v982_v19 = vld [vmem:[#allocation8 + $0xbc0] sm:$0xff]  ;;  %v10237_v23 = vcombine.high %v990_v13, %v994_v15  ;;  %4300 = vmatprep.subr.bf16.mxu0 %v10109_v18  ;;  %v10236_v27 = vcombine.low %v990_v13, %v994_v15 }
 0x16a   :  { %v986_v20 = vld [vmem:[#allocation8 + $0xbe0] sm:$0xff] }
 0x16b   :  { %v1110_v22 = vld [vmem:[#allocation8 + $0xfc0] sm:$0xff]  ;;  %v10229_v28 = vcombine.high %v982_v19, %v986_v20  ;;  %4343 = vmatprep.subr.bf16.mxu1 %v10237_v23  ;;  %v10228_v35 = vcombine.low %v982_v19, %v986_v20 }
 0x16c   :  { %v1114_v24 = vld [vmem:[#allocation8 + $0xfe0] sm:$0xff]  ;;  %4301 = vmatpush1.bf16.msra.mxu0 %v10108_v26  ;;  %4344 = vmatpush1.bf16.msra.mxu1 %v10236_v27  ;;  %v663_v27 = vld [vmem:[#allocation8 + $0x1c8] sm:$0xff] }
 0x16d   :  { %v974_v29 = vld [vmem:[#allocation8 + $0xb80] sm:$0xff]  ;;  %v10357_v32 = vcombine.high %v1110_v22, %v1114_v24  ;;  %4302 = vmatprep.subr.bf16.mxu0 %v10229_v28  ;;  %v10356_v36 = vcombine.low %v1110_v22, %v1114_v24  ;;  %v667_v28 = vld [vmem:[#allocation8 + $0x1e8] sm:$0xff] }
 0x16e   :  { %v978_v30 = vld [vmem:[#allocation8 + $0xba0] sm:$0xff] }
 0x16f   :  { %v1102_v31 = vld [vmem:[#allocation8 + $0xf80] sm:$0xff]  ;;  %v10221_v38 = vcombine.high %v974_v29, %v978_v30  ;;  %4345 = vmatprep.subr.bf16.mxu1 %v10357_v32  ;;  %v10220_v44 = vcombine.low %v974_v29, %v978_v30  ;;  %v791_v29 = vld [vmem:[#allocation8 + $0x5c8] sm:$0xff] }
 0x170   :  { %v1106_v33 = vld [vmem:[#allocation8 + $0xfa0] sm:$0xff]  ;;  %4303 = vmatpush2.bf16.msra.mxu0 %v10228_v35  ;;  %4346 = vmatpush2.bf16.msra.mxu1 %v10356_v36  ;;  %v1622_v35 = vld [vmem:[#allocation2 + $0x30] sm:$0xff] }
 0x171   :  { %v966_v39 = vld [vmem:[#allocation8 + $0xb40] sm:$0xff]  ;;  %v10349_v42 = vcombine.high %v1102_v31, %v1106_v33  ;;  %4304 = vmatprep.subr.bf16.mxu0 %v10221_v38  ;;  %v10348_v45 = vcombine.low %v1102_v31, %v1106_v33  ;;  %v795_v33 = vld [vmem:[#allocation8 + $0x5e8] sm:$0xff]  ;;  %v1630_v36 = vld [vmem:[#allocation2 + $0x70] sm:$0xff] }
 0x172   :  { %v970_v40 = vld [vmem:[#allocation8 + $0xb60] sm:$0xff] }
 0x173   :  { %v1094_v41 = vld [vmem:[#allocation8 + $0xf40] sm:$0xff]  ;;  %v10213_v46 = vcombine.high %v966_v39, %v970_v40  ;;  %4347 = vmatprep.subr.bf16.mxu1 %v10349_v42  ;;  %v10212_v52 = vcombine.low %v966_v39, %v970_v40  ;;  %v9911_v40 = vcombine.high %v663_v27, %v667_v28  ;;  %v659_v42 = vld [vmem:[#allocation8 + $0x1a8] sm:$0xff] }
 0x174   :  { %v1098_v43 = vld [vmem:[#allocation8 + $0xf60] sm:$0xff]  ;;  %4305 = vmatpush2.bf16.msra.mxu0 %v10220_v44  ;;  %4348 = vmatpush2.bf16.msra.mxu1 %v10348_v45  ;;  %v10039_v44 = vcombine.high %v791_v29, %v795_v33  ;;  %v787_v45 = vld [vmem:[#allocation8 + $0x5a8] sm:$0xff] }
 0x175   :  { %v958_v47 = vld [vmem:[#allocation8 + $0xb00] sm:$0xff]  ;;  %v10341_v50 = vcombine.high %v1094_v41, %v1098_v43  ;;  %4306 = vmatprep.subr.bf16.mxu0 %v10213_v46  ;;  %v10340_v53 = vcombine.low %v1094_v41, %v1098_v43  ;;  %v655_v41 = vld [vmem:[#allocation8 + $0x188] sm:$0xff] }
 0x176   :  { %v962_v48 = vld [vmem:[#allocation8 + $0xb20] sm:$0xff]  ;;  %v783_v43 = vld [vmem:[#allocation8 + $0x588] sm:$0xff] }
 0x177   :  { %v1086_v49 = vld [vmem:[#allocation8 + $0xf00] sm:$0xff]  ;;  %v10205_v54 = vcombine.high %v958_v47, %v962_v48  ;;  %4349 = vmatprep.subr.bf16.mxu1 %v10341_v50  ;;  %v10204_v61 = vcombine.low %v958_v47, %v962_v48  ;;  %v13091_v47 = vpack.c.bf16 %v1630_v36, %v1622_v35  ;;  %v9910_v48 = vcombine.low %v663_v27, %v667_v28  ;;  %v747_v27 = vld [vmem:[#allocation8 + $0x468] sm:$0xff] }
 0x178   :  { %v1090_v51 = vld [vmem:[#allocation8 + $0xf20] sm:$0xff]  ;;  %4307 = vmatpush2.bf16.msra.mxu0 %v10212_v52  ;;  %4350 = vmatpush2.bf16.msra.mxu1 %v10340_v53  ;;  %v9903_v50 = vcombine.high %v655_v41, %v659_v42  ;;  %v651_v52 = vld [vmem:[#allocation8 + $0x168] sm:$0xff] }
 0x179   :  { %v950_v55 = vld [vmem:[#allocation8 + $0xac0] sm:$0xff]  ;;  %v10333_v59 = vcombine.high %v1086_v49, %v1090_v51  ;;  %4308 = vmatprep.subr.bf16.mxu0 %v10205_v54  ;;  %v10332_v62 = vcombine.low %v1086_v49, %v1090_v51  ;;  %v10038_v49 = vcombine.low %v791_v29, %v795_v33  ;;  %v647_v51 = vld [vmem:[#allocation8 + $0x148] sm:$0xff]  ;;  %v10031_v54 = vcombine.high %v783_v43, %v787_v45 }
 0x17a   :  { %v954_v56 = vld [vmem:[#allocation8 + $0xae0] sm:$0xff]  ;;  %v775_v53 = vld [vmem:[#allocation8 + $0x548] sm:$0xff] }
 0x17b   :  { %v1078_v57 = vld [vmem:[#allocation8 + $0xec0] sm:$0xff]  ;;  %v10197_v0 = vcombine.high %v950_v55, %v954_v56  ;;  %4351 = vmatprep.subr.bf16.mxu1 %v10333_v59  ;;  %v10196_v6 = vcombine.low %v950_v55, %v954_v56  ;;  %v779_v55 = vld [vmem:[#allocation8 + $0x568] sm:$0xff]  ;;  %v9902_v56 = vcombine.low %v655_v41, %v659_v42  ;;  %v9895_v59 = vcombine.high %v647_v51, %v651_v52 }
 0x17c   :  { %v1082_v60 = vld [vmem:[#allocation8 + $0xee0] sm:$0xff]  ;;  %4309 = vmatpush2.bf16.msra.mxu0 %v10204_v61  ;;  %4352 = vmatpush2.bf16.msra.mxu1 %v10332_v62  ;;  %v643_v61 = vld [vmem:[#allocation8 + $0x128] sm:$0xff] }
 0x17d   :  { %v942_v1 = vld [vmem:[#allocation8 + $0xa80] sm:$0xff]  ;;  %v10325_v4 = vcombine.high %v1078_v57, %v1082_v60  ;;  %4310 = vmatprep.subr.bf16.mxu0 %v10197_v0  ;;  %v10324_v7 = vcombine.low %v1078_v57, %v1082_v60  ;;  %v10030_v57 = vcombine.low %v783_v43, %v787_v45  ;;  %v639_v60 = vld [vmem:[#allocation8 + $0x108] sm:$0xff]  ;;  %v10023_v0 = vcombine.high %v775_v53, %v779_v55 }
 0x17e   :  { %v946_v2 = vld [vmem:[#allocation8 + $0xaa0] sm:$0xff]  ;;  %v767_v62 = vld [vmem:[#allocation8 + $0x508] sm:$0xff] }
 0x17f   :  { %v1070_v3 = vld [vmem:[#allocation8 + $0xe80] sm:$0xff]  ;;  %v10189_v8 = vcombine.high %v942_v1, %v946_v2  ;;  %4353 = vmatprep.subr.bf16.mxu1 %v10325_v4  ;;  %v10188_v14 = vcombine.low %v942_v1, %v946_v2  ;;  %v771_v1 = vld [vmem:[#allocation8 + $0x528] sm:$0xff]  ;;  %v9894_v2 = vcombine.low %v647_v51, %v651_v52  ;;  %v9887_v4 = vcombine.high %v639_v60, %v643_v61 }
 0x180   :  { %v1074_v5 = vld [vmem:[#allocation8 + $0xea0] sm:$0xff]  ;;  %4311 = vmatpush2.bf16.msra.mxu0 %v10196_v6  ;;  %4354 = vmatpush2.bf16.msra.mxu1 %v10324_v7  ;;  %v635_v6 = vld [vmem:[#allocation8 + $0xe8] sm:$0xff] }
 0x181   :  { %v934_v9 = vld [vmem:[#allocation8 + $0xa40] sm:$0xff]  ;;  %v10317_v12 = vcombine.high %v1070_v3, %v1074_v5  ;;  %4312 = vmatprep.subr.bf16.mxu0 %v10189_v8  ;;  %v10316_v15 = vcombine.low %v1070_v3, %v1074_v5  ;;  %v10022_v3 = vcombine.low %v775_v53, %v779_v55  ;;  %v631_v5 = vld [vmem:[#allocation8 + $0xc8] sm:$0xff]  ;;  %v10015_v8 = vcombine.high %v767_v62, %v771_v1 }
 0x182   :  { %v938_v10 = vld [vmem:[#allocation8 + $0xa60] sm:$0xff]  ;;  %v759_v7 = vld [vmem:[#allocation8 + $0x4c8] sm:$0xff] }
 0x183   :  { %v1062_v11 = vld [vmem:[#allocation8 + $0xe40] sm:$0xff]  ;;  %v10181_v16 = vcombine.high %v934_v9, %v938_v10  ;;  %4355 = vmatprep.subr.bf16.mxu1 %v10317_v12  ;;  %v10180_v23 = vcombine.low %v934_v9, %v938_v10  ;;  %v763_v9 = vld [vmem:[#allocation8 + $0x4e8] sm:$0xff]  ;;  %v9886_v10 = vcombine.low %v639_v60, %v643_v61  ;;  %v9879_v12 = vcombine.high %v631_v5, %v635_v6 }
 0x184   :  { %v1066_v13 = vld [vmem:[#allocation8 + $0xe60] sm:$0xff]  ;;  %4313 = vmatpush2.bf16.msra.mxu0 %v10188_v14  ;;  %4356 = vmatpush2.bf16.msra.mxu1 %v10316_v15  ;;  %v627_v14 = vld [vmem:[#allocation8 + $0xa8] sm:$0xff] }
 0x185   :  { %v926_v17 = vld [vmem:[#allocation8 + $0xa00] sm:$0xff]  ;;  %v10309_v20 = vcombine.high %v1062_v11, %v1066_v13  ;;  %4314 = vmatprep.subr.bf16.mxu0 %v10181_v16  ;;  %v10308_v24 = vcombine.low %v1062_v11, %v1066_v13  ;;  %v10014_v11 = vcombine.low %v767_v62, %v771_v1  ;;  %v623_v13 = vld [vmem:[#allocation8 + $0x88] sm:$0xff]  ;;  %v10007_v16 = vcombine.high %v759_v7, %v763_v9 }
 0x186   :  { %v930_v18 = vld [vmem:[#allocation8 + $0xa20] sm:$0xff]  ;;  %v751_v15 = vld [vmem:[#allocation8 + $0x488] sm:$0xff]  ;;  %v9870_v28 = vcombine.low %v623_v13, %v627_v14 }
 0x187   :  { %v1054_v19 = vld [vmem:[#allocation8 + $0xe00] sm:$0xff]  ;;  %v10173_v26 = vcombine.high %v926_v17, %v930_v18  ;;  %4357 = vmatprep.subr.bf16.mxu1 %v10309_v20  ;;  %v10172_v38 = vcombine.low %v926_v17, %v930_v18  ;;  %v755_v17 = vld [vmem:[#allocation8 + $0x4a8] sm:$0xff]  ;;  %v9878_v18 = vcombine.low %v631_v5, %v635_v6  ;;  %v9871_v20 = vcombine.high %v623_v13, %v627_v14 }
 0x188   :  { %v1058_v22 = vld [vmem:[#allocation8 + $0xe20] sm:$0xff]  ;;  %4315 = vmatpush2.bf16.msra.mxu0 %v10180_v23  ;;  %4358 = vmatpush2.bf16.msra.mxu1 %v10308_v24  ;;  %v619_v23 = vld [vmem:[#allocation8 + $0x68] sm:$0xff]  ;;  %v9998_v29 = vcombine.low %v751_v15, %v755_v17 }
 0x189   :  { %v10301_v30 = vcombine.high %v1054_v19, %v1058_v22  ;;  %v1620_v31 = vld [vmem:[#allocation2 + $0x20] sm:$0xff]  ;;  %4316 = vmatprep.subr.bf16.mxu0 %v10173_v26  ;;  %v10300_v39 = vcombine.low %v1054_v19, %v1058_v22  ;;  %v10006_v19 = vcombine.low %v759_v7, %v763_v9  ;;  %v615_v22 = vld [vmem:[#allocation8 + $0x48] sm:$0xff]  ;;  %v9999_v26 = vcombine.high %v751_v15, %v755_v17 }
 0x18a   :  { %v1628_v32 = vld [vmem:[#allocation2 + $0x60] sm:$0xff]  ;;  %v743_v24 = vld [vmem:[#allocation8 + $0x448] sm:$0xff] }
 0x18b   :  { %4359 = vmatprep.subr.bf16.mxu1 %v10301_v30  ;;  %v13089_v46 = vpack.c.bf16 %v1628_v32, %v1620_v31  ;;  %v9863_v30 = vcombine.high %v615_v22, %v619_v23  ;;  %v607_v31 = vld [vmem:[#allocation8 + $0x8] sm:$0xff]  ;;  %v9991_v35 = vcombine.high %v743_v24, %v747_v27 }
 0x18c   :  { %4317 = vmatpush2.bf16.msra.mxu0 %v10172_v38  ;;  %4360 = vmatpush2.bf16.msra.mxu1 %v10300_v39  ;;  %v611_v32 = vld [vmem:[#allocation8 + $0x28] sm:$0xff]  ;;  %v9862_v38 = vcombine.low %v615_v22, %v619_v23  ;;  %v9990_v39 = vcombine.low %v743_v24, %v747_v27 }
 0x18d   :  { %4372 = vmatprep.subr.bf16.mxu0 %v9911_v40  ;;  %4415 = vmatprep.subr.bf16.mxu1 %v10039_v44  ;;  %v735_v33 = vld [vmem:[#allocation8 + $0x408] sm:$0xff]  ;;  %v9855_v40 = vcombine.high %v607_v31, %v611_v32 }
 0x18e   :  { %v739_v36 = vld [vmem:[#allocation8 + $0x428] sm:$0xff] }
 0x18f   :  { %4319 = vmatmul.mubr.bf16.vlgmr.msra.gmra.mxu0 %v13089_v46  ;;  %4362 = vmatmul.mubr.bf16.vlgmr.msra.gmra.mxu1 %v13091_v47  ;;  %v727_v41 = vld [vmem:[#allocation8 + $0x3c8] sm:$0xff]  ;;  %v9983_v44 = vcombine.high %v735_v33, %v739_v36 }
 0x190   :  { %4373 = vmatpush1.bf16.msra.mxu0 %v9910_v48  ;;  %4416 = vmatpush1.bf16.msra.mxu1 %v10038_v49  ;;  %v731_v42 = vld [vmem:[#allocation8 + $0x3e8] sm:$0xff]  ;;  %v9854_v48 = vcombine.low %v607_v31, %v611_v32  ;;  %v9982_v49 = vcombine.low %v735_v33, %v739_v36 }
 0x191   :  { %4374 = vmatprep.subr.bf16.mxu0 %v9903_v50  ;;  %4417 = vmatprep.subr.bf16.mxu1 %v10031_v54  ;;  %v855_v43 = vld [vmem:[#allocation8 + $0x7c8] sm:$0xff]  ;;  %v9975_v50 = vcombine.high %v727_v41, %v731_v42 }
 0x192   :  { %4404 = vmatprep.mubr.bf16.mxu0 %v13071_v58  ;;  %4447 = vmatprep.mubr.bf16.mxu1 %v13073_v63  ;;  %v859_v45 = vld [vmem:[#allocation8 + $0x7e8] sm:$0xff] }
 0x193   :  { %v719_v51 = vld [vmem:[#allocation8 + $0x388] sm:$0xff]  ;;  %v10103_v54 = vcombine.high %v855_v43, %v859_v45 }
 0x194   :  { %4375 = vmatpush1.bf16.msra.mxu0 %v9902_v56  ;;  %4418 = vmatpush1.bf16.msra.mxu1 %v10030_v57  ;;  %v723_v52 = vld [vmem:[#allocation8 + $0x3a8] sm:$0xff]  ;;  %v9974_v56 = vcombine.low %v727_v41, %v731_v42  ;;  %v10102_v57 = vcombine.low %v855_v43, %v859_v45 }
 0x195   :  { %4376 = vmatprep.subr.bf16.mxu0 %v9895_v59  ;;  %4419 = vmatprep.subr.bf16.mxu1 %v10023_v0  ;;  %v847_v53 = vld [vmem:[#allocation8 + $0x788] sm:$0xff]  ;;  %v9967_v59 = vcombine.high %v719_v51, %v723_v52 }
 0x196   :  { %v851_v55 = vld [vmem:[#allocation8 + $0x7a8] sm:$0xff] }
 0x197   :  { %v711_v60 = vld [vmem:[#allocation8 + $0x348] sm:$0xff]  ;;  %v10095_v0 = vcombine.high %v847_v53, %v851_v55 }
 0x198   :  { %4377 = vmatpush1.bf16.msra.mxu0 %v9894_v2  ;;  %4420 = vmatpush1.bf16.msra.mxu1 %v10022_v3  ;;  %v715_v61 = vld [vmem:[#allocation8 + $0x368] sm:$0xff]  ;;  %v9966_v2 = vcombine.low %v719_v51, %v723_v52  ;;  %v10094_v3 = vcombine.low %v847_v53, %v851_v55 }
 0x199   :  { %4378 = vmatprep.subr.bf16.mxu0 %v9887_v4  ;;  %4421 = vmatprep.subr.bf16.mxu1 %v10015_v8  ;;  %v839_v62 = vld [vmem:[#allocation8 + $0x748] sm:$0xff]  ;;  %v9959_v4 = vcombine.high %v711_v60, %v715_v61 }
 0x19a   :  { %v843_v1 = vld [vmem:[#allocation8 + $0x768] sm:$0xff] }
 0x19b   :  { %v703_v5 = vld [vmem:[#allocation8 + $0x308] sm:$0xff]  ;;  %v10087_v8 = vcombine.high %v839_v62, %v843_v1 }
 0x19c   :  { %4379 = vmatpush1.bf16.msra.mxu0 %v9886_v10  ;;  %4422 = vmatpush1.bf16.msra.mxu1 %v10014_v11  ;;  %v707_v6 = vld [vmem:[#allocation8 + $0x328] sm:$0xff]  ;;  %v9958_v10 = vcombine.low %v711_v60, %v715_v61  ;;  %v10086_v11 = vcombine.low %v839_v62, %v843_v1 }
 0x19d   :  { %4380 = vmatprep.subr.bf16.mxu0 %v9879_v12  ;;  %4423 = vmatprep.subr.bf16.mxu1 %v10007_v16  ;;  %v831_v7 = vld [vmem:[#allocation8 + $0x708] sm:$0xff]  ;;  %v9951_v12 = vcombine.high %v703_v5, %v707_v6 }
 0x19e   :  { %v835_v9 = vld [vmem:[#allocation8 + $0x728] sm:$0xff] }
 0x19f   :  { %v695_v13 = vld [vmem:[#allocation8 + $0x2c8] sm:$0xff]  ;;  %v10079_v16 = vcombine.high %v831_v7, %v835_v9 }
 0x1a0   :  { %4381 = vmatpush1.bf16.msra.mxu0 %v9878_v18  ;;  %4424 = vmatpush1.bf16.msra.mxu1 %v10006_v19  ;;  %v699_v14 = vld [vmem:[#allocation8 + $0x2e8] sm:$0xff]  ;;  %v9950_v18 = vcombine.low %v703_v5, %v707_v6  ;;  %v10078_v19 = vcombine.low %v831_v7, %v835_v9 }
 0x1a1   :  { %4382 = vmatprep.subr.bf16.mxu0 %v9871_v20  ;;  %4425 = vmatprep.subr.bf16.mxu1 %v9999_v26  ;;  %v823_v15 = vld [vmem:[#allocation8 + $0x6c8] sm:$0xff]  ;;  %v9943_v20 = vcombine.high %v695_v13, %v699_v14 }
 0x1a2   :  { %v827_v17 = vld [vmem:[#allocation8 + $0x6e8] sm:$0xff] }
 0x1a3   :  { %v687_v22 = vld [vmem:[#allocation8 + $0x288] sm:$0xff]  ;;  %v10071_v26 = vcombine.high %v823_v15, %v827_v17 }
 0x1a4   :  { %4383 = vmatpush1.bf16.msra.mxu0 %v9870_v28  ;;  %4426 = vmatpush1.bf16.msra.mxu1 %v9998_v29  ;;  %v691_v23 = vld [vmem:[#allocation8 + $0x2a8] sm:$0xff]  ;;  %v9942_v28 = vcombine.low %v695_v13, %v699_v14  ;;  %v10070_v29 = vcombine.low %v823_v15, %v827_v17 }
 0x1a5   :  { %4384 = vmatprep.subr.bf16.mxu0 %v9863_v30  ;;  %4427 = vmatprep.subr.bf16.mxu1 %v9991_v35  ;;  %v815_v24 = vld [vmem:[#allocation8 + $0x688] sm:$0xff]  ;;  %v9935_v30 = vcombine.high %v687_v22, %v691_v23 }
 0x1a6   :  { %v819_v27 = vld [vmem:[#allocation8 + $0x6a8] sm:$0xff] }
 0x1a7   :  { %v679_v31 = vld [vmem:[#allocation8 + $0x248] sm:$0xff]  ;;  %v10063_v35 = vcombine.high %v815_v24, %v819_v27 }
 0x1a8   :  { %4385 = vmatpush1.bf16.msra.mxu0 %v9862_v38  ;;  %4428 = vmatpush1.bf16.msra.mxu1 %v9990_v39  ;;  %v683_v32 = vld [vmem:[#allocation8 + $0x268] sm:$0xff]  ;;  %v9934_v38 = vcombine.low %v687_v22, %v691_v23  ;;  %v10062_v39 = vcombine.low %v815_v24, %v819_v27 }
 0x1a9   :  { %4386 = vmatprep.subr.bf16.mxu0 %v9855_v40  ;;  %4429 = vmatprep.subr.bf16.mxu1 %v9983_v44  ;;  %v807_v33 = vld [vmem:[#allocation8 + $0x648] sm:$0xff]  ;;  %v9927_v40 = vcombine.high %v679_v31, %v683_v32 }
 0x1aa   :  { %v811_v36 = vld [vmem:[#allocation8 + $0x668] sm:$0xff] }
 0x1ab   :  { %v671_v41 = vld [vmem:[#allocation8 + $0x208] sm:$0xff]  ;;  %v10055_v44 = vcombine.high %v807_v33, %v811_v36 }
 0x1ac   :  { %4387 = vmatpush1.bf16.msra.mxu0 %v9854_v48  ;;  %4430 = vmatpush1.bf16.msra.mxu1 %v9982_v49  ;;  %v675_v42 = vld [vmem:[#allocation8 + $0x228] sm:$0xff]  ;;  %v9926_v48 = vcombine.low %v679_v31, %v683_v32  ;;  %v10054_v49 = vcombine.low %v807_v33, %v811_v36 }
 0x1ad   :  { %4388 = vmatprep.subr.bf16.mxu0 %v9975_v50  ;;  %4431 = vmatprep.subr.bf16.mxu1 %v10103_v54  ;;  %v799_v43 = vld [vmem:[#allocation8 + $0x608] sm:$0xff]  ;;  %v9919_v50 = vcombine.high %v671_v41, %v675_v42 }
 0x1ae   :  { %v803_v45 = vld [vmem:[#allocation8 + $0x628] sm:$0xff] }
 0x1af   :  { %v919_v51 = vld [vmem:[#allocation8 + $0x9c8] sm:$0xff]  ;;  %v10047_v54 = vcombine.high %v799_v43, %v803_v45 }
 0x1b0   :  { %4389 = vmatpush2.bf16.msra.mxu0 %v9974_v56  ;;  %4432 = vmatpush2.bf16.msra.mxu1 %v10102_v57  ;;  %v923_v52 = vld [vmem:[#allocation8 + $0x9e8] sm:$0xff]  ;;  %v9918_v56 = vcombine.low %v671_v41, %v675_v42  ;;  %v10046_v57 = vcombine.low %v799_v43, %v803_v45 }
 0x1b1   :  { %4390 = vmatprep.subr.bf16.mxu0 %v9967_v59  ;;  %4433 = vmatprep.subr.bf16.mxu1 %v10095_v0  ;;  %v1047_v53 = vld [vmem:[#allocation8 + $0xdc8] sm:$0xff]  ;;  %v10167_v59 = vcombine.high %v919_v51, %v923_v52 }
 0x1b2   :  { %v1051_v55 = vld [vmem:[#allocation8 + $0xde8] sm:$0xff] }
 0x1b3   :  { %v911_v60 = vld [vmem:[#allocation8 + $0x988] sm:$0xff]  ;;  %v10295_v0 = vcombine.high %v1047_v53, %v1051_v55 }
 0x1b4   :  { %4391 = vmatpush2.bf16.msra.mxu0 %v9966_v2  ;;  %4434 = vmatpush2.bf16.msra.mxu1 %v10094_v3  ;;  %v915_v61 = vld [vmem:[#allocation8 + $0x9a8] sm:$0xff]  ;;  %v10166_v2 = vcombine.low %v919_v51, %v923_v52  ;;  %v10294_v3 = vcombine.low %v1047_v53, %v1051_v55 }
 0x1b5   :  { %4392 = vmatprep.subr.bf16.mxu0 %v9959_v4  ;;  %4435 = vmatprep.subr.bf16.mxu1 %v10087_v8  ;;  %v1039_v62 = vld [vmem:[#allocation8 + $0xd88] sm:$0xff]  ;;  %v10159_v4 = vcombine.high %v911_v60, %v915_v61 }
 0x1b6   :  { %v1043_v1 = vld [vmem:[#allocation8 + $0xda8] sm:$0xff] }
 0x1b7   :  { %v903_v5 = vld [vmem:[#allocation8 + $0x948] sm:$0xff]  ;;  %v10287_v8 = vcombine.high %v1039_v62, %v1043_v1 }
 0x1b8   :  { %4393 = vmatpush2.bf16.msra.mxu0 %v9958_v10  ;;  %4436 = vmatpush2.bf16.msra.mxu1 %v10086_v11  ;;  %v907_v6 = vld [vmem:[#allocation8 + $0x968] sm:$0xff]  ;;  %v10158_v10 = vcombine.low %v911_v60, %v915_v61  ;;  %v10286_v11 = vcombine.low %v1039_v62, %v1043_v1 }
 0x1b9   :  { %4394 = vmatprep.subr.bf16.mxu0 %v9951_v12  ;;  %4437 = vmatprep.subr.bf16.mxu1 %v10079_v16  ;;  %v1031_v7 = vld [vmem:[#allocation8 + $0xd48] sm:$0xff]  ;;  %v10151_v12 = vcombine.high %v903_v5, %v907_v6 }
 0x1ba   :  { %v1035_v9 = vld [vmem:[#allocation8 + $0xd68] sm:$0xff] }
 0x1bb   :  { %v895_v13 = vld [vmem:[#allocation8 + $0x908] sm:$0xff]  ;;  %v10279_v16 = vcombine.high %v1031_v7, %v1035_v9 }
 0x1bc   :  { %4395 = vmatpush2.bf16.msra.mxu0 %v9950_v18  ;;  %4438 = vmatpush2.bf16.msra.mxu1 %v10078_v19  ;;  %v899_v14 = vld [vmem:[#allocation8 + $0x928] sm:$0xff]  ;;  %v10150_v18 = vcombine.low %v903_v5, %v907_v6  ;;  %v10278_v19 = vcombine.low %v1031_v7, %v1035_v9 }
 0x1bd   :  { %4396 = vmatprep.subr.bf16.mxu0 %v9943_v20  ;;  %4439 = vmatprep.subr.bf16.mxu1 %v10071_v26  ;;  %v1023_v15 = vld [vmem:[#allocation8 + $0xd08] sm:$0xff]  ;;  %v10143_v20 = vcombine.high %v895_v13, %v899_v14 }
 0x1be   :  { %v1027_v17 = vld [vmem:[#allocation8 + $0xd28] sm:$0xff] }
 0x1bf   :  { %v887_v22 = vld [vmem:[#allocation8 + $0x8c8] sm:$0xff]  ;;  %v10271_v26 = vcombine.high %v1023_v15, %v1027_v17 }
 0x1c0   :  { %4397 = vmatpush2.bf16.msra.mxu0 %v9942_v28  ;;  %4440 = vmatpush2.bf16.msra.mxu1 %v10070_v29  ;;  %v891_v23 = vld [vmem:[#allocation8 + $0x8e8] sm:$0xff]  ;;  %v10142_v28 = vcombine.low %v895_v13, %v899_v14  ;;  %v10270_v29 = vcombine.low %v1023_v15, %v1027_v17 }
 0x1c1   :  { %4398 = vmatprep.subr.bf16.mxu0 %v9935_v30  ;;  %4441 = vmatprep.subr.bf16.mxu1 %v10063_v35  ;;  %v1015_v24 = vld [vmem:[#allocation8 + $0xcc8] sm:$0xff]  ;;  %v10135_v30 = vcombine.high %v887_v22, %v891_v23 }
 0x1c2   :  { %v1019_v27 = vld [vmem:[#allocation8 + $0xce8] sm:$0xff] }
 0x1c3   :  { %v879_v31 = vld [vmem:[#allocation8 + $0x888] sm:$0xff]  ;;  %v10263_v35 = vcombine.high %v1015_v24, %v1019_v27 }
 0x1c4   :  { %4399 = vmatpush2.bf16.msra.mxu0 %v9934_v38  ;;  %4442 = vmatpush2.bf16.msra.mxu1 %v10062_v39  ;;  %v883_v32 = vld [vmem:[#allocation8 + $0x8a8] sm:$0xff]  ;;  %v10134_v38 = vcombine.low %v887_v22, %v891_v23  ;;  %v10262_v39 = vcombine.low %v1015_v24, %v1019_v27 }
 0x1c5   :  { %4400 = vmatprep.subr.bf16.mxu0 %v9927_v40  ;;  %4443 = vmatprep.subr.bf16.mxu1 %v10055_v44  ;;  %v1007_v33 = vld [vmem:[#allocation8 + $0xc88] sm:$0xff]  ;;  %v10127_v40 = vcombine.high %v879_v31, %v883_v32 }
 0x1c6   :  { %v1011_v36 = vld [vmem:[#allocation8 + $0xca8] sm:$0xff] }
 0x1c7   :  { %v871_v41 = vld [vmem:[#allocation8 + $0x848] sm:$0xff]  ;;  %v10255_v44 = vcombine.high %v1007_v33, %v1011_v36 }
 0x1c8   :  { %4401 = vmatpush2.bf16.msra.mxu0 %v9926_v48  ;;  %4444 = vmatpush2.bf16.msra.mxu1 %v10054_v49  ;;  %v875_v42 = vld [vmem:[#allocation8 + $0x868] sm:$0xff]  ;;  %v10126_v48 = vcombine.low %v879_v31, %v883_v32  ;;  %v10254_v49 = vcombine.low %v1007_v33, %v1011_v36 }
 0x1c9   :  { %4402 = vmatprep.subr.bf16.mxu0 %v9919_v50  ;;  %4445 = vmatprep.subr.bf16.mxu1 %v10047_v54  ;;  %v999_v43 = vld [vmem:[#allocation8 + $0xc48] sm:$0xff]  ;;  %v10119_v50 = vcombine.high %v871_v41, %v875_v42 }
 0x1ca   :  { %v1003_v45 = vld [vmem:[#allocation8 + $0xc68] sm:$0xff] }
 0x1cb   :  { %v863_v51 = vld [vmem:[#allocation8 + $0x808] sm:$0xff]  ;;  %v10247_v54 = vcombine.high %v999_v43, %v1003_v45 }
 0x1cc   :  { %4403 = vmatpush2.bf16.msra.mxu0 %v9918_v56  ;;  %4446 = vmatpush2.bf16.msra.mxu1 %v10046_v57  ;;  %v867_v52 = vld [vmem:[#allocation8 + $0x828] sm:$0xff]  ;;  %v10118_v56 = vcombine.low %v871_v41, %v875_v42  ;;  %v10246_v57 = vcombine.low %v999_v43, %v1003_v45 }
 0x1cd   :  { %4458 = vmatprep.subr.bf16.mxu0 %v10167_v59  ;;  %4501 = vmatprep.subr.bf16.mxu1 %v10295_v0  ;;  %v991_v53 = vld [vmem:[#allocation8 + $0xc08] sm:$0xff]  ;;  %v10111_v59 = vcombine.high %v863_v51, %v867_v52 }
 0x1ce   :  { %v995_v55 = vld [vmem:[#allocation8 + $0xc28] sm:$0xff] }
 0x1cf   :  { %4405 = vmatmul.mubr.bf16.vlgmr.msra.gmra.mxu0 %v13077_v21  ;;  %4448 = vmatmul.mubr.bf16.vlgmr.msra.gmra.mxu1 %v13079_v25  ;;  %v983_v60 = vld [vmem:[#allocation8 + $0xbc8] sm:$0xff]  ;;  %v10239_v0 = vcombine.high %v991_v53, %v995_v55 }
 0x1d0   :  { %4459 = vmatpush1.bf16.msra.mxu0 %v10166_v2  ;;  %4502 = vmatpush1.bf16.msra.mxu1 %v10294_v3  ;;  %v987_v61 = vld [vmem:[#allocation8 + $0xbe8] sm:$0xff]  ;;  %v10110_v2 = vcombine.low %v863_v51, %v867_v52  ;;  %v10238_v3 = vcombine.low %v991_v53, %v995_v55 }
 0x1d1   :  { %4460 = vmatprep.subr.bf16.mxu0 %v10159_v4  ;;  %4503 = vmatprep.subr.bf16.mxu1 %v10287_v8  ;;  %v1111_v62 = vld [vmem:[#allocation8 + $0xfc8] sm:$0xff]  ;;  %v10231_v4 = vcombine.high %v983_v60, %v987_v61 }
 0x1d2   :  { %4490 = vmatprep.mubr.bf16.mxu0 %v13081_v34  ;;  %4533 = vmatprep.mubr.bf16.mxu1 %v13084_v37  ;;  %v1115_v1 = vld [vmem:[#allocation8 + $0xfe8] sm:$0xff] }
 0x1d3   :  { %v975_v5 = vld [vmem:[#allocation8 + $0xb88] sm:$0xff]  ;;  %v10359_v8 = vcombine.high %v1111_v62, %v1115_v1 }
 0x1d4   :  { %4461 = vmatpush1.bf16.msra.mxu0 %v10158_v10  ;;  %4504 = vmatpush1.bf16.msra.mxu1 %v10286_v11  ;;  %v979_v6 = vld [vmem:[#allocation8 + $0xba8] sm:$0xff]  ;;  %v10230_v10 = vcombine.low %v983_v60, %v987_v61  ;;  %v10358_v11 = vcombine.low %v1111_v62, %v1115_v1 }
 0x1d5   :  { %4462 = vmatprep.subr.bf16.mxu0 %v10151_v12  ;;  %4505 = vmatprep.subr.bf16.mxu1 %v10279_v16  ;;  %v1103_v7 = vld [vmem:[#allocation8 + $0xf88] sm:$0xff]  ;;  %v10223_v12 = vcombine.high %v975_v5, %v979_v6 }
 0x1d6   :  { %v1107_v9 = vld [vmem:[#allocation8 + $0xfa8] sm:$0xff] }
 0x1d7   :  { %v967_v13 = vld [vmem:[#allocation8 + $0xb48] sm:$0xff]  ;;  %v10351_v16 = vcombine.high %v1103_v7, %v1107_v9 }
 0x1d8   :  { %4463 = vmatpush1.bf16.msra.mxu0 %v10150_v18  ;;  %4506 = vmatpush1.bf16.msra.mxu1 %v10278_v19  ;;  %v971_v14 = vld [vmem:[#allocation8 + $0xb68] sm:$0xff]  ;;  %v10222_v18 = vcombine.low %v975_v5, %v979_v6  ;;  %v10350_v19 = vcombine.low %v1103_v7, %v1107_v9  ;;  %v664_v5 = vld [vmem:[#allocation8 + $0x1d0] sm:$0xff] }
 0x1d9   :  { %4464 = vmatprep.subr.bf16.mxu0 %v10143_v20  ;;  %4507 = vmatprep.subr.bf16.mxu1 %v10271_v26  ;;  %v1095_v15 = vld [vmem:[#allocation8 + $0xf48] sm:$0xff]  ;;  %v10215_v20 = vcombine.high %v967_v13, %v971_v14  ;;  %v668_v6 = vld [vmem:[#allocation8 + $0x1f0] sm:$0xff] }
 0x1da   :  { %v1099_v17 = vld [vmem:[#allocation8 + $0xf68] sm:$0xff]  ;;  %v792_v7 = vld [vmem:[#allocation8 + $0x5d0] sm:$0xff] }
 0x1db   :  { %v959_v22 = vld [vmem:[#allocation8 + $0xb08] sm:$0xff]  ;;  %v10343_v26 = vcombine.high %v1095_v15, %v1099_v17  ;;  %v796_v9 = vld [vmem:[#allocation8 + $0x5f0] sm:$0xff] }
 0x1dc   :  { %4465 = vmatpush1.bf16.msra.mxu0 %v10142_v28  ;;  %4508 = vmatpush1.bf16.msra.mxu1 %v10270_v29  ;;  %v963_v23 = vld [vmem:[#allocation8 + $0xb28] sm:$0xff]  ;;  %v10214_v28 = vcombine.low %v967_v13, %v971_v14  ;;  %v10342_v29 = vcombine.low %v1095_v15, %v1099_v17  ;;  %v656_v13 = vld [vmem:[#allocation8 + $0x190] sm:$0xff] }
 0x1dd   :  { %4466 = vmatprep.subr.bf16.mxu0 %v10135_v30  ;;  %4509 = vmatprep.subr.bf16.mxu1 %v10263_v35  ;;  %v1087_v24 = vld [vmem:[#allocation8 + $0xf08] sm:$0xff]  ;;  %v10207_v30 = vcombine.high %v959_v22, %v963_v23  ;;  %v660_v14 = vld [vmem:[#allocation8 + $0x1b0] sm:$0xff] }
 0x1de   :  { %v1091_v27 = vld [vmem:[#allocation8 + $0xf28] sm:$0xff]  ;;  %v784_v15 = vld [vmem:[#allocation8 + $0x590] sm:$0xff] }
 0x1df   :  { %v951_v31 = vld [vmem:[#allocation8 + $0xac8] sm:$0xff]  ;;  %v10335_v35 = vcombine.high %v1087_v24, %v1091_v27  ;;  %v788_v17 = vld [vmem:[#allocation8 + $0x5b0] sm:$0xff] }
 0x1e0   :  { %4467 = vmatpush1.bf16.msra.mxu0 %v10134_v38  ;;  %4510 = vmatpush1.bf16.msra.mxu1 %v10262_v39  ;;  %v955_v32 = vld [vmem:[#allocation8 + $0xae8] sm:$0xff]  ;;  %v10206_v38 = vcombine.low %v959_v22, %v963_v23  ;;  %v10334_v39 = vcombine.low %v1087_v24, %v1091_v27  ;;  %v648_v22 = vld [vmem:[#allocation8 + $0x150] sm:$0xff] }
 0x1e1   :  { %4468 = vmatprep.subr.bf16.mxu0 %v10127_v40  ;;  %4511 = vmatprep.subr.bf16.mxu1 %v10255_v44  ;;  %v1079_v33 = vld [vmem:[#allocation8 + $0xec8] sm:$0xff]  ;;  %v10199_v40 = vcombine.high %v951_v31, %v955_v32  ;;  %v652_v23 = vld [vmem:[#allocation8 + $0x170] sm:$0xff] }
 0x1e2   :  { %v1083_v36 = vld [vmem:[#allocation8 + $0xee8] sm:$0xff]  ;;  %v776_v24 = vld [vmem:[#allocation8 + $0x550] sm:$0xff] }
 0x1e3   :  { %v943_v41 = vld [vmem:[#allocation8 + $0xa88] sm:$0xff]  ;;  %v10327_v44 = vcombine.high %v1079_v33, %v1083_v36  ;;  %v780_v27 = vld [vmem:[#allocation8 + $0x570] sm:$0xff] }
 0x1e4   :  { %4469 = vmatpush1.bf16.msra.mxu0 %v10126_v48  ;;  %4512 = vmatpush1.bf16.msra.mxu1 %v10254_v49  ;;  %v947_v42 = vld [vmem:[#allocation8 + $0xaa8] sm:$0xff]  ;;  %v10198_v48 = vcombine.low %v951_v31, %v955_v32  ;;  %v10326_v49 = vcombine.low %v1079_v33, %v1083_v36  ;;  %v10032_v33 = vcombine.low %v784_v15, %v788_v17  ;;  %v640_v36 = vld [vmem:[#allocation8 + $0x110] sm:$0xff] }
 0x1e5   :  { %4470 = vmatprep.subr.bf16.mxu0 %v10119_v50  ;;  %4513 = vmatprep.subr.bf16.mxu1 %v10247_v54  ;;  %v1071_v43 = vld [vmem:[#allocation8 + $0xe88] sm:$0xff]  ;;  %v10191_v50 = vcombine.high %v943_v41, %v947_v42 }
 0x1e6   :  { %v1075_v45 = vld [vmem:[#allocation8 + $0xea8] sm:$0xff] }
 0x1e7   :  { %v935_v51 = vld [vmem:[#allocation8 + $0xa48] sm:$0xff]  ;;  %v10319_v54 = vcombine.high %v1071_v43, %v1075_v45 }
 0x1e8   :  { %4471 = vmatpush1.bf16.msra.mxu0 %v10118_v56  ;;  %4514 = vmatpush1.bf16.msra.mxu1 %v10246_v57  ;;  %v939_v52 = vld [vmem:[#allocation8 + $0xa68] sm:$0xff]  ;;  %v10190_v56 = vcombine.low %v943_v41, %v947_v42  ;;  %v10318_v57 = vcombine.low %v1071_v43, %v1075_v45  ;;  %v10025_v41 = vcombine.high %v776_v24, %v780_v27  ;;  %v772_v42 = vld [vmem:[#allocation8 + $0x530] sm:$0xff] }
 0x1e9   :  { %4472 = vmatprep.subr.bf16.mxu0 %v10111_v59  ;;  %4515 = vmatprep.subr.bf16.mxu1 %v10239_v0  ;;  %v1063_v53 = vld [vmem:[#allocation8 + $0xe48] sm:$0xff]  ;;  %v10183_v59 = vcombine.high %v935_v51, %v939_v52 }
 0x1ea   :  { %v1067_v55 = vld [vmem:[#allocation8 + $0xe68] sm:$0xff] }
 0x1eb   :  { %v927_v60 = vld [vmem:[#allocation8 + $0xa08] sm:$0xff]  ;;  %v10311_v0 = vcombine.high %v1063_v53, %v1067_v55 }
 0x1ec   :  { %4473 = vmatpush1.bf16.msra.mxu0 %v10110_v2  ;;  %4516 = vmatpush1.bf16.msra.mxu1 %v10238_v3  ;;  %v931_v61 = vld [vmem:[#allocation8 + $0xa28] sm:$0xff]  ;;  %v10182_v2 = vcombine.low %v935_v51, %v939_v52  ;;  %v10310_v3 = vcombine.low %v1063_v53, %v1067_v55  ;;  %v10024_v51 = vcombine.low %v776_v24, %v780_v27  ;;  %v632_v53 = vld [vmem:[#allocation8 + $0xd0] sm:$0xff] }
 0x1ed   :  { %4474 = vmatprep.subr.bf16.mxu0 %v10231_v4  ;;  %4517 = vmatprep.subr.bf16.mxu1 %v10359_v8  ;;  %v1055_v62 = vld [vmem:[#allocation8 + $0xe08] sm:$0xff]  ;;  %v10175_v4 = vcombine.high %v927_v60, %v931_v61  ;;  %v760_v55 = vld [vmem:[#allocation8 + $0x4d0] sm:$0xff] }
 0x1ee   :  { %v1059_v1 = vld [vmem:[#allocation8 + $0xe28] sm:$0xff]  ;;  %v728_v27 = vld [vmem:[#allocation8 + $0x3d0] sm:$0xff] }
 0x1ef   :  { %v10303_v8 = vcombine.high %v1055_v62, %v1059_v1 }
 0x1f0   :  { %4475 = vmatpush2.bf16.msra.mxu0 %v10230_v10  ;;  %4518 = vmatpush2.bf16.msra.mxu1 %v10358_v11  ;;  %v10174_v10 = vcombine.low %v927_v60, %v931_v61  ;;  %v10302_v11 = vcombine.low %v1055_v62, %v1059_v1  ;;  %v624_v1 = vld [vmem:[#allocation8 + $0x90] sm:$0xff] }
 0x1f1   :  { %4476 = vmatprep.subr.bf16.mxu0 %v10223_v12  ;;  %4519 = vmatprep.subr.bf16.mxu1 %v10351_v16  ;;  %v9913_v12 = vcombine.high %v664_v5, %v668_v6  ;;  %v10041_v16 = vcombine.high %v792_v7, %v796_v9 }
 0x1f4   :  { %4477 = vmatpush2.bf16.msra.mxu0 %v10222_v18  ;;  %4520 = vmatpush2.bf16.msra.mxu1 %v10350_v19  ;;  %v9912_v18 = vcombine.low %v664_v5, %v668_v6  ;;  %v10040_v19 = vcombine.low %v792_v7, %v796_v9  ;;  %v756_v5 = vld [vmem:[#allocation8 + $0x4b0] sm:$0xff] }
 0x1f5   :  { %4478 = vmatprep.subr.bf16.mxu0 %v10215_v20  ;;  %4521 = vmatprep.subr.bf16.mxu1 %v10343_v26  ;;  %v9905_v20 = vcombine.high %v656_v13, %v660_v14  ;;  %v10033_v26 = vcombine.high %v784_v15, %v788_v17  ;;  %v616_v9 = vld [vmem:[#allocation8 + $0x50] sm:$0xff] }
 0x1f6   :  { %v608_v17 = vld [vmem:[#allocation8 + $0x10] sm:$0xff] }
 0x1f8   :  { %4479 = vmatpush2.bf16.msra.mxu0 %v10214_v28  ;;  %4522 = vmatpush2.bf16.msra.mxu1 %v10342_v29 }
 0x1f9   :  { %4480 = vmatprep.subr.bf16.mxu0 %v10207_v30  ;;  %4523 = vmatprep.subr.bf16.mxu1 %v10335_v35  ;;  %v9904_v30 = vcombine.low %v656_v13, %v660_v14  ;;  %v9897_v35 = vcombine.high %v648_v22, %v652_v23  ;;  %v748_v13 = vld [vmem:[#allocation8 + $0x470] sm:$0xff] }
 0x1fc   :  { %4481 = vmatpush2.bf16.msra.mxu0 %v10206_v38  ;;  %4524 = vmatpush2.bf16.msra.mxu1 %v10334_v39  ;;  %v644_v38 = vld [vmem:[#allocation8 + $0x130] sm:$0xff] }
 0x1fd   :  { %4482 = vmatprep.subr.bf16.mxu0 %v10199_v40  ;;  %4525 = vmatprep.subr.bf16.mxu1 %v10327_v44  ;;  %v768_v39 = vld [vmem:[#allocation8 + $0x510] sm:$0xff]  ;;  %v9889_v52 = vcombine.high %v640_v36, %v644_v38  ;;  %v9888_v61 = vcombine.low %v640_v36, %v644_v38 }
 0x1fe   :  { %v10016_v62 = vcombine.low %v768_v39, %v772_v42  ;;  %v720_v38 = vld [vmem:[#allocation8 + $0x390] sm:$0xff] }
 0x200   :  { %4483 = vmatpush2.bf16.msra.mxu0 %v10198_v48  ;;  %4526 = vmatpush2.bf16.msra.mxu1 %v10326_v49  ;;  %v9896_v48 = vcombine.low %v648_v22, %v652_v23  ;;  %v740_v22 = vld [vmem:[#allocation8 + $0x430] sm:$0xff] }
 0x201   :  { %4484 = vmatprep.subr.bf16.mxu0 %v10191_v50  ;;  %4527 = vmatprep.subr.bf16.mxu1 %v10319_v54  ;;  %v636_v54 = vld [vmem:[#allocation8 + $0xf0] sm:$0xff] }
 0x202   :  { %v9880_v6 = vcombine.low %v632_v53, %v636_v54 }
 0x204   :  { %4485 = vmatpush2.bf16.msra.mxu0 %v10190_v56  ;;  %4528 = vmatpush2.bf16.msra.mxu1 %v10318_v57  ;;  %v10017_v57 = vcombine.high %v768_v39, %v772_v42  ;;  %v724_v39 = vld [vmem:[#allocation8 + $0x3b0] sm:$0xff] }
 0x205   :  { %4486 = vmatprep.subr.bf16.mxu0 %v10183_v59  ;;  %4529 = vmatprep.subr.bf16.mxu1 %v10311_v0  ;;  %v764_v59 = vld [vmem:[#allocation8 + $0x4f0] sm:$0xff]  ;;  %v9881_v0 = vcombine.high %v632_v53, %v636_v54 }
 0x206   :  { %v10008_v7 = vcombine.low %v760_v55, %v764_v59  ;;  %v852_v42 = vld [vmem:[#allocation8 + $0x7b0] sm:$0xff] }
 0x207   :  { %v844_v54 = vld [vmem:[#allocation8 + $0x770] sm:$0xff] }
 0x208   :  { %4487 = vmatpush2.bf16.msra.mxu0 %v10182_v2  ;;  %4530 = vmatpush2.bf16.msra.mxu1 %v10310_v3  ;;  %v628_v2 = vld [vmem:[#allocation8 + $0xb0] sm:$0xff] }
 0x209   :  { %4488 = vmatprep.subr.bf16.mxu0 %v10175_v4  ;;  %4531 = vmatprep.subr.bf16.mxu1 %v10303_v8  ;;  %v752_v3 = vld [vmem:[#allocation8 + $0x490] sm:$0xff]  ;;  %v10009_v4 = vcombine.high %v760_v55, %v764_v59  ;;  %v9873_v8 = vcombine.high %v624_v1, %v628_v2  ;;  %v9872_v14 = vcombine.low %v624_v1, %v628_v2 }
 0x20a   :  { %v10000_v15 = vcombine.low %v752_v3, %v756_v5  ;;  %v9968_v55 = vcombine.low %v720_v38, %v724_v39  ;;  %v704_v59 = vld [vmem:[#allocation8 + $0x310] sm:$0xff] }
 0x20b   :  { %v836_v1 = vld [vmem:[#allocation8 + $0x730] sm:$0xff] }
 0x20c   :  { %4489 = vmatpush2.bf16.msra.mxu0 %v10174_v10  ;;  %4532 = vmatpush2.bf16.msra.mxu1 %v10302_v11  ;;  %v620_v10 = vld [vmem:[#allocation8 + $0x70] sm:$0xff] }
 0x20d   :  { %4544 = vmatprep.subr.bf16.mxu0 %v9913_v12  ;;  %4587 = vmatprep.subr.bf16.mxu1 %v10041_v16  ;;  %v4277_v29 = vpop.f32.mrf.mxu1  ;;  %v744_v11 = vld [vmem:[#allocation8 + $0x450] sm:$0xff]  ;;  %v10001_v12 = vcombine.high %v752_v3, %v756_v5  ;;  %v9865_v16 = vcombine.high %v616_v9, %v620_v10  ;;  %v9864_v23 = vcombine.low %v616_v9, %v620_v10 }
 0x20e   :  { %v9992_v24 = vcombine.low %v744_v11, %v748_v13  ;;  %v696_v5 = vld [vmem:[#allocation8 + $0x2d0] sm:$0xff] }
 0x20f   :  { %v4234_v28 = vpop.f32.mrf.mxu0  ;;  %4491 = vmatmul.mubr.bf16.vlgmr.msra.gmra.mxu0 %v13089_v46  ;;  %4534 = vmatmul.mubr.bf16.vlgmr.msra.gmra.mxu1 %v13091_v47  ;;  %v4279_v40 = vpop.f32.mrf.mxu1  ;;  %v828_v9 = vld [vmem:[#allocation8 + $0x6f0] sm:$0xff] }
 0x210   :  { %4545 = vmatpush1.bf16.msra.mxu0 %v9912_v18  ;;  %v13103_v31 = vadd.f32 %v4277_v29, %v4234_v28  ;;  %4588 = vmatpush1.bf16.msra.mxu1 %v10040_v19  ;;  %v612_v18 = vld [vmem:[#allocation8 + $0x30] sm:$0xff] }
 0x211   :  { %v4236_v32 = vpop.f32.mrf.mxu0  ;;  %4546 = vmatprep.subr.bf16.mxu0 %v9905_v20  ;;  %4589 = vmatprep.subr.bf16.mxu1 %v10033_v26  ;;  %v4281_v45 = vpop.f32.mrf.mxu1  ;;  %v736_v19 = vld [vmem:[#allocation8 + $0x410] sm:$0xff]  ;;  %v9993_v20 = vcombine.high %v744_v11, %v748_v13  ;;  %v9857_v26 = vcombine.high %v608_v17, %v612_v18 }
 0x212   :  { %4576 = vmatprep.mubr.bf16.mxu0 %v13071_v58  ;;  %v13106_v43 = vadd.f32 %v4279_v40, %v4236_v32  ;;  %4619 = vmatprep.mubr.bf16.mxu1 %v13073_v63  ;;  %v732_v28 = vld [vmem:[#allocation8 + $0x3f0] sm:$0xff] }
 0x213   :  { %v4238_v44 = vpop.f32.mrf.mxu0  ;;  %v4283_v56 = vpop.f32.mrf.mxu1  ;;  %v856_v29 = vld [vmem:[#allocation8 + $0x7d0] sm:$0xff]  ;;  %v9977_v36 = vcombine.high %v728_v27, %v732_v28 }
 0x214   :  { %4547 = vmatpush1.bf16.msra.mxu0 %v9904_v30  ;;  %v13109_v49 = vadd.f32 %v4281_v45, %v4238_v44  ;;  %4590 = vmatpush1.bf16.msra.mxu1 %v10032_v33  ;;  %v9985_v30 = vcombine.high %v736_v19, %v740_v22  ;;  %v860_v32 = vld [vmem:[#allocation8 + $0x7f0] sm:$0xff]  ;;  %v9856_v33 = vcombine.low %v608_v17, %v612_v18 }
 0x215   :  { %v4240_v50 = vpop.f32.mrf.mxu0  ;;  %4548 = vmatprep.subr.bf16.mxu0 %v9897_v35  ;;  %4591 = vmatprep.subr.bf16.mxu1 %v10025_v41  ;;  %v9984_v35 = vcombine.low %v736_v19, %v740_v22  ;;  %v848_v40 = vld [vmem:[#allocation8 + $0x790] sm:$0xff]  ;;  %v10105_v41 = vcombine.high %v856_v29, %v860_v32  ;;  %v9976_v44 = vcombine.low %v728_v27, %v732_v28 }
 0x216   :  { %v13111_v60 = vadd.f32 %v4283_v56, %v4240_v50  ;;  %v10104_v45 = vcombine.low %v856_v29, %v860_v32  ;;  %v712_v50 = vld [vmem:[#allocation8 + $0x350] sm:$0xff]  ;;  %v10097_v53 = vcombine.high %v848_v40, %v852_v42  ;;  %v10096_v56 = vcombine.low %v848_v40, %v852_v42 }
 0x217   :  { %v688_v13 = vld [vmem:[#allocation8 + $0x290] sm:$0xff] }
 0x218   :  { %4549 = vmatpush1.bf16.msra.mxu0 %v9896_v48  ;;  %4592 = vmatpush1.bf16.msra.mxu1 %v10024_v51  ;;  %v9969_v48 = vcombine.high %v720_v38, %v724_v39  ;;  %v716_v51 = vld [vmem:[#allocation8 + $0x370] sm:$0xff] }
 0x219   :  { %4550 = vmatprep.subr.bf16.mxu0 %v9889_v52  ;;  %4593 = vmatprep.subr.bf16.mxu1 %v10017_v57  ;;  %v840_v52 = vld [vmem:[#allocation8 + $0x750] sm:$0xff]  ;;  %v9961_v57 = vcombine.high %v712_v50, %v716_v51  ;;  %v9960_v2 = vcombine.low %v712_v50, %v716_v51 }
 0x21a   :  { %v10088_v3 = vcombine.low %v840_v52, %v844_v54  ;;  %v820_v17 = vld [vmem:[#allocation8 + $0x6b0] sm:$0xff] }
 0x21b   :  { %v680_v22 = vld [vmem:[#allocation8 + $0x250] sm:$0xff] }
 0x21c   :  { %4551 = vmatpush1.bf16.msra.mxu0 %v9888_v61  ;;  %4594 = vmatpush1.bf16.msra.mxu1 %v10016_v62  ;;  %v708_v61 = vld [vmem:[#allocation8 + $0x330] sm:$0xff] }
 0x21d   :  { %4552 = vmatprep.subr.bf16.mxu0 %v9881_v0  ;;  %4595 = vmatprep.subr.bf16.mxu1 %v10009_v4  ;;  %v832_v62 = vld [vmem:[#allocation8 + $0x710] sm:$0xff]  ;;  %v10089_v0 = vcombine.high %v840_v52, %v844_v54  ;;  %v9953_v4 = vcombine.high %v704_v59, %v708_v61  ;;  %v9952_v10 = vcombine.low %v704_v59, %v708_v61 }
 0x21e   :  { %v10080_v11 = vcombine.low %v832_v62, %v836_v1  ;;  %v812_v27 = vld [vmem:[#allocation8 + $0x670] sm:$0xff] }
 0x21f   :  { %v672_v32 = vld [vmem:[#allocation8 + $0x210] sm:$0xff] }
 0x220   :  { %4553 = vmatpush1.bf16.msra.mxu0 %v9880_v6  ;;  %4596 = vmatpush1.bf16.msra.mxu1 %v10008_v7  ;;  %v700_v6 = vld [vmem:[#allocation8 + $0x2f0] sm:$0xff] }
 0x221   :  { %4554 = vmatprep.subr.bf16.mxu0 %v9873_v8  ;;  %4597 = vmatprep.subr.bf16.mxu1 %v10001_v12  ;;  %v824_v7 = vld [vmem:[#allocation8 + $0x6d0] sm:$0xff]  ;;  %v10081_v8 = vcombine.high %v832_v62, %v836_v1  ;;  %v9945_v12 = vcombine.high %v696_v5, %v700_v6  ;;  %v9944_v18 = vcombine.low %v696_v5, %v700_v6 }
 0x222   :  { %v10072_v19 = vcombine.low %v824_v7, %v828_v9  ;;  %v804_v38 = vld [vmem:[#allocation8 + $0x630] sm:$0xff] }
 0x223   :  { %v920_v42 = vld [vmem:[#allocation8 + $0x9d0] sm:$0xff] }
 0x224   :  { %4555 = vmatpush1.bf16.msra.mxu0 %v9872_v14  ;;  %4598 = vmatpush1.bf16.msra.mxu1 %v10000_v15  ;;  %v692_v14 = vld [vmem:[#allocation8 + $0x2b0] sm:$0xff] }
 0x225   :  { %4556 = vmatprep.subr.bf16.mxu0 %v9865_v16  ;;  %4599 = vmatprep.subr.bf16.mxu1 %v9993_v20  ;;  %v816_v15 = vld [vmem:[#allocation8 + $0x690] sm:$0xff]  ;;  %v10073_v16 = vcombine.high %v824_v7, %v828_v9  ;;  %v9937_v20 = vcombine.high %v688_v13, %v692_v14  ;;  %v9936_v28 = vcombine.low %v688_v13, %v692_v14 }
 0x226   :  { %v10064_v29 = vcombine.low %v816_v15, %v820_v17  ;;  %v1052_v50 = vld [vmem:[#allocation8 + $0xdf0] sm:$0xff] }
 0x227   :  { %v912_v54 = vld [vmem:[#allocation8 + $0x990] sm:$0xff] }
 0x228   :  { %4557 = vmatpush1.bf16.msra.mxu0 %v9864_v23  ;;  %4600 = vmatpush1.bf16.msra.mxu1 %v9992_v24  ;;  %v684_v23 = vld [vmem:[#allocation8 + $0x270] sm:$0xff] }
 0x229   :  { %4558 = vmatprep.subr.bf16.mxu0 %v9857_v26  ;;  %4601 = vmatprep.subr.bf16.mxu1 %v9985_v30  ;;  %v808_v24 = vld [vmem:[#allocation8 + $0x650] sm:$0xff]  ;;  %v10065_v26 = vcombine.high %v816_v15, %v820_v17  ;;  %v9929_v30 = vcombine.high %v680_v22, %v684_v23  ;;  %v9928_v39 = vcombine.low %v680_v22, %v684_v23 }
 0x22a   :  { %v10056_v40 = vcombine.low %v808_v24, %v812_v27  ;;  %v1044_v59 = vld [vmem:[#allocation8 + $0xdb0] sm:$0xff] }
 0x22b   :  { %v904_v1 = vld [vmem:[#allocation8 + $0x950] sm:$0xff] }
 0x22c   :  { %4559 = vmatpush1.bf16.msra.mxu0 %v9856_v33  ;;  %4602 = vmatpush1.bf16.msra.mxu1 %v9984_v35  ;;  %v676_v33 = vld [vmem:[#allocation8 + $0x230] sm:$0xff] }
 0x22d   :  { %4560 = vmatprep.subr.bf16.mxu0 %v9977_v36  ;;  %4603 = vmatprep.subr.bf16.mxu1 %v10105_v41  ;;  %v800_v35 = vld [vmem:[#allocation8 + $0x610] sm:$0xff]  ;;  %v10057_v36 = vcombine.high %v808_v24, %v812_v27  ;;  %v9921_v41 = vcombine.high %v672_v32, %v676_v33  ;;  %v9920_v51 = vcombine.low %v672_v32, %v676_v33 }
 0x22e   :  { %v10048_v52 = vcombine.low %v800_v35, %v804_v38  ;;  %v1036_v5 = vld [vmem:[#allocation8 + $0xd70] sm:$0xff] }
 0x22f   :  { %v896_v13 = vld [vmem:[#allocation8 + $0x910] sm:$0xff] }
 0x230   :  { %4561 = vmatpush2.bf16.msra.mxu0 %v9976_v44  ;;  %4604 = vmatpush2.bf16.msra.mxu1 %v10104_v45  ;;  %v924_v44 = vld [vmem:[#allocation8 + $0x9f0] sm:$0xff] }
 0x231   :  { %4562 = vmatprep.subr.bf16.mxu0 %v9969_v48  ;;  %4605 = vmatprep.subr.bf16.mxu1 %v10097_v53  ;;  %v1048_v45 = vld [vmem:[#allocation8 + $0xdd0] sm:$0xff]  ;;  %v10049_v48 = vcombine.high %v800_v35, %v804_v38  ;;  %v10169_v53 = vcombine.high %v920_v42, %v924_v44  ;;  %v10168_v61 = vcombine.low %v920_v42, %v924_v44 }
 0x232   :  { %v10296_v62 = vcombine.low %v1048_v45, %v1052_v50  ;;  %v900_v14 = vld [vmem:[#allocation8 + $0x930] sm:$0xff] }
 0x233   :  { %v1024_v15 = vld [vmem:[#allocation8 + $0xd10] sm:$0xff] }
 0x234   :  { %4563 = vmatpush2.bf16.msra.mxu0 %v9968_v55  ;;  %4606 = vmatpush2.bf16.msra.mxu1 %v10096_v56  ;;  %v916_v55 = vld [vmem:[#allocation8 + $0x9b0] sm:$0xff] }
 0x235   :  { %4564 = vmatprep.subr.bf16.mxu0 %v9961_v57  ;;  %4607 = vmatprep.subr.bf16.mxu1 %v10089_v0  ;;  %v1040_v56 = vld [vmem:[#allocation8 + $0xd90] sm:$0xff]  ;;  %v10297_v57 = vcombine.high %v1048_v45, %v1052_v50  ;;  %v10161_v0 = vcombine.high %v912_v54, %v916_v55  ;;  %v10160_v9 = vcombine.low %v912_v54, %v916_v55 }
 0x236   :  { %v1016_v32 = vld [vmem:[#allocation8 + $0xcd0] sm:$0xff] }
 0x237   :  { %v1020_v38 = vld [vmem:[#allocation8 + $0xcf0] sm:$0xff] }
 0x238   :  { %4565 = vmatpush2.bf16.msra.mxu0 %v9960_v2  ;;  %4608 = vmatpush2.bf16.msra.mxu1 %v10088_v3  ;;  %v908_v2 = vld [vmem:[#allocation8 + $0x970] sm:$0xff]  ;;  %v10265_v50 = vcombine.high %v1016_v32, %v1020_v38 }
 0x239   :  { %4566 = vmatprep.subr.bf16.mxu0 %v9953_v4  ;;  %4609 = vmatprep.subr.bf16.mxu1 %v10081_v8  ;;  %v1032_v3 = vld [vmem:[#allocation8 + $0xd50] sm:$0xff]  ;;  %v10289_v4 = vcombine.high %v1040_v56, %v1044_v59 }
 0x23a   :  { %v880_v44 = vld [vmem:[#allocation8 + $0x890] sm:$0xff] }
 0x23b   :  { %v884_v45 = vld [vmem:[#allocation8 + $0x8b0] sm:$0xff] }
 0x23c   :  { %4567 = vmatpush2.bf16.msra.mxu0 %v9952_v10  ;;  %4610 = vmatpush2.bf16.msra.mxu1 %v10080_v11  ;;  %v10288_v11 = vcombine.low %v1040_v56, %v1044_v59  ;;  %v872_v54 = vld [vmem:[#allocation8 + $0x850] sm:$0xff] }
 0x23d   :  { %4568 = vmatprep.subr.bf16.mxu0 %v9945_v12  ;;  %4611 = vmatprep.subr.bf16.mxu1 %v10073_v16  ;;  %v10153_v12 = vcombine.high %v904_v1, %v908_v2  ;;  %v876_v55 = vld [vmem:[#allocation8 + $0x870] sm:$0xff] }
 0x23e   :  { %v1000_v56 = vld [vmem:[#allocation8 + $0xc50] sm:$0xff] }
 0x23f   :  { %v1004_v59 = vld [vmem:[#allocation8 + $0xc70] sm:$0xff] }
 0x240   :  { %4569 = vmatpush2.bf16.msra.mxu0 %v9944_v18  ;;  %4612 = vmatpush2.bf16.msra.mxu1 %v10072_v19  ;;  %v1028_v19 = vld [vmem:[#allocation8 + $0xd30] sm:$0xff] }
 0x241   :  { %4570 = vmatprep.subr.bf16.mxu0 %v9937_v20  ;;  %4613 = vmatprep.subr.bf16.mxu1 %v10065_v26  ;;  %v10152_v26 = vcombine.low %v904_v1, %v908_v2  ;;  %v864_v1 = vld [vmem:[#allocation8 + $0x810] sm:$0xff] }
 0x242   :  { %v868_v2 = vld [vmem:[#allocation8 + $0x830] sm:$0xff] }
 0x244   :  { %4571 = vmatpush2.bf16.msra.mxu0 %v9936_v28  ;;  %4614 = vmatpush2.bf16.msra.mxu1 %v10064_v29  ;;  %v10145_v28 = vcombine.high %v896_v13, %v900_v14  ;;  %v888_v29 = vld [vmem:[#allocation8 + $0x8d0] sm:$0xff] }
 0x245   :  { %4572 = vmatprep.subr.bf16.mxu0 %v9929_v30  ;;  %4615 = vmatprep.subr.bf16.mxu1 %v10057_v36  ;;  %v892_v30 = vld [vmem:[#allocation8 + $0x8f0] sm:$0xff]  ;;  %v10273_v36 = vcombine.high %v1024_v15, %v1028_v19 }
 0x246   :  { %v10137_v42 = vcombine.high %v888_v29, %v892_v30 }
 0x248   :  { %4573 = vmatpush2.bf16.msra.mxu0 %v9928_v39  ;;  %4616 = vmatpush2.bf16.msra.mxu1 %v10056_v40  ;;  %v10144_v40 = vcombine.low %v896_v13, %v900_v14  ;;  %v1116_v13 = vld [vmem:[#allocation8 + $0xff0] sm:$0xff]  ;;  %v10112_v14 = vcombine.low %v864_v1, %v868_v2 }
 0x249   :  { %4574 = vmatprep.subr.bf16.mxu0 %v9921_v41  ;;  %4617 = vmatprep.subr.bf16.mxu1 %v10049_v48  ;;  %v10272_v41 = vcombine.low %v1024_v15, %v1028_v19  ;;  %v1008_v48 = vld [vmem:[#allocation8 + $0xc90] sm:$0xff] }
 0x24a   :  { %v1104_v19 = vld [vmem:[#allocation8 + $0xf90] sm:$0xff] }
 0x24c   :  { %4575 = vmatpush2.bf16.msra.mxu0 %v9920_v51  ;;  %4618 = vmatpush2.bf16.msra.mxu1 %v10048_v52  ;;  %v1012_v51 = vld [vmem:[#allocation8 + $0xcb0] sm:$0xff]  ;;  %v10264_v52 = vcombine.low %v1016_v32, %v1020_v38 }
 0x24d   :  { %4630 = vmatprep.subr.bf16.mxu0 %v10169_v53  ;;  %4673 = vmatprep.subr.bf16.mxu1 %v10297_v57  ;;  %v10129_v53 = vcombine.high %v880_v44, %v884_v45  ;;  %v10257_v57 = vcombine.high %v1008_v48, %v1012_v51  ;;  %v1100_v32 = vld [vmem:[#allocation8 + $0xf70] sm:$0xff] }
 0x24f   :  { %v4320_v6 = vpop.f32.mrf.mxu0  ;;  %4577 = vmatmul.mubr.bf16.vlgmr.msra.gmra.mxu0 %v13077_v21  ;;  %v4363_v8 = vpop.f32.mrf.mxu1  ;;  %4620 = vmatmul.mubr.bf16.vlgmr.msra.gmra.mxu1 %v13079_v25 }
 0x250   :  { %v4321_v7 = vadd.f32 %v4320_v6, %v13103_v31  ;;  %4631 = vmatpush1.bf16.msra.mxu0 %v10168_v61  ;;  %4674 = vmatpush1.bf16.msra.mxu1 %v10296_v62  ;;  %v10281_v31 = vcombine.high %v1032_v3, %v1036_v5  ;;  %v10128_v61 = vcombine.low %v880_v44, %v884_v45  ;;  %v1092_v44 = vld [vmem:[#allocation8 + $0xf30] sm:$0xff] }
 0x251   :  { %v4322_v10 = vpop.f32.mrf.mxu0  ;;  %4632 = vmatprep.subr.bf16.mxu0 %v10161_v0  ;;  %v4365_v18 = vpop.f32.mrf.mxu1  ;;  %4675 = vmatprep.subr.bf16.mxu1 %v10289_v4  ;;  %v10256_v62 = vcombine.low %v1008_v48, %v1012_v51  ;;  %v10121_v0 = vcombine.high %v872_v54, %v876_v55  ;;  %v10249_v4 = vcombine.high %v1000_v56, %v1004_v59  ;;  %v952_v51 = vld [vmem:[#allocation8 + $0xad0] sm:$0xff] }
 0x252   :  { %v13116_v16 = vadd.f32 %v4363_v8, %v4321_v7  ;;  %v4323_v17 = vadd.f32 %v4322_v10, %v13106_v43  ;;  %4662 = vmatprep.mubr.bf16.mxu0 %v13081_v34  ;;  %4705 = vmatprep.mubr.bf16.mxu1 %v13084_v37  ;;  %v10280_v43 = vcombine.low %v1032_v3, %v1036_v5  ;;  %v992_v3 = vld [vmem:[#allocation8 + $0xc10] sm:$0xff] }
 0x253   :  { %v4324_v20 = vpop.f32.mrf.mxu0  ;;  %v4367_v24 = vpop.f32.mrf.mxu1  ;;  %v996_v5 = vld [vmem:[#allocation8 + $0xc30] sm:$0xff]  ;;  %v10120_v6 = vcombine.low %v872_v54, %v876_v55  ;;  %v10248_v7 = vcombine.low %v1000_v56, %v1004_v59  ;;  %v10113_v8 = vcombine.high %v864_v1, %v868_v2 }
 0x254   :  { %v13121_v22 = vadd.f32 %v4365_v18, %v4323_v17  ;;  %v4325_v23 = vadd.f32 %v4324_v20, %v13109_v49  ;;  %4633 = vmatpush1.bf16.msra.mxu0 %v10160_v9  ;;  %4676 = vmatpush1.bf16.msra.mxu1 %v10288_v11  ;;  %v984_v9 = vld [vmem:[#allocation8 + $0xbd0] sm:$0xff]  ;;  %v10240_v15 = vcombine.low %v992_v3, %v996_v5 }
 0x255   :  { %v4326_v27 = vpop.f32.mrf.mxu0  ;;  %4634 = vmatprep.subr.bf16.mxu0 %v10153_v12  ;;  %4677 = vmatprep.subr.bf16.mxu1 %v10281_v31  ;;  %v4369_v39 = vpop.f32.mrf.mxu1  ;;  %v988_v10 = vld [vmem:[#allocation8 + $0xbf0] sm:$0xff]  ;;  %v10241_v12 = vcombine.high %v992_v3, %v996_v5 }
 0x256   :  { %v13124_v33 = vadd.f32 %v4367_v24, %v4325_v23  ;;  %v4327_v35 = vadd.f32 %v4326_v27, %v13111_v60  ;;  %v10136_v60 = vcombine.low %v888_v29, %v892_v30  ;;  %v1112_v11 = vld [vmem:[#allocation8 + $0xfd0] sm:$0xff]  ;;  %v10233_v17 = vcombine.high %v984_v9, %v988_v10 }
 0x257   :  { %v976_v18 = vld [vmem:[#allocation8 + $0xb90] sm:$0xff]  ;;  %v10361_v20 = vcombine.high %v1112_v11, %v1116_v13  ;;  %v10232_v24 = vcombine.low %v984_v9, %v988_v10 }
 0x258   :  { %v13127_v49 = vadd.f32 %v4369_v39, %v4327_v35  ;;  %4635 = vmatpush1.bf16.msra.mxu0 %v10152_v26  ;;  %4678 = vmatpush1.bf16.msra.mxu1 %v10280_v43  ;;  %v980_v31 = vld [vmem:[#allocation8 + $0xbb0] sm:$0xff]  ;;  %v10360_v26 = vcombine.low %v1112_v11, %v1116_v13 }
 0x259   :  { %4636 = vmatprep.subr.bf16.mxu0 %v10145_v28  ;;  %4679 = vmatprep.subr.bf16.mxu1 %v10273_v36  ;;  %v1108_v23 = vld [vmem:[#allocation8 + $0xfb0] sm:$0xff]  ;;  %v10225_v27 = vcombine.high %v976_v18, %v980_v31  ;;  %v10224_v35 = vcombine.low %v976_v18, %v980_v31 }
 0x25a   :  { %v968_v43 = vld [vmem:[#allocation8 + $0xb50] sm:$0xff]  ;;  %v10353_v30 = vcombine.high %v1104_v19, %v1108_v23  ;;  %v10352_v36 = vcombine.low %v1104_v19, %v1108_v23  ;;  %v665_v23 = vld [vmem:[#allocation8 + $0x1d8] sm:$0xff] }
 0x25b   :  { %v972_v28 = vld [vmem:[#allocation8 + $0xb70] sm:$0xff] }
 0x25c   :  { %4637 = vmatpush1.bf16.msra.mxu0 %v10144_v40  ;;  %4680 = vmatpush1.bf16.msra.mxu1 %v10272_v41  ;;  %v1096_v29 = vld [vmem:[#allocation8 + $0xf50] sm:$0xff]  ;;  %v10217_v38 = vcombine.high %v968_v43, %v972_v28  ;;  %v10216_v45 = vcombine.low %v968_v43, %v972_v28  ;;  %v797_v43 = vld [vmem:[#allocation8 + $0x5f8] sm:$0xff] }
 0x25d   :  { %4638 = vmatprep.subr.bf16.mxu0 %v10137_v42  ;;  %4681 = vmatprep.subr.bf16.mxu1 %v10265_v50  ;;  %v960_v39 = vld [vmem:[#allocation8 + $0xb10] sm:$0xff]  ;;  %v10345_v42 = vcombine.high %v1096_v29, %v1100_v32  ;;  %v10344_v48 = vcombine.low %v1096_v29, %v1100_v32  ;;  %v657_v32 = vld [vmem:[#allocation8 + $0x198] sm:$0xff] }
 0x25e   :  { %v964_v40 = vld [vmem:[#allocation8 + $0xb30] sm:$0xff] }
 0x25f   :  { %v1088_v41 = vld [vmem:[#allocation8 + $0xf10] sm:$0xff]  ;;  %v10209_v50 = vcombine.high %v960_v39, %v964_v40  ;;  %v10208_v55 = vcombine.low %v960_v39, %v964_v40  ;;  %v789_v39 = vld [vmem:[#allocation8 + $0x5b8] sm:$0xff] }
 0x260   :  { %4639 = vmatpush1.bf16.msra.mxu0 %v10136_v60  ;;  %4682 = vmatpush1.bf16.msra.mxu1 %v10264_v52  ;;  %v956_v60 = vld [vmem:[#allocation8 + $0xaf0] sm:$0xff]  ;;  %v10336_v56 = vcombine.low %v1088_v41, %v1092_v44 }
 0x261   :  { %4640 = vmatprep.subr.bf16.mxu0 %v10129_v53  ;;  %4683 = vmatprep.subr.bf16.mxu1 %v10257_v57  ;;  %v1080_v52 = vld [vmem:[#allocation8 + $0xed0] sm:$0xff]  ;;  %v10337_v53 = vcombine.high %v1088_v41, %v1092_v44  ;;  %v10201_v57 = vcombine.high %v952_v51, %v956_v60  ;;  %v10200_v2 = vcombine.low %v952_v51, %v956_v60  ;;  %v777_v51 = vld [vmem:[#allocation8 + $0x558] sm:$0xff] }
 0x262   :  { %v1084_v54 = vld [vmem:[#allocation8 + $0xef0] sm:$0xff]  ;;  %v781_v60 = vld [vmem:[#allocation8 + $0x578] sm:$0xff] }
 0x263   :  { %v944_v59 = vld [vmem:[#allocation8 + $0xa90] sm:$0xff]  ;;  %v10328_v3 = vcombine.low %v1080_v52, %v1084_v54 }
 0x264   :  { %4641 = vmatpush1.bf16.msra.mxu0 %v10128_v61  ;;  %4684 = vmatpush1.bf16.msra.mxu1 %v10256_v62  ;;  %v948_v61 = vld [vmem:[#allocation8 + $0xab0] sm:$0xff] }
 0x265   :  { %4642 = vmatprep.subr.bf16.mxu0 %v10121_v0  ;;  %4685 = vmatprep.subr.bf16.mxu1 %v10249_v4  ;;  %v1072_v62 = vld [vmem:[#allocation8 + $0xe90] sm:$0xff]  ;;  %v10329_v0 = vcombine.high %v1080_v52, %v1084_v54  ;;  %v10193_v4 = vcombine.high %v944_v59, %v948_v61  ;;  %v10192_v10 = vcombine.low %v944_v59, %v948_v61 }
 0x266   :  { %v1076_v1 = vld [vmem:[#allocation8 + $0xeb0] sm:$0xff]  ;;  %v10027_v61 = vcombine.high %v777_v51, %v781_v60 }
 0x267   :  { %v936_v5 = vld [vmem:[#allocation8 + $0xa50] sm:$0xff]  ;;  %v10320_v11 = vcombine.low %v1072_v62, %v1076_v1 }
 0x268   :  { %4643 = vmatpush1.bf16.msra.mxu0 %v10120_v6  ;;  %4686 = vmatpush1.bf16.msra.mxu1 %v10248_v7  ;;  %v940_v6 = vld [vmem:[#allocation8 + $0xa70] sm:$0xff] }
 0x269   :  { %4644 = vmatprep.subr.bf16.mxu0 %v10113_v8  ;;  %4687 = vmatprep.subr.bf16.mxu1 %v10241_v12  ;;  %v1064_v7 = vld [vmem:[#allocation8 + $0xe50] sm:$0xff]  ;;  %v10321_v8 = vcombine.high %v1072_v62, %v1076_v1  ;;  %v10185_v12 = vcombine.high %v936_v5, %v940_v6  ;;  %v10184_v31 = vcombine.low %v936_v5, %v940_v6  ;;  %v641_v62 = vld [vmem:[#allocation8 + $0x118] sm:$0xff] }
 0x26a   :  { %v1068_v9 = vld [vmem:[#allocation8 + $0xe70] sm:$0xff] }
 0x26b   :  { %v928_v13 = vld [vmem:[#allocation8 + $0xa10] sm:$0xff]  ;;  %v10312_v19 = vcombine.low %v1064_v7, %v1068_v9 }
 0x26c   :  { %4645 = vmatpush1.bf16.msra.mxu0 %v10112_v14  ;;  %4688 = vmatpush1.bf16.msra.mxu1 %v10240_v15  ;;  %v932_v14 = vld [vmem:[#allocation8 + $0xa30] sm:$0xff] }
 0x26d   :  { %4646 = vmatprep.subr.bf16.mxu0 %v10233_v17  ;;  %4689 = vmatprep.subr.bf16.mxu1 %v10361_v20  ;;  %v1056_v15 = vld [vmem:[#allocation8 + $0xe10] sm:$0xff]  ;;  %v10313_v17 = vcombine.high %v1064_v7, %v1068_v9  ;;  %v10177_v20 = vcombine.high %v928_v13, %v932_v14  ;;  %v10176_v28 = vcombine.low %v928_v13, %v932_v14  ;;  %v633_v13 = vld [vmem:[#allocation8 + $0xd8] sm:$0xff] }
 0x26e   :  { %v1060_v18 = vld [vmem:[#allocation8 + $0xe30] sm:$0xff]  ;;  %v10026_v9 = vcombine.low %v777_v51, %v781_v60  ;;  %v637_v14 = vld [vmem:[#allocation8 + $0xf8] sm:$0xff] }
 0x26f   :  { %v10304_v29 = vcombine.low %v1056_v15, %v1060_v18  ;;  %v741_v51 = vld [vmem:[#allocation8 + $0x438] sm:$0xff] }
 0x270   :  { %4647 = vmatpush2.bf16.msra.mxu0 %v10232_v24  ;;  %4690 = vmatpush2.bf16.msra.mxu1 %v10360_v26  ;;  %v669_v24 = vld [vmem:[#allocation8 + $0x1f8] sm:$0xff] }
 0x271   :  { %4648 = vmatprep.subr.bf16.mxu0 %v10225_v27  ;;  %4691 = vmatprep.subr.bf16.mxu1 %v10353_v30  ;;  %v793_v26 = vld [vmem:[#allocation8 + $0x5d8] sm:$0xff]  ;;  %v10305_v27 = vcombine.high %v1056_v15, %v1060_v18  ;;  %v9915_v30 = vcombine.high %v665_v23, %v669_v24  ;;  %v9914_v40 = vcombine.low %v665_v23, %v669_v24 }
 0x272   :  { %v10042_v41 = vcombine.low %v793_v26, %v797_v43  ;;  %v765_v18 = vld [vmem:[#allocation8 + $0x4f8] sm:$0xff] }
 0x273   :  { %v625_v23 = vld [vmem:[#allocation8 + $0x98] sm:$0xff] }
 0x274   :  { %4649 = vmatpush2.bf16.msra.mxu0 %v10224_v35  ;;  %4692 = vmatpush2.bf16.msra.mxu1 %v10352_v36  ;;  %v661_v35 = vld [vmem:[#allocation8 + $0x1b8] sm:$0xff] }
 0x275   :  { %4650 = vmatprep.subr.bf16.mxu0 %v10217_v38  ;;  %4693 = vmatprep.subr.bf16.mxu1 %v10345_v42  ;;  %v785_v36 = vld [vmem:[#allocation8 + $0x598] sm:$0xff]  ;;  %v10043_v38 = vcombine.high %v793_v26, %v797_v43  ;;  %v9907_v42 = vcombine.high %v657_v32, %v661_v35 }
 0x276   :  { %v10035_v44 = vcombine.high %v785_v36, %v789_v39  ;;  %v629_v24 = vld [vmem:[#allocation8 + $0xb8] sm:$0xff] }
 0x277   :  { %v753_v26 = vld [vmem:[#allocation8 + $0x498] sm:$0xff] }
 0x278   :  { %4651 = vmatpush2.bf16.msra.mxu0 %v10216_v45  ;;  %4694 = vmatpush2.bf16.msra.mxu1 %v10344_v48  ;;  %v649_v45 = vld [vmem:[#allocation8 + $0x158] sm:$0xff] }
 0x279   :  { %4652 = vmatprep.subr.bf16.mxu0 %v10209_v50  ;;  %4695 = vmatprep.subr.bf16.mxu1 %v10337_v53  ;;  %v653_v48 = vld [vmem:[#allocation8 + $0x178] sm:$0xff]  ;;  %v9906_v53 = vcombine.low %v657_v32, %v661_v35 }
 0x27a   :  { %v9898_v6 = vcombine.low %v649_v45, %v653_v48  ;;  %v757_v43 = vld [vmem:[#allocation8 + $0x4b8] sm:$0xff] }
 0x27b   :  { %v617_v32 = vld [vmem:[#allocation8 + $0x58] sm:$0xff] }
 0x27c   :  { %4653 = vmatpush2.bf16.msra.mxu0 %v10208_v55  ;;  %4696 = vmatpush2.bf16.msra.mxu1 %v10336_v56  ;;  %v10034_v56 = vcombine.low %v785_v36, %v789_v39  ;;  %v621_v35 = vld [vmem:[#allocation8 + $0x78] sm:$0xff] }
 0x27d   :  { %4654 = vmatprep.subr.bf16.mxu0 %v10201_v57  ;;  %4697 = vmatprep.subr.bf16.mxu1 %v10329_v0  ;;  %v9899_v57 = vcombine.high %v649_v45, %v653_v48  ;;  %v645_v0 = vld [vmem:[#allocation8 + $0x138] sm:$0xff]  ;;  %v9866_v60 = vcombine.low %v617_v32, %v621_v35 }
 0x27e   :  { %v745_v36 = vld [vmem:[#allocation8 + $0x458] sm:$0xff] }
 0x27f   :  { %v749_v39 = vld [vmem:[#allocation8 + $0x478] sm:$0xff] }
 0x280   :  { %4655 = vmatpush2.bf16.msra.mxu0 %v10200_v2  ;;  %4698 = vmatpush2.bf16.msra.mxu1 %v10328_v3  ;;  %v769_v3 = vld [vmem:[#allocation8 + $0x518] sm:$0xff] }
 0x281   :  { %4656 = vmatprep.subr.bf16.mxu0 %v10193_v4  ;;  %4699 = vmatprep.subr.bf16.mxu1 %v10321_v8  ;;  %v773_v4 = vld [vmem:[#allocation8 + $0x538] sm:$0xff] }
 0x282   :  { %v613_v45 = vld [vmem:[#allocation8 + $0x38] sm:$0xff] }
 0x283   :  { %v737_v48 = vld [vmem:[#allocation8 + $0x418] sm:$0xff] }
 0x284   :  { %4657 = vmatpush2.bf16.msra.mxu0 %v10192_v10  ;;  %4700 = vmatpush2.bf16.msra.mxu1 %v10320_v11  ;;  %v9891_v10 = vcombine.high %v641_v62, %v645_v0 }
 0x285   :  { %4658 = vmatprep.subr.bf16.mxu0 %v10185_v12  ;;  %4701 = vmatprep.subr.bf16.mxu1 %v10313_v17  ;;  %v10019_v12 = vcombine.high %v769_v3, %v773_v4  ;;  %v761_v17 = vld [vmem:[#allocation8 + $0x4d8] sm:$0xff] }
 0x288   :  { %4659 = vmatpush2.bf16.msra.mxu0 %v10184_v31  ;;  %4702 = vmatpush2.bf16.msra.mxu1 %v10312_v19  ;;  %v9890_v31 = vcombine.low %v641_v62, %v645_v0  ;;  %v10018_v19 = vcombine.low %v769_v3, %v773_v4  ;;  %v9986_v0 = vcombine.low %v737_v48, %v741_v51  ;;  %v721_v3 = vld [vmem:[#allocation8 + $0x398] sm:$0xff] }
 0x289   :  { %4660 = vmatprep.subr.bf16.mxu0 %v10177_v20  ;;  %4703 = vmatprep.subr.bf16.mxu1 %v10305_v27  ;;  %v9883_v20 = vcombine.high %v633_v13, %v637_v14  ;;  %v10011_v27 = vcombine.high %v761_v17, %v765_v18  ;;  %v725_v4 = vld [vmem:[#allocation8 + $0x3b8] sm:$0xff] }
 0x28c   :  { %4661 = vmatpush2.bf16.msra.mxu0 %v10176_v28  ;;  %4704 = vmatpush2.bf16.msra.mxu1 %v10304_v29  ;;  %v9882_v28 = vcombine.low %v633_v13, %v637_v14  ;;  %v10010_v29 = vcombine.low %v761_v17, %v765_v18  ;;  %v717_v13 = vld [vmem:[#allocation8 + $0x378] sm:$0xff] }
 0x28d   :  { %4716 = vmatprep.subr.bf16.mxu0 %v9915_v30  ;;  %4759 = vmatprep.subr.bf16.mxu1 %v10043_v38  ;;  %v9875_v30 = vcombine.high %v625_v23, %v629_v24  ;;  %v10003_v38 = vcombine.high %v753_v26, %v757_v43  ;;  %v841_v14 = vld [vmem:[#allocation8 + $0x758] sm:$0xff] }
 0x28e   :  { %v845_v18 = vld [vmem:[#allocation8 + $0x778] sm:$0xff] }
 0x28f   :  { %v4406_v50 = vpop.f32.mrf.mxu0  ;;  %4663 = vmatmul.mubr.bf16.vlgmr.msra.gmra.mxu0 %v13089_v46  ;;  %v4449_v52 = vpop.f32.mrf.mxu1  ;;  %4706 = vmatmul.mubr.bf16.vlgmr.msra.gmra.mxu1 %v13091_v47 }
 0x290   :  { %4717 = vmatpush1.bf16.msra.mxu0 %v9914_v40  ;;  %v13131_v54 = vadd.f32 %v4449_v52, %v4406_v50  ;;  %4760 = vmatpush1.bf16.msra.mxu1 %v10042_v41  ;;  %v9874_v40 = vcombine.low %v625_v23, %v629_v24  ;;  %v10002_v41 = vcombine.low %v753_v26, %v757_v43  ;;  %v705_v23 = vld [vmem:[#allocation8 + $0x318] sm:$0xff] }
 0x291   :  { %v4408_v55 = vpop.f32.mrf.mxu0  ;;  %4718 = vmatprep.subr.bf16.mxu0 %v9907_v42  ;;  %v4451_v59 = vpop.f32.mrf.mxu1  ;;  %4761 = vmatprep.subr.bf16.mxu1 %v10035_v44  ;;  %v9867_v42 = vcombine.high %v617_v32, %v621_v35  ;;  %v609_v44 = vld [vmem:[#allocation8 + $0x18] sm:$0xff]  ;;  %v9995_v50 = vcombine.high %v745_v36, %v749_v39  ;;  %v9994_v52 = vcombine.low %v745_v36, %v749_v39 }
 0x292   :  { %4748 = vmatprep.mubr.bf16.mxu0 %v13071_v58  ;;  %v13134_v1 = vadd.f32 %v4451_v59, %v4408_v55  ;;  %4791 = vmatprep.mubr.bf16.mxu1 %v13073_v63  ;;  %v729_v55 = vld [vmem:[#allocation8 + $0x3d8] sm:$0xff]  ;;  %v9987_v59 = vcombine.high %v737_v48, %v741_v51  ;;  %v9858_v62 = vcombine.low %v609_v44, %v613_v45 }
 0x293   :  { %v4410_v2 = vpop.f32.mrf.mxu0  ;;  %v4453_v5 = vpop.f32.mrf.mxu1  ;;  %v709_v24 = vld [vmem:[#allocation8 + $0x338] sm:$0xff] }
 0x294   :  { %4719 = vmatpush1.bf16.msra.mxu0 %v9906_v53  ;;  %v13137_v7 = vadd.f32 %v4453_v5, %v4410_v2  ;;  %4762 = vmatpush1.bf16.msra.mxu1 %v10034_v56  ;;  %v9859_v53 = vcombine.high %v609_v44, %v613_v45  ;;  %v733_v56 = vld [vmem:[#allocation8 + $0x3f8] sm:$0xff] }
 0x295   :  { %v4412_v8 = vpop.f32.mrf.mxu0  ;;  %4720 = vmatprep.subr.bf16.mxu0 %v9899_v57  ;;  %v4455_v11 = vpop.f32.mrf.mxu1  ;;  %4763 = vmatprep.subr.bf16.mxu1 %v10027_v61  ;;  %v857_v57 = vld [vmem:[#allocation8 + $0x7d8] sm:$0xff]  ;;  %v9979_v2 = vcombine.high %v729_v55, %v733_v56 }
 0x296   :  { %v13139_v15 = vadd.f32 %v4455_v11, %v4412_v8  ;;  %v861_v61 = vld [vmem:[#allocation8 + $0x7f8] sm:$0xff]  ;;  %v9971_v11 = vcombine.high %v721_v3, %v725_v4 }
 0x297   :  { %v849_v5 = vld [vmem:[#allocation8 + $0x798] sm:$0xff] }
 0x298   :  { %4721 = vmatpush1.bf16.msra.mxu0 %v9898_v6  ;;  %4764 = vmatpush1.bf16.msra.mxu1 %v10026_v9  ;;  %v10107_v6 = vcombine.high %v857_v57, %v861_v61  ;;  %v853_v8 = vld [vmem:[#allocation8 + $0x7b8] sm:$0xff]  ;;  %v9978_v9 = vcombine.low %v729_v55, %v733_v56 }
 0x299   :  { %4722 = vmatprep.subr.bf16.mxu0 %v9891_v10  ;;  %4765 = vmatprep.subr.bf16.mxu1 %v10019_v12  ;;  %v10106_v10 = vcombine.low %v857_v57, %v861_v61  ;;  %v713_v12 = vld [vmem:[#allocation8 + $0x358] sm:$0xff]  ;;  %v10099_v17 = vcombine.high %v849_v5, %v853_v8 }
 0x29a   :  { %v833_v26 = vld [vmem:[#allocation8 + $0x718] sm:$0xff] }
 0x29b   :  { %v837_v43 = vld [vmem:[#allocation8 + $0x738] sm:$0xff] }
 0x29c   :  { %4723 = vmatpush1.bf16.msra.mxu0 %v9890_v31  ;;  %4766 = vmatpush1.bf16.msra.mxu1 %v10018_v19  ;;  %v9970_v31 = vcombine.low %v721_v3, %v725_v4  ;;  %v10098_v19 = vcombine.low %v849_v5, %v853_v8  ;;  %v697_v32 = vld [vmem:[#allocation8 + $0x2d8] sm:$0xff] }
 0x29d   :  { %4724 = vmatprep.subr.bf16.mxu0 %v9883_v20  ;;  %4767 = vmatprep.subr.bf16.mxu1 %v10011_v27  ;;  %v9963_v20 = vcombine.high %v713_v12, %v717_v13  ;;  %v10091_v27 = vcombine.high %v841_v14, %v845_v18  ;;  %v701_v35 = vld [vmem:[#allocation8 + $0x2f8] sm:$0xff] }
 0x29e   :  { %v825_v36 = vld [vmem:[#allocation8 + $0x6d8] sm:$0xff] }
 0x29f   :  { %v829_v39 = vld [vmem:[#allocation8 + $0x6f8] sm:$0xff] }
 0x2a0   :  { %4725 = vmatpush1.bf16.msra.mxu0 %v9882_v28  ;;  %4768 = vmatpush1.bf16.msra.mxu1 %v10010_v29  ;;  %v9962_v28 = vcombine.low %v713_v12, %v717_v13  ;;  %v10090_v29 = vcombine.low %v841_v14, %v845_v18  ;;  %v689_v44 = vld [vmem:[#allocation8 + $0x298] sm:$0xff] }
 0x2a1   :  { %4726 = vmatprep.subr.bf16.mxu0 %v9875_v30  ;;  %4769 = vmatprep.subr.bf16.mxu1 %v10003_v38  ;;  %v9955_v30 = vcombine.high %v705_v23, %v709_v24  ;;  %v10083_v38 = vcombine.high %v833_v26, %v837_v43  ;;  %v693_v45 = vld [vmem:[#allocation8 + $0x2b8] sm:$0xff] }
 0x2a2   :  { %v817_v48 = vld [vmem:[#allocation8 + $0x698] sm:$0xff] }
 0x2a3   :  { %v821_v51 = vld [vmem:[#allocation8 + $0x6b8] sm:$0xff] }
 0x2a4   :  { %4727 = vmatpush1.bf16.msra.mxu0 %v9874_v40  ;;  %4770 = vmatpush1.bf16.msra.mxu1 %v10002_v41  ;;  %v9954_v40 = vcombine.low %v705_v23, %v709_v24  ;;  %v10082_v41 = vcombine.low %v833_v26, %v837_v43  ;;  %v681_v55 = vld [vmem:[#allocation8 + $0x258] sm:$0xff] }
 0x2a5   :  { %4728 = vmatprep.subr.bf16.mxu0 %v9867_v42  ;;  %4771 = vmatprep.subr.bf16.mxu1 %v9995_v50  ;;  %v9947_v42 = vcombine.high %v697_v32, %v701_v35  ;;  %v10075_v50 = vcombine.high %v825_v36, %v829_v39  ;;  %v685_v56 = vld [vmem:[#allocation8 + $0x278] sm:$0xff] }
 0x2a6   :  { %v809_v57 = vld [vmem:[#allocation8 + $0x658] sm:$0xff] }
 0x2a7   :  { %v813_v61 = vld [vmem:[#allocation8 + $0x678] sm:$0xff] }
 0x2a8   :  { %4729 = vmatpush1.bf16.msra.mxu0 %v9866_v60  ;;  %4772 = vmatpush1.bf16.msra.mxu1 %v9994_v52  ;;  %v9946_v60 = vcombine.low %v697_v32, %v701_v35  ;;  %v10074_v52 = vcombine.low %v825_v36, %v829_v39  ;;  %v673_v3 = vld [vmem:[#allocation8 + $0x218] sm:$0xff] }
 0x2a9   :  { %4730 = vmatprep.subr.bf16.mxu0 %v9859_v53  ;;  %4773 = vmatprep.subr.bf16.mxu1 %v9987_v59  ;;  %v9939_v53 = vcombine.high %v689_v44, %v693_v45  ;;  %v10067_v59 = vcombine.high %v817_v48, %v821_v51  ;;  %v677_v4 = vld [vmem:[#allocation8 + $0x238] sm:$0xff] }
 0x2aa   :  { %v801_v5 = vld [vmem:[#allocation8 + $0x618] sm:$0xff] }
 0x2ab   :  { %v805_v8 = vld [vmem:[#allocation8 + $0x638] sm:$0xff] }
 0x2ac   :  { %4731 = vmatpush1.bf16.msra.mxu0 %v9858_v62  ;;  %4774 = vmatpush1.bf16.msra.mxu1 %v9986_v0  ;;  %v9938_v62 = vcombine.low %v689_v44, %v693_v45  ;;  %v10066_v0 = vcombine.low %v817_v48, %v821_v51  ;;  %v921_v12 = vld [vmem:[#allocation8 + $0x9d8] sm:$0xff] }
 0x2ad   :  { %4732 = vmatprep.subr.bf16.mxu0 %v9979_v2  ;;  %4775 = vmatprep.subr.bf16.mxu1 %v10107_v6  ;;  %v9931_v2 = vcombine.high %v681_v55, %v685_v56  ;;  %v10059_v6 = vcombine.high %v809_v57, %v813_v61  ;;  %v925_v13 = vld [vmem:[#allocation8 + $0x9f8] sm:$0xff] }
 0x2ae   :  { %v1049_v14 = vld [vmem:[#allocation8 + $0xdd8] sm:$0xff] }
 0x2af   :  { %v1053_v18 = vld [vmem:[#allocation8 + $0xdf8] sm:$0xff] }
 0x2b0   :  { %4733 = vmatpush2.bf16.msra.mxu0 %v9978_v9  ;;  %4776 = vmatpush2.bf16.msra.mxu1 %v10106_v10  ;;  %v9930_v9 = vcombine.low %v681_v55, %v685_v56  ;;  %v10058_v10 = vcombine.low %v809_v57, %v813_v61  ;;  %v913_v23 = vld [vmem:[#allocation8 + $0x998] sm:$0xff] }
 0x2b1   :  { %4734 = vmatprep.subr.bf16.mxu0 %v9971_v11  ;;  %4777 = vmatprep.subr.bf16.mxu1 %v10099_v17  ;;  %v9923_v11 = vcombine.high %v673_v3, %v677_v4  ;;  %v10051_v17 = vcombine.high %v801_v5, %v805_v8  ;;  %v917_v24 = vld [vmem:[#allocation8 + $0x9b8] sm:$0xff] }
 0x2b2   :  { %v1041_v26 = vld [vmem:[#allocation8 + $0xd98] sm:$0xff]  ;;  %v10162_v44 = vcombine.low %v913_v23, %v917_v24 }
 0x2b3   :  { %v1045_v43 = vld [vmem:[#allocation8 + $0xdb8] sm:$0xff] }
 0x2b4   :  { %4735 = vmatpush2.bf16.msra.mxu0 %v9970_v31  ;;  %4778 = vmatpush2.bf16.msra.mxu1 %v10098_v19  ;;  %v9922_v31 = vcombine.low %v673_v3, %v677_v4  ;;  %v10050_v19 = vcombine.low %v801_v5, %v805_v8  ;;  %v10291_v32 = vcombine.high %v1041_v26, %v1045_v43  ;;  %v905_v35 = vld [vmem:[#allocation8 + $0x958] sm:$0xff] }
 0x2b5   :  { %4736 = vmatprep.subr.bf16.mxu0 %v9963_v20  ;;  %4779 = vmatprep.subr.bf16.mxu1 %v10091_v27  ;;  %v10171_v20 = vcombine.high %v921_v12, %v925_v13  ;;  %v10299_v27 = vcombine.high %v1049_v14, %v1053_v18  ;;  %v909_v36 = vld [vmem:[#allocation8 + $0x978] sm:$0xff]  ;;  %v10290_v48 = vcombine.low %v1041_v26, %v1045_v43 }
 0x2b6   :  { %v1033_v39 = vld [vmem:[#allocation8 + $0xd58] sm:$0xff] }
 0x2b7   :  { %v897_v55 = vld [vmem:[#allocation8 + $0x918] sm:$0xff] }
 0x2b8   :  { %4737 = vmatpush2.bf16.msra.mxu0 %v9962_v28  ;;  %4780 = vmatpush2.bf16.msra.mxu1 %v10090_v29  ;;  %v10170_v28 = vcombine.low %v921_v12, %v925_v13  ;;  %v10298_v29 = vcombine.low %v1049_v14, %v1053_v18  ;;  %v901_v56 = vld [vmem:[#allocation8 + $0x938] sm:$0xff] }
 0x2b9   :  { %4738 = vmatprep.subr.bf16.mxu0 %v9955_v30  ;;  %4781 = vmatprep.subr.bf16.mxu1 %v10083_v38  ;;  %v10163_v30 = vcombine.high %v913_v23, %v917_v24  ;;  %v1025_v57 = vld [vmem:[#allocation8 + $0xd18] sm:$0xff]  ;;  %v10147_v5 = vcombine.high %v897_v55, %v901_v56 }
 0x2ba   :  { %v893_v12 = vld [vmem:[#allocation8 + $0x8f8] sm:$0xff] }
 0x2bb   :  { %v1021_v14 = vld [vmem:[#allocation8 + $0xcf8] sm:$0xff] }
 0x2bc   :  { %4739 = vmatpush2.bf16.msra.mxu0 %v9954_v40  ;;  %4782 = vmatpush2.bf16.msra.mxu1 %v10082_v41  ;;  %v1037_v40 = vld [vmem:[#allocation8 + $0xd78] sm:$0xff] }
 0x2bd   :  { %4740 = vmatprep.subr.bf16.mxu0 %v9947_v42  ;;  %4783 = vmatprep.subr.bf16.mxu1 %v10075_v50  ;;  %v10155_v50 = vcombine.high %v905_v35, %v909_v36  ;;  %v10282_v4 = vcombine.low %v1033_v39, %v1037_v40  ;;  %v881_v24 = vld [vmem:[#allocation8 + $0x898] sm:$0xff] }
 0x2be   :  { %v885_v26 = vld [vmem:[#allocation8 + $0x8b8] sm:$0xff] }
 0x2bf   :  { %v1013_v43 = vld [vmem:[#allocation8 + $0xcb8] sm:$0xff] }
 0x2c0   :  { %4741 = vmatpush2.bf16.msra.mxu0 %v9946_v60  ;;  %4784 = vmatpush2.bf16.msra.mxu1 %v10074_v52 }
 0x2c1   :  { %4742 = vmatprep.subr.bf16.mxu0 %v9939_v53  ;;  %4785 = vmatprep.subr.bf16.mxu1 %v10067_v59  ;;  %v10283_v53 = vcombine.high %v1033_v39, %v1037_v40  ;;  %v1029_v59 = vld [vmem:[#allocation8 + $0xd38] sm:$0xff]  ;;  %v10130_v40 = vcombine.low %v881_v24, %v885_v26 }
 0x2c2   :  { %v1005_v39 = vld [vmem:[#allocation8 + $0xc78] sm:$0xff] }
 0x2c4   :  { %4743 = vmatpush2.bf16.msra.mxu0 %v9938_v62  ;;  %4786 = vmatpush2.bf16.msra.mxu1 %v10066_v0 }
 0x2c5   :  { %4744 = vmatprep.subr.bf16.mxu0 %v9931_v2  ;;  %4787 = vmatprep.subr.bf16.mxu1 %v10059_v6 }
 0x2c8   :  { %4745 = vmatpush2.bf16.msra.mxu0 %v9930_v9  ;;  %4788 = vmatpush2.bf16.msra.mxu1 %v10058_v10  ;;  %v10275_v10 = vcombine.high %v1025_v57, %v1029_v59 }
 0x2c9   :  { %4746 = vmatprep.subr.bf16.mxu0 %v9923_v11  ;;  %4789 = vmatprep.subr.bf16.mxu1 %v10051_v17  ;;  %v889_v11 = vld [vmem:[#allocation8 + $0x8d8] sm:$0xff] }
 0x2cc   :  { %4747 = vmatpush2.bf16.msra.mxu0 %v9922_v31  ;;  %4790 = vmatpush2.bf16.msra.mxu1 %v10050_v19  ;;  %v10146_v31 = vcombine.low %v897_v55, %v901_v56  ;;  %v10274_v19 = vcombine.low %v1025_v57, %v1029_v59  ;;  %v985_v56 = vld [vmem:[#allocation8 + $0xbd8] sm:$0xff] }
 0x2cd   :  { %4802 = vmatprep.subr.bf16.mxu0 %v10171_v20  ;;  %4845 = vmatprep.subr.bf16.mxu1 %v10299_v27  ;;  %v10139_v20 = vcombine.high %v889_v11, %v893_v12  ;;  %v1009_v27 = vld [vmem:[#allocation8 + $0xc98] sm:$0xff] }
 0x2ce   :  { %v1113_v57 = vld [vmem:[#allocation8 + $0xfd8] sm:$0xff] }
 0x2cf   :  { %v4492_v38 = vpop.f32.mrf.mxu0  ;;  %4749 = vmatmul.mubr.bf16.vlgmr.msra.gmra.mxu0 %v13077_v21  ;;  %v4535_v42 = vpop.f32.mrf.mxu1  ;;  %4792 = vmatmul.mubr.bf16.vlgmr.msra.gmra.mxu1 %v13079_v25  ;;  %v1117_v59 = vld [vmem:[#allocation8 + $0xff8] sm:$0xff] }
 0x2d0   :  { %v4493_v41 = vadd.f32 %v4492_v38, %v13131_v54  ;;  %4803 = vmatpush1.bf16.msra.mxu0 %v10170_v28  ;;  %4846 = vmatpush1.bf16.msra.mxu1 %v10298_v29  ;;  %v10138_v28 = vcombine.low %v889_v11, %v893_v12  ;;  %v1001_v38 = vld [vmem:[#allocation8 + $0xc58] sm:$0xff] }
 0x2d1   :  { %v4494_v45 = vpop.f32.mrf.mxu0  ;;  %4804 = vmatprep.subr.bf16.mxu0 %v10163_v30  ;;  %v4537_v52 = vpop.f32.mrf.mxu1  ;;  %4847 = vmatprep.subr.bf16.mxu1 %v10291_v32  ;;  %v10131_v30 = vcombine.high %v881_v24, %v885_v26  ;;  %v10259_v32 = vcombine.high %v1009_v27, %v1013_v43  ;;  %v961_v24 = vld [vmem:[#allocation8 + $0xb18] sm:$0xff] }
 0x2d2   :  { %v4536_v51 = vadd.f32 %v4535_v42, %v4493_v41  ;;  %v4495_v60 = vadd.f32 %v4494_v45, %v13134_v1  ;;  %4834 = vmatprep.mubr.bf16.mxu0 %v13081_v34  ;;  %4877 = vmatprep.mubr.bf16.mxu1 %v13084_v37  ;;  %v10154_v1 = vcombine.low %v905_v35, %v909_v36  ;;  %v873_v35 = vld [vmem:[#allocation8 + $0x858] sm:$0xff] }
 0x2d3   :  { %v4496_v54 = vpop.f32.mrf.mxu0  ;;  %v4539_v2 = vpop.f32.mrf.mxu1  ;;  %v877_v36 = vld [vmem:[#allocation8 + $0x878] sm:$0xff]  ;;  %v10258_v41 = vcombine.low %v1009_v27, %v1013_v43 }
 0x2d4   :  { %v13148_v61 = vsub.f32 %v4536_v51, %v13116_v16  ;;  %v4538_v62 = vadd.f32 %v4537_v52, %v4495_v60  ;;  %v4497_v0 = vadd.f32 %v4496_v54, %v13137_v7  ;;  %4805 = vmatpush1.bf16.msra.mxu0 %v10162_v44  ;;  %4848 = vmatpush1.bf16.msra.mxu1 %v10290_v48  ;;  %v1017_v7 = vld [vmem:[#allocation8 + $0xcd8] sm:$0xff] }
 0x2d5   :  { %v4498_v3 = vpop.f32.mrf.mxu0  ;;  %4806 = vmatprep.subr.bf16.mxu0 %v10155_v50  ;;  %4849 = vmatprep.subr.bf16.mxu1 %v10283_v53  ;;  %v4541_v13 = vpop.f32.mrf.mxu1  ;;  %v10266_v29 = vcombine.low %v1017_v7, %v1021_v14  ;;  %v10123_v42 = vcombine.high %v873_v35, %v877_v36  ;;  %v10251_v44 = vcombine.high %v1001_v38, %v1005_v39  ;;  %v865_v45 = vld [vmem:[#allocation8 + $0x818] sm:$0xff] }
 0x2d6   :  { %v13152_v6 = vsub.f32 %v4538_v62, %v13121_v22  ;;  %v4540_v8 = vadd.f32 %v4539_v2, %v4497_v0  ;;  %v4499_v9 = vadd.f32 %v4498_v3, %v13139_v15  ;;  %v10267_v15 = vcombine.high %v1017_v7, %v1021_v14  ;;  %v869_v48 = vld [vmem:[#allocation8 + $0x838] sm:$0xff] }
 0x2d7   :  { %v993_v50 = vld [vmem:[#allocation8 + $0xc18] sm:$0xff]  ;;  %v10122_v60 = vcombine.low %v873_v35, %v877_v36  ;;  %v10250_v52 = vcombine.low %v1001_v38, %v1005_v39  ;;  %v10115_v53 = vcombine.high %v865_v45, %v869_v48  ;;  %v10114_v62 = vcombine.low %v865_v45, %v869_v48 }
 0x2d8   :  { %v13156_v17 = vsub.f32 %v4540_v8, %v13124_v33  ;;  %v4542_v18 = vadd.f32 %v4541_v13, %v4499_v9  ;;  %4807 = vmatpush1.bf16.msra.mxu0 %v10154_v1  ;;  %4850 = vmatpush1.bf16.msra.mxu1 %v10282_v4  ;;  %v997_v51 = vld [vmem:[#allocation8 + $0xc38] sm:$0xff]  ;;  %v10363_v1 = vcombine.high %v1113_v57, %v1117_v59 }
 0x2d9   :  { %4808 = vmatprep.subr.bf16.mxu0 %v10147_v5  ;;  %4851 = vmatprep.subr.bf16.mxu1 %v10275_v10  ;;  %v10243_v55 = vcombine.high %v993_v50, %v997_v51  ;;  %v989_v54 = vld [vmem:[#allocation8 + $0xbf8] sm:$0xff]  ;;  %v10242_v0 = vcombine.low %v993_v50, %v997_v51  ;;  %v10362_v10 = vcombine.low %v1113_v57, %v1117_v59 }
 0x2da   :  { %v13159_v23 = vsub.f32 %v4542_v18, %v13127_v49  ;;  %v10235_v2 = vcombine.high %v985_v56, %v989_v54  ;;  %v977_v3 = vld [vmem:[#allocation8 + $0xb98] sm:$0xff]  ;;  %v10234_v9 = vcombine.low %v985_v56, %v989_v54 }
 0x2db   :  { %v981_v4 = vld [vmem:[#allocation8 + $0xbb8] sm:$0xff] }
 0x2dc   :  { %4809 = vmatpush1.bf16.msra.mxu0 %v10146_v31  ;;  %4852 = vmatpush1.bf16.msra.mxu1 %v10274_v19  ;;  %v1105_v5 = vld [vmem:[#allocation8 + $0xf98] sm:$0xff]  ;;  %v10227_v11 = vcombine.high %v977_v3, %v981_v4  ;;  %v10226_v31 = vcombine.low %v977_v3, %v981_v4 }
 0x2dd   :  { %4810 = vmatprep.subr.bf16.mxu0 %v10139_v20  ;;  %4853 = vmatprep.subr.bf16.mxu1 %v10267_v15  ;;  %v1109_v8 = vld [vmem:[#allocation8 + $0xfb8] sm:$0xff] }
 0x2de   :  { %v10355_v12 = vcombine.high %v1105_v5, %v1109_v8  ;;  %v969_v13 = vld [vmem:[#allocation8 + $0xb58] sm:$0xff]  ;;  %v10354_v19 = vcombine.low %v1105_v5, %v1109_v8 }
 0x2df   :  { %v973_v7 = vld [vmem:[#allocation8 + $0xb78] sm:$0xff] }
 0x2e0   :  { %4811 = vmatpush1.bf16.msra.mxu0 %v10138_v28  ;;  %4854 = vmatpush1.bf16.msra.mxu1 %v10266_v29  ;;  %v1097_v14 = vld [vmem:[#allocation8 + $0xf58] sm:$0xff]  ;;  %v10219_v20 = vcombine.high %v969_v13, %v973_v7  ;;  %v10218_v28 = vcombine.low %v969_v13, %v973_v7 }
 0x2e1   :  { %4812 = vmatprep.subr.bf16.mxu0 %v10131_v30  ;;  %4855 = vmatprep.subr.bf16.mxu1 %v10259_v32  ;;  %v1101_v18 = vld [vmem:[#allocation8 + $0xf78] sm:$0xff] }
 0x2e2   :  { %v10347_v15 = vcombine.high %v1097_v14, %v1101_v18  ;;  %v965_v26 = vld [vmem:[#allocation8 + $0xb38] sm:$0xff]  ;;  %v10346_v29 = vcombine.low %v1097_v14, %v1101_v18  ;;  %v11311_v14 = vld [vmem:[#allocation5 + $0xe4] ss:$16 sps:$4 sm:$0xff]  }
 0x2e3   :  { %v1089_v27 = vld [vmem:[#allocation8 + $0xf18] sm:$0xff]  ;;  %v10211_v30 = vcombine.high %v961_v24, %v965_v26  ;;  %v11314_v18 = vld [vmem:[#allocation5 + $0x2e4] ss:$16 sps:$4 sm:$0xff]  }
 0x2e4   :  { %4813 = vmatpush1.bf16.msra.mxu0 %v10130_v40  ;;  %4856 = vmatpush1.bf16.msra.mxu1 %v10258_v41  ;;  %v1093_v43 = vld [vmem:[#allocation8 + $0xf38] sm:$0xff]  ;;  %v10210_v40 = vcombine.low %v961_v24, %v965_v26 }
 0x2e5   :  { %4814 = vmatprep.subr.bf16.mxu0 %v10123_v42  ;;  %4857 = vmatprep.subr.bf16.mxu1 %v10251_v44  ;;  %v10339_v32 = vcombine.high %v1089_v27, %v1093_v43  ;;  %v953_v35 = vld [vmem:[#allocation8 + $0xad8] sm:$0xff]  ;;  %v10338_v41 = vcombine.low %v1089_v27, %v1093_v43  ;;  %v11315_v27 = vld [vmem:[#allocation5 + $0xc0] ss:$16 sps:$4 sm:$0xff]  }
 0x2e6   :  { %v957_v36 = vld [vmem:[#allocation8 + $0xaf8] sm:$0xff] }
 0x2e7   :  { %v1081_v38 = vld [vmem:[#allocation8 + $0xed8] sm:$0xff]  ;;  %v10203_v42 = vcombine.high %v953_v35, %v957_v36 }
 0x2e8   :  { %4815 = vmatpush1.bf16.msra.mxu0 %v10122_v60  ;;  %4858 = vmatpush1.bf16.msra.mxu1 %v10250_v52  ;;  %v1085_v39 = vld [vmem:[#allocation8 + $0xef8] sm:$0xff]  ;;  %v10202_v60 = vcombine.low %v953_v35, %v957_v36  ;;  %v11326_v35 = vld [vmem:[#allocation5 + $0x2a4] ss:$16 sps:$4 sm:$0xff]  }
 0x2e9   :  { %4816 = vmatprep.subr.bf16.mxu0 %v10115_v53  ;;  %4859 = vmatprep.subr.bf16.mxu1 %v10243_v55  ;;  %v10331_v44 = vcombine.high %v1081_v38, %v1085_v39  ;;  %v945_v45 = vld [vmem:[#allocation8 + $0xa98] sm:$0xff]  ;;  %v10330_v52 = vcombine.low %v1081_v38, %v1085_v39 }
 0x2ea   :  { %v949_v48 = vld [vmem:[#allocation8 + $0xab8] sm:$0xff] }
 0x2eb   :  { %v1073_v50 = vld [vmem:[#allocation8 + $0xe98] sm:$0xff]  ;;  %v10195_v53 = vcombine.high %v945_v45, %v949_v48 }
 0x2ec   :  { %4817 = vmatpush1.bf16.msra.mxu0 %v10114_v62  ;;  %4860 = vmatpush1.bf16.msra.mxu1 %v10242_v0  ;;  %v1077_v51 = vld [vmem:[#allocation8 + $0xeb8] sm:$0xff]  ;;  %v10194_v62 = vcombine.low %v945_v45, %v949_v48  ;;  %v11329_v45 = vld [vmem:[#allocation5 + $0x84] ss:$16 sps:$4 sm:$0xff]  }
 0x2ed   :  { %4818 = vmatprep.subr.bf16.mxu0 %v10235_v2  ;;  %4861 = vmatprep.subr.bf16.mxu1 %v10363_v1  ;;  %v10323_v55 = vcombine.high %v1073_v50, %v1077_v51  ;;  %v937_v56 = vld [vmem:[#allocation8 + $0xa58] sm:$0xff]  ;;  %v10322_v0 = vcombine.low %v1073_v50, %v1077_v51  ;;  %v11332_v50 = vld [vmem:[#allocation5 + $0x284] ss:$16 sps:$4 sm:$0xff]  }
 0x2ee   :  { %v941_v54 = vld [vmem:[#allocation8 + $0xa78] sm:$0xff] }
 0x2ef   :  { %v1065_v57 = vld [vmem:[#allocation8 + $0xe58] sm:$0xff]  ;;  %v10187_v2 = vcombine.high %v937_v56, %v941_v54 }
 0x2f0   :  { %4819 = vmatpush2.bf16.msra.mxu0 %v10234_v9  ;;  %4862 = vmatpush2.bf16.msra.mxu1 %v10362_v10  ;;  %v1069_v59 = vld [vmem:[#allocation8 + $0xe78] sm:$0xff]  ;;  %v10186_v9 = vcombine.low %v937_v56, %v941_v54  ;;  %v11333_v56 = vld [vmem:[#allocation5 + $0x60] ss:$16 sps:$4 sm:$0xff]  }
 0x2f1   :  { %4820 = vmatprep.subr.bf16.mxu0 %v10227_v11  ;;  %4863 = vmatprep.subr.bf16.mxu1 %v10355_v12  ;;  %v10315_v1 = vcombine.high %v1065_v57, %v1069_v59  ;;  %v929_v3 = vld [vmem:[#allocation8 + $0xa18] sm:$0xff]  ;;  %v10314_v10 = vcombine.low %v1065_v57, %v1069_v59  ;;  %v11336_v54 = vld [vmem:[#allocation5 + $0x260] ss:$16 sps:$4 sm:$0xff]   ;;  %v11341_v57 = vld [vmem:[#allocation5 + $0x44] ss:$16 sps:$4 sm:$0xff]  }
 0x2f2   :  { %v933_v4 = vld [vmem:[#allocation8 + $0xa38] sm:$0xff]  ;;  %v11344_v59 = vld [vmem:[#allocation5 + $0x244] ss:$16 sps:$4 sm:$0xff]  }
 0x2f3   :  { %v1057_v5 = vld [vmem:[#allocation8 + $0xe18] sm:$0xff]  ;;  %v10179_v11 = vcombine.high %v929_v3, %v933_v4  ;;  %v10178_v13 = vcombine.low %v929_v3, %v933_v4  ;;  %v11345_v3 = vld [vmem:[#allocation5 + $0x20] ss:$16 sps:$4 sm:$0xff]  }
 0x2f4   :  { %4821 = vmatpush2.bf16.msra.mxu0 %v10226_v31  ;;  %4864 = vmatpush2.bf16.msra.mxu1 %v10354_v19  ;;  %v1061_v8 = vld [vmem:[#allocation8 + $0xe38] sm:$0xff]  ;;  %v11309_v31 = vld [vmem:[#allocation5 + $0xe0] ss:$16 sps:$4 sm:$0xff]  }
 0x2f5   :  { %4822 = vmatprep.subr.bf16.mxu0 %v10219_v20  ;;  %4865 = vmatprep.subr.bf16.mxu1 %v10347_v15  ;;  %v10307_v12 = vcombine.high %v1057_v5, %v1061_v8  ;;  %v10306_v7 = vcombine.low %v1057_v5, %v1061_v8  ;;  %v11312_v19 = vld [vmem:[#allocation5 + $0x2e0] ss:$16 sps:$4 sm:$0xff]   ;;  %v11317_v20 = vld [vmem:[#allocation5 + $0xc4] ss:$16 sps:$4 sm:$0xff]  }
 0x2f6   :  { %v11320_v15 = vld [vmem:[#allocation5 + $0x2c4] ss:$16 sps:$4 sm:$0xff]   ;;  %v11348_v4 = vld [vmem:[#allocation5 + $0x220] ss:$16 sps:$4 sm:$0xff]  }
 0x2f7   :  { %v11353_v5 = vld [vmem:[#allocation5 + $0x4] ss:$16 sps:$4 sm:$0xff]  }
 0x2f8   :  { %4823 = vmatpush2.bf16.msra.mxu0 %v10218_v28  ;;  %4866 = vmatpush2.bf16.msra.mxu1 %v10346_v29  ;;  %v11318_v29 = vld [vmem:[#allocation5 + $0x2c0] ss:$16 sps:$4 sm:$0xff]   ;;  %v11356_v8 = vld [vmem:[#allocation5 + $0x204] ss:$16 sps:$4 sm:$0xff]  }
 0x2f9   :  { %4824 = vmatprep.subr.bf16.mxu0 %v10211_v30  ;;  %4867 = vmatprep.subr.bf16.mxu1 %v10339_v32  ;;  %v11323_v30 = vld [vmem:[#allocation5 + $0xa4] ss:$16 sps:$4 sm:$0xff]  }
 0x2fc   :  { %4825 = vmatpush2.bf16.msra.mxu0 %v10210_v40  ;;  %4868 = vmatpush2.bf16.msra.mxu1 %v10338_v41  ;;  %v11321_v40 = vld [vmem:[#allocation5 + $0xa0] ss:$16 sps:$4 sm:$0xff]  }
 0x2fd   :  { %4826 = vmatprep.subr.bf16.mxu0 %v10203_v42  ;;  %4869 = vmatprep.subr.bf16.mxu1 %v10331_v44  ;;  %v11324_v44 = vld [vmem:[#allocation5 + $0x2a0] ss:$16 sps:$4 sm:$0xff]  }
 0x300   :  { %4827 = vmatpush2.bf16.msra.mxu0 %v10202_v60  ;;  %4870 = vmatpush2.bf16.msra.mxu1 %v10330_v52  ;;  %v11327_v60 = vld [vmem:[#allocation5 + $0x80] ss:$16 sps:$4 sm:$0xff]  }
 0x301   :  { %4828 = vmatprep.subr.bf16.mxu0 %v10195_v53  ;;  %4871 = vmatprep.subr.bf16.mxu1 %v10323_v55  ;;  %v11330_v52 = vld [vmem:[#allocation5 + $0x280] ss:$16 sps:$4 sm:$0xff]   ;;  %v11335_v53 = vld [vmem:[#allocation5 + $0x64] ss:$16 sps:$4 sm:$0xff]  }
 0x302   :  { %v11338_v55 = vld [vmem:[#allocation5 + $0x264] ss:$16 sps:$4 sm:$0xff]  }
 0x304   :  { %4829 = vmatpush2.bf16.msra.mxu0 %v10194_v62  ;;  %4872 = vmatpush2.bf16.msra.mxu1 %v10322_v0  ;;  %v11339_v62 = vld [vmem:[#allocation5 + $0x40] ss:$16 sps:$4 sm:$0xff]  }
 0x305   :  { %4830 = vmatprep.subr.bf16.mxu0 %v10187_v2  ;;  %4873 = vmatprep.subr.bf16.mxu1 %v10315_v1  ;;  %v11342_v0 = vld [vmem:[#allocation5 + $0x240] ss:$16 sps:$4 sm:$0xff]   ;;  %v11347_v2 = vld [vmem:[#allocation5 + $0x24] ss:$16 sps:$4 sm:$0xff]  }
 0x306   :  { %v11350_v1 = vld [vmem:[#allocation5 + $0x224] ss:$16 sps:$4 sm:$0xff]  }
 0x308   :  { %4831 = vmatpush2.bf16.msra.mxu0 %v10186_v9  ;;  %4874 = vmatpush2.bf16.msra.mxu1 %v10314_v10  ;;  %v11351_v9 = vld [vmem:[#allocation5] ss:$16 sps:$4 sm:$0xff]  }
 0x309   :  { %4832 = vmatprep.subr.bf16.mxu0 %v10179_v11  ;;  %4875 = vmatprep.subr.bf16.mxu1 %v10307_v12  ;;  %v11354_v10 = vld [vmem:[#allocation5 + $0x200] ss:$16 sps:$4 sm:$0xff]   ;;  %v11359_v11 = vld [vmem:[#allocation5 + $0x1e4] ss:$16 sps:$4 sm:$0xff]  }
 0x30a   :  { %v11362_v12 = vld [vmem:[#allocation5 + $0x3e4] ss:$16 sps:$4 sm:$0xff]  }
 0x30c   :  { %4833 = vmatpush2.bf16.msra.mxu0 %v10178_v13  ;;  %4876 = vmatpush2.bf16.msra.mxu1 %v10306_v7  ;;  %v11357_v13 = vld [vmem:[#allocation5 + $0x1e0] ss:$16 sps:$4 sm:$0xff]  }
 0x30d   :  { %5528 = vmatprep.subr.bf16.mxu0 %v11311_v14  ;;  %5571 = vmatprep.subr.bf16.mxu1 %v11314_v18  ;;  %v11360_v7 = vld [vmem:[#allocation5 + $0x3e0] ss:$16 sps:$4 sm:$0xff]   ;;  %v11365_v14 = vld [vmem:[#allocation5 + $0x1c4] ss:$16 sps:$4 sm:$0xff]  }
 0x30e   :  { %v11368_v18 = vld [vmem:[#allocation5 + $0x3c4] ss:$16 sps:$4 sm:$0xff]  }
 0x30f   :  { %v4578_v24 = vpop.f32.mrf.mxu0  ;;  %4835 = vmatmul.mubr.bf16.vlgmr.msra.gmra.mxu0 %v13089_v46  ;;  %v4621_v26 = vpop.f32.mrf.mxu1  ;;  %4878 = vmatmul.mubr.bf16.vlgmr.msra.gmra.mxu1 %v13091_v47 }
 0x310   :  { %5529 = vmatpush1.bf16.msra.mxu0 %v11309_v31  ;;  %v13163_v43 = vadd.f32 %v4621_v26, %v4578_v24  ;;  %5572 = vmatpush1.bf16.msra.mxu1 %v11312_v19  ;;  %v11363_v31 = vld [vmem:[#allocation5 + $0x1c0] ss:$16 sps:$4 sm:$0xff]  }
 0x311   :  { %v4580_v28 = vpop.f32.mrf.mxu0  ;;  %5530 = vmatprep.subr.bf16.mxu0 %v11317_v20  ;;  %v4623_v32 = vpop.f32.mrf.mxu1  ;;  %5573 = vmatprep.subr.bf16.mxu1 %v11320_v15  ;;  %v11366_v19 = vld [vmem:[#allocation5 + $0x3c0] ss:$16 sps:$4 sm:$0xff]   ;;  %v11371_v20 = vld [vmem:[#allocation5 + $0x1a4] ss:$16 sps:$4 sm:$0xff]  }
 0x312   :  { %5560 = vmatprep.mubr.bf16.mxu0 %v13071_v58  ;;  %v13166_v36 = vadd.f32 %v4623_v32, %v4580_v28  ;;  %5603 = vmatprep.mubr.bf16.mxu1 %v13073_v63  ;;  %v11374_v15 = vld [vmem:[#allocation5 + $0x3a4] ss:$16 sps:$4 sm:$0xff]   ;;  %v11369_v24 = vld [vmem:[#allocation5 + $0x1a0] ss:$16 sps:$4 sm:$0xff]  }
 0x313   :  { %v4582_v38 = vpop.f32.mrf.mxu0  ;;  %v4625_v39 = vpop.f32.mrf.mxu1  ;;  %v11372_v26 = vld [vmem:[#allocation5 + $0x3a0] ss:$16 sps:$4 sm:$0xff]   ;;  %v11380_v28 = vld [vmem:[#allocation5 + $0x384] ss:$16 sps:$4 sm:$0xff]  }
 0x314   :  { %5531 = vmatpush1.bf16.msra.mxu0 %v11315_v27  ;;  %v13169_v41 = vadd.f32 %v4625_v39, %v4582_v38  ;;  %5574 = vmatpush1.bf16.msra.mxu1 %v11318_v29  ;;  %v11377_v27 = vld [vmem:[#allocation5 + $0x184] ss:$16 sps:$4 sm:$0xff]   ;;  %v11375_v29 = vld [vmem:[#allocation5 + $0x180] ss:$16 sps:$4 sm:$0xff]  }
 0x315   :  { %v4584_v42 = vpop.f32.mrf.mxu0  ;;  %5532 = vmatprep.subr.bf16.mxu0 %v11323_v30  ;;  %v4627_v48 = vpop.f32.mrf.mxu1  ;;  %5575 = vmatprep.subr.bf16.mxu1 %v11326_v35  ;;  %v11378_v30 = vld [vmem:[#allocation5 + $0x380] ss:$16 sps:$4 sm:$0xff]   ;;  %v11383_v32 = vld [vmem:[#allocation5 + $0x164] ss:$16 sps:$4 sm:$0xff]  }
 0x316   :  { %v13171_v51 = vadd.f32 %v4627_v48, %v4584_v42  ;;  %v11386_v35 = vld [vmem:[#allocation5 + $0x364] ss:$16 sps:$4 sm:$0xff]   ;;  %v11381_v38 = vld [vmem:[#allocation5 + $0x160] ss:$16 sps:$4 sm:$0xff]  }
 0x317   :  { %v11384_v39 = vld [vmem:[#allocation5 + $0x360] ss:$16 sps:$4 sm:$0xff]   ;;  %v11392_v42 = vld [vmem:[#allocation5 + $0x344] ss:$16 sps:$4 sm:$0xff]  }
 0x318   :  { %5533 = vmatpush1.bf16.msra.mxu0 %v11321_v40  ;;  %5576 = vmatpush1.bf16.msra.mxu1 %v11324_v44  ;;  %v11389_v40 = vld [vmem:[#allocation5 + $0x144] ss:$16 sps:$4 sm:$0xff]   ;;  %v11387_v44 = vld [vmem:[#allocation5 + $0x140] ss:$16 sps:$4 sm:$0xff]  }
 0x319   :  { %5534 = vmatprep.subr.bf16.mxu0 %v11329_v45  ;;  %5577 = vmatprep.subr.bf16.mxu1 %v11332_v50  ;;  %v11390_v45 = vld [vmem:[#allocation5 + $0x340] ss:$16 sps:$4 sm:$0xff]   ;;  %v11395_v48 = vld [vmem:[#allocation5 + $0x124] ss:$16 sps:$4 sm:$0xff]  }
 0x31a   :  { %v11398_v50 = vld [vmem:[#allocation5 + $0x324] ss:$16 sps:$4 sm:$0xff]  }
 0x31c   :  { %5535 = vmatpush1.bf16.msra.mxu0 %v11327_v60  ;;  %5578 = vmatpush1.bf16.msra.mxu1 %v11330_v52  ;;  %v11393_v60 = vld [vmem:[#allocation5 + $0x120] ss:$16 sps:$4 sm:$0xff]  }
 0x31d   :  { %5536 = vmatprep.subr.bf16.mxu0 %v11335_v53  ;;  %5579 = vmatprep.subr.bf16.mxu1 %v11338_v55  ;;  %v11396_v52 = vld [vmem:[#allocation5 + $0x320] ss:$16 sps:$4 sm:$0xff]   ;;  %v11401_v53 = vld [vmem:[#allocation5 + $0x104] ss:$16 sps:$4 sm:$0xff]  }
 0x31e   :  { %v11404_v55 = vld [vmem:[#allocation5 + $0x304] ss:$16 sps:$4 sm:$0xff]  }
 0x320   :  { %5537 = vmatpush1.bf16.msra.mxu0 %v11333_v56  ;;  %5580 = vmatpush1.bf16.msra.mxu1 %v11336_v54  ;;  %v11399_v56 = vld [vmem:[#allocation5 + $0x100] ss:$16 sps:$4 sm:$0xff]  }
 0x321   :  { %5538 = vmatprep.subr.bf16.mxu0 %v11341_v57  ;;  %5581 = vmatprep.subr.bf16.mxu1 %v11344_v59  ;;  %v11402_v54 = vld [vmem:[#allocation5 + $0x300] ss:$16 sps:$4 sm:$0xff]   ;;  %v11407_v57 = vld [vmem:[#allocation5 + $0xec] ss:$16 sps:$4 sm:$0xff]  }
 0x322   :  { %v11410_v59 = vld [vmem:[#allocation5 + $0x2ec] ss:$16 sps:$4 sm:$0xff]  }
 0x324   :  { %5539 = vmatpush1.bf16.msra.mxu0 %v11339_v62  ;;  %5582 = vmatpush1.bf16.msra.mxu1 %v11342_v0  ;;  %v11405_v62 = vld [vmem:[#allocation5 + $0xe8] ss:$16 sps:$4 sm:$0xff]  }
 0x325   :  { %5540 = vmatprep.subr.bf16.mxu0 %v11347_v2  ;;  %5583 = vmatprep.subr.bf16.mxu1 %v11350_v1  ;;  %v11408_v0 = vld [vmem:[#allocation5 + $0x2e8] ss:$16 sps:$4 sm:$0xff]   ;;  %v11413_v2 = vld [vmem:[#allocation5 + $0xcc] ss:$16 sps:$4 sm:$0xff]  }
 0x326   :  { %v11416_v1 = vld [vmem:[#allocation5 + $0x2cc] ss:$16 sps:$4 sm:$0xff]  }
 0x328   :  { %5541 = vmatpush1.bf16.msra.mxu0 %v11345_v3  ;;  %5584 = vmatpush1.bf16.msra.mxu1 %v11348_v4 }
 0x329   :  { %5542 = vmatprep.subr.bf16.mxu0 %v11353_v5  ;;  %5585 = vmatprep.subr.bf16.mxu1 %v11356_v8  ;;  %v11411_v8 = vld [vmem:[#allocation5 + $0xc8] ss:$16 sps:$4 sm:$0xff]  }
 0x32c   :  { %5543 = vmatpush1.bf16.msra.mxu0 %v11351_v9  ;;  %5586 = vmatpush1.bf16.msra.mxu1 %v11354_v10  ;;  %v11414_v10 = vld [vmem:[#allocation5 + $0x2c8] ss:$16 sps:$4 sm:$0xff]  }
 0x32d   :  { %5544 = vmatprep.subr.bf16.mxu0 %v11359_v11  ;;  %5587 = vmatprep.subr.bf16.mxu1 %v11362_v12  ;;  %v11419_v11 = vld [vmem:[#allocation5 + $0xac] ss:$16 sps:$4 sm:$0xff]  }
 0x330   :  { %5545 = vmatpush2.bf16.msra.mxu0 %v11357_v13  ;;  %5588 = vmatpush2.bf16.msra.mxu1 %v11360_v7 }
 0x331   :  { %5546 = vmatprep.subr.bf16.mxu0 %v11365_v14  ;;  %5589 = vmatprep.subr.bf16.mxu1 %v11368_v18  ;;  %v11422_v14 = vld [vmem:[#allocation5 + $0x2ac] ss:$16 sps:$4 sm:$0xff]  }
 0x334   :  { %5547 = vmatpush2.bf16.msra.mxu0 %v11363_v31  ;;  %5590 = vmatpush2.bf16.msra.mxu1 %v11366_v19 }
 0x335   :  { %5548 = vmatprep.subr.bf16.mxu0 %v11371_v20  ;;  %5591 = vmatprep.subr.bf16.mxu1 %v11374_v15  ;;  %v11417_v20 = vld [vmem:[#allocation5 + $0xa8] ss:$16 sps:$4 sm:$0xff]  }
 0x338   :  { %5549 = vmatpush2.bf16.msra.mxu0 %v11369_v24  ;;  %5592 = vmatpush2.bf16.msra.mxu1 %v11372_v26  ;;  %v11420_v24 = vld [vmem:[#allocation5 + $0x2a8] ss:$16 sps:$4 sm:$0xff]  }
 0x339   :  { %5550 = vmatprep.subr.bf16.mxu0 %v11377_v27  ;;  %5593 = vmatprep.subr.bf16.mxu1 %v11380_v28 }
 0x33c   :  { %5551 = vmatpush2.bf16.msra.mxu0 %v11375_v29  ;;  %5594 = vmatpush2.bf16.msra.mxu1 %v11378_v30  ;;  %v11423_v29 = vld [vmem:[#allocation5 + $0x88] ss:$16 sps:$4 sm:$0xff]   ;;  %v11431_v30 = vld [vmem:[#allocation5 + $0x6c] ss:$16 sps:$4 sm:$0xff]  }
 0x33d   :  { %5552 = vmatprep.subr.bf16.mxu0 %v11383_v32  ;;  %5595 = vmatprep.subr.bf16.mxu1 %v11386_v35  ;;  %v11434_v32 = vld [vmem:[#allocation5 + $0x26c] ss:$16 sps:$4 sm:$0xff]   ;;  %v11429_v35 = vld [vmem:[#allocation5 + $0x68] ss:$16 sps:$4 sm:$0xff]  }
 0x340   :  { %5553 = vmatpush2.bf16.msra.mxu0 %v11381_v38  ;;  %5596 = vmatpush2.bf16.msra.mxu1 %v11384_v39  ;;  %v11432_v38 = vld [vmem:[#allocation5 + $0x268] ss:$16 sps:$4 sm:$0xff]   ;;  %v11437_v39 = vld [vmem:[#allocation5 + $0x4c] ss:$16 sps:$4 sm:$0xff]  }
 0x341   :  { %5554 = vmatprep.subr.bf16.mxu0 %v11389_v40  ;;  %5597 = vmatprep.subr.bf16.mxu1 %v11392_v42  ;;  %v11435_v40 = vld [vmem:[#allocation5 + $0x48] ss:$16 sps:$4 sm:$0xff]  }
 0x342   :  { %v11438_v42 = vld [vmem:[#allocation5 + $0x248] ss:$16 sps:$4 sm:$0xff]  }
 0x344   :  { %5555 = vmatpush2.bf16.msra.mxu0 %v11387_v44  ;;  %5598 = vmatpush2.bf16.msra.mxu1 %v11390_v45  ;;  %v11443_v44 = vld [vmem:[#allocation5 + $0x2c] ss:$16 sps:$4 sm:$0xff]  }
 0x345   :  { %5556 = vmatprep.subr.bf16.mxu0 %v11395_v48  ;;  %5599 = vmatprep.subr.bf16.mxu1 %v11398_v50  ;;  %v11446_v45 = vld [vmem:[#allocation5 + $0x22c] ss:$16 sps:$4 sm:$0xff]   ;;  %v11441_v48 = vld [vmem:[#allocation5 + $0x28] ss:$16 sps:$4 sm:$0xff]  }
 0x346   :  { %v11444_v50 = vld [vmem:[#allocation5 + $0x228] ss:$16 sps:$4 sm:$0xff]  }
 0x348   :  { %5557 = vmatpush2.bf16.msra.mxu0 %v11393_v60  ;;  %5600 = vmatpush2.bf16.msra.mxu1 %v11396_v52  ;;  %v11449_v60 = vld [vmem:[#allocation5 + $0xc] ss:$16 sps:$4 sm:$0xff]  }
 0x349   :  { %5558 = vmatprep.subr.bf16.mxu0 %v11401_v53  ;;  %5601 = vmatprep.subr.bf16.mxu1 %v11404_v55  ;;  %v11452_v52 = vld [vmem:[#allocation5 + $0x20c] ss:$16 sps:$4 sm:$0xff]   ;;  %v11447_v53 = vld [vmem:[#allocation5 + $0x8] ss:$16 sps:$4 sm:$0xff]  }
 0x34a   :  { %v11450_v55 = vld [vmem:[#allocation5 + $0x208] ss:$16 sps:$4 sm:$0xff]  }
 0x34c   :  { %5559 = vmatpush2.bf16.msra.mxu0 %v11399_v56  ;;  %5602 = vmatpush2.bf16.msra.mxu1 %v11402_v54  ;;  %v11455_v56 = vld [vmem:[#allocation5 + $0x1ec] ss:$16 sps:$4 sm:$0xff]  }
 0x34d   :  { %5614 = vmatprep.subr.bf16.mxu0 %v11407_v57  ;;  %5657 = vmatprep.subr.bf16.mxu1 %v11410_v59  ;;  %v11458_v54 = vld [vmem:[#allocation5 + $0x3ec] ss:$16 sps:$4 sm:$0xff]   ;;  %v11453_v57 = vld [vmem:[#allocation5 + $0x1e8] ss:$16 sps:$4 sm:$0xff]  }
 0x34e   :  { %v11456_v59 = vld [vmem:[#allocation5 + $0x3e8] ss:$16 sps:$4 sm:$0xff]  }
 0x34f   :  { %v4664_v3 = vpop.f32.mrf.mxu0  ;;  %5561 = vmatmul.mubr.bf16.vlgmr.msra.gmra.mxu0 %v13077_v21  ;;  %v4707_v5 = vpop.f32.mrf.mxu1  ;;  %5604 = vmatmul.mubr.bf16.vlgmr.msra.gmra.mxu1 %v13079_v25 }
 0x350   :  { %v4665_v4 = vadd.f32 %v4664_v3, %v13163_v43  ;;  %5615 = vmatpush1.bf16.msra.mxu0 %v11405_v62  ;;  %5658 = vmatpush1.bf16.msra.mxu1 %v11408_v0  ;;  %v11461_v62 = vld [vmem:[#allocation5 + $0x1cc] ss:$16 sps:$4 sm:$0xff]  }
 0x351   :  { %v4666_v9 = vpop.f32.mrf.mxu0  ;;  %5616 = vmatprep.subr.bf16.mxu0 %v11413_v2  ;;  %v4709_v7 = vpop.f32.mrf.mxu1  ;;  %5659 = vmatprep.subr.bf16.mxu1 %v11416_v1  ;;  %v11464_v0 = vld [vmem:[#allocation5 + $0x3cc] ss:$16 sps:$4 sm:$0xff]   ;;  %v11459_v2 = vld [vmem:[#allocation5 + $0x1c8] ss:$16 sps:$4 sm:$0xff]  }
 0x352   :  { %v13176_v12 = vadd.f32 %v4707_v5, %v4665_v4  ;;  %v4667_v13 = vadd.f32 %v4666_v9, %v13166_v36  ;;  %5646 = vmatprep.mubr.bf16.mxu0 %v13071_v58  ;;  %5689 = vmatprep.mubr.bf16.mxu1 %v13073_v63  ;;  %v11425_v36 = vld [vmem:[#allocation5 + $0x8c] ss:$16 sps:$4 sm:$0xff]   ;;  %v11462_v1 = vld [vmem:[#allocation5 + $0x3c8] ss:$16 sps:$4 sm:$0xff]  }
 0x353   :  { %v4668_v43 = vpop.f32.mrf.mxu0  ;;  %v4711_v19 = vpop.f32.mrf.mxu1  ;;  %v11428_v58 = vld [vmem:[#allocation5 + $0x28c] ss:$16 sps:$4 sm:$0xff]   ;;  %v11465_v5 = vld [vmem:[#allocation5 + $0x1a8] ss:$16 sps:$4 sm:$0xff]  }
 0x354   :  { %v13181_v18 = vadd.f32 %v4709_v7, %v4667_v13  ;;  %v4669_v31 = vadd.f32 %v4668_v43, %v13169_v41  ;;  %5617 = vmatpush1.bf16.msra.mxu0 %v11411_v8  ;;  %5660 = vmatpush1.bf16.msra.mxu1 %v11414_v10  ;;  %v11426_v41 = vld [vmem:[#allocation5 + $0x288] ss:$16 sps:$4 sm:$0xff]   ;;  %v11467_v3 = vld [vmem:[#allocation5 + $0x1ac] ss:$16 sps:$4 sm:$0xff]  }
 0x355   :  { %v4670_v15 = vpop.f32.mrf.mxu0  ;;  %5618 = vmatprep.subr.bf16.mxu0 %v11419_v11  ;;  %5661 = vmatprep.subr.bf16.mxu1 %v11422_v14  ;;  %v4713_v28 = vpop.f32.mrf.mxu1  ;;  %v11470_v4 = vld [vmem:[#allocation5 + $0x3ac] ss:$16 sps:$4 sm:$0xff]   ;;  %v11468_v8 = vld [vmem:[#allocation5 + $0x3a8] ss:$16 sps:$4 sm:$0xff]  }
 0x356   :  { %v13184_v26 = vadd.f32 %v4711_v19, %v4669_v31  ;;  %v4671_v27 = vadd.f32 %v4670_v15, %v13171_v51  ;;  %v11440_v51 = vld [vmem:[#allocation5 + $0x24c] ss:$16 sps:$4 sm:$0xff]   ;;  %v11471_v11 = vld [vmem:[#allocation5 + $0x188] ss:$16 sps:$4 sm:$0xff]  }
 0x357   :  { %v11473_v9 = vld [vmem:[#allocation5 + $0x18c] ss:$16 sps:$4 sm:$0xff]   ;;  %v11474_v13 = vld [vmem:[#allocation5 + $0x388] ss:$16 sps:$4 sm:$0xff]  }
 0x358   :  { %v13187_v63 = vadd.f32 %v4713_v28, %v4671_v27  ;;  %5619 = vmatpush1.bf16.msra.mxu0 %v11417_v20  ;;  %5662 = vmatpush1.bf16.msra.mxu1 %v11420_v24  ;;  %v11476_v10 = vld [vmem:[#allocation5 + $0x38c] ss:$16 sps:$4 sm:$0xff]   ;;  %v11477_v43 = vld [vmem:[#allocation5 + $0x168] ss:$16 sps:$4 sm:$0xff]  }
 0x359   :  { %5620 = vmatprep.subr.bf16.mxu0 %v11425_v36  ;;  %5663 = vmatprep.subr.bf16.mxu1 %v11428_v58  ;;  %v11479_v7 = vld [vmem:[#allocation5 + $0x16c] ss:$16 sps:$4 sm:$0xff]   ;;  %v11480_v31 = vld [vmem:[#allocation5 + $0x368] ss:$16 sps:$4 sm:$0xff]  }
 0x35a   :  { %v11482_v14 = vld [vmem:[#allocation5 + $0x36c] ss:$16 sps:$4 sm:$0xff]   ;;  %v11483_v15 = vld [vmem:[#allocation5 + $0x148] ss:$16 sps:$4 sm:$0xff]  }
 0x35b   :  { %v11485_v19 = vld [vmem:[#allocation5 + $0x14c] ss:$16 sps:$4 sm:$0xff]   ;;  %v11486_v24 = vld [vmem:[#allocation5 + $0x348] ss:$16 sps:$4 sm:$0xff]  }
 0x35c   :  { %5621 = vmatpush1.bf16.msra.mxu0 %v11423_v29  ;;  %5664 = vmatpush1.bf16.msra.mxu1 %v11426_v41  ;;  %v11488_v20 = vld [vmem:[#allocation5 + $0x34c] ss:$16 sps:$4 sm:$0xff]   ;;  %v11489_v58 = vld [vmem:[#allocation5 + $0x128] ss:$16 sps:$4 sm:$0xff]  }
 0x35d   :  { %5622 = vmatprep.subr.bf16.mxu0 %v11431_v30  ;;  %5665 = vmatprep.subr.bf16.mxu1 %v11434_v32  ;;  %v11491_v36 = vld [vmem:[#allocation5 + $0x12c] ss:$16 sps:$4 sm:$0xff]   ;;  %v11492_v28 = vld [vmem:[#allocation5 + $0x328] ss:$16 sps:$4 sm:$0xff]  }
 0x35e   :  { %v11494_v27 = vld [vmem:[#allocation5 + $0x32c] ss:$16 sps:$4 sm:$0xff]   ;;  %v11495_v30 = vld [vmem:[#allocation5 + $0x108] ss:$16 sps:$4 sm:$0xff]  }
 0x35f   :  { %v11497_v29 = vld [vmem:[#allocation5 + $0x10c] ss:$16 sps:$4 sm:$0xff]   ;;  %v11498_v32 = vld [vmem:[#allocation5 + $0x308] ss:$16 sps:$4 sm:$0xff]  }
 0x360   :  { %5623 = vmatpush1.bf16.msra.mxu0 %v11429_v35  ;;  %5666 = vmatpush1.bf16.msra.mxu1 %v11432_v38  ;;  %v11500_v41 = vld [vmem:[#allocation5 + $0x30c] ss:$16 sps:$4 sm:$0xff]   ;;  %v11503_v35 = vld [vmem:[#allocation7 + $0xe4] ss:$16 sps:$4 sm:$0xff]  }
 0x361   :  { %5624 = vmatprep.subr.bf16.mxu0 %v11437_v39  ;;  %5667 = vmatprep.subr.bf16.mxu1 %v11440_v51  ;;  %v11506_v38 = vld [vmem:[#allocation7 + $0x2e4] ss:$16 sps:$4 sm:$0xff]   ;;  %v11501_v39 = vld [vmem:[#allocation7 + $0xe0] ss:$16 sps:$4 sm:$0xff]  }
 0x362   :  { %v11504_v51 = vld [vmem:[#allocation7 + $0x2e0] ss:$16 sps:$4 sm:$0xff]  }
 0x364   :  { %5625 = vmatpush1.bf16.msra.mxu0 %v11435_v40  ;;  %5668 = vmatpush1.bf16.msra.mxu1 %v11438_v42  ;;  %v11509_v40 = vld [vmem:[#allocation7 + $0xc4] ss:$16 sps:$4 sm:$0xff]  }
 0x365   :  { %5626 = vmatprep.subr.bf16.mxu0 %v11443_v44  ;;  %5669 = vmatprep.subr.bf16.mxu1 %v11446_v45  ;;  %v11512_v42 = vld [vmem:[#allocation7 + $0x2c4] ss:$16 sps:$4 sm:$0xff]  }
 0x368   :  { %5627 = vmatpush1.bf16.msra.mxu0 %v11441_v48  ;;  %5670 = vmatpush1.bf16.msra.mxu1 %v11444_v50  ;;  %v11507_v48 = vld [vmem:[#allocation7 + $0xc0] ss:$16 sps:$4 sm:$0xff]  }
 0x369   :  { %5628 = vmatprep.subr.bf16.mxu0 %v11449_v60  ;;  %5671 = vmatprep.subr.bf16.mxu1 %v11452_v52  ;;  %v11510_v52 = vld [vmem:[#allocation7 + $0x2c0] ss:$16 sps:$4 sm:$0xff]  }
 0x36c   :  { %5629 = vmatpush1.bf16.msra.mxu0 %v11447_v53  ;;  %5672 = vmatpush1.bf16.msra.mxu1 %v11450_v55  ;;  %v11515_v53 = vld [vmem:[#allocation7 + $0xa4] ss:$16 sps:$4 sm:$0xff]  }
 0x36d   :  { %5630 = vmatprep.subr.bf16.mxu0 %v11455_v56  ;;  %5673 = vmatprep.subr.bf16.mxu1 %v11458_v54  ;;  %v11518_v56 = vld [vmem:[#allocation7 + $0x2a4] ss:$16 sps:$4 sm:$0xff]  }
 0x370   :  { %5631 = vmatpush2.bf16.msra.mxu0 %v11453_v57  ;;  %5674 = vmatpush2.bf16.msra.mxu1 %v11456_v59  ;;  %v11513_v57 = vld [vmem:[#allocation7 + $0xa0] ss:$16 sps:$4 sm:$0xff]  }
 0x371   :  { %5632 = vmatprep.subr.bf16.mxu0 %v11461_v62  ;;  %5675 = vmatprep.subr.bf16.mxu1 %v11464_v0  ;;  %v11516_v0 = vld [vmem:[#allocation7 + $0x2a0] ss:$16 sps:$4 sm:$0xff]  }
 0x374   :  { %5633 = vmatpush2.bf16.msra.mxu0 %v11459_v2  ;;  %5676 = vmatpush2.bf16.msra.mxu1 %v11462_v1  ;;  %v11521_v2 = vld [vmem:[#allocation7 + $0x84] ss:$16 sps:$4 sm:$0xff]  }
 0x375   :  { %5634 = vmatprep.subr.bf16.mxu0 %v11467_v3  ;;  %5677 = vmatprep.subr.bf16.mxu1 %v11470_v4  ;;  %v11524_v3 = vld [vmem:[#allocation7 + $0x284] ss:$16 sps:$4 sm:$0xff]  }
 0x378   :  { %5635 = vmatpush2.bf16.msra.mxu0 %v11465_v5  ;;  %5678 = vmatpush2.bf16.msra.mxu1 %v11468_v8  ;;  %v11519_v5 = vld [vmem:[#allocation7 + $0x80] ss:$16 sps:$4 sm:$0xff]  }
 0x379   :  { %5636 = vmatprep.subr.bf16.mxu0 %v11473_v9  ;;  %5679 = vmatprep.subr.bf16.mxu1 %v11476_v10  ;;  %v11522_v8 = vld [vmem:[#allocation7 + $0x280] ss:$16 sps:$4 sm:$0xff]   ;;  %v11527_v9 = vld [vmem:[#allocation7 + $0x64] ss:$16 sps:$4 sm:$0xff]  }
 0x37a   :  { %v11530_v10 = vld [vmem:[#allocation7 + $0x264] ss:$16 sps:$4 sm:$0xff]  }
 0x37c   :  { %5637 = vmatpush2.bf16.msra.mxu0 %v11471_v11  ;;  %5680 = vmatpush2.bf16.msra.mxu1 %v11474_v13  ;;  %v11525_v11 = vld [vmem:[#allocation7 + $0x60] ss:$16 sps:$4 sm:$0xff]  }
 0x37d   :  { %5638 = vmatprep.subr.bf16.mxu0 %v11479_v7  ;;  %5681 = vmatprep.subr.bf16.mxu1 %v11482_v14  ;;  %v11528_v13 = vld [vmem:[#allocation7 + $0x260] ss:$16 sps:$4 sm:$0xff]   ;;  %v11533_v7 = vld [vmem:[#allocation7 + $0x44] ss:$16 sps:$4 sm:$0xff]  }
 0x37e   :  { %v11536_v14 = vld [vmem:[#allocation7 + $0x244] ss:$16 sps:$4 sm:$0xff]  }
 0x380   :  { %5639 = vmatpush2.bf16.msra.mxu0 %v11477_v43  ;;  %5682 = vmatpush2.bf16.msra.mxu1 %v11480_v31  ;;  %v11531_v43 = vld [vmem:[#allocation7 + $0x40] ss:$16 sps:$4 sm:$0xff]  }
 0x381   :  { %5640 = vmatprep.subr.bf16.mxu0 %v11485_v19  ;;  %5683 = vmatprep.subr.bf16.mxu1 %v11488_v20  ;;  %v11534_v31 = vld [vmem:[#allocation7 + $0x240] ss:$16 sps:$4 sm:$0xff]   ;;  %v11539_v19 = vld [vmem:[#allocation7 + $0x24] ss:$16 sps:$4 sm:$0xff]  }
 0x382   :  { %v11542_v20 = vld [vmem:[#allocation7 + $0x224] ss:$16 sps:$4 sm:$0xff]  }
 0x384   :  { %5641 = vmatpush2.bf16.msra.mxu0 %v11483_v15  ;;  %5684 = vmatpush2.bf16.msra.mxu1 %v11486_v24  ;;  %v11537_v15 = vld [vmem:[#allocation7 + $0x20] ss:$16 sps:$4 sm:$0xff]  }
 0x385   :  { %5642 = vmatprep.subr.bf16.mxu0 %v11491_v36  ;;  %5685 = vmatprep.subr.bf16.mxu1 %v11494_v27  ;;  %v11540_v24 = vld [vmem:[#allocation7 + $0x220] ss:$16 sps:$4 sm:$0xff]   ;;  %v11545_v36 = vld [vmem:[#allocation7 + $0x4] ss:$16 sps:$4 sm:$0xff]  }
 0x386   :  { %v11548_v27 = vld [vmem:[#allocation7 + $0x204] ss:$16 sps:$4 sm:$0xff]  }
 0x388   :  { %5643 = vmatpush2.bf16.msra.mxu0 %v11489_v58  ;;  %5686 = vmatpush2.bf16.msra.mxu1 %v11492_v28  ;;  %v11543_v58 = vld [vmem:[#allocation7] ss:$16 sps:$4 sm:$0xff]  }
 0x389   :  { %5644 = vmatprep.subr.bf16.mxu0 %v11497_v29  ;;  %5687 = vmatprep.subr.bf16.mxu1 %v11500_v41  ;;  %v11546_v28 = vld [vmem:[#allocation7 + $0x200] ss:$16 sps:$4 sm:$0xff]   ;;  %v11551_v29 = vld [vmem:[#allocation7 + $0x1e4] ss:$16 sps:$4 sm:$0xff]  }
 0x38a   :  { %v11554_v41 = vld [vmem:[#allocation7 + $0x3e4] ss:$16 sps:$4 sm:$0xff]  }
 0x38c   :  { %5645 = vmatpush2.bf16.msra.mxu0 %v11495_v30  ;;  %5688 = vmatpush2.bf16.msra.mxu1 %v11498_v32  ;;  %v11549_v30 = vld [vmem:[#allocation7 + $0x1e0] ss:$16 sps:$4 sm:$0xff]  }
 0x38d   :  { %6340 = vmatprep.subr.bf16.mxu0 %v11503_v35  ;;  %6383 = vmatprep.subr.bf16.mxu1 %v11506_v38  ;;  %v11552_v32 = vld [vmem:[#allocation7 + $0x3e0] ss:$16 sps:$4 sm:$0xff]   ;;  %v11557_v35 = vld [vmem:[#allocation7 + $0x1c4] ss:$16 sps:$4 sm:$0xff]  }
 0x38e   :  { %v11560_v38 = vld [vmem:[#allocation7 + $0x3c4] ss:$16 sps:$4 sm:$0xff]  }
 0x38f   :  { %v4750_v44 = vpop.f32.mrf.mxu0  ;;  %5647 = vmatmul.mubr.bf16.vlgmr.msra.gmra.mxu0 %v13077_v21  ;;  %v4793_v45 = vpop.f32.mrf.mxu1  ;;  %5690 = vmatmul.mubr.bf16.vlgmr.msra.gmra.mxu1 %v13079_v25 }
 0x390   :  { %6341 = vmatpush1.bf16.msra.mxu0 %v11501_v39  ;;  %v13191_v50 = vadd.f32 %v4793_v45, %v4750_v44  ;;  %6384 = vmatpush1.bf16.msra.mxu1 %v11504_v51  ;;  %v11555_v39 = vld [vmem:[#allocation7 + $0x1c0] ss:$16 sps:$4 sm:$0xff]  }
 0x391   :  { %v4752_v60 = vpop.f32.mrf.mxu0  ;;  %6342 = vmatprep.subr.bf16.mxu0 %v11509_v40  ;;  %v4795_v55 = vpop.f32.mrf.mxu1  ;;  %6385 = vmatprep.subr.bf16.mxu1 %v11512_v42  ;;  %v11558_v51 = vld [vmem:[#allocation7 + $0x3c0] ss:$16 sps:$4 sm:$0xff]   ;;  %v11563_v40 = vld [vmem:[#allocation7 + $0x1a4] ss:$16 sps:$4 sm:$0xff]  }
 0x392   :  { %6372 = vmatprep.mubr.bf16.mxu0 %v13081_v34  ;;  %v13194_v54 = vadd.f32 %v4795_v55, %v4752_v60  ;;  %6415 = vmatprep.mubr.bf16.mxu1 %v13084_v37  ;;  %v11566_v42 = vld [vmem:[#allocation7 + $0x3a4] ss:$16 sps:$4 sm:$0xff]   ;;  %v11561_v44 = vld [vmem:[#allocation7 + $0x1a0] ss:$16 sps:$4 sm:$0xff]  }
 0x393   :  { %v4754_v21 = vpop.f32.mrf.mxu0  ;;  %v4797_v25 = vpop.f32.mrf.mxu1  ;;  %v11564_v45 = vld [vmem:[#allocation7 + $0x3a0] ss:$16 sps:$4 sm:$0xff]   ;;  %v11572_v60 = vld [vmem:[#allocation7 + $0x384] ss:$16 sps:$4 sm:$0xff]  }
 0x394   :  { %6343 = vmatpush1.bf16.msra.mxu0 %v11507_v48  ;;  %v13197_v59 = vadd.f32 %v4797_v25, %v4754_v21  ;;  %6386 = vmatpush1.bf16.msra.mxu1 %v11510_v52  ;;  %v11569_v48 = vld [vmem:[#allocation7 + $0x184] ss:$16 sps:$4 sm:$0xff]   ;;  %v11567_v52 = vld [vmem:[#allocation7 + $0x180] ss:$16 sps:$4 sm:$0xff]  }
 0x395   :  { %v4756_v62 = vpop.f32.mrf.mxu0  ;;  %6344 = vmatprep.subr.bf16.mxu0 %v11515_v53  ;;  %v4799_v1 = vpop.f32.mrf.mxu1  ;;  %6387 = vmatprep.subr.bf16.mxu1 %v11518_v56  ;;  %v11570_v53 = vld [vmem:[#allocation7 + $0x380] ss:$16 sps:$4 sm:$0xff]   ;;  %v11575_v55 = vld [vmem:[#allocation7 + $0x164] ss:$16 sps:$4 sm:$0xff]  }
 0x396   :  { %v13199_v4 = vadd.f32 %v4799_v1, %v4756_v62  ;;  %v11578_v56 = vld [vmem:[#allocation7 + $0x364] ss:$16 sps:$4 sm:$0xff]   ;;  %v11573_v21 = vld [vmem:[#allocation7 + $0x160] ss:$16 sps:$4 sm:$0xff]  }
 0x397   :  { %v11576_v25 = vld [vmem:[#allocation7 + $0x360] ss:$16 sps:$4 sm:$0xff]   ;;  %v11584_v62 = vld [vmem:[#allocation7 + $0x344] ss:$16 sps:$4 sm:$0xff]  }
 0x398   :  { %6345 = vmatpush1.bf16.msra.mxu0 %v11513_v57  ;;  %6388 = vmatpush1.bf16.msra.mxu1 %v11516_v0  ;;  %v11581_v57 = vld [vmem:[#allocation7 + $0x144] ss:$16 sps:$4 sm:$0xff]   ;;  %v11579_v0 = vld [vmem:[#allocation7 + $0x140] ss:$16 sps:$4 sm:$0xff]  }
 0x399   :  { %6346 = vmatprep.subr.bf16.mxu0 %v11521_v2  ;;  %6389 = vmatprep.subr.bf16.mxu1 %v11524_v3  ;;  %v11582_v2 = vld [vmem:[#allocation7 + $0x340] ss:$16 sps:$4 sm:$0xff]   ;;  %v11587_v1 = vld [vmem:[#allocation7 + $0x124] ss:$16 sps:$4 sm:$0xff]  }
 0x39a   :  { %v11590_v3 = vld [vmem:[#allocation7 + $0x324] ss:$16 sps:$4 sm:$0xff]  }
 0x39c   :  { %6347 = vmatpush1.bf16.msra.mxu0 %v11519_v5  ;;  %6390 = vmatpush1.bf16.msra.mxu1 %v11522_v8  ;;  %v11585_v5 = vld [vmem:[#allocation7 + $0x120] ss:$16 sps:$4 sm:$0xff]  }
 0x39d   :  { %6348 = vmatprep.subr.bf16.mxu0 %v11527_v9  ;;  %6391 = vmatprep.subr.bf16.mxu1 %v11530_v10  ;;  %v11588_v8 = vld [vmem:[#allocation7 + $0x320] ss:$16 sps:$4 sm:$0xff]   ;;  %v11593_v9 = vld [vmem:[#allocation7 + $0x104] ss:$16 sps:$4 sm:$0xff]  }
 0x39e   :  { %v11596_v10 = vld [vmem:[#allocation7 + $0x304] ss:$16 sps:$4 sm:$0xff]  }
 0x3a0   :  { %6349 = vmatpush1.bf16.msra.mxu0 %v11525_v11  ;;  %6392 = vmatpush1.bf16.msra.mxu1 %v11528_v13  ;;  %v11591_v11 = vld [vmem:[#allocation7 + $0x100] ss:$16 sps:$4 sm:$0xff]  }
 0x3a1   :  { %6350 = vmatprep.subr.bf16.mxu0 %v11533_v7  ;;  %6393 = vmatprep.subr.bf16.mxu1 %v11536_v14  ;;  %v11594_v13 = vld [vmem:[#allocation7 + $0x300] ss:$16 sps:$4 sm:$0xff]   ;;  %v11599_v7 = vld [vmem:[#allocation7 + $0xec] ss:$16 sps:$4 sm:$0xff]  }
 0x3a2   :  { %v11602_v14 = vld [vmem:[#allocation7 + $0x2ec] ss:$16 sps:$4 sm:$0xff]  }
 0x3a4   :  { %6351 = vmatpush1.bf16.msra.mxu0 %v11531_v43  ;;  %6394 = vmatpush1.bf16.msra.mxu1 %v11534_v31  ;;  %v11597_v43 = vld [vmem:[#allocation7 + $0xe8] ss:$16 sps:$4 sm:$0xff]  }
 0x3a5   :  { %6352 = vmatprep.subr.bf16.mxu0 %v11539_v19  ;;  %6395 = vmatprep.subr.bf16.mxu1 %v11542_v20  ;;  %v11600_v31 = vld [vmem:[#allocation7 + $0x2e8] ss:$16 sps:$4 sm:$0xff]   ;;  %v11605_v19 = vld [vmem:[#allocation7 + $0xcc] ss:$16 sps:$4 sm:$0xff]  }
 0x3a6   :  { %v11608_v20 = vld [vmem:[#allocation7 + $0x2cc] ss:$16 sps:$4 sm:$0xff]  }
 0x3a8   :  { %6353 = vmatpush1.bf16.msra.mxu0 %v11537_v15  ;;  %6396 = vmatpush1.bf16.msra.mxu1 %v11540_v24 }
 0x3a9   :  { %6354 = vmatprep.subr.bf16.mxu0 %v11545_v36  ;;  %6397 = vmatprep.subr.bf16.mxu1 %v11548_v27  ;;  %v11603_v27 = vld [vmem:[#allocation7 + $0xc8] ss:$16 sps:$4 sm:$0xff]  }
 0x3ac   :  { %6355 = vmatpush1.bf16.msra.mxu0 %v11543_v58  ;;  %6398 = vmatpush1.bf16.msra.mxu1 %v11546_v28  ;;  %v11606_v28 = vld [vmem:[#allocation7 + $0x2c8] ss:$16 sps:$4 sm:$0xff]  }
 0x3ad   :  { %6356 = vmatprep.subr.bf16.mxu0 %v11551_v29  ;;  %6399 = vmatprep.subr.bf16.mxu1 %v11554_v41  ;;  %v11611_v29 = vld [vmem:[#allocation7 + $0xac] ss:$16 sps:$4 sm:$0xff]  }
 0x3b0   :  { %6357 = vmatpush2.bf16.msra.mxu0 %v11549_v30  ;;  %6400 = vmatpush2.bf16.msra.mxu1 %v11552_v32 }
 0x3b1   :  { %6358 = vmatprep.subr.bf16.mxu0 %v11557_v35  ;;  %6401 = vmatprep.subr.bf16.mxu1 %v11560_v38  ;;  %v11614_v35 = vld [vmem:[#allocation7 + $0x2ac] ss:$16 sps:$4 sm:$0xff]  }
 0x3b4   :  { %6359 = vmatpush2.bf16.msra.mxu0 %v11555_v39  ;;  %6402 = vmatpush2.bf16.msra.mxu1 %v11558_v51 }
 0x3b5   :  { %6360 = vmatprep.subr.bf16.mxu0 %v11563_v40  ;;  %6403 = vmatprep.subr.bf16.mxu1 %v11566_v42  ;;  %v11609_v40 = vld [vmem:[#allocation7 + $0xa8] ss:$16 sps:$4 sm:$0xff]  }
 0x3b8   :  { %6361 = vmatpush2.bf16.msra.mxu0 %v11561_v44  ;;  %6404 = vmatpush2.bf16.msra.mxu1 %v11564_v45  ;;  %v11612_v44 = vld [vmem:[#allocation7 + $0x2a8] ss:$16 sps:$4 sm:$0xff]  }
 0x3b9   :  { %6362 = vmatprep.subr.bf16.mxu0 %v11569_v48  ;;  %6405 = vmatprep.subr.bf16.mxu1 %v11572_v60 }
 0x3bc   :  { %6363 = vmatpush2.bf16.msra.mxu0 %v11567_v52  ;;  %6406 = vmatpush2.bf16.msra.mxu1 %v11570_v53  ;;  %v11615_v52 = vld [vmem:[#allocation7 + $0x88] ss:$16 sps:$4 sm:$0xff]   ;;  %v11623_v53 = vld [vmem:[#allocation7 + $0x6c] ss:$16 sps:$4 sm:$0xff]  }
 0x3bd   :  { %6364 = vmatprep.subr.bf16.mxu0 %v11575_v55  ;;  %6407 = vmatprep.subr.bf16.mxu1 %v11578_v56  ;;  %v11626_v55 = vld [vmem:[#allocation7 + $0x26c] ss:$16 sps:$4 sm:$0xff]   ;;  %v11621_v56 = vld [vmem:[#allocation7 + $0x68] ss:$16 sps:$4 sm:$0xff]  }
 0x3c0   :  { %6365 = vmatpush2.bf16.msra.mxu0 %v11573_v21  ;;  %6408 = vmatpush2.bf16.msra.mxu1 %v11576_v25  ;;  %v11624_v21 = vld [vmem:[#allocation7 + $0x268] ss:$16 sps:$4 sm:$0xff]   ;;  %v11629_v25 = vld [vmem:[#allocation7 + $0x4c] ss:$16 sps:$4 sm:$0xff]  }
 0x3c1   :  { %6366 = vmatprep.subr.bf16.mxu0 %v11581_v57  ;;  %6409 = vmatprep.subr.bf16.mxu1 %v11584_v62  ;;  %v11627_v57 = vld [vmem:[#allocation7 + $0x48] ss:$16 sps:$4 sm:$0xff]  }
 0x3c2   :  { %v11630_v62 = vld [vmem:[#allocation7 + $0x248] ss:$16 sps:$4 sm:$0xff]  }
 0x3c4   :  { %6367 = vmatpush2.bf16.msra.mxu0 %v11579_v0  ;;  %6410 = vmatpush2.bf16.msra.mxu1 %v11582_v2  ;;  %v11635_v0 = vld [vmem:[#allocation7 + $0x2c] ss:$16 sps:$4 sm:$0xff]  }
 0x3c5   :  { %6368 = vmatprep.subr.bf16.mxu0 %v11587_v1  ;;  %6411 = vmatprep.subr.bf16.mxu1 %v11590_v3  ;;  %v11638_v2 = vld [vmem:[#allocation7 + $0x22c] ss:$16 sps:$4 sm:$0xff]   ;;  %v11633_v1 = vld [vmem:[#allocation7 + $0x28] ss:$16 sps:$4 sm:$0xff]  }
 0x3c6   :  { %v11636_v3 = vld [vmem:[#allocation7 + $0x228] ss:$16 sps:$4 sm:$0xff]  }
 0x3c8   :  { %6369 = vmatpush2.bf16.msra.mxu0 %v11585_v5  ;;  %6412 = vmatpush2.bf16.msra.mxu1 %v11588_v8  ;;  %v11641_v5 = vld [vmem:[#allocation7 + $0xc] ss:$16 sps:$4 sm:$0xff]  }
 0x3c9   :  { %6370 = vmatprep.subr.bf16.mxu0 %v11593_v9  ;;  %6413 = vmatprep.subr.bf16.mxu1 %v11596_v10  ;;  %v11644_v8 = vld [vmem:[#allocation7 + $0x20c] ss:$16 sps:$4 sm:$0xff]   ;;  %v11639_v9 = vld [vmem:[#allocation7 + $0x8] ss:$16 sps:$4 sm:$0xff]  }
 0x3ca   :  { %v11642_v10 = vld [vmem:[#allocation7 + $0x208] ss:$16 sps:$4 sm:$0xff]  }
 0x3cc   :  { %6371 = vmatpush2.bf16.msra.mxu0 %v11591_v11  ;;  %6414 = vmatpush2.bf16.msra.mxu1 %v11594_v13  ;;  %v11647_v11 = vld [vmem:[#allocation7 + $0x1ec] ss:$16 sps:$4 sm:$0xff]  }
 0x3cd   :  { %6426 = vmatprep.subr.bf16.mxu0 %v11599_v7  ;;  %6469 = vmatprep.subr.bf16.mxu1 %v11602_v14  ;;  %v11650_v13 = vld [vmem:[#allocation7 + $0x3ec] ss:$16 sps:$4 sm:$0xff]   ;;  %v11645_v7 = vld [vmem:[#allocation7 + $0x1e8] ss:$16 sps:$4 sm:$0xff]  }
 0x3ce   :  { %v11648_v14 = vld [vmem:[#allocation7 + $0x3e8] ss:$16 sps:$4 sm:$0xff]  }
 0x3cf   :  { %v4836_v15 = vpop.f32.mrf.mxu0  ;;  %6373 = vmatmul.mubr.bf16.vlgmr.msra.gmra.mxu0 %v13089_v46  ;;  %v4879_v36 = vpop.f32.mrf.mxu1  ;;  %6416 = vmatmul.mubr.bf16.vlgmr.msra.gmra.mxu1 %v13091_v47 }
 0x3d0   :  { %v4837_v24 = vadd.f32 %v4836_v15, %v13191_v50  ;;  %6427 = vmatpush1.bf16.msra.mxu0 %v11597_v43  ;;  %6470 = vmatpush1.bf16.msra.mxu1 %v11600_v31  ;;  %v11653_v43 = vld [vmem:[#allocation7 + $0x1cc] ss:$16 sps:$4 sm:$0xff]  }
 0x3d1   :  { %v4838_v58 = vpop.f32.mrf.mxu0  ;;  %6428 = vmatprep.subr.bf16.mxu0 %v11605_v19  ;;  %v4881_v32 = vpop.f32.mrf.mxu1  ;;  %6471 = vmatprep.subr.bf16.mxu1 %v11608_v20  ;;  %v11656_v31 = vld [vmem:[#allocation7 + $0x3cc] ss:$16 sps:$4 sm:$0xff]   ;;  %v11651_v19 = vld [vmem:[#allocation7 + $0x1c8] ss:$16 sps:$4 sm:$0xff]  }
 0x3d2   :  { %v13204_v41 = vadd.f32 %v4879_v36, %v4837_v24  ;;  %v4839_v30 = vadd.f32 %v4838_v58, %v13194_v54  ;;  %6458 = vmatprep.mubr.bf16.mxu0 %v13081_v34  ;;  %6501 = vmatprep.mubr.bf16.mxu1 %v13084_v37  ;;  %v11617_v54 = vld [vmem:[#allocation7 + $0x8c] ss:$16 sps:$4 sm:$0xff]   ;;  %v11654_v20 = vld [vmem:[#allocation7 + $0x3c8] ss:$16 sps:$4 sm:$0xff]  }
 0x3d3   :  { %v4840_v50 = vpop.f32.mrf.mxu0  ;;  %v4883_v51 = vpop.f32.mrf.mxu1  ;;  %v11620_v34 = vld [vmem:[#allocation7 + $0x28c] ss:$16 sps:$4 sm:$0xff]   ;;  %v11657_v36 = vld [vmem:[#allocation7 + $0x1a8] ss:$16 sps:$4 sm:$0xff]  }
 0x3d4   :  { %v13209_v38 = vadd.f32 %v4881_v32, %v4839_v30  ;;  %v4841_v39 = vadd.f32 %v4840_v50, %v13197_v59  ;;  %6429 = vmatpush1.bf16.msra.mxu0 %v11603_v27  ;;  %6472 = vmatpush1.bf16.msra.mxu1 %v11606_v28  ;;  %v11618_v59 = vld [vmem:[#allocation7 + $0x288] ss:$16 sps:$4 sm:$0xff]   ;;  %v11659_v15 = vld [vmem:[#allocation7 + $0x1ac] ss:$16 sps:$4 sm:$0xff]  }
 0x3d5   :  { %v4842_v42 = vpop.f32.mrf.mxu0  ;;  %6430 = vmatprep.subr.bf16.mxu0 %v11611_v29  ;;  %6473 = vmatprep.subr.bf16.mxu1 %v11614_v35  ;;  %v4885_v60 = vpop.f32.mrf.mxu1  ;;  %v11662_v24 = vld [vmem:[#allocation7 + $0x3ac] ss:$16 sps:$4 sm:$0xff]   ;;  %v11660_v27 = vld [vmem:[#allocation7 + $0x3a8] ss:$16 sps:$4 sm:$0xff]  }
 0x3d6   :  { %v13212_v45 = vadd.f32 %v4883_v51, %v4841_v39  ;;  %v4843_v48 = vadd.f32 %v4842_v42, %v13199_v4  ;;  %v11632_v4 = vld [vmem:[#allocation7 + $0x24c] ss:$16 sps:$4 sm:$0xff]   ;;  %v11663_v29 = vld [vmem:[#allocation7 + $0x188] ss:$16 sps:$4 sm:$0xff]  }
 0x3d7   :  { %v11665_v58 = vld [vmem:[#allocation7 + $0x18c] ss:$16 sps:$4 sm:$0xff]   ;;  %v11666_v30 = vld [vmem:[#allocation7 + $0x388] ss:$16 sps:$4 sm:$0xff]  }
 0x3d8   :  { %v13215_v37 = vadd.f32 %v4885_v60, %v4843_v48  ;;  %6431 = vmatpush1.bf16.msra.mxu0 %v11609_v40  ;;  %6474 = vmatpush1.bf16.msra.mxu1 %v11612_v44  ;;  %v11668_v28 = vld [vmem:[#allocation7 + $0x38c] ss:$16 sps:$4 sm:$0xff]   ;;  %v11669_v50 = vld [vmem:[#allocation7 + $0x168] ss:$16 sps:$4 sm:$0xff]  }
 0x3d9   :  { %6432 = vmatprep.subr.bf16.mxu0 %v11617_v54  ;;  %6475 = vmatprep.subr.bf16.mxu1 %v11620_v34  ;;  %v11671_v32 = vld [vmem:[#allocation7 + $0x16c] ss:$16 sps:$4 sm:$0xff]   ;;  %v11672_v39 = vld [vmem:[#allocation7 + $0x368] ss:$16 sps:$4 sm:$0xff]  }
 0x3da   :  { %v11674_v35 = vld [vmem:[#allocation7 + $0x36c] ss:$16 sps:$4 sm:$0xff]   ;;  %v11675_v42 = vld [vmem:[#allocation7 + $0x148] ss:$16 sps:$4 sm:$0xff]  }
 0x3db   :  { %v11677_v51 = vld [vmem:[#allocation7 + $0x14c] ss:$16 sps:$4 sm:$0xff]   ;;  %v11678_v44 = vld [vmem:[#allocation7 + $0x348] ss:$16 sps:$4 sm:$0xff]  }
 0x3dc   :  { %6433 = vmatpush1.bf16.msra.mxu0 %v11615_v52  ;;  %6476 = vmatpush1.bf16.msra.mxu1 %v11618_v59  ;;  %v11680_v40 = vld [vmem:[#allocation7 + $0x34c] ss:$16 sps:$4 sm:$0xff]   ;;  %v11681_v34 = vld [vmem:[#allocation7 + $0x128] ss:$16 sps:$4 sm:$0xff]  }
 0x3dd   :  { %6434 = vmatprep.subr.bf16.mxu0 %v11623_v53  ;;  %6477 = vmatprep.subr.bf16.mxu1 %v11626_v55  ;;  %v11683_v54 = vld [vmem:[#allocation7 + $0x12c] ss:$16 sps:$4 sm:$0xff]   ;;  %v11684_v60 = vld [vmem:[#allocation7 + $0x328] ss:$16 sps:$4 sm:$0xff]  }
 0x3de   :  { %v11686_v48 = vld [vmem:[#allocation7 + $0x32c] ss:$16 sps:$4 sm:$0xff]   ;;  %v11687_v53 = vld [vmem:[#allocation7 + $0x108] ss:$16 sps:$4 sm:$0xff]  }
 0x3df   :  { %v11689_v52 = vld [vmem:[#allocation7 + $0x10c] ss:$16 sps:$4 sm:$0xff]   ;;  %v11690_v55 = vld [vmem:[#allocation7 + $0x308] ss:$16 sps:$4 sm:$0xff]  }
 0x3e0   :  { %6435 = vmatpush1.bf16.msra.mxu0 %v11621_v56  ;;  %6478 = vmatpush1.bf16.msra.mxu1 %v11624_v21  ;;  %v11692_v59 = vld [vmem:[#allocation7 + $0x30c] ss:$16 sps:$4 sm:$0xff]  }
 0x3e1   :  { %6436 = vmatprep.subr.bf16.mxu0 %v11629_v25  ;;  %6479 = vmatprep.subr.bf16.mxu1 %v11632_v4 }
 0x3e4   :  { %6437 = vmatpush1.bf16.msra.mxu0 %v11627_v57  ;;  %6480 = vmatpush1.bf16.msra.mxu1 %v11630_v62 }
 0x3e5   :  { %6438 = vmatprep.subr.bf16.mxu0 %v11635_v0  ;;  %6481 = vmatprep.subr.bf16.mxu1 %v11638_v2 }
 0x3e8   :  { %6439 = vmatpush1.bf16.msra.mxu0 %v11633_v1  ;;  %6482 = vmatpush1.bf16.msra.mxu1 %v11636_v3 }
 0x3e9   :  { %6440 = vmatprep.subr.bf16.mxu0 %v11641_v5  ;;  %6483 = vmatprep.subr.bf16.mxu1 %v11644_v8 }
 0x3ec   :  { %6441 = vmatpush1.bf16.msra.mxu0 %v11639_v9  ;;  %6484 = vmatpush1.bf16.msra.mxu1 %v11642_v10 }
 0x3ed   :  { %6442 = vmatprep.subr.bf16.mxu0 %v11647_v11  ;;  %6485 = vmatprep.subr.bf16.mxu1 %v11650_v13 }
 0x3f0   :  { %6443 = vmatpush2.bf16.msra.mxu0 %v11645_v7  ;;  %6486 = vmatpush2.bf16.msra.mxu1 %v11648_v14 }
 0x3f1   :  { %6444 = vmatprep.subr.bf16.mxu0 %v11653_v43  ;;  %6487 = vmatprep.subr.bf16.mxu1 %v11656_v31 }
 0x3f4   :  { %6445 = vmatpush2.bf16.msra.mxu0 %v11651_v19  ;;  %6488 = vmatpush2.bf16.msra.mxu1 %v11654_v20 }
 0x3f5   :  { %6446 = vmatprep.subr.bf16.mxu0 %v11659_v15  ;;  %6489 = vmatprep.subr.bf16.mxu1 %v11662_v24 }
 0x3f8   :  { %6447 = vmatpush2.bf16.msra.mxu0 %v11657_v36  ;;  %6490 = vmatpush2.bf16.msra.mxu1 %v11660_v27 }
 0x3f9   :  { %6448 = vmatprep.subr.bf16.mxu0 %v11665_v58  ;;  %6491 = vmatprep.subr.bf16.mxu1 %v11668_v28 }
 0x3fc   :  { %6449 = vmatpush2.bf16.msra.mxu0 %v11663_v29  ;;  %6492 = vmatpush2.bf16.msra.mxu1 %v11666_v30 }
 0x3fd   :  { %6450 = vmatprep.subr.bf16.mxu0 %v11671_v32  ;;  %6493 = vmatprep.subr.bf16.mxu1 %v11674_v35 }
 0x400   :  { %6451 = vmatpush2.bf16.msra.mxu0 %v11669_v50  ;;  %6494 = vmatpush2.bf16.msra.mxu1 %v11672_v39 }
 0x401   :  { %6452 = vmatprep.subr.bf16.mxu0 %v11677_v51  ;;  %6495 = vmatprep.subr.bf16.mxu1 %v11680_v40 }
 0x404   :  { %6453 = vmatpush2.bf16.msra.mxu0 %v11675_v42  ;;  %6496 = vmatpush2.bf16.msra.mxu1 %v11678_v44 }
 0x405   :  { %6454 = vmatprep.subr.bf16.mxu0 %v11683_v54  ;;  %6497 = vmatprep.subr.bf16.mxu1 %v11686_v48 }
 0x408   :  { %6455 = vmatpush2.bf16.msra.mxu0 %v11681_v34  ;;  %6498 = vmatpush2.bf16.msra.mxu1 %v11684_v60 }
 0x409   :  { %6456 = vmatprep.subr.bf16.mxu0 %v11689_v52  ;;  %6499 = vmatprep.subr.bf16.mxu1 %v11692_v59 }
 0x40c   :  { %6457 = vmatpush2.bf16.msra.mxu0 %v11687_v53  ;;  %6500 = vmatpush2.bf16.msra.mxu1 %v11690_v55 }
 0x40f   :  { %6459 = vmatmul.mubr.bf16.vlgmr.msra.gmra.mxu0 %v13089_v46  ;;  %6502 = vmatmul.mubr.bf16.vlgmr.msra.gmra.mxu1 %v13091_v47  ;;  %v5562_v56 = vpop.f32.mrf.mxu0  ;;  %v5605_v21 = vpop.f32.mrf.mxu1 }
 0x410   :  { %v13219_v31 = vadd.f32 %v5605_v21, %v5562_v56  ;;  %v11693_v56 = vld [vmem:[#allocation10 + $0x70] ss:$8 sps:$4 sm:$0xff]   ;;  %v11695_v21 = vld [vmem:[#allocation10 + $0x74] ss:$8 sps:$4 sm:$0xff]  }
 0x411   :  { %v5564_v25 = vpop.f32.mrf.mxu0  ;;  %v5607_v4 = vpop.f32.mrf.mxu1  ;;  %6924 = vmatprep.subr.bf16.mxu0 %v11695_v21  ;;  %v11723_v21 = vld [vmem:[#allocation10 + $0x130] ss:$8 sps:$4 sm:$0xff]  }
 0x412   :  { %v13221_v19 = vadd.f32 %v5607_v4, %v5564_v25  ;;  %v11698_v25 = vld [vmem:[#allocation10 + $0x64] ss:$8 sps:$4 sm:$0xff]   ;;  %v11699_v4 = vld [vmem:[#allocation10 + $0x170] ss:$8 sps:$4 sm:$0xff]   ;;  %6925 = vmatpush1.bf16.msra.mxu0 %v11693_v56  ;;  %v11720_v56 = vld [vmem:[#allocation10 + $0x20] ss:$8 sps:$4 sm:$0xff]  }
 0x413   :  { %v5566_v57 = vpop.f32.mrf.mxu0  ;;  %v5609_v62 = vpop.f32.mrf.mxu1  ;;  %6926 = vmatprep.subr.bf16.mxu0 %v11698_v25  ;;  %v11726_v25 = vld [vmem:[#allocation10 + $0x10] ss:$8 sps:$4 sm:$0xff]  }
 0x414   :  { %v13239_v34 = vadd.f32 %v5609_v62, %v5566_v57  ;;  %v11707_v57 = vld [vmem:[#allocation10 + $0x164] ss:$8 sps:$4 sm:$0xff]   ;;  %v11704_v62 = vld [vmem:[#allocation10 + $0x54] ss:$8 sps:$4 sm:$0xff]  }
 0x415   :  { %v5568_v0 = vpop.f32.mrf.mxu0  ;;  %v5611_v2 = vpop.f32.mrf.mxu1 }
 0x416   :  { %v13234_v42 = vadd.f32 %v5611_v2, %v5568_v0  ;;  %v11701_v0 = vld [vmem:[#allocation10 + $0x174] ss:$8 sps:$4 sm:$0xff]   ;;  %v11696_v2 = vld [vmem:[#allocation10 + $0x60] ss:$8 sps:$4 sm:$0xff]  }
 0x417   :  { %6967 = vmatprep.subr.bf16.mxu1 %v11701_v0  ;;  %6927 = vmatpush1.bf16.msra.mxu0 %v11696_v2  ;;  %v11732_v0 = vld [vmem:[#allocation10] ss:$8 sps:$4 sm:$0xff]   ;;  %v11735_v2 = vld [vmem:[#allocation10 + $0x110] ss:$8 sps:$4 sm:$0xff]  }
 0x418   :  { %6968 = vmatpush1.bf16.msra.mxu1 %v11699_v4  ;;  %6928 = vmatprep.subr.bf16.mxu0 %v11704_v62  ;;  %v11737_v4 = vld [vmem:[#allocation10 + $0x114] ss:$8 sps:$4 sm:$0xff]   ;;  %v11743_v62 = vld [vmem:[#allocation10 + $0x104] ss:$8 sps:$4 sm:$0xff]  }
 0x419   :  { %6969 = vmatprep.subr.bf16.mxu1 %v11707_v57  ;;  %v11740_v57 = vld [vmem:[#allocation10 + $0xf4] ss:$8 sps:$4 sm:$0xff]  }
 0x44f   :  { %v5648_v1 = vpop.f32.mrf.mxu0  ;;  %v5691_v3 = vpop.f32.mrf.mxu1 }
 0x450   :  { %v13227_v30 = vadd.f32 %v5691_v3, %v5648_v1  ;;  %v11705_v1 = vld [vmem:[#allocation10 + $0x160] ss:$8 sps:$4 sm:$0xff]   ;;  %v11713_v3 = vld [vmem:[#allocation10 + $0x154] ss:$8 sps:$4 sm:$0xff]  }
 0x451   :  { %v5650_v5 = vpop.f32.mrf.mxu0  ;;  %v5693_v8 = vpop.f32.mrf.mxu1  ;;  %6970 = vmatpush1.bf16.msra.mxu1 %v11705_v1  ;;  %v11738_v1 = vld [vmem:[#allocation10 + $0xf0] ss:$8 sps:$4 sm:$0xff]  }
 0x452   :  { %v13223_v36 = vadd.f32 %v5693_v8, %v5650_v5  ;;  %v11702_v5 = vld [vmem:[#allocation10 + $0x50] ss:$8 sps:$4 sm:$0xff]   ;;  %v11710_v8 = vld [vmem:[#allocation10 + $0x44] ss:$8 sps:$4 sm:$0xff]   ;;  %6971 = vmatprep.subr.bf16.mxu1 %v11713_v3  ;;  %v11741_v3 = vld [vmem:[#allocation10 + $0x100] ss:$8 sps:$4 sm:$0xff]  }
 0x453   :  { %v5652_v9 = vpop.f32.mrf.mxu0  ;;  %v5695_v10 = vpop.f32.mrf.mxu1  ;;  %6929 = vmatpush1.bf16.msra.mxu0 %v11702_v5  ;;  %v11746_v5 = vld [vmem:[#allocation10 + $0xe4] ss:$8 sps:$4 sm:$0xff]  }
 0x454   :  { %v13229_v32 = vadd.f32 %v5695_v10, %v5652_v9  ;;  %v11711_v9 = vld [vmem:[#allocation10 + $0x150] ss:$8 sps:$4 sm:$0xff]   ;;  %v11719_v10 = vld [vmem:[#allocation10 + $0x144] ss:$8 sps:$4 sm:$0xff]   ;;  %6930 = vmatprep.subr.bf16.mxu0 %v11710_v8  ;;  %v11749_v8 = vld [vmem:[#allocation10 + $0x1f4] ss:$8 sps:$4 sm:$0xff]  }
 0x455   :  { %v5654_v11 = vpop.f32.mrf.mxu0  ;;  %v5697_v13 = vpop.f32.mrf.mxu1  ;;  %6972 = vmatpush1.bf16.msra.mxu1 %v11711_v9  ;;  %v11744_v9 = vld [vmem:[#allocation10 + $0xe0] ss:$8 sps:$4 sm:$0xff]  }
 0x456   :  { %v13231_v50 = vadd.f32 %v5697_v13, %v5654_v11  ;;  %v11708_v11 = vld [vmem:[#allocation10 + $0x40] ss:$8 sps:$4 sm:$0xff]   ;;  %v11716_v13 = vld [vmem:[#allocation10 + $0x34] ss:$8 sps:$4 sm:$0xff]   ;;  %6973 = vmatprep.subr.bf16.mxu1 %v11719_v10  ;;  %v11747_v10 = vld [vmem:[#allocation10 + $0x1f0] ss:$8 sps:$4 sm:$0xff]  }
 0x457   :  { %6931 = vmatpush1.bf16.msra.mxu0 %v11708_v11  ;;  %v11752_v11 = vld [vmem:[#allocation10 + $0xd4] ss:$8 sps:$4 sm:$0xff]  }
 0x458   :  { %6932 = vmatprep.subr.bf16.mxu0 %v11716_v13  ;;  %v11755_v13 = vld [vmem:[#allocation10 + $0x1e4] ss:$8 sps:$4 sm:$0xff]  }
 0x48f   :  { %v6374_v7 = vpop.f32.mrf.mxu0  ;;  %v6417_v46 = vpop.f32.mrf.mxu1 }
 0x490   :  { %v6418_v14 = vadd.f32 %v6417_v46, %v6374_v7  ;;  %v11717_v7 = vld [vmem:[#allocation10 + $0x140] ss:$8 sps:$4 sm:$0xff]   ;;  %v11714_v46 = vld [vmem:[#allocation10 + $0x30] ss:$8 sps:$4 sm:$0xff]  }
 0x491   :  { %v6376_v47 = vpop.f32.mrf.mxu0  ;;  %v6419_v43 = vpop.f32.mrf.mxu1  ;;  %6974 = vmatpush1.bf16.msra.mxu1 %v11717_v7  ;;  %6933 = vmatpush1.bf16.msra.mxu0 %v11714_v46  ;;  %v11750_v7 = vld [vmem:[#allocation10 + $0xd0] ss:$8 sps:$4 sm:$0xff]   ;;  %v11753_v46 = vld [vmem:[#allocation10 + $0x1e0] ss:$8 sps:$4 sm:$0xff]  }
 0x492   :  { %v6420_v20 = vadd.f32 %v6419_v43, %v6376_v47  ;;  %v6516_v28 = vmul.f32 %v6418_v14, %v13219_v31  ;;  %v6536_v44 = vmul.f32 %v6418_v14, %v13227_v30 }
 0x493   :  { %v6378_v15 = vpop.f32.mrf.mxu0  ;;  %v6421_v24 = vpop.f32.mrf.mxu1 }
 0x494   :  { %v6422_v27 = vadd.f32 %v6421_v24, %v6378_v15  ;;  %v6517_v29 = vmul.f32 %v6420_v20, %v13221_v19  ;;  %v6537_v39 = vmul.f32 %v6420_v20, %v13223_v36 }
 0x495   :  { %v6380_v58 = vpop.f32.mrf.mxu0  ;;  %v6423_v35 = vpop.f32.mrf.mxu1 }
 0x496   :  { %v6424_v51 = vadd.f32 %v6423_v35, %v6380_v58  ;;  %v6520_v40 = vadd.f32 %v6517_v29, %v6516_v28  ;;  %v6538_v54 = vmul.f32 %v6422_v27, %v13229_v32  ;;  %v6540_v52 = vadd.f32 %v6537_v39, %v6536_v44 }
 0x497   :  { %v6518_v53 = vmul.f32 %v6422_v27, %v13239_v34 }
 0x498   :  { %6521 = vadd.xlane.f32.xlu0 %v6520_v40  ;;  %v6539_v48 = vmul.f32 %v6424_v51, %v13231_v50  ;;  %v6519_v60 = vmul.f32 %v6424_v51, %v13234_v42 }
 0x49a   :  { %v6543_v59 = vadd.f32 %v6539_v48, %v6538_v54  ;;  %v6523_v55 = vadd.f32 %v6519_v60, %v6518_v53 }
 0x49c   :  { %6541 = vadd.xlane.f32.xlu0 %v6540_v52  ;;  %6544 = vadd.xlane.f32.xlu1 %v6543_v59 }
 0x4a0   :  { %6524 = vadd.xlane.f32.xlu0 %v6523_v55  ;;  %v11722_v55 = vld [vmem:[#allocation10 + $0x24] ss:$8 sps:$4 sm:$0xff]  }
 0x4a1   :  { %6934 = vmatprep.subr.bf16.mxu0 %v11722_v55 }
 0x4a2   :  { %6935 = vmatpush1.bf16.msra.mxu0 %v11720_v56 }
 0x4cf   :  { %v6460_v14 = vpop.f32.mrf.mxu0  ;;  %v6503_v47 = vpop.f32.mrf.mxu1 }
 0x4d0   :  { %v6504_v43 = vadd.f32 %v6503_v47, %v6460_v14  ;;  %v11758_v14 = vld [vmem:[#allocation10 + $0xc4] ss:$8 sps:$4 sm:$0xff]   ;;  %v11761_v47 = vld [vmem:[#allocation10 + $0x1d4] ss:$8 sps:$4 sm:$0xff]  }
 0x4d1   :  { %v6462_v20 = vpop.f32.mrf.mxu0  ;;  %v6505_v15 = vpop.f32.mrf.mxu1 }
 0x4d2   :  { %v6506_v24 = vadd.f32 %v6505_v15, %v6462_v20  ;;  %v6526_v28 = vmul.f32 %v6504_v43, %v13219_v31  ;;  %v6546_v40 = vmul.f32 %v6504_v43, %v13227_v30  ;;  %v11725_v30 = vld [vmem:[#allocation10 + $0x134] ss:$8 sps:$4 sm:$0xff]   ;;  %v11756_v43 = vld [vmem:[#allocation10 + $0xc0] ss:$8 sps:$4 sm:$0xff]   ;;  %v11759_v20 = vld [vmem:[#allocation10 + $0x1d0] ss:$8 sps:$4 sm:$0xff]  }
 0x4d3   :  { %v6464_v27 = vpop.f32.mrf.mxu0  ;;  %v6507_v58 = vpop.f32.mrf.mxu1  ;;  %6975 = vmatprep.subr.bf16.mxu1 %v11725_v30  ;;  %v11762_v15 = vld [vmem:[#allocation10 + $0xb0] ss:$8 sps:$4 sm:$0xff]  }
 0x4d4   :  { %v6527_v29 = vmul.f32 %v6506_v24, %v13221_v19  ;;  %v6547_v35 = vmul.f32 %v6506_v24, %v13223_v36  ;;  %v6508_v39 = vadd.f32 %v6507_v58, %v6464_v27  ;;  %6976 = vmatpush1.bf16.msra.mxu1 %v11723_v21  ;;  %v11764_v24 = vld [vmem:[#allocation10 + $0xb4] ss:$8 sps:$4 sm:$0xff]   ;;  %v11765_v27 = vld [vmem:[#allocation10 + $0x1c0] ss:$8 sps:$4 sm:$0xff]   ;;  %v11767_v58 = vld [vmem:[#allocation10 + $0x1c4] ss:$8 sps:$4 sm:$0xff]  }
 0x4d5   :  { %v6466_v51 = vpop.f32.mrf.mxu0  ;;  %v6509_v44 = vpop.f32.mrf.mxu1 }
 0x4d6   :  { %v6510_v54 = vadd.f32 %v6509_v44, %v6466_v51  ;;  %v6530_v48 = vadd.f32 %v6527_v29, %v6526_v28  ;;  %v6550_v60 = vadd.f32 %v6547_v35, %v6546_v40  ;;  %v6528_v52 = vmul.f32 %v6508_v39, %v13239_v34  ;;  %v11728_v34 = vld [vmem:[#allocation10 + $0x14] ss:$8 sps:$4 sm:$0xff]   ;;  %v11770_v28 = vld [vmem:[#allocation10 + $0xa4] ss:$8 sps:$4 sm:$0xff]   ;;  %v11768_v35 = vld [vmem:[#allocation10 + $0xa0] ss:$8 sps:$4 sm:$0xff]  }
 0x4d7   :  { %v6548_v59 = vmul.f32 %v6508_v39, %v13229_v32  ;;  %v11731_v32 = vld [vmem:[#allocation10 + $0x124] ss:$8 sps:$4 sm:$0xff]   ;;  %6936 = vmatprep.subr.bf16.mxu0 %v11728_v34  ;;  %v11773_v29 = vld [vmem:[#allocation10 + $0x1b4] ss:$8 sps:$4 sm:$0xff]   ;;  %v11771_v39 = vld [vmem:[#allocation10 + $0x1b0] ss:$8 sps:$4 sm:$0xff]  }
 0x4d8   :  { %v6529_v53 = vmul.f32 %v6510_v54, %v13234_v42  ;;  %v6549_v31 = vmul.f32 %v6510_v54, %v13231_v50  ;;  %6531 = vadd.xlane.f32.xlu1 %v6530_v48  ;;  %6551 = vadd.xlane.f32.xlu0 %v6550_v60  ;;  %v11729_v42 = vld [vmem:[#allocation10 + $0x120] ss:$8 sps:$4 sm:$0xff]   ;;  %v11734_v50 = vld [vmem:[#allocation10 + $0x4] ss:$8 sps:$4 sm:$0xff]   ;;  %v11776_v51 = vld [vmem:[#allocation10 + $0x94] ss:$8 sps:$4 sm:$0xff]  }
 0x4d9   :  { %6977 = vmatprep.subr.bf16.mxu1 %v11731_v32  ;;  %6937 = vmatpush1.bf16.msra.mxu0 %v11726_v25  ;;  %v11779_v40 = vld [vmem:[#allocation10 + $0x1a4] ss:$8 sps:$4 sm:$0xff]   ;;  %v11774_v44 = vld [vmem:[#allocation10 + $0x90] ss:$8 sps:$4 sm:$0xff]   ;;  %v11777_v54 = vld [vmem:[#allocation10 + $0x1a0] ss:$8 sps:$4 sm:$0xff]  }
 0x4da   :  { %v6533_v19 = vadd.f32 %v6529_v53, %v6528_v52  ;;  %v6553_v36 = vadd.f32 %v6549_v31, %v6548_v59  ;;  %6978 = vmatpush1.bf16.msra.mxu1 %v11729_v42  ;;  %6938 = vmatprep.subr.bf16.mxu0 %v11734_v50  ;;  %v11782_v48 = vld [vmem:[#allocation10 + $0x84] ss:$8 sps:$4 sm:$0xff]   ;;  %v11785_v60 = vld [vmem:[#allocation10 + $0x194] ss:$8 sps:$4 sm:$0xff]   ;;  %v11780_v52 = vld [vmem:[#allocation10 + $0x80] ss:$8 sps:$4 sm:$0xff]  }
 0x4db   :  { %6979 = vmatprep.subr.bf16.mxu1 %v11737_v4  ;;  %v11783_v59 = vld [vmem:[#allocation10 + $0x190] ss:$8 sps:$4 sm:$0xff]   ;;  %v11788_v53 = vld [vmem:[#allocation10 + $0x184] ss:$8 sps:$4 sm:$0xff]   ;;  %v11786_v31 = vld [vmem:[#allocation10 + $0x180] ss:$8 sps:$4 sm:$0xff]  }
 0x4dc   :  { %6534 = vadd.xlane.f32.xlu1 %v6533_v19  ;;  %v11791_v19 = vld [vmem:[#allocation11 + $0x74] ss:$8 sps:$4 sm:$0xff]  }
 0x4dd   :  { %6939 = vmatpush1.bf16.msra.mxu0 %v11732_v0 }
 0x4de   :  { %6980 = vmatpush1.bf16.msra.mxu1 %v11735_v2  ;;  %6940 = vmatprep.subr.bf16.mxu0 %v11740_v57 }
 0x4df   :  { %6981 = vmatprep.subr.bf16.mxu1 %v11743_v62 }
 0x4e0   :  { %6554 = vadd.xlane.f32.xlu1 %v6553_v36 }
 0x4e1   :  { %6941 = vmatpush2.bf16.msra.mxu0 %v11738_v1 }
 0x4e2   :  { %6982 = vmatpush1.bf16.msra.mxu1 %v11741_v3  ;;  %6942 = vmatprep.subr.bf16.mxu0 %v11746_v5 }
 0x4e3   :  { %6983 = vmatprep.subr.bf16.mxu1 %v11749_v8 }
 0x4e5   :  { %6943 = vmatpush2.bf16.msra.mxu0 %v11744_v9 }
 0x4e6   :  { %6984 = vmatpush2.bf16.msra.mxu1 %v11747_v10  ;;  %6944 = vmatprep.subr.bf16.mxu0 %v11752_v11 }
 0x4e7   :  { %6985 = vmatprep.subr.bf16.mxu1 %v11755_v13 }
 0x4e9   :  { %6945 = vmatpush2.bf16.msra.mxu0 %v11750_v7 }
 0x4ea   :  { %6986 = vmatpush2.bf16.msra.mxu1 %v11753_v46  ;;  %6946 = vmatprep.subr.bf16.mxu0 %v11758_v14 }
 0x4eb   :  { %6987 = vmatprep.subr.bf16.mxu1 %v11761_v47 }
 0x4ed   :  { %6947 = vmatpush2.bf16.msra.mxu0 %v11756_v43 }
 0x4ee   :  { %6988 = vmatpush2.bf16.msra.mxu1 %v11759_v20  ;;  %6948 = vmatprep.subr.bf16.mxu0 %v11764_v24 }
 0x4ef   :  { %6989 = vmatprep.subr.bf16.mxu1 %v11767_v58 }
 0x4f1   :  { %6949 = vmatpush2.bf16.msra.mxu0 %v11762_v15 }
 0x4f2   :  { %6990 = vmatpush2.bf16.msra.mxu1 %v11765_v27  ;;  %6950 = vmatprep.subr.bf16.mxu0 %v11770_v28 }
 0x4f3   :  { %6991 = vmatprep.subr.bf16.mxu1 %v11773_v29 }
 0x4f5   :  { %6951 = vmatpush2.bf16.msra.mxu0 %v11768_v35 }
 0x4f6   :  { %6992 = vmatpush2.bf16.msra.mxu1 %v11771_v39  ;;  %6952 = vmatprep.subr.bf16.mxu0 %v11776_v51 }
 0x4f7   :  { %6993 = vmatprep.subr.bf16.mxu1 %v11779_v40 }
 0x4f9   :  { %6953 = vmatpush2.bf16.msra.mxu0 %v11774_v44 }
 0x4fa   :  { %6994 = vmatpush2.bf16.msra.mxu1 %v11777_v54  ;;  %6954 = vmatprep.subr.bf16.mxu0 %v11782_v48 }
 0x4fb   :  { %6995 = vmatprep.subr.bf16.mxu1 %v11785_v60  ;;  %v11789_v60 = vld [vmem:[#allocation11 + $0x70] ss:$8 sps:$4 sm:$0xff]  }
 0x4fd   :  { %6955 = vmatpush2.bf16.msra.mxu0 %v11780_v52  ;;  %v11794_v52 = vld [vmem:[#allocation11 + $0x64] ss:$8 sps:$4 sm:$0xff]  }
 0x4fe   :  { %6996 = vmatpush2.bf16.msra.mxu1 %v11783_v59  ;;  %7172 = vmatprep.subr.bf16.mxu0 %v11791_v19  ;;  %v11797_v19 = vld [vmem:[#allocation11 + $0x54] ss:$8 sps:$4 sm:$0xff]  }
 0x4ff   :  { %6997 = vmatprep.subr.bf16.mxu1 %v11788_v53 }
 0x502   :  { %6998 = vmatpush2.bf16.msra.mxu1 %v11786_v31  ;;  %v11792_v31 = vld [vmem:[#allocation11 + $0x60] ss:$8 sps:$4 sm:$0xff]  }
 0x521   :  { %v6522_v36 = vpop.xlane.xlu0 %6521 }
 0x525   :  { %v6542_v55 = vpop.xlane.xlu0 %6541  ;;  %v6545_v30 = vpop.xlane.xlu1 %6544 }
 0x529   :  { %v6525_v56 = vpop.xlane.xlu0 %6524 }
 0x561   :  { %v6532_v21 = vpop.xlane.xlu1 %6531  ;;  %v6552_v32 = vpop.xlane.xlu0 %6551 }
 0x562   :  { %v6556_v34 = vsub.f32 %v6532_v21, %v6522_v36  ;;  %v6570_v25 = vsub.f32 %v6552_v32, %v6542_v55  ;;  %v11798_v36 = vld [vmem:[#allocation11 + $0x40] ss:$8 sps:$4 sm:$0xff]   ;;  %v11803_v55 = vld [vmem:[#allocation11 + $0x34] ss:$8 sps:$4 sm:$0xff]   ;;  %v11807_v21 = vld [vmem:[#allocation11 + $0x10] ss:$8 sps:$4 sm:$0xff]  }
 0x563   :  { %v11810_v32 = vld [vmem:[#allocation11] ss:$8 sps:$4 sm:$0xff]  }
 0x564   :  { %v10620_v42 = vmul.f32 -1.442695, %v6556_v34  ;;  %v10622_v50 = vmul.f32 -1.442695, %v6570_v25  ;;  %v11812_v34 = vld [vmem:[#allocation11 + $0x4] ss:$8 sps:$4 sm:$0xff]  }
 0x565   :  { %v6535_v4 = vpop.xlane.xlu1 %6534  ;;  %v11815_v25 = vld [vmem:[#allocation11 + $0xf4] ss:$8 sps:$4 sm:$0xff]  }
 0x566   :  { %12277 = vpow2.f32 %v10620_v42  ;;  %v6557_v0 = vsub.f32 %v6535_v4, %v6525_v56  ;;  %v11809_v56 = vld [vmem:[#allocation11 + $0x14] ss:$8 sps:$4 sm:$0xff]   ;;  %v11813_v42 = vld [vmem:[#allocation11 + $0xf0] ss:$8 sps:$4 sm:$0xff]   ;;  %v11816_v4 = vld [vmem:[#allocation11 + $0xe0] ss:$8 sps:$4 sm:$0xff]  }
 0x567   :  { %12279 = vpow2.f32 %v10622_v50  ;;  %v11818_v50 = vld [vmem:[#allocation11 + $0xe4] ss:$8 sps:$4 sm:$0xff]  }
 0x568   :  { %v10621_v2 = vmul.f32 -1.442695, %v6557_v0  ;;  %v11821_v0 = vld [vmem:[#allocation11 + $0xd4] ss:$8 sps:$4 sm:$0xff]  }
 0x569   :  { %v6555_v57 = vpop.xlane.xlu1 %6554 }
 0x56a   :  { %12281 = vpow2.f32 %v10621_v2  ;;  %v6571_v62 = vsub.f32 %v6555_v57, %v6545_v30  ;;  %v11804_v30 = vld [vmem:[#allocation11 + $0x20] ss:$8 sps:$4 sm:$0xff]   ;;  %v11819_v2 = vld [vmem:[#allocation11 + $0xd0] ss:$8 sps:$4 sm:$0xff]   ;;  %v11824_v57 = vld [vmem:[#allocation11 + $0xc4] ss:$8 sps:$4 sm:$0xff]  }
 0x56c   :  { %v10623_v1 = vmul.f32 -1.442695, %v6571_v62  ;;  %v11822_v62 = vld [vmem:[#allocation11 + $0xc0] ss:$8 sps:$4 sm:$0xff]  }
 0x56e   :  { %12283 = vpow2.f32 %v10623_v1  ;;  %v11827_v1 = vld [vmem:[#allocation11 + $0xb4] ss:$8 sps:$4 sm:$0xff]  }
 0x573   :  { %v12278_v3 = vpop.eup %12277 }
 0x574   :  { %v12280_v5 = vpop.eup %12279  ;;  %v6564_v8 = vadd.f32 1.0, %v12278_v3  ;;  %v11825_v3 = vld [vmem:[#allocation11 + $0xb0] ss:$8 sps:$4 sm:$0xff]  }
 0x575   :  { %v6578_v9 = vadd.f32 1.0, %v12280_v5  ;;  %v11830_v5 = vld [vmem:[#allocation11 + $0xa4] ss:$8 sps:$4 sm:$0xff]  }
 0x576   :  { %12285 = vrcp.f32 %v6564_v8  ;;  %v11828_v8 = vld [vmem:[#allocation11 + $0xa0] ss:$8 sps:$4 sm:$0xff]  }
 0x577   :  { %v12282_v10 = vpop.eup %12281  ;;  %12287 = vrcp.f32 %v6578_v9  ;;  %v11833_v9 = vld [vmem:[#allocation11 + $0x94] ss:$8 sps:$4 sm:$0xff]  }
 0x578   :  { %v6565_v11 = vadd.f32 1.0, %v12282_v10  ;;  %v11831_v10 = vld [vmem:[#allocation11 + $0x90] ss:$8 sps:$4 sm:$0xff]  }
 0x57a   :  { %12289 = vrcp.f32 %v6565_v11  ;;  %v11836_v11 = vld [vmem:[#allocation11 + $0x84] ss:$8 sps:$4 sm:$0xff]  }
 0x57b   :  { %v12284_v13 = vpop.eup %12283 }
 0x57c   :  { %v6579_v7 = vadd.f32 1.0, %v12284_v13  ;;  %v11834_v13 = vld [vmem:[#allocation11 + $0x80] ss:$8 sps:$4 sm:$0xff]  }
 0x57e   :  { %12291 = vrcp.f32 %v6579_v7  ;;  %v11837_v7 = vld [vmem:[#allocation13 + $0x70] ss:$8 sps:$4 sm:$0xff]  }
 0x583   :  { %v12286_v46 = vpop.eup %12285 }
 0x584   :  { %v12288_v14 = vpop.eup %12287  ;;  %v6585_v47 = vmul.f32 %v12286_v46, %v13152_v6  ;;  %v6584_v43 = vmul.f32 %v12286_v46, %v13148_v61  ;;  %v11839_v46 = vld [vmem:[#allocation13 + $0x74] ss:$8 sps:$4 sm:$0xff]  }
 0x585   :  { %v6593_v20 = vmul.f32 %v12288_v14, %v13152_v6  ;;  %v6592_v15 = vmul.f32 %v12288_v14, %v13148_v61  ;;  %v11842_v14 = vld [vmem:[#allocation13 + $0x64] ss:$8 sps:$4 sm:$0xff]   ;;  %7381 = vmatprep.subr.bf16.mxu1 %v11839_v46 }
 0x586   :  { %v6589_v24 = vadd.f32 %v6585_v47, %v13121_v22  ;;  %v6588_v27 = vadd.f32 %v6584_v43, %v13116_v16  ;;  %v11840_v47 = vld [vmem:[#allocation13 + $0x60] ss:$8 sps:$4 sm:$0xff]   ;;  %v11845_v43 = vld [vmem:[#allocation13 + $0x54] ss:$8 sps:$4 sm:$0xff]   ;;  %v11917_v46 = vld [vmem:[#allocation14 + $0x24] ss:$8 sps:$4 sm:$0xff]  }
 0x587   :  { %v12290_v58 = vpop.eup %12289  ;;  %v6597_v28 = vadd.f32 %v6593_v20, %v13121_v22  ;;  %v6596_v29 = vadd.f32 %v6592_v15, %v13116_v16  ;;  %v11843_v20 = vld [vmem:[#allocation13 + $0x50] ss:$8 sps:$4 sm:$0xff]   ;;  %v11848_v15 = vld [vmem:[#allocation13 + $0x44] ss:$8 sps:$4 sm:$0xff]  }
 0x588   :  { %v6587_v35 = vmul.f32 %v12290_v58, %v13159_v23  ;;  %v6586_v39 = vmul.f32 %v12290_v58, %v13156_v17  ;;  %v11849_v58 = vld [vmem:[#allocation13 + $0x30] ss:$8 sps:$4 sm:$0xff]  }
 0x58a   :  { %v6591_v51 = vadd.f32 %v6587_v35, %v13127_v49  ;;  %v6590_v40 = vadd.f32 %v6586_v39, %v13124_v33  ;;  %v11857_v35 = vld [vmem:[#allocation13 + $0x14] ss:$8 sps:$4 sm:$0xff]   ;;  %v11855_v39 = vld [vmem:[#allocation13 + $0x10] ss:$8 sps:$4 sm:$0xff]  }
 0x58b   :  { %v12292_v6 = vpop.eup %12291 }
 0x58c   :  { %v6601_v44 = vpack.c.bf16 %v6591_v51, %v6589_v24  ;;  %v6600_v61 = vpack.c.bf16 %v6590_v40, %v6588_v27  ;;  %v6595_v54 = vmul.f32 %v12292_v6, %v13159_v23  ;;  %v6594_v48 = vmul.f32 %v12292_v6, %v13156_v17  ;;  %v11795_v23 = vld [vmem:[#allocation11 + $0x50] ss:$8 sps:$4 sm:$0xff]   ;;  %v11800_v17 = vld [vmem:[#allocation11 + $0x44] ss:$8 sps:$4 sm:$0xff]   ;;  %v11846_v24 = vld [vmem:[#allocation13 + $0x40] ss:$8 sps:$4 sm:$0xff]  }
 0x58d   :  { %v11851_v27 = vld [vmem:[#allocation13 + $0x34] ss:$8 sps:$4 sm:$0xff]   ;;  %v11860_v51 = vld [vmem:[#allocation13 + $0x4] ss:$8 sps:$4 sm:$0xff]   ;;  %v11858_v40 = vld [vmem:[#allocation13] ss:$8 sps:$4 sm:$0xff]  }
 0x58e   :  { %6956 = vmatprep.mubr.bf16.mxu0 %v6601_v44  ;;  %v6599_v16 = vadd.f32 %v6595_v54, %v13127_v49  ;;  %v6598_v22 = vadd.f32 %v6594_v48, %v13124_v33  ;;  %v11801_v49 = vld [vmem:[#allocation11 + $0x30] ss:$8 sps:$4 sm:$0xff]   ;;  %v11806_v33 = vld [vmem:[#allocation11 + $0x24] ss:$8 sps:$4 sm:$0xff]   ;;  %v11863_v6 = vld [vmem:[#allocation13 + $0xf4] ss:$8 sps:$4 sm:$0xff]  }
 0x58f   :  { %6957 = vmatmul.mubr.bf16.vlgmr.msra.gmra.mxu0 %v6600_v61  ;;  %v11861_v44 = vld [vmem:[#allocation13 + $0xf0] ss:$8 sps:$4 sm:$0xff]   ;;  %v11866_v61 = vld [vmem:[#allocation13 + $0xe4] ss:$8 sps:$4 sm:$0xff]   ;;  %v11864_v54 = vld [vmem:[#allocation13 + $0xe0] ss:$8 sps:$4 sm:$0xff]  }
 0x590   :  { %v6603_v59 = vpack.c.bf16 %v6599_v16, %v6597_v28  ;;  %v6602_v53 = vpack.c.bf16 %v6598_v22, %v6596_v29  ;;  %7173 = vmatpush1.bf16.msra.mxu0 %v11789_v60  ;;  %v11854_v28 = vld [vmem:[#allocation13 + $0x24] ss:$8 sps:$4 sm:$0xff]   ;;  %v11852_v29 = vld [vmem:[#allocation13 + $0x20] ss:$8 sps:$4 sm:$0xff]   ;;  %v11869_v48 = vld [vmem:[#allocation13 + $0xd4] ss:$8 sps:$4 sm:$0xff]  }
 0x591   :  { %7174 = vmatprep.subr.bf16.mxu0 %v11794_v52  ;;  %v11867_v60 = vld [vmem:[#allocation13 + $0xd0] ss:$8 sps:$4 sm:$0xff]   ;;  %v11872_v52 = vld [vmem:[#allocation13 + $0xc4] ss:$8 sps:$4 sm:$0xff]   ;;  %v11870_v16 = vld [vmem:[#allocation13 + $0xc0] ss:$8 sps:$4 sm:$0xff]  }
 0x592   :  { %6999 = vmatprep.mubr.bf16.mxu1 %v6603_v59  ;;  %v11875_v22 = vld [vmem:[#allocation13 + $0xb4] ss:$8 sps:$4 sm:$0xff]   ;;  %v11873_v59 = vld [vmem:[#allocation13 + $0xb0] ss:$8 sps:$4 sm:$0xff]  }
 0x593   :  { %7000 = vmatmul.mubr.bf16.vlgmr.msra.gmra.mxu1 %v6602_v53 }
 0x594   :  { %7175 = vmatpush1.bf16.msra.mxu0 %v11792_v31  ;;  %7382 = vmatpush1.bf16.msra.mxu1 %v11837_v7  ;;  %v11909_v7 = vld [vmem:[#allocation14 + $0x30] ss:$8 sps:$4 sm:$0xff]  }
 0x595   :  { %7176 = vmatprep.subr.bf16.mxu0 %v11797_v19  ;;  %7383 = vmatprep.subr.bf16.mxu1 %v11842_v14  ;;  %v11915_v14 = vld [vmem:[#allocation14 + $0x20] ss:$8 sps:$4 sm:$0xff]  }
 0x598   :  { %7177 = vmatpush1.bf16.msra.mxu0 %v11795_v23  ;;  %7384 = vmatpush1.bf16.msra.mxu1 %v11840_v47  ;;  %v11923_v47 = vld [vmem:[#allocation14 + $0x14] ss:$8 sps:$4 sm:$0xff]  }
 0x599   :  { %7178 = vmatprep.subr.bf16.mxu0 %v11800_v17  ;;  %7385 = vmatprep.subr.bf16.mxu1 %v11845_v43  ;;  %v11921_v43 = vld [vmem:[#allocation14 + $0x10] ss:$8 sps:$4 sm:$0xff]  }
 0x59c   :  { %7179 = vmatpush1.bf16.msra.mxu0 %v11798_v36  ;;  %7386 = vmatpush1.bf16.msra.mxu1 %v11843_v20  ;;  %v11929_v20 = vld [vmem:[#allocation14 + $0x4] ss:$8 sps:$4 sm:$0xff]  }
 0x59d   :  { %7180 = vmatprep.subr.bf16.mxu0 %v11803_v55  ;;  %7387 = vmatprep.subr.bf16.mxu1 %v11848_v15  ;;  %v11927_v15 = vld [vmem:[#allocation14] ss:$8 sps:$4 sm:$0xff]  }
 0x5a0   :  { %7181 = vmatpush1.bf16.msra.mxu0 %v11801_v49  ;;  %7388 = vmatpush1.bf16.msra.mxu1 %v11846_v24  ;;  %v11935_v24 = vld [vmem:[#allocation14 + $0xf4] ss:$8 sps:$4 sm:$0xff]  }
 0x5a1   :  { %7182 = vmatprep.subr.bf16.mxu0 %v11806_v33  ;;  %7389 = vmatprep.subr.bf16.mxu1 %v11851_v27  ;;  %v11933_v27 = vld [vmem:[#allocation14 + $0xf0] ss:$8 sps:$4 sm:$0xff]  }
 0x5a4   :  { %7183 = vmatpush1.bf16.msra.mxu0 %v11804_v30  ;;  %7390 = vmatpush1.bf16.msra.mxu1 %v11849_v58  ;;  %v11941_v58 = vld [vmem:[#allocation14 + $0xe4] ss:$8 sps:$4 sm:$0xff]  }
 0x5a5   :  { %7184 = vmatprep.subr.bf16.mxu0 %v11809_v56  ;;  %7391 = vmatprep.subr.bf16.mxu1 %v11854_v28  ;;  %v11939_v28 = vld [vmem:[#allocation14 + $0xe0] ss:$8 sps:$4 sm:$0xff]  }
 0x5a8   :  { %7185 = vmatpush1.bf16.msra.mxu0 %v11807_v21  ;;  %7392 = vmatpush1.bf16.msra.mxu1 %v11852_v29  ;;  %v11947_v29 = vld [vmem:[#allocation14 + $0xd4] ss:$8 sps:$4 sm:$0xff]  }
 0x5a9   :  { %7186 = vmatprep.subr.bf16.mxu0 %v11812_v34  ;;  %7393 = vmatprep.subr.bf16.mxu1 %v11857_v35  ;;  %v11945_v35 = vld [vmem:[#allocation14 + $0xd0] ss:$8 sps:$4 sm:$0xff]  }
 0x5ac   :  { %7187 = vmatpush1.bf16.msra.mxu0 %v11810_v32  ;;  %7394 = vmatpush1.bf16.msra.mxu1 %v11855_v39  ;;  %v11953_v39 = vld [vmem:[#allocation14 + $0xc4] ss:$8 sps:$4 sm:$0xff]  }
 0x5ad   :  { %7188 = vmatprep.subr.bf16.mxu0 %v11815_v25  ;;  %7395 = vmatprep.subr.bf16.mxu1 %v11860_v51  ;;  %v11951_v51 = vld [vmem:[#allocation14 + $0xc0] ss:$8 sps:$4 sm:$0xff]  }
 0x5b0   :  { %7189 = vmatpush2.bf16.msra.mxu0 %v11813_v42  ;;  %7396 = vmatpush1.bf16.msra.mxu1 %v11858_v40  ;;  %v11959_v40 = vld [vmem:[#allocation14 + $0xb4] ss:$8 sps:$4 sm:$0xff]  }
 0x5b1   :  { %7190 = vmatprep.subr.bf16.mxu0 %v11818_v50  ;;  %7397 = vmatprep.subr.bf16.mxu1 %v11863_v6  ;;  %v11957_v6 = vld [vmem:[#allocation14 + $0xb0] ss:$8 sps:$4 sm:$0xff]  }
 0x5b4   :  { %7191 = vmatpush2.bf16.msra.mxu0 %v11816_v4  ;;  %7398 = vmatpush2.bf16.msra.mxu1 %v11861_v44  ;;  %v11879_v4 = vld [vmem:[#allocation13 + $0x90] ss:$8 sps:$4 sm:$0xff]   ;;  %v11965_v44 = vld [vmem:[#allocation14 + $0xa4] ss:$8 sps:$4 sm:$0xff]  }
 0x5b5   :  { %7192 = vmatprep.subr.bf16.mxu0 %v11821_v0  ;;  %7399 = vmatprep.subr.bf16.mxu1 %v11866_v61  ;;  %v11884_v0 = vld [vmem:[#allocation13 + $0x84] ss:$8 sps:$4 sm:$0xff]   ;;  %v11963_v61 = vld [vmem:[#allocation14 + $0xa0] ss:$8 sps:$4 sm:$0xff]  }
 0x5b8   :  { %7193 = vmatpush2.bf16.msra.mxu0 %v11819_v2  ;;  %7400 = vmatpush2.bf16.msra.mxu1 %v11864_v54  ;;  %v11882_v2 = vld [vmem:[#allocation13 + $0x80] ss:$8 sps:$4 sm:$0xff]  }
 0x5b9   :  { %7194 = vmatprep.subr.bf16.mxu0 %v11824_v57  ;;  %7401 = vmatprep.subr.bf16.mxu1 %v11869_v48  ;;  %v11885_v57 = vld [vmem:[#allocation14 + $0x70] ss:$8 sps:$4 sm:$0xff]  }
 0x5bc   :  { %7195 = vmatpush2.bf16.msra.mxu0 %v11822_v62  ;;  %7402 = vmatpush2.bf16.msra.mxu1 %v11867_v60  ;;  %v11887_v62 = vld [vmem:[#allocation14 + $0x74] ss:$8 sps:$4 sm:$0xff]  }
 0x5bd   :  { %7196 = vmatprep.subr.bf16.mxu0 %v11827_v1  ;;  %7403 = vmatprep.subr.bf16.mxu1 %v11872_v52  ;;  %v11890_v1 = vld [vmem:[#allocation17 + $0xe4] ss:$16 sps:$4 sm:$0xff]  }
 0x5c0   :  { %7197 = vmatpush2.bf16.msra.mxu0 %v11825_v3  ;;  %7404 = vmatpush2.bf16.msra.mxu1 %v11870_v16  ;;  %v11893_v3 = vld [vmem:[#allocation14 + $0x64] ss:$8 sps:$4 sm:$0xff]  }
 0x5c1   :  { %7198 = vmatprep.subr.bf16.mxu0 %v11830_v5  ;;  %7405 = vmatprep.subr.bf16.mxu1 %v11875_v22  ;;  %v11891_v5 = vld [vmem:[#allocation14 + $0x60] ss:$8 sps:$4 sm:$0xff]  }
 0x5c4   :  { %7199 = vmatpush2.bf16.msra.mxu0 %v11828_v8  ;;  %7406 = vmatpush2.bf16.msra.mxu1 %v11873_v59  ;;  %v11899_v8 = vld [vmem:[#allocation14 + $0x54] ss:$8 sps:$4 sm:$0xff]  }
 0x5c5   :  { %7200 = vmatprep.subr.bf16.mxu0 %v11833_v9  ;;  %v11897_v9 = vld [vmem:[#allocation14 + $0x50] ss:$8 sps:$4 sm:$0xff]  }
 0x5c8   :  { %7201 = vmatpush2.bf16.msra.mxu0 %v11831_v10  ;;  %v11905_v10 = vld [vmem:[#allocation14 + $0x44] ss:$8 sps:$4 sm:$0xff]  }
 0x5c9   :  { %7202 = vmatprep.subr.bf16.mxu0 %v11836_v11  ;;  %v11903_v11 = vld [vmem:[#allocation14 + $0x40] ss:$8 sps:$4 sm:$0xff]  }
 0x5cc   :  { %7203 = vmatpush2.bf16.msra.mxu0 %v11834_v13  ;;  %v11911_v13 = vld [vmem:[#allocation14 + $0x34] ss:$8 sps:$4 sm:$0xff]  }
 0x5cd   :  { %7586 = vmatprep.subr.bf16.mxu0 %v11887_v62  ;;  %v11942_v62 = vld [vmem:[#allocation17 + $0x1c0] ss:$16 sps:$4 sm:$0xff]  }
 0x64f   :  { %v6958_v53 = vpop.f32.mrf.mxu0 }
 0x650   :  { %v6959_v56 = vadd.f32 %v6958_v53, %v13176_v12  ;;  %v11881_v12 = vld [vmem:[#allocation13 + $0x94] ss:$8 sps:$4 sm:$0xff]  }
 0x651   :  { %v6960_v31 = vpop.f32.mrf.mxu0 }
 0x652   :  { %v6961_v33 = vadd.f32 %v6960_v31, %v13181_v18  ;;  %v11878_v18 = vld [vmem:[#allocation13 + $0xa4] ss:$8 sps:$4 sm:$0xff]  }
 0x653   :  { %v6962_v19 = vpop.f32.mrf.mxu0  ;;  %v7001_v23 = vpop.f32.mrf.mxu1  ;;  %7407 = vmatprep.subr.bf16.mxu1 %v11878_v18  ;;  %v11926_v18 = vld [vmem:[#allocation17 + $0x24] ss:$16 sps:$4 sm:$0xff]  }
 0x654   :  { %v6963_v55 = vadd.f32 %v6962_v19, %v13184_v26  ;;  %v13277_v42 = vadd.f32 %v7001_v23, %v6959_v56  ;;  %v11888_v19 = vld [vmem:[#allocation17 + $0xe0] ss:$16 sps:$4 sm:$0xff]   ;;  %v11914_v56 = vld [vmem:[#allocation17 + $0x64] ss:$16 sps:$4 sm:$0xff]  }
 0x655   :  { %v6964_v17 = vpop.f32.mrf.mxu0  ;;  %v7003_v36 = vpop.f32.mrf.mxu1 }
 0x656   :  { %v6965_v30 = vadd.f32 %v6964_v17, %v13187_v63  ;;  %v13273_v32 = vadd.f32 %v7003_v36, %v6961_v33  ;;  %v11876_v63 = vld [vmem:[#allocation13 + $0xa0] ss:$8 sps:$4 sm:$0xff]  }
 0x657   :  { %v7005_v49 = vpop.f32.mrf.mxu1  ;;  %7408 = vmatpush2.bf16.msra.mxu1 %v11876_v63  ;;  %v11896_v17 = vld [vmem:[#allocation17 + $0xc4] ss:$16 sps:$4 sm:$0xff]   ;;  %v11894_v36 = vld [vmem:[#allocation17 + $0xc0] ss:$16 sps:$4 sm:$0xff]  }
 0x658   :  { %v13271_v21 = vadd.f32 %v7005_v49, %v6963_v55  ;;  %7409 = vmatprep.subr.bf16.mxu1 %v11881_v12  ;;  %v11902_v55 = vld [vmem:[#allocation17 + $0xa4] ss:$16 sps:$4 sm:$0xff]   ;;  %v11900_v49 = vld [vmem:[#allocation17 + $0xa0] ss:$16 sps:$4 sm:$0xff]  }
 0x659   :  { %v7007_v34 = vpop.f32.mrf.mxu1  ;;  %v11908_v33 = vld [vmem:[#allocation17 + $0x84] ss:$16 sps:$4 sm:$0xff]   ;;  %v11924_v63 = vld [vmem:[#allocation17 + $0x20] ss:$16 sps:$4 sm:$0xff]  }
 0x65a   :  { %v13275_v25 = vadd.f32 %v7007_v34, %v6965_v30  ;;  %v7010_v26 = vpack.c.bf16 %v13271_v21, %v13277_v42  ;;  %v11906_v30 = vld [vmem:[#allocation17 + $0x80] ss:$16 sps:$4 sm:$0xff]   ;;  %v11932_v12 = vld [vmem:[#allocation17 + $0x4] ss:$16 sps:$4 sm:$0xff]  }
 0x65b   :  { %7410 = vmatpush2.bf16.msra.mxu1 %v11879_v4  ;;  %v11912_v34 = vld [vmem:[#allocation17 + $0x60] ss:$16 sps:$4 sm:$0xff]  }
 0x65c   :  { %v7011_v50 = vpack.c.bf16 %v13275_v25, %v13273_v32  ;;  %7411 = vmatprep.subr.bf16.mxu1 %v11884_v0  ;;  %v11930_v4 = vld [vmem:[#allocation17] ss:$16 sps:$4 sm:$0xff]   ;;  %v11938_v0 = vld [vmem:[#allocation17 + $0x1e4] ss:$16 sps:$4 sm:$0xff]  }
 0x65e   :  { %7204 = vmatprep.mubr.bf16.mxu0 %v7011_v50  ;;  %v11920_v50 = vld [vmem:[#allocation17 + $0x44] ss:$16 sps:$4 sm:$0xff]  }
 0x65f   :  { %7205 = vmatmul.mubr.bf16.vlgmr.msra.gmra.mxu0 %v7010_v26  ;;  %7412 = vmatpush2.bf16.msra.mxu1 %v11882_v2  ;;  %v11918_v26 = vld [vmem:[#allocation17 + $0x40] ss:$16 sps:$4 sm:$0xff]  }
 0x660   :  { %7587 = vmatpush1.bf16.msra.mxu0 %v11885_v57  ;;  %7994 = vmatprep.subr.bf16.mxu1 %v11890_v1  ;;  %v11936_v2 = vld [vmem:[#allocation17 + $0x1e0] ss:$16 sps:$4 sm:$0xff]   ;;  %v11944_v57 = vld [vmem:[#allocation17 + $0x1c4] ss:$16 sps:$4 sm:$0xff]  }
 0x661   :  { %7588 = vmatprep.subr.bf16.mxu0 %v11893_v3  ;;  %v11950_v1 = vld [vmem:[#allocation17 + $0x1a4] ss:$16 sps:$4 sm:$0xff]   ;;  %v11948_v3 = vld [vmem:[#allocation17 + $0x1a0] ss:$16 sps:$4 sm:$0xff]  }
 0x664   :  { %7589 = vmatpush1.bf16.msra.mxu0 %v11891_v5  ;;  %v11956_v5 = vld [vmem:[#allocation17 + $0x184] ss:$16 sps:$4 sm:$0xff]  }
 0x665   :  { %7590 = vmatprep.subr.bf16.mxu0 %v11899_v8  ;;  %v11954_v8 = vld [vmem:[#allocation17 + $0x180] ss:$16 sps:$4 sm:$0xff]  }
 0x668   :  { %7591 = vmatpush1.bf16.msra.mxu0 %v11897_v9  ;;  %v11962_v9 = vld [vmem:[#allocation17 + $0x164] ss:$16 sps:$4 sm:$0xff]  }
 0x669   :  { %7592 = vmatprep.subr.bf16.mxu0 %v11905_v10  ;;  %v11960_v10 = vld [vmem:[#allocation17 + $0x160] ss:$16 sps:$4 sm:$0xff]  }
 0x66c   :  { %7593 = vmatpush1.bf16.msra.mxu0 %v11903_v11  ;;  %v11968_v11 = vld [vmem:[#allocation17 + $0x144] ss:$16 sps:$4 sm:$0xff]  }
 0x66d   :  { %7594 = vmatprep.subr.bf16.mxu0 %v11911_v13  ;;  %v11966_v13 = vld [vmem:[#allocation17 + $0x140] ss:$16 sps:$4 sm:$0xff]  }
 0x670   :  { %7595 = vmatpush1.bf16.msra.mxu0 %v11909_v7  ;;  %v11971_v7 = vld [vmem:[#allocation14 + $0x94] ss:$8 sps:$4 sm:$0xff]  }
 0x671   :  { %7596 = vmatprep.subr.bf16.mxu0 %v11917_v46  ;;  %v11969_v46 = vld [vmem:[#allocation14 + $0x90] ss:$8 sps:$4 sm:$0xff]  }
 0x674   :  { %7597 = vmatpush1.bf16.msra.mxu0 %v11915_v14  ;;  %v11974_v14 = vld [vmem:[#allocation17 + $0x124] ss:$16 sps:$4 sm:$0xff]  }
 0x675   :  { %7598 = vmatprep.subr.bf16.mxu0 %v11923_v47  ;;  %v11972_v47 = vld [vmem:[#allocation17 + $0x120] ss:$16 sps:$4 sm:$0xff]  }
 0x678   :  { %7599 = vmatpush1.bf16.msra.mxu0 %v11921_v43  ;;  %v11977_v43 = vld [vmem:[#allocation14 + $0x84] ss:$8 sps:$4 sm:$0xff]  }
 0x679   :  { %7600 = vmatprep.subr.bf16.mxu0 %v11929_v20  ;;  %v11975_v20 = vld [vmem:[#allocation14 + $0x80] ss:$8 sps:$4 sm:$0xff]  }
 0x67c   :  { %7601 = vmatpush1.bf16.msra.mxu0 %v11927_v15  ;;  %v11980_v15 = vld [vmem:[#allocation17 + $0x104] ss:$16 sps:$4 sm:$0xff]  }
 0x67d   :  { %7602 = vmatprep.subr.bf16.mxu0 %v11935_v24  ;;  %v11978_v24 = vld [vmem:[#allocation17 + $0x100] ss:$16 sps:$4 sm:$0xff]  }
 0x680   :  { %7603 = vmatpush2.bf16.msra.mxu0 %v11933_v27  ;;  %v11983_v27 = vld [vmem:[#allocation17 + $0xec] ss:$16 sps:$4 sm:$0xff]  }
 0x681   :  { %7604 = vmatprep.subr.bf16.mxu0 %v11941_v58  ;;  %v12031_v58 = vld [vmem:[#allocation19 + $0xe4] ss:$16 sps:$4 sm:$0xff]  }
 0x684   :  { %7605 = vmatpush2.bf16.msra.mxu0 %v11939_v28 }
 0x685   :  { %7606 = vmatprep.subr.bf16.mxu0 %v11947_v29 }
 0x688   :  { %7607 = vmatpush2.bf16.msra.mxu0 %v11945_v35 }
 0x689   :  { %7608 = vmatprep.subr.bf16.mxu0 %v11953_v39 }
 0x68c   :  { %7609 = vmatpush2.bf16.msra.mxu0 %v11951_v51 }
 0x68d   :  { %7610 = vmatprep.subr.bf16.mxu0 %v11959_v40 }
 0x690   :  { %7611 = vmatpush2.bf16.msra.mxu0 %v11957_v6 }
 0x691   :  { %7612 = vmatprep.subr.bf16.mxu0 %v11965_v44 }
 0x694   :  { %7613 = vmatpush2.bf16.msra.mxu0 %v11963_v61 }
 0x695   :  { %7614 = vmatprep.subr.bf16.mxu0 %v11971_v7  ;;  %v12040_v7 = vld [vmem:[#allocation19 + $0xcc] ss:$16 sps:$4 sm:$0xff]  }
 0x698   :  { %7615 = vmatpush2.bf16.msra.mxu0 %v11969_v46  ;;  %v12055_v46 = vld [vmem:[#allocation19 + $0x64] ss:$16 sps:$4 sm:$0xff]  }
 0x699   :  { %7616 = vmatprep.subr.bf16.mxu0 %v11977_v43  ;;  %v12046_v43 = vld [vmem:[#allocation19 + $0xac] ss:$16 sps:$4 sm:$0xff]  }
 0x69c   :  { %7617 = vmatpush2.bf16.msra.mxu0 %v11975_v20  ;;  %v12061_v20 = vld [vmem:[#allocation19 + $0x44] ss:$16 sps:$4 sm:$0xff]  }
 0x69d   :  { %8037 = vmatprep.subr.bf16.mxu0 %v11983_v27  ;;  %v12052_v27 = vld [vmem:[#allocation19 + $0x8c] ss:$16 sps:$4 sm:$0xff]  }
 0x71f   :  { %v7206_v54 = vpop.f32.mrf.mxu0 }
 0x720   :  { %v7215_v53 = vmax.f32 %v7206_v54, 0.0  ;;  %v11981_v54 = vld [vmem:[#allocation17 + $0xe8] ss:$16 sps:$4 sm:$0xff]  }
 0x721   :  { %v7208_v48 = vpop.f32.mrf.mxu0 }
 0x722   :  { %v7216_v22 = vmax.f32 %v7208_v48, 0.0 }
 0x723   :  { %v7210_v60 = vpop.f32.mrf.mxu0 }
 0x724   :  { %v7217_v52 = vmax.f32 %v7210_v60, 0.0  ;;  %v12029_v60 = vld [vmem:[#allocation19 + $0xe0] ss:$16 sps:$4 sm:$0xff]  }
 0x725   :  { %v7212_v16 = vpop.f32.mrf.mxu0 }
 0x726   :  { %v7218_v59 = vmax.f32 %v7212_v16, 0.0  ;;  %v7219_v23 = vpack.c.bf16 %v7217_v52, %v7215_v53  ;;  %v12035_v52 = vld [vmem:[#allocation19 + $0xc0] ss:$16 sps:$4 sm:$0xff]   ;;  %v12043_v16 = vld [vmem:[#allocation19 + $0xa4] ss:$16 sps:$4 sm:$0xff]  }
 0x727   :  { %v12041_v53 = vld [vmem:[#allocation19 + $0xa0] ss:$16 sps:$4 sm:$0xff]  }
 0x728   :  { %v7220_v31 = vpack.c.bf16 %v7218_v59, %v7216_v22  ;;  %v11987_v22 = vld [vmem:[#allocation17 + $0xa8] ss:$16 sps:$4 sm:$0xff]   ;;  %v11992_v59 = vld [vmem:[#allocation17 + $0x8c] ss:$16 sps:$4 sm:$0xff]  }
 0x72a   :  { %7413 = vmatprep.mubr.bf16.mxu1 %v7220_v31  ;;  %v12049_v31 = vld [vmem:[#allocation19 + $0x84] ss:$16 sps:$4 sm:$0xff]  }
 0x72b   :  { %7414 = vmatmul.mubr.bf16.vlgmr.msra.gmra.mxu1 %v7219_v23  ;;  %v11995_v23 = vld [vmem:[#allocation17 + $0x6c] ss:$16 sps:$4 sm:$0xff]  }
 0x72c   :  { %7995 = vmatpush1.bf16.msra.mxu1 %v11888_v19  ;;  %v11990_v19 = vld [vmem:[#allocation17 + $0x88] ss:$16 sps:$4 sm:$0xff]  }
 0x72d   :  { %7996 = vmatprep.subr.bf16.mxu1 %v11896_v17  ;;  %v12047_v17 = vld [vmem:[#allocation19 + $0x80] ss:$16 sps:$4 sm:$0xff]  }
 0x730   :  { %7997 = vmatpush1.bf16.msra.mxu1 %v11894_v36  ;;  %v11993_v36 = vld [vmem:[#allocation17 + $0x68] ss:$16 sps:$4 sm:$0xff]  }
 0x731   :  { %7998 = vmatprep.subr.bf16.mxu1 %v11902_v55  ;;  %v11998_v55 = vld [vmem:[#allocation17 + $0x4c] ss:$16 sps:$4 sm:$0xff]  }
 0x734   :  { %7999 = vmatpush1.bf16.msra.mxu1 %v11900_v49  ;;  %v11996_v49 = vld [vmem:[#allocation17 + $0x48] ss:$16 sps:$4 sm:$0xff]  }
 0x735   :  { %8000 = vmatprep.subr.bf16.mxu1 %v11908_v33  ;;  %v12001_v33 = vld [vmem:[#allocation17 + $0x2c] ss:$16 sps:$4 sm:$0xff]  }
 0x738   :  { %8001 = vmatpush1.bf16.msra.mxu1 %v11906_v30  ;;  %v11999_v30 = vld [vmem:[#allocation17 + $0x28] ss:$16 sps:$4 sm:$0xff]  }
 0x739   :  { %8002 = vmatprep.subr.bf16.mxu1 %v11914_v56  ;;  %v12004_v56 = vld [vmem:[#allocation17 + $0xc] ss:$16 sps:$4 sm:$0xff]  }
 0x73c   :  { %8003 = vmatpush1.bf16.msra.mxu1 %v11912_v34  ;;  %v12002_v34 = vld [vmem:[#allocation17 + $0x8] ss:$16 sps:$4 sm:$0xff]  }
 0x73d   :  { %8004 = vmatprep.subr.bf16.mxu1 %v11920_v50  ;;  %v12007_v50 = vld [vmem:[#allocation17 + $0x1ec] ss:$16 sps:$4 sm:$0xff]  }
 0x740   :  { %8005 = vmatpush1.bf16.msra.mxu1 %v11918_v26  ;;  %v12005_v26 = vld [vmem:[#allocation17 + $0x1e8] ss:$16 sps:$4 sm:$0xff]  }
 0x741   :  { %8006 = vmatprep.subr.bf16.mxu1 %v11926_v18  ;;  %v12010_v18 = vld [vmem:[#allocation17 + $0x1cc] ss:$16 sps:$4 sm:$0xff]  }
 0x744   :  { %8007 = vmatpush1.bf16.msra.mxu1 %v11924_v63  ;;  %v12008_v63 = vld [vmem:[#allocation17 + $0x1c8] ss:$16 sps:$4 sm:$0xff]  }
 0x745   :  { %8008 = vmatprep.subr.bf16.mxu1 %v11932_v12  ;;  %v12013_v12 = vld [vmem:[#allocation17 + $0x1ac] ss:$16 sps:$4 sm:$0xff]  }
 0x748   :  { %8009 = vmatpush1.bf16.msra.mxu1 %v11930_v4  ;;  %v12011_v4 = vld [vmem:[#allocation17 + $0x1a8] ss:$16 sps:$4 sm:$0xff]  }
 0x749   :  { %8010 = vmatprep.subr.bf16.mxu1 %v11938_v0  ;;  %v12016_v0 = vld [vmem:[#allocation17 + $0x18c] ss:$16 sps:$4 sm:$0xff]  }
 0x74c   :  { %8011 = vmatpush2.bf16.msra.mxu1 %v11936_v2  ;;  %v12014_v2 = vld [vmem:[#allocation17 + $0x188] ss:$16 sps:$4 sm:$0xff]  }
 0x74d   :  { %8012 = vmatprep.subr.bf16.mxu1 %v11944_v57  ;;  %v12019_v57 = vld [vmem:[#allocation17 + $0x16c] ss:$16 sps:$4 sm:$0xff]  }
 0x750   :  { %8013 = vmatpush2.bf16.msra.mxu1 %v11942_v62  ;;  %v12017_v62 = vld [vmem:[#allocation17 + $0x168] ss:$16 sps:$4 sm:$0xff]  }
 0x751   :  { %8014 = vmatprep.subr.bf16.mxu1 %v11950_v1  ;;  %v12022_v1 = vld [vmem:[#allocation17 + $0x14c] ss:$16 sps:$4 sm:$0xff]  }
 0x754   :  { %8015 = vmatpush2.bf16.msra.mxu1 %v11948_v3  ;;  %v12020_v3 = vld [vmem:[#allocation17 + $0x148] ss:$16 sps:$4 sm:$0xff]  }
 0x755   :  { %8016 = vmatprep.subr.bf16.mxu1 %v11956_v5  ;;  %v12025_v5 = vld [vmem:[#allocation17 + $0x12c] ss:$16 sps:$4 sm:$0xff]  }
 0x758   :  { %8017 = vmatpush2.bf16.msra.mxu1 %v11954_v8  ;;  %v12023_v8 = vld [vmem:[#allocation17 + $0x128] ss:$16 sps:$4 sm:$0xff]  }
 0x759   :  { %8018 = vmatprep.subr.bf16.mxu1 %v11962_v9  ;;  %v12028_v9 = vld [vmem:[#allocation17 + $0x10c] ss:$16 sps:$4 sm:$0xff]  }
 0x75c   :  { %8019 = vmatpush2.bf16.msra.mxu1 %v11960_v10  ;;  %v12026_v10 = vld [vmem:[#allocation17 + $0x108] ss:$16 sps:$4 sm:$0xff]  }
 0x75d   :  { %8020 = vmatprep.subr.bf16.mxu1 %v11968_v11  ;;  %v12034_v11 = vld [vmem:[#allocation19 + $0xec] ss:$16 sps:$4 sm:$0xff]  }
 0x760   :  { %8021 = vmatpush2.bf16.msra.mxu1 %v11966_v13  ;;  %v12032_v13 = vld [vmem:[#allocation19 + $0xe8] ss:$16 sps:$4 sm:$0xff]  }
 0x761   :  { %8022 = vmatprep.subr.bf16.mxu1 %v11974_v14  ;;  %v12053_v14 = vld [vmem:[#allocation19 + $0x60] ss:$16 sps:$4 sm:$0xff]  }
 0x764   :  { %8023 = vmatpush2.bf16.msra.mxu1 %v11972_v47  ;;  %v12038_v47 = vld [vmem:[#allocation19 + $0xc8] ss:$16 sps:$4 sm:$0xff]  }
 0x765   :  { %8024 = vmatprep.subr.bf16.mxu1 %v11980_v15  ;;  %v12059_v15 = vld [vmem:[#allocation19 + $0x40] ss:$16 sps:$4 sm:$0xff]  }
 0x768   :  { %8025 = vmatpush2.bf16.msra.mxu1 %v11978_v24  ;;  %v12044_v24 = vld [vmem:[#allocation19 + $0xa8] ss:$16 sps:$4 sm:$0xff]  }
 0x769   :  { %8400 = vmatprep.subr.bf16.mxu1 %v12031_v58  ;;  %v12067_v58 = vld [vmem:[#allocation19 + $0x24] ss:$16 sps:$4 sm:$0xff]  }
 0x7eb   :  { %v7415_v28 = vpop.f32.mrf.mxu1 }
 0x7ec   :  { %v13293_v44 = vadd.f32 %v7415_v28, %v13277_v42  ;;  %v11989_v42 = vld [vmem:[#allocation17 + $0xac] ss:$16 sps:$4 sm:$0xff]   ;;  %v12065_v28 = vld [vmem:[#allocation19 + $0x20] ss:$16 sps:$4 sm:$0xff]  }
 0x7ed   :  { %v7417_v29 = vpop.f32.mrf.mxu1 }
 0x7ee   :  { %v13287_v40 = vadd.f32 %v7417_v29, %v13273_v32  ;;  %v12037_v32 = vld [vmem:[#allocation19 + $0xc4] ss:$16 sps:$4 sm:$0xff]   ;;  %v12050_v29 = vld [vmem:[#allocation19 + $0x88] ss:$16 sps:$4 sm:$0xff]  }
 0x7ef   :  { %v7419_v35 = vpop.f32.mrf.mxu1 }
 0x7f0   :  { %v13284_v39 = vadd.f32 %v7419_v35, %v13271_v21  ;;  %v11986_v21 = vld [vmem:[#allocation17 + $0xcc] ss:$16 sps:$4 sm:$0xff]  }
 0x7f1   :  { %v7421_v51 = vpop.f32.mrf.mxu1  ;;  %v12058_v35 = vld [vmem:[#allocation19 + $0x6c] ss:$16 sps:$4 sm:$0xff]  }
 0x7f2   :  { %v13290_v6 = vadd.f32 %v7421_v51, %v13275_v25  ;;  %v13299_v48 = vpack.c.bf16 %v13284_v39, %v13293_v44  ;;  %v11984_v25 = vld [vmem:[#allocation17 + $0xc8] ss:$16 sps:$4 sm:$0xff]   ;;  %v12073_v51 = vld [vmem:[#allocation19 + $0x4] ss:$16 sps:$4 sm:$0xff]  }
 0x7f4   :  { %v7425_v61 = vpack.c.bf16 %v13290_v6, %v13287_v40 }
 0x7f6   :  { %7618 = vmatprep.mubr.bf16.mxu0 %v7425_v61  ;;  %8026 = vmatprep.mubr.bf16.mxu1 %v7425_v61 }
 0x7f7   :  { %7619 = vmatmul.mubr.bf16.vlgmr.msra.gmra.mxu0 %v13299_v48  ;;  %8027 = vmatmul.mubr.bf16.vlgmr.msra.gmra.mxu1 %v13299_v48 }
 0x7f8   :  { %8038 = vmatpush1.bf16.msra.mxu0 %v11981_v54  ;;  %8069 = vmatprep.mubr.bf16.mxu0 %v7425_v61  ;;  %v12071_v61 = vld [vmem:[#allocation19] ss:$16 sps:$4 sm:$0xff]   ;;  %v12056_v54 = vld [vmem:[#allocation19 + $0x68] ss:$16 sps:$4 sm:$0xff]  }
 0x7f9   :  { %8039 = vmatprep.subr.bf16.mxu0 %v11986_v21  ;;  %8401 = vmatpush1.bf16.msra.mxu1 %v12029_v60  ;;  %v12079_v21 = vld [vmem:[#allocation19 + $0x1e4] ss:$16 sps:$4 sm:$0xff]   ;;  %v12077_v60 = vld [vmem:[#allocation19 + $0x1e0] ss:$16 sps:$4 sm:$0xff]  }
 0x7fa   :  { %8402 = vmatprep.subr.bf16.mxu1 %v12037_v32  ;;  %v12062_v32 = vld [vmem:[#allocation19 + $0x48] ss:$16 sps:$4 sm:$0xff]  }
 0x7fc   :  { %8040 = vmatpush1.bf16.msra.mxu0 %v11984_v25  ;;  %v12070_v25 = vld [vmem:[#allocation19 + $0x2c] ss:$16 sps:$4 sm:$0xff]  }
 0x7fd   :  { %8041 = vmatprep.subr.bf16.mxu0 %v11989_v42  ;;  %8403 = vmatpush1.bf16.msra.mxu1 %v12035_v52  ;;  %v12085_v42 = vld [vmem:[#allocation19 + $0x1c4] ss:$16 sps:$4 sm:$0xff]   ;;  %v12083_v52 = vld [vmem:[#allocation19 + $0x1c0] ss:$16 sps:$4 sm:$0xff]  }
 0x7fe   :  { %8404 = vmatprep.subr.bf16.mxu1 %v12043_v16  ;;  %v12068_v16 = vld [vmem:[#allocation19 + $0x28] ss:$16 sps:$4 sm:$0xff]  }
 0x800   :  { %8042 = vmatpush1.bf16.msra.mxu0 %v11987_v22  ;;  %v12076_v22 = vld [vmem:[#allocation19 + $0xc] ss:$16 sps:$4 sm:$0xff]  }
 0x801   :  { %8043 = vmatprep.subr.bf16.mxu0 %v11992_v59  ;;  %8405 = vmatpush1.bf16.msra.mxu1 %v12041_v53  ;;  %v12091_v59 = vld [vmem:[#allocation19 + $0x1a4] ss:$16 sps:$4 sm:$0xff]   ;;  %v12089_v53 = vld [vmem:[#allocation19 + $0x1a0] ss:$16 sps:$4 sm:$0xff]  }
 0x802   :  { %8406 = vmatprep.subr.bf16.mxu1 %v12049_v31  ;;  %v12074_v31 = vld [vmem:[#allocation19 + $0x8] ss:$16 sps:$4 sm:$0xff]  }
 0x804   :  { %8044 = vmatpush1.bf16.msra.mxu0 %v11990_v19  ;;  %v12082_v19 = vld [vmem:[#allocation19 + $0x1ec] ss:$16 sps:$4 sm:$0xff]  }
 0x805   :  { %8045 = vmatprep.subr.bf16.mxu0 %v11995_v23  ;;  %8407 = vmatpush1.bf16.msra.mxu1 %v12047_v17  ;;  %v12097_v23 = vld [vmem:[#allocation19 + $0x184] ss:$16 sps:$4 sm:$0xff]   ;;  %v12095_v17 = vld [vmem:[#allocation19 + $0x180] ss:$16 sps:$4 sm:$0xff]  }
 0x806   :  { %8408 = vmatprep.subr.bf16.mxu1 %v12055_v46  ;;  %v1278_v46 = vld [vmem:[#allocation16] sm:$0x3] }
 0x808   :  { %8046 = vmatpush1.bf16.msra.mxu0 %v11993_v36  ;;  %v12080_v36 = vld [vmem:[#allocation19 + $0x1e8] ss:$16 sps:$4 sm:$0xff]  }
 0x809   :  { %8047 = vmatprep.subr.bf16.mxu0 %v11998_v55  ;;  %8409 = vmatpush1.bf16.msra.mxu1 %v12053_v14  ;;  %v12103_v55 = vld [vmem:[#allocation19 + $0x164] ss:$16 sps:$4 sm:$0xff]  }
 0x80a   :  { %8410 = vmatprep.subr.bf16.mxu1 %v12061_v20 }
 0x80c   :  { %8048 = vmatpush1.bf16.msra.mxu0 %v11996_v49  ;;  %v12088_v49 = vld [vmem:[#allocation19 + $0x1cc] ss:$16 sps:$4 sm:$0xff]  }
 0x80d   :  { %8049 = vmatprep.subr.bf16.mxu0 %v12001_v33  ;;  %8411 = vmatpush1.bf16.msra.mxu1 %v12059_v15  ;;  %v12101_v33 = vld [vmem:[#allocation19 + $0x160] ss:$16 sps:$4 sm:$0xff]  }
 0x80e   :  { %8412 = vmatprep.subr.bf16.mxu1 %v12067_v58 }
 0x810   :  { %8050 = vmatpush1.bf16.msra.mxu0 %v11999_v30  ;;  %v12109_v30 = vld [vmem:[#allocation19 + $0x144] ss:$16 sps:$4 sm:$0xff]  }
 0x811   :  { %8051 = vmatprep.subr.bf16.mxu0 %v12004_v56  ;;  %8413 = vmatpush1.bf16.msra.mxu1 %v12065_v28  ;;  %v12086_v56 = vld [vmem:[#allocation19 + $0x1c8] ss:$16 sps:$4 sm:$0xff]  }
 0x812   :  { %8414 = vmatprep.subr.bf16.mxu1 %v12073_v51 }
 0x814   :  { %8052 = vmatpush1.bf16.msra.mxu0 %v12002_v34  ;;  %v12094_v34 = vld [vmem:[#allocation19 + $0x1ac] ss:$16 sps:$4 sm:$0xff]  }
 0x815   :  { %8053 = vmatprep.subr.bf16.mxu0 %v12007_v50  ;;  %8415 = vmatpush1.bf16.msra.mxu1 %v12071_v61  ;;  %v12107_v50 = vld [vmem:[#allocation19 + $0x140] ss:$16 sps:$4 sm:$0xff]  }
 0x816   :  { %8416 = vmatprep.subr.bf16.mxu1 %v12079_v21 }
 0x818   :  { %8054 = vmatpush2.bf16.msra.mxu0 %v12005_v26  ;;  %v12115_v26 = vld [vmem:[#allocation19 + $0x124] ss:$16 sps:$4 sm:$0xff]  }
 0x819   :  { %8055 = vmatprep.subr.bf16.mxu0 %v12010_v18  ;;  %8417 = vmatpush2.bf16.msra.mxu1 %v12077_v60  ;;  %v12092_v18 = vld [vmem:[#allocation19 + $0x1a8] ss:$16 sps:$4 sm:$0xff]  }
 0x81a   :  { %8418 = vmatprep.subr.bf16.mxu1 %v12085_v42 }
 0x81c   :  { %8056 = vmatpush2.bf16.msra.mxu0 %v12008_v63  ;;  %v12100_v63 = vld [vmem:[#allocation19 + $0x18c] ss:$16 sps:$4 sm:$0xff]  }
 0x81d   :  { %8057 = vmatprep.subr.bf16.mxu0 %v12013_v12  ;;  %8419 = vmatpush2.bf16.msra.mxu1 %v12083_v52  ;;  %v12113_v12 = vld [vmem:[#allocation19 + $0x120] ss:$16 sps:$4 sm:$0xff]  }
 0x81e   :  { %8420 = vmatprep.subr.bf16.mxu1 %v12091_v59 }
 0x820   :  { %8058 = vmatpush2.bf16.msra.mxu0 %v12011_v4  ;;  %v12121_v4 = vld [vmem:[#allocation19 + $0x104] ss:$16 sps:$4 sm:$0xff]  }
 0x821   :  { %8059 = vmatprep.subr.bf16.mxu0 %v12016_v0  ;;  %8421 = vmatpush2.bf16.msra.mxu1 %v12089_v53  ;;  %v12098_v0 = vld [vmem:[#allocation19 + $0x188] ss:$16 sps:$4 sm:$0xff]  }
 0x822   :  { %8422 = vmatprep.subr.bf16.mxu1 %v12097_v23 }
 0x824   :  { %8060 = vmatpush2.bf16.msra.mxu0 %v12014_v2  ;;  %v12106_v2 = vld [vmem:[#allocation19 + $0x16c] ss:$16 sps:$4 sm:$0xff]  }
 0x825   :  { %8061 = vmatprep.subr.bf16.mxu0 %v12019_v57  ;;  %8423 = vmatpush2.bf16.msra.mxu1 %v12095_v17  ;;  %v12119_v57 = vld [vmem:[#allocation19 + $0x100] ss:$16 sps:$4 sm:$0xff]  }
 0x826   :  { %8424 = vmatprep.subr.bf16.mxu1 %v12103_v55 }
 0x828   :  { %8062 = vmatpush2.bf16.msra.mxu0 %v12017_v62  ;;  %v12104_v62 = vld [vmem:[#allocation19 + $0x168] ss:$16 sps:$4 sm:$0xff]  }
 0x829   :  { %8063 = vmatprep.subr.bf16.mxu0 %v12022_v1  ;;  %8425 = vmatpush2.bf16.msra.mxu1 %v12101_v33  ;;  %v12112_v1 = vld [vmem:[#allocation19 + $0x14c] ss:$16 sps:$4 sm:$0xff]  }
 0x82a   :  { %8426 = vmatprep.subr.bf16.mxu1 %v12109_v30 }
 0x82c   :  { %8064 = vmatpush2.bf16.msra.mxu0 %v12020_v3  ;;  %v12110_v3 = vld [vmem:[#allocation19 + $0x148] ss:$16 sps:$4 sm:$0xff]  }
 0x82d   :  { %8065 = vmatprep.subr.bf16.mxu0 %v12025_v5  ;;  %8427 = vmatpush2.bf16.msra.mxu1 %v12107_v50  ;;  %v12118_v5 = vld [vmem:[#allocation19 + $0x12c] ss:$16 sps:$4 sm:$0xff]  }
 0x82e   :  { %8428 = vmatprep.subr.bf16.mxu1 %v12115_v26 }
 0x830   :  { %8066 = vmatpush2.bf16.msra.mxu0 %v12023_v8  ;;  %v12116_v8 = vld [vmem:[#allocation19 + $0x128] ss:$16 sps:$4 sm:$0xff]  }
 0x831   :  { %8067 = vmatprep.subr.bf16.mxu0 %v12028_v9  ;;  %8429 = vmatpush2.bf16.msra.mxu1 %v12113_v12  ;;  %v12124_v9 = vld [vmem:[#allocation19 + $0x10c] ss:$16 sps:$4 sm:$0xff]  }
 0x832   :  { %8430 = vmatprep.subr.bf16.mxu1 %v12121_v4 }
 0x834   :  { %8068 = vmatpush2.bf16.msra.mxu0 %v12026_v10  ;;  %v12122_v10 = vld [vmem:[#allocation19 + $0x108] ss:$16 sps:$4 sm:$0xff]  }
 0x835   :  { %8443 = vmatprep.subr.bf16.mxu0 %v12034_v11  ;;  %8431 = vmatpush2.bf16.msra.mxu1 %v12119_v57  ;;  %v7630_v11 = vlaneseq }
 0x837   :  { %8070 = vmatmul.mubr.bf16.vlgmr.msra.gmra.mxu0 %v13299_v48  ;;  %v12064_v48 = vld [vmem:[#allocation19 + $0x4c] ss:$16 sps:$4 sm:$0xff]  }
 0x838   :  { %8444 = vmatpush1.bf16.msra.mxu0 %v12032_v13  ;;  %v7631_v13 = vshrl.u32 %v7630_v11, 7  ;;  %v12132_v11 = vld [vmem:[#allocation20 + $0x20] sm:$0xff]  }
 0x839   :  { %8445 = vmatprep.subr.bf16.mxu0 %v12040_v7 }
 0x83a   :  { %v7632_v7 = vsub.s32 0, %v7631_v13  ;;  %v7636_v14 = vsub.s32 1, %v7631_v13  ;;  %v12133_v13 = vld [vmem:[#allocation20 + $0x58] sm:$0xff]  }
 0x83c   :  { %8446 = vmatpush1.bf16.msra.mxu0 %v12038_v47  ;;  %v7633_v47 = vrot.slane %v1278_v46, %v7632_v7  ;;  %v7637_v15 = vrot.slane %v1278_v46, %v7636_v14  ;;  %v12134_v7 = vld [vmem:[#allocation20 + $0x18] sm:$0xff]   ;;  %v12135_v46 = vld [vmem:[#allocation20 + $0x50] sm:$0xff]  }
 0x83d   :  { %8447 = vmatprep.subr.bf16.mxu0 %v12046_v43  ;;  %v12136_v14 = vld [vmem:[#allocation20 + $0x10] sm:$0xff]  }
 0x840   :  { %8448 = vmatpush1.bf16.msra.mxu0 %v12044_v24 }
 0x841   :  { %8449 = vmatprep.subr.bf16.mxu0 %v12052_v27 }
 0x844   :  { %8450 = vmatpush1.bf16.msra.mxu0 %v12050_v29 }
 0x845   :  { %8451 = vmatprep.subr.bf16.mxu0 %v12058_v35 }
 0x848   :  { %8452 = vmatpush1.bf16.msra.mxu0 %v12056_v54 }
 0x849   :  { %8453 = vmatprep.subr.bf16.mxu0 %v12064_v48 }
 0x84c   :  { %8454 = vmatpush1.bf16.msra.mxu0 %v12062_v32 }
 0x84d   :  { %8455 = vmatprep.subr.bf16.mxu0 %v12070_v25 }
 0x850   :  { %8456 = vmatpush1.bf16.msra.mxu0 %v12068_v16 }
 0x851   :  { %8457 = vmatprep.subr.bf16.mxu0 %v12076_v22 }
 0x854   :  { %8458 = vmatpush1.bf16.msra.mxu0 %v12074_v31 }
 0x855   :  { %8459 = vmatprep.subr.bf16.mxu0 %v12082_v19 }
 0x858   :  { %8460 = vmatpush2.bf16.msra.mxu0 %v12080_v36 }
 0x859   :  { %8461 = vmatprep.subr.bf16.mxu0 %v12088_v49 }
 0x85c   :  { %8462 = vmatpush2.bf16.msra.mxu0 %v12086_v56 }
 0x85d   :  { %8463 = vmatprep.subr.bf16.mxu0 %v12094_v34 }
 0x860   :  { %8464 = vmatpush2.bf16.msra.mxu0 %v12092_v18 }
 0x861   :  { %8465 = vmatprep.subr.bf16.mxu0 %v12100_v63 }
 0x864   :  { %8466 = vmatpush2.bf16.msra.mxu0 %v12098_v0 }
 0x865   :  { %8467 = vmatprep.subr.bf16.mxu0 %v12106_v2 }
 0x868   :  { %8468 = vmatpush2.bf16.msra.mxu0 %v12104_v62  ;;  %v12125_v62 = vld [vmem:[#allocation20 + $0x78] sm:$0xff]  }
 0x869   :  { %8469 = vmatprep.subr.bf16.mxu0 %v12112_v1  ;;  %v12126_v1 = vld [vmem:[#allocation20 + $0x38] sm:$0xff]   ;;  %11055 = vmatprep.subr.bf16.mxu1 %v12125_v62  ;;  %v12144_v62 = vld [vmem:[#allocation22 + $0x20] sm:$0xff]  }
 0x86c   :  { %8470 = vmatpush2.bf16.msra.mxu0 %v12110_v3  ;;  %v12127_v3 = vld [vmem:[#allocation20 + $0x70] sm:$0xff]  }
 0x86d   :  { %8471 = vmatprep.subr.bf16.mxu0 %v12118_v5  ;;  %v12128_v5 = vld [vmem:[#allocation20 + $0x30] sm:$0xff]  }
 0x870   :  { %8472 = vmatpush2.bf16.msra.mxu0 %v12116_v8  ;;  %v12129_v8 = vld [vmem:[#allocation20 + $0x68] sm:$0xff]  }
 0x871   :  { %8473 = vmatprep.subr.bf16.mxu0 %v12124_v9  ;;  %v12130_v9 = vld [vmem:[#allocation20 + $0x28] sm:$0xff]  }
 0x874   :  { %8474 = vmatpush2.bf16.msra.mxu0 %v12122_v10  ;;  %v12131_v10 = vld [vmem:[#allocation20 + $0x60] sm:$0xff]  }
 0x8b7   :  { %v7620_v43 = vpop.f32.mrf.mxu0  ;;  %v8028_v30 = vpop.f32.mrf.mxu1 }
 0x8b8   :  { %v7621_v20 = vadd.f32 %v7620_v43, %v13204_v41  ;;  %v12138_v43 = vld [vmem:[#allocation20 + $0x8] sm:$0xff]  }
 0x8b9   :  { %v7622_v24 = vpop.f32.mrf.mxu0  ;;  %v8030_v56 = vpop.f32.mrf.mxu1 }
 0x8ba   :  { %v7640_v27 = vadd.f32 %v7633_v47, %v7621_v20  ;;  %v7623_v58 = vadd.f32 %v7622_v24, %v13209_v38  ;;  %v12139_v20 = vld [vmem:[#allocation20 + $0x40] sm:$0xff]   ;;  %v12845_v24 = vmov 0.0  }
 0x8bb   :  { %v7624_v28 = vpop.f32.mrf.mxu0  ;;  %v8032_v34 = vpop.f32.mrf.mxu1  ;;  %11173 = vmatprep.subr.bf16.mxu0 %v12845_v24 }
 0x8bc   :  { %v10784_v29 = vmul.f32 -1.442695, %v7640_v27  ;;  %v7641_v35 = vadd.f32 %v7637_v15, %v7623_v58  ;;  %v7625_v51 = vadd.f32 %v7624_v28, %v13212_v45 }
 0x8bd   :  { %v7626_v61 = vpop.f32.mrf.mxu0 }
 0x8be   :  { %12293 = vpow2.f32 %v10784_v29  ;;  %v10785_v54 = vmul.f32 -1.442695, %v7641_v35  ;;  %v7642_v48 = vadd.f32 %v7633_v47, %v7625_v51  ;;  %v7627_v21 = vadd.f32 %v7626_v61, %v13215_v37  ;;  %v12137_v47 = vld [vmem:[#allocation20 + $0x48] sm:$0xff]  }
 0x8c0   :  { %12295 = vpow2.f32 %v10785_v54  ;;  %v10786_v60 = vmul.f32 -1.442695, %v7642_v48  ;;  %v7643_v32 = vadd.f32 %v7637_v15, %v7627_v21  ;;  %v12140_v15 = vld [vmem:[#allocation20] sm:$0xff]  }
 0x8c2   :  { %12297 = vpow2.f32 %v10786_v60  ;;  %v10787_v41 = vmul.f32 -1.442695, %v7643_v32 }
 0x8c4   :  { %12299 = vpow2.f32 %v10787_v41 }
 0x8cb   :  { %v12294_v25 = vpop.eup %12293 }
 0x8cc   :  { %v7656_v42 = vadd.f32 1.0, %v12294_v25 }
 0x8cd   :  { %v12296_v38 = vpop.eup %12295 }
 0x8ce   :  { %v7657_v52 = vadd.f32 1.0, %v12296_v38  ;;  %12301 = vrcp.f32 %v7656_v42 }
 0x8cf   :  { %v12298_v16 = vpop.eup %12297 }
 0x8d0   :  { %v7658_v22 = vadd.f32 1.0, %v12298_v16  ;;  %12303 = vrcp.f32 %v7657_v52 }
 0x8d1   :  { %v12300_v45 = vpop.eup %12299 }
 0x8d2   :  { %12305 = vrcp.f32 %v7658_v22  ;;  %v7659_v59 = vadd.f32 1.0, %v12300_v45 }
 0x8d4   :  { %12307 = vrcp.f32 %v7659_v59 }
 0x8db   :  { %v12302_v53 = vpop.eup %12301 }
 0x8dc   :  { %v7668_v19 = vmul.f32 %v12302_v53, %v13293_v44  ;;  %v8034_v44 = vpop.f32.mrf.mxu1 }
 0x8dd   :  { %v12304_v37 = vpop.eup %12303 }
 0x8de   :  { %v7669_v36 = vmul.f32 %v12304_v37, %v13287_v40 }
 0x8df   :  { %v12306_v31 = vpop.eup %12305 }
 0x8e0   :  { %v7670_v23 = vmul.f32 %v12306_v31, %v13284_v39 }
 0x8e1   :  { %v12308_v17 = vpop.eup %12307 }
 0x8e2   :  { %v7671_v55 = vmul.f32 %v12308_v17, %v13290_v6  ;;  %v7672_v49 = vpack.c.bf16 %v7670_v23, %v7668_v19 }
 0x8e4   :  { %v7673_v33 = vpack.c.bf16 %v7671_v55, %v7669_v36 }
 0x8e6   :  { %8432 = vmatprep.mubr.bf16.mxu1 %v7673_v33  ;;  %8475 = vmatprep.mubr.bf16.mxu0 %v7673_v33 }
 0x8e7   :  { %8433 = vmatmul.mubr.bf16.vlgmr.msra.gmra.mxu1 %v7672_v49  ;;  %8476 = vmatmul.mubr.bf16.vlgmr.msra.gmra.mxu0 %v7672_v49 }
 0x8e8   :  { %11056 = vmatpush3.bf16.msra.mxu1 %v12126_v1  ;;  %v12145_v1 = vld [vmem:[#allocation22 + $0x18] sm:$0xff]   ;;  %11189 = vmatprep.mubr.msk.bf16.mxu0 %vm12846_vm0, %v12845_v24 }
 0x8e9   :  { %11057 = vmatprep.subr.bf16.mxu1 %v12127_v3  ;;  %v12146_v3 = vld [vmem:[#allocation22 + $0x10] sm:$0xff]  }
 0x8ec   :  { %11058 = vmatpush3.bf16.msra.mxu1 %v12128_v5  ;;  %v12147_v5 = vld [vmem:[#allocation22 + $0x8] sm:$0xff]  }
 0x8ed   :  { %11059 = vmatprep.subr.bf16.mxu1 %v12129_v8  ;;  %v12148_v8 = vld [vmem:[#allocation22] sm:$0xff]  }
 0x8f0   :  { %11060 = vmatpush3.bf16.msra.mxu1 %v12130_v9  ;;  %v12149_v9 = vld [vmem:[#allocation23 + $0x38] sm:$0xff]  }
 0x8f1   :  { %11061 = vmatprep.subr.bf16.mxu1 %v12131_v10  ;;  %11174 = vmatpush3.bf16.msra.mxu0 %v12149_v9  ;;  %v12150_v10 = vld [vmem:[#allocation23 + $0x30] sm:$0xff]   ;;  %v12192_v9 = vld [vmem:[#allocation28 + $0xc8] ss:$16 sps:$4 sm:$0xff]  }
 0x8f2   :  { %11175 = vmatprep.subr.bf16.mxu0 %v12845_v24 }
 0x8f4   :  { %11062 = vmatpush3.bf16.msra.mxu1 %v12132_v11  ;;  %v12151_v11 = vld [vmem:[#allocation23 + $0x28] sm:$0xff]  }
 0x8f5   :  { %11063 = vmatprep.subr.bf16.mxu1 %v12133_v13  ;;  %11176 = vmatpush3.bf16.msra.mxu0 %v12150_v10  ;;  %v12152_v13 = vld [vmem:[#allocation23 + $0x20] sm:$0xff]  }
 0x8f6   :  { %11177 = vmatprep.subr.bf16.mxu0 %v12845_v24  ;;  %v12197_v10 = vld [vmem:[#allocation28 + $0xac] ss:$16 sps:$4 sm:$0xff]  }
 0x8f7   :  { %v8071_v50 = vpop.f32.mrf.mxu0 }
 0x8f8   :  { %v8500_v26 = vmul.f32 %v8071_v50, %v8030_v56  ;;  %v8488_v63 = vmul.f32 %v8071_v50, %v8028_v30  ;;  %11064 = vmatpush3.bf16.msra.mxu1 %v12134_v7  ;;  %v12153_v7 = vld [vmem:[#allocation23 + $0x18] sm:$0xff]  }
 0x8f9   :  { %v8073_v18 = vpop.f32.mrf.mxu0  ;;  %11065 = vmatprep.subr.bf16.mxu1 %v12135_v46  ;;  %11178 = vmatpush3.bf16.msra.mxu0 %v12151_v11  ;;  %v12154_v46 = vld [vmem:[#allocation23 + $0x10] sm:$0xff]   ;;  %v12195_v11 = vld [vmem:[#allocation28 + $0xa8] ss:$16 sps:$4 sm:$0xff]  }
 0x8fa   :  { %8502 = vadd.xlane.f32.xlu0 %v8500_v26  ;;  %v8506_v40 = vmul.f32 %v8073_v18, %v8030_v56  ;;  %v8494_v0 = vmul.f32 %v8073_v18, %v8028_v30  ;;  %11179 = vmatprep.subr.bf16.mxu0 %v12845_v24 }
 0x8fb   :  { %v8075_v39 = vpop.f32.mrf.mxu0 }
 0x8fc   :  { %v8501_v12 = vmul.f32 %v8075_v39, %v8034_v44  ;;  %v8489_v6 = vmul.f32 %v8075_v39, %v8032_v34  ;;  %11066 = vmatpush3.bf16.msra.mxu1 %v12136_v14 }
 0x8fd   :  { %v8077_v4 = vpop.f32.mrf.mxu0  ;;  %11067 = vmatprep.subr.bf16.mxu1 %v12137_v47  ;;  %11180 = vmatpush3.bf16.msra.mxu0 %v12152_v13  ;;  %v12200_v13 = vld [vmem:[#allocation28 + $0x8c] ss:$16 sps:$4 sm:$0xff]  }
 0x8fe   :  { %8490 = vadd.xlane.f32.xlu0 %v8488_v63  ;;  %8504 = vadd.xlane.f32.xlu1 %v8501_v12  ;;  %v8507_v2 = vmul.f32 %v8077_v4, %v8034_v44  ;;  %v8495_v57 = vmul.f32 %v8077_v4, %v8032_v34  ;;  %v12141_v4 = vld [vmem:[#allocation22 + $0x38] sm:$0xff]  }
 0x8ff   :  { %11181 = vmatprep.subr.bf16.mxu0 %v12845_v24 }
 0x900   :  { %11068 = vmatpush3.bf16.msra.mxu1 %v12138_v43 }
 0x901   :  { %11069 = vmatprep.subr.bf16.mxu1 %v12139_v20  ;;  %11182 = vmatpush3.bf16.msra.mxu0 %v12153_v7  ;;  %v12198_v7 = vld [vmem:[#allocation28 + $0x88] ss:$16 sps:$4 sm:$0xff]  }
 0x902   :  { %8508 = vadd.xlane.f32.xlu0 %v8506_v40  ;;  %8492 = vadd.xlane.f32.xlu1 %v8489_v6 }
 0x903   :  { %11183 = vmatprep.subr.bf16.mxu0 %v12845_v24 }
 0x904   :  { %11070 = vmatpush3.bf16.msra.mxu1 %v12140_v15 }
 0x905   :  { %11153 = vmatprep.subr.bf16.mxu1 %v12845_v24  ;;  %11184 = vmatpush3.bf16.msra.mxu0 %v12154_v46  ;;  %v12203_v46 = vld [vmem:[#allocation28 + $0x6c] ss:$16 sps:$4 sm:$0xff]  }
 0x906   :  { %8496 = vadd.xlane.f32.xlu0 %v8494_v0  ;;  %8510 = vadd.xlane.f32.xlu1 %v8507_v2  ;;  %v12142_v2 = vld [vmem:[#allocation22 + $0x30] sm:$0xff]  }
 0x907   :  { %11185 = vmatprep.subr.bf16.mxu0 %v12845_v24 }
 0x90a   :  { %8498 = vadd.xlane.f32.xlu1 %v8495_v57  ;;  %v12143_v57 = vld [vmem:[#allocation22 + $0x28] sm:$0xff]  }
 0x983   :  { %v8503_v27 = vpop.xlane.xlu0 %8502 }
 0x987   :  { %v8491_v58 = vpop.xlane.xlu0 %8490  ;;  %v8505_v28 = vpop.xlane.xlu1 %8504 }
 0x98b   :  { %v8509_v29 = vpop.xlane.xlu0 %8508  ;;  %v8493_v35 = vpop.xlane.xlu1 %8492 }
 0x98c   :  { %v8526_v51 = vsub.f32 %v8509_v29, %v8503_v27 }
 0x98e   :  { %v10918_v61 = vmul.f32 -1.442695, %v8526_v51 }
 0x98f   :  { %v8497_v54 = vpop.xlane.xlu0 %8496  ;;  %v8511_v48 = vpop.xlane.xlu1 %8510 }
 0x990   :  { %12309 = vpow2.f32 %v10918_v61  ;;  %v8512_v21 = vsub.f32 %v8497_v54, %v8491_v58  ;;  %v8527_v60 = vsub.f32 %v8511_v48, %v8505_v28  ;;  %v12155_v54 = vld [vmem:[#allocation23 + $0x8] sm:$0xff]   ;;  %v12156_v48 = vld [vmem:[#allocation23] sm:$0xff]  }
 0x991   :  { %11186 = vmatpush3.bf16.msra.mxu0 %v12155_v54  ;;  %v12217_v54 = vld [vmem:[#allocation29 + $0x90] ss:$12 sps:$4 sm:$0xff]  }
 0x992   :  { %v10916_v32 = vmul.f32 -1.442695, %v8512_v21  ;;  %v10919_v41 = vmul.f32 -1.442695, %v8527_v60  ;;  %11187 = vmatprep.subr.bf16.mxu0 %v12845_v24  ;;  %v12157_v21 = vld [vmem:[#allocation25 + $0x38] sm:$0xff]  }
 0x993   :  { %v8499_v25 = vpop.xlane.xlu1 %8498  ;;  %v12160_v60 = vld [vmem:[#allocation28 + $0xe4] ss:$16 sps:$4 sm:$0xff]  }
 0x994   :  { %12311 = vpow2.f32 %v10916_v32  ;;  %v8513_v42 = vsub.f32 %v8499_v25, %v8493_v35  ;;  %v12161_v32 = vld [vmem:[#allocation25 + $0x30] sm:$0xff]   ;;  %v12169_v25 = vld [vmem:[#allocation25 + $0x20] sm:$0xff]  }
 0x995   :  { %12313 = vpow2.f32 %v10919_v41  ;;  %11188 = vmatpush3.bf16.msra.mxu0 %v12156_v48  ;;  %v12165_v41 = vld [vmem:[#allocation25 + $0x28] sm:$0xff]  }
 0x996   :  { %v10917_v38 = vmul.f32 -1.442695, %v8513_v42  ;;  %9142 = vmatprep.subr.bf16.mxu0 %v12160_v60  ;;  %v12173_v42 = vld [vmem:[#allocation25 + $0x18] sm:$0xff]  }
 0x997   :  { %v12220_v48 = vld [vmem:[#allocation29 + $0x98] ss:$12 sps:$4 sm:$0xff]  }
 0x998   :  { %12315 = vpow2.f32 %v10917_v38  ;;  %v12177_v38 = vld [vmem:[#allocation25 + $0x10] sm:$0xff]   ;;  %v12221_v60 = vld [vmem:[#allocation29 + $0x78] ss:$12 sps:$4 sm:$0xff]  }
 0x99d   :  { %v12310_v52 = vpop.eup %12309 }
 0x99e   :  { %v8534_v16 = vadd.f32 1.0, %v12310_v52 }
 0x9a0   :  { %12317 = vrcp.f32 %v8534_v16 }
 0x9a1   :  { %v12312_v22 = vpop.eup %12311 }
 0x9a2   :  { %v12314_v45 = vpop.eup %12313  ;;  %v8520_v59 = vadd.f32 1.0, %v12312_v22 }
 0x9a3   :  { %v8535_v53 = vadd.f32 1.0, %v12314_v45 }
 0x9a4   :  { %12319 = vrcp.f32 %v8520_v59 }
 0x9a5   :  { %v12316_v37 = vpop.eup %12315  ;;  %12321 = vrcp.f32 %v8535_v53 }
 0x9a6   :  { %v8521_v31 = vadd.f32 1.0, %v12316_v37  ;;  %v12158_v37 = vld [vmem:[#allocation28 + $0xe0] ss:$16 sps:$4 sm:$0xff]  }
 0x9a7   :  { %v8434_v19 = vpop.f32.mrf.mxu1  ;;  %v8477_v14 = vpop.f32.mrf.mxu0 }
 0x9a8   :  { %12323 = vrcp.f32 %v8521_v31 }
 0x9a9   :  { %v8436_v23 = vpop.f32.mrf.mxu1  ;;  %v13332_v20 = vpop.f32.mrf.mxu0 }
 0x9aa   :  { %v8486_v36 = vsub.f32 %v8436_v23, %v8434_v19  ;;  %v12162_v23 = vld [vmem:[#allocation28 + $0xc0] ss:$16 sps:$4 sm:$0xff]  }
 0x9ab   :  { %v8438_v17 = vpop.f32.mrf.mxu1  ;;  %v8481_v29 = vpop.f32.mrf.mxu0 }
 0x9ad   :  { %v8440_v55 = vpop.f32.mrf.mxu1  ;;  %v12318_v49 = vpop.eup %12317 }
 0x9ae   :  { %v8487_v33 = vsub.f32 %v8440_v55, %v8438_v17  ;;  %v8544_v56 = vmul.f32 %v12318_v49, %v8486_v36  ;;  %v12172_v55 = vld [vmem:[#allocation28 + $0x84] ss:$16 sps:$4 sm:$0xff]   ;;  %v12170_v49 = vld [vmem:[#allocation28 + $0x80] ss:$16 sps:$4 sm:$0xff]  }
 0x9b0   :  { %v8546_v44 = vadd.f32 %v8544_v56, %v8434_v19  ;;  %v12180_v56 = vld [vmem:[#allocation28 + $0x44] ss:$16 sps:$4 sm:$0xff]  }
 0x9b1   :  { %v12320_v30 = vpop.eup %12319 }
 0x9b2   :  { %v12322_v34 = vpop.eup %12321  ;;  %v8540_v26 = vmul.f32 %v12320_v30, %v8486_v36  ;;  %v12166_v36 = vld [vmem:[#allocation28 + $0xa0] ss:$16 sps:$4 sm:$0xff]  }
 0x9b3   :  { %v8545_v50 = vmul.f32 %v12322_v34, %v8487_v33  ;;  %v12174_v30 = vld [vmem:[#allocation28 + $0x60] ss:$16 sps:$4 sm:$0xff]  }
 0x9b4   :  { %v8542_v40 = vadd.f32 %v8540_v26, %v8434_v19  ;;  %v12164_v19 = vld [vmem:[#allocation28 + $0xc4] ss:$16 sps:$4 sm:$0xff]   ;;  %v12178_v34 = vld [vmem:[#allocation28 + $0x40] ss:$16 sps:$4 sm:$0xff]  }
 0x9b5   :  { %v12324_v18 = vpop.eup %12323  ;;  %v8547_v39 = vadd.f32 %v8545_v50, %v8438_v17  ;;  %v12181_v50 = vld [vmem:[#allocation25 + $0x8] sm:$0xff]  }
 0x9b6   :  { %v8541_v63 = vmul.f32 %v12324_v18, %v8487_v33  ;;  %v12176_v33 = vld [vmem:[#allocation28 + $0x64] ss:$16 sps:$4 sm:$0xff]   ;;  %v12182_v18 = vld [vmem:[#allocation28 + $0x20] ss:$16 sps:$4 sm:$0xff]  }
 0x9b7   :  { %v8549_v12 = vpack.c.bf16 %v8547_v39, %v8546_v44  ;;  %v12184_v26 = vld [vmem:[#allocation28 + $0x24] ss:$16 sps:$4 sm:$0xff]  }
 0x9b8   :  { %v8543_v6 = vadd.f32 %v8541_v63, %v8438_v17  ;;  %v12168_v17 = vld [vmem:[#allocation28 + $0xa4] ss:$16 sps:$4 sm:$0xff]   ;;  %v12186_v63 = vld [vmem:[#allocation28] ss:$16 sps:$4 sm:$0xff]  }
 0x9b9   :  { %8678 = vmatprep.mubr.bf16.mxu1 %v8549_v12  ;;  %v12185_v44 = vld [vmem:[#allocation25] sm:$0xff]  }
 0x9ba   :  { %v8548_v0 = vpack.c.bf16 %v8543_v6, %v8542_v40  ;;  %v12188_v39 = vld [vmem:[#allocation28 + $0x4] ss:$16 sps:$4 sm:$0xff]   ;;  %v12191_v12 = vld [vmem:[#allocation28 + $0xec] ss:$16 sps:$4 sm:$0xff]   ;;  %v12847_v40 = vmov 0   ;;  %v13350_v6 = vpop.f32.mrf.mxu0 }
 0x9bc   :  { %8679 = vmatmul.mubr.bf16.vlgmr.msra.gmra.mxu1 %v8548_v0 }
 0x9bd   :  { %11154 = vmatpush3.bf16.msra.mxu1 %v12141_v4  ;;  %11169 = vmatprep.mubr.msk.bf16.mxu1 %vm12846_vm0, %v12845_v24 }
 0x9be   :  { %11155 = vmatprep.subr.bf16.mxu1 %v12845_v24 }
 0x9c1   :  { %11156 = vmatpush3.bf16.msra.mxu1 %v12142_v2 }
 0x9c2   :  { %11157 = vmatprep.subr.bf16.mxu1 %v12845_v24 }
 0x9c5   :  { %11158 = vmatpush3.bf16.msra.mxu1 %v12143_v57 }
 0x9c6   :  { %11159 = vmatprep.subr.bf16.mxu1 %v12845_v24 }
 0x9c9   :  { %11160 = vmatpush3.bf16.msra.mxu1 %v12144_v62 }
 0x9ca   :  { %11161 = vmatprep.subr.bf16.mxu1 %v12845_v24 }
 0x9cd   :  { %11162 = vmatpush3.bf16.msra.mxu1 %v12145_v1 }
 0x9ce   :  { %11163 = vmatprep.subr.bf16.mxu1 %v12845_v24 }
 0x9d1   :  { %11164 = vmatpush3.bf16.msra.mxu1 %v12146_v3  ;;  %v12189_v3 = vld [vmem:[#allocation28 + $0xe8] ss:$16 sps:$4 sm:$0xff]  }
 0x9d2   :  { %11165 = vmatprep.subr.bf16.mxu1 %v12845_v24 }
 0x9d5   :  { %11166 = vmatpush3.bf16.msra.mxu1 %v12147_v5 }
 0x9d6   :  { %11167 = vmatprep.subr.bf16.mxu1 %v12845_v24 }
 0x9d9   :  { %11168 = vmatpush3.bf16.msra.mxu1 %v12148_v8  ;;  %v12194_v8 = vld [vmem:[#allocation28 + $0xcc] ss:$16 sps:$4 sm:$0xff]  }
 0x9da   :  { %11193 = vmatprep.subr.bf16.mxu1 %v12845_v24 }
 0xa7c   :  { %v11071_v47 = vpop.f32.mrf.mxu1 }
 0xa7e   :  { %v11072_v43 = vpop.f32.mrf.mxu1 }
 0xa7f   :  { %v11073_v27 = vadd.f32 %v11072_v43, %v11071_v47  ;;  %v12206_v47 = vld [vmem:[#allocation28 + $0x4c] ss:$16 sps:$4 sm:$0xff]   ;;  %v12204_v43 = vld [vmem:[#allocation28 + $0x48] ss:$16 sps:$4 sm:$0xff]  }
 0xa80   :  { %v11074_v15 = vpop.f32.mrf.mxu1 }
 0xa81   :  { %v13334_v35 = vadd.f32 %v11073_v27, %v8477_v14  ;;  %v12201_v14 = vld [vmem:[#allocation28 + $0x68] ss:$16 sps:$4 sm:$0xff]  }
 0xa82   :  { %v11075_v58 = vpop.f32.mrf.mxu1  ;;  %v12207_v27 = vld [vmem:[#allocation28 + $0x28] ss:$16 sps:$4 sm:$0xff]  }
 0xa83   :  { %v11076_v28 = vadd.f32 %v11075_v58, %v11074_v15  ;;  %v12209_v15 = vld [vmem:[#allocation28 + $0x2c] ss:$16 sps:$4 sm:$0xff]  }
 0xa84   :  { %v12212_v58 = vld [vmem:[#allocation28 + $0xc] ss:$16 sps:$4 sm:$0xff]  }
 0xa85   :  { %v13336_v51 = vadd.f32 %v11076_v28, %v8481_v29  ;;  %v12210_v28 = vld [vmem:[#allocation28 + $0x8] ss:$16 sps:$4 sm:$0xff]  }
 0xa86   :  { %v12215_v29 = vld [vmem:[#allocation29 + $0xac] ss:$12 sps:$4 sm:$0xff]  }
 0xa87   :  { %v8687_v61 = vpack.c.bf16 %v13336_v51, %v13334_v35 }
 0xa89   :  { %11170 = vmatmul.mubr.bf16.vlgmr.msra.gmra.mxu1 %v8687_v61  ;;  %v12219_v61 = vld [vmem:[#allocation29 + $0x94] ss:$12 sps:$4 sm:$0xff]  }
 0xa8a   :  { %11209 = vmatprep.mubr.msk.bf16.mxu1 %vm12846_vm0, %v12845_v24  ;;  %11194 = vmatpush3.bf16.msra.mxu1 %v12157_v21  ;;  %v12223_v21 = vld [vmem:[#allocation29 + $0x7c] ss:$12 sps:$4 sm:$0xff]  }
 0xa8b   :  { %11195 = vmatprep.subr.bf16.mxu1 %v12845_v24 }
 0xa8e   :  { %11196 = vmatpush3.bf16.msra.mxu1 %v12161_v32  ;;  %v12224_v32 = vld [vmem:[#allocation29 + $0x80] ss:$12 sps:$4 sm:$0xff]  }
 0xa8f   :  { %11197 = vmatprep.subr.bf16.mxu1 %v12845_v24 }
 0xa92   :  { %11198 = vmatpush3.bf16.msra.mxu1 %v12165_v41  ;;  %v12227_v41 = vld [vmem:[#allocation29 + $0x64] ss:$12 sps:$4 sm:$0xff]  }
 0xa93   :  { %11199 = vmatprep.subr.bf16.mxu1 %v12845_v24 }
 0xa96   :  { %11200 = vmatpush3.bf16.msra.mxu1 %v12169_v25  ;;  %v12225_v25 = vld [vmem:[#allocation29 + $0x60] ss:$12 sps:$4 sm:$0xff]  }
 0xa97   :  { %11201 = vmatprep.subr.bf16.mxu1 %v12845_v24 }
 0xa9a   :  { %11202 = vmatpush3.bf16.msra.mxu1 %v12173_v42  ;;  %v12228_v42 = vld [vmem:[#allocation29 + $0x68] ss:$12 sps:$4 sm:$0xff]  }
 0xa9b   :  { %11203 = vmatprep.subr.bf16.mxu1 %v12845_v24 }
 0xa9e   :  { %11204 = vmatpush3.bf16.msra.mxu1 %v12177_v38  ;;  %v12229_v38 = vld [vmem:[#allocation29 + $0x48] ss:$12 sps:$4 sm:$0xff]  }
 0xa9f   :  { %11205 = vmatprep.subr.bf16.mxu1 %v12845_v24 }
 0xaa2   :  { %11206 = vmatpush3.bf16.msra.mxu1 %v12181_v50 }
 0xaa3   :  { %11207 = vmatprep.subr.bf16.mxu1 %v12845_v24 }
 0xaa6   :  { %11208 = vmatpush3.bf16.msra.mxu1 %v12185_v44 }
 0xaa7   :  { %9185 = vmatprep.subr.bf16.mxu1 %v12191_v12 }
 0xb49   :  { %v8770_v52 = vpop.f32.mrf.mxu1 }
 0xb4a   :  { %v8777_v45 = vmax.f32 %v8770_v52, 0.0  ;;  %v12231_v52 = vld [vmem:[#allocation29 + $0x4c] ss:$12 sps:$4 sm:$0xff]  }
 0xb4b   :  { %v11171_v16 = vpop.f32.mrf.mxu1 }
 0xb4c   :  { %v12232_v16 = vld [vmem:[#allocation29 + $0x50] ss:$12 sps:$4 sm:$0xff]  }
 0xb4d   :  { %v8773_v22 = vpop.f32.mrf.mxu1 }
 0xb4e   :  { %v8778_v59 = vmax.f32 %v8773_v22, 0.0  ;;  %v12235_v22 = vld [vmem:[#allocation29 + $0x34] ss:$12 sps:$4 sm:$0xff]  }
 0xb4f   :  { %v11172_v53 = vpop.f32.mrf.mxu1 }
 0xb50   :  { %v8779_v31 = vpack.c.bf16 %v8778_v59, %v8777_v45  ;;  %v12233_v45 = vld [vmem:[#allocation29 + $0x30] ss:$12 sps:$4 sm:$0xff]   ;;  %v12236_v59 = vld [vmem:[#allocation29 + $0x38] ss:$12 sps:$4 sm:$0xff]  }
 0xb51   :  { %v12239_v53 = vld [vmem:[#allocation29 + $0x1c] ss:$12 sps:$4 sm:$0xff]  }
 0xb52   :  { %11190 = vmatmul.mubr.bf16.vlgmr.msra.gmra.mxu0 %v8779_v31  ;;  %v12240_v31 = vld [vmem:[#allocation29 + $0x20] ss:$12 sps:$4 sm:$0xff]  }
 0xb53   :  { %9143 = vmatpush1.bf16.msra.mxu0 %v12158_v37  ;;  %9174 = vmatprep.mubr.bf16.mxu0 %v12847_v40  ;;  %v12237_v37 = vld [vmem:[#allocation29 + $0x18] ss:$12 sps:$4 sm:$0xff]  }
 0xb54   :  { %9144 = vmatprep.subr.bf16.mxu0 %v12164_v19  ;;  %v12241_v19 = vld [vmem:[#allocation29] ss:$12 sps:$4 sm:$0xff]  }
 0xb57   :  { %9145 = vmatpush1.bf16.msra.mxu0 %v12162_v23  ;;  %v12243_v23 = vld [vmem:[#allocation29 + $0x4] ss:$12 sps:$4 sm:$0xff]  }
 0xb58   :  { %9146 = vmatprep.subr.bf16.mxu0 %v12168_v17  ;;  %v12244_v17 = vld [vmem:[#allocation29 + $0x8] ss:$12 sps:$4 sm:$0xff]  }
 0xb5b   :  { %9147 = vmatpush1.bf16.msra.mxu0 %v12166_v36  ;;  %v10960_v36 = vld [vmem:[#allocation26] ss:$0 sm:$0xff] }
 0xb5c   :  { %9148 = vmatprep.subr.bf16.mxu0 %v12172_v55 }
 0xb5f   :  { %9149 = vmatpush1.bf16.msra.mxu0 %v12170_v49 }
 0xb60   :  { %9150 = vmatprep.subr.bf16.mxu0 %v12176_v33 }
 0xb63   :  { %9151 = vmatpush1.bf16.msra.mxu0 %v12174_v30 }
 0xb64   :  { %9152 = vmatprep.subr.bf16.mxu0 %v12180_v56 }
 0xb67   :  { %9153 = vmatpush1.bf16.msra.mxu0 %v12178_v34 }
 0xb68   :  { %9154 = vmatprep.subr.bf16.mxu0 %v12184_v26 }
 0xb6b   :  { %9155 = vmatpush1.bf16.msra.mxu0 %v12182_v18 }
 0xb6c   :  { %9156 = vmatprep.subr.bf16.mxu0 %v12188_v39 }
 0xb6f   :  { %9157 = vmatpush1.bf16.msra.mxu0 %v12186_v63 }
 0xb70   :  { %9356 = vmatprep.subr.bf16.mxu0 %v12215_v29  ;;  %v12246_v29 = vld [vmem:[#allocation31 + $0x38] sm:$0xff]  }
 0xc12   :  { %v8862_v4 = vpop.f32.mrf.mxu0 }
 0xc13   :  { %v13353_v57 = vadd.f32 %v8862_v4, %v13334_v35  ;;  %v12213_v35 = vld [vmem:[#allocation29 + $0xa8] ss:$12 sps:$4 sm:$0xff]  }
 0xc14   :  { %v11191_v0 = vpop.f32.mrf.mxu0 }
 0xc16   :  { %v8865_v2 = vpop.f32.mrf.mxu0 }
 0xc17   :  { %v13356_v62 = vadd.f32 %v8865_v2, %v13336_v51  ;;  %v12216_v51 = vld [vmem:[#allocation29 + $0xb0] ss:$12 sps:$4 sm:$0xff]  }
 0xc18   :  { %v11192_v1 = vpop.f32.mrf.mxu0 }
 0xc19   :  { %v8869_v5 = vpack.c.bf16 %v13356_v62, %v13353_v57 }
 0xc1b   :  { %11210 = vmatmul.mubr.bf16.vlgmr.msra.gmra.mxu1 %v8869_v5  ;;  %9175 = vmatmul.mubr.bf16.vlgmr.msra.gmra.mxu0 %v8869_v5 }
 0xc1c   :  { %9186 = vmatpush1.bf16.msra.mxu1 %v12189_v3  ;;  %9217 = vmatprep.mubr.bf16.mxu1 %v12847_v40 }
 0xc1d   :  { %9187 = vmatprep.subr.bf16.mxu1 %v12194_v8  ;;  %9388 = vmatprep.mubr.bf16.mxu0 %v12847_v40 }
 0xc1e   :  { %9357 = vmatpush1.bf16.msra.mxu0 %v12213_v35  ;;  %v12249_v35 = vld [vmem:[#allocation31 + $0x68] sm:$0xff]  }
 0xc1f   :  { %9358 = vmatprep.subr.bf16.mxu0 %v12219_v61  ;;  %v12251_v61 = vld [vmem:[#allocation31 + $0x60] sm:$0xff]  }
 0xc20   :  { %9188 = vmatpush1.bf16.msra.mxu1 %v12192_v9 }
 0xc21   :  { %9189 = vmatprep.subr.bf16.mxu1 %v12197_v10 }
 0xc22   :  { %9359 = vmatpush1.bf16.msra.mxu0 %v12217_v54  ;;  %v12252_v54 = vld [vmem:[#allocation31 + $0x20] sm:$0xff]  }
 0xc23   :  { %9360 = vmatprep.subr.bf16.mxu0 %v12223_v21  ;;  %v12254_v21 = vld [vmem:[#allocation31 + $0x18] sm:$0xff]  }
 0xc24   :  { %9190 = vmatpush1.bf16.msra.mxu1 %v12195_v11 }
 0xc25   :  { %9191 = vmatprep.subr.bf16.mxu1 %v12200_v13 }
 0xc26   :  { %9361 = vmatpush1.bf16.msra.mxu0 %v12221_v60  ;;  %v12255_v60 = vld [vmem:[#allocation31 + $0x50] sm:$0xff]  }
 0xc27   :  { %9362 = vmatprep.subr.bf16.mxu0 %v12227_v41  ;;  %v12257_v41 = vld [vmem:[#allocation31 + $0x48] sm:$0xff]  }
 0xc28   :  { %9192 = vmatpush1.bf16.msra.mxu1 %v12198_v7 }
 0xc29   :  { %9193 = vmatprep.subr.bf16.mxu1 %v12203_v46 }
 0xc2a   :  { %9363 = vmatpush1.bf16.msra.mxu0 %v12225_v25  ;;  %v12258_v25 = vld [vmem:[#allocation31 + $0x8] sm:$0xff]  }
 0xc2b   :  { %9364 = vmatprep.subr.bf16.mxu0 %v12231_v52  ;;  %v12261_v52 = vld [vmem:[#allocation32 + $0x38] sm:$0xff]  }
 0xc2c   :  { %9194 = vmatpush1.bf16.msra.mxu1 %v12201_v14 }
 0xc2d   :  { %9195 = vmatprep.subr.bf16.mxu1 %v12206_v47 }
 0xc2e   :  { %9365 = vmatpush1.bf16.msra.mxu0 %v12229_v38  ;;  %v12260_v38 = vld [vmem:[#allocation31] sm:$0xff]  }
 0xc2f   :  { %9366 = vmatprep.subr.bf16.mxu0 %v12235_v22  ;;  %v12263_v22 = vld [vmem:[#allocation32 + $0x28] sm:$0xff]  }
 0xc30   :  { %9196 = vmatpush1.bf16.msra.mxu1 %v12204_v43 }
 0xc31   :  { %9197 = vmatprep.subr.bf16.mxu1 %v12209_v15 }
 0xc32   :  { %9367 = vmatpush1.bf16.msra.mxu0 %v12233_v45  ;;  %v12264_v45 = vld [vmem:[#allocation32 + $0x20] sm:$0xff]  }
 0xc33   :  { %9368 = vmatprep.subr.bf16.mxu0 %v12239_v53 }
 0xc34   :  { %9198 = vmatpush1.bf16.msra.mxu1 %v12207_v27 }
 0xc35   :  { %9199 = vmatprep.subr.bf16.mxu1 %v12212_v58 }
 0xc36   :  { %9369 = vmatpush1.bf16.msra.mxu0 %v12237_v37 }
 0xc37   :  { %9370 = vmatprep.subr.bf16.mxu0 %v12243_v23 }
 0xc38   :  { %9200 = vmatpush1.bf16.msra.mxu1 %v12210_v28  ;;  %v12245_v28 = vld [vmem:[#allocation31 + $0x78] sm:$0xff]  }
 0xc39   :  { %11213 = vmatprep.subr.bf16.mxu1 %v12845_v24 }
 0xc3a   :  { %9371 = vmatpush1.bf16.msra.mxu0 %v12241_v19 }
 0xc3b   :  { %9218 = vmatmul.mubr.bf16.vlgmr.msra.gmra.mxu1 %v8869_v5  ;;  %11113 = vmatprep.subr.bf16.mxu0 %v12245_v28 }
 0xc3c   :  { %11229 = vmatprep.mubr.msk.bf16.mxu1 %vm12846_vm0, %v12845_v24  ;;  %11214 = vmatpush3.bf16.msra.mxu1 %v12216_v51  ;;  %v12250_v51 = vld [vmem:[#allocation31 + $0x28] sm:$0xff]  }
 0xc3d   :  { %11215 = vmatprep.subr.bf16.mxu1 %v12845_v24 }
 0xc40   :  { %11216 = vmatpush3.bf16.msra.mxu1 %v12220_v48  ;;  %v12253_v48 = vld [vmem:[#allocation31 + $0x58] sm:$0xff]  }
 0xc41   :  { %11217 = vmatprep.subr.bf16.mxu1 %v12845_v24 }
 0xc44   :  { %11218 = vmatpush3.bf16.msra.mxu1 %v12224_v32  ;;  %v12256_v32 = vld [vmem:[#allocation31 + $0x10] sm:$0xff]  }
 0xc45   :  { %11219 = vmatprep.subr.bf16.mxu1 %v12845_v24 }
 0xc48   :  { %11220 = vmatpush3.bf16.msra.mxu1 %v12228_v42  ;;  %v12259_v42 = vld [vmem:[#allocation31 + $0x40] sm:$0xff]  }
 0xc49   :  { %11221 = vmatprep.subr.bf16.mxu1 %v12845_v24 }
 0xc4c   :  { %11222 = vmatpush3.bf16.msra.mxu1 %v12232_v16  ;;  %v12262_v16 = vld [vmem:[#allocation32 + $0x30] sm:$0xff]  }
 0xc4d   :  { %11223 = vmatprep.subr.bf16.mxu1 %v12845_v24 }
 0xc50   :  { %11224 = vmatpush3.bf16.msra.mxu1 %v12236_v59  ;;  %v12265_v59 = vld [vmem:[#allocation32 + $0x18] sm:$0xff]  }
 0xc51   :  { %11225 = vmatprep.subr.bf16.mxu1 %v12845_v24 }
 0xc54   :  { %11226 = vmatpush3.bf16.msra.mxu1 %v12240_v31 }
 0xc55   :  { %11227 = vmatprep.subr.bf16.mxu1 %v12845_v24 }
 0xc58   :  { %11228 = vmatpush3.bf16.msra.mxu1 %v12244_v17 }
 0xc59   :  { %11233 = vmatprep.subr.bf16.mxu1 %v12845_v24 }
 0xcdb   :  { %v8952_v55 = vpop.f32.mrf.mxu1  ;;  %v9176_v40 = vpop.f32.mrf.mxu0 }
 0xcdc   :  { %v8953_v49 = vadd.f32 %v8952_v55, %v13332_v20 }
 0xcdd   :  { %v11211_v33 = vpop.f32.mrf.mxu1  ;;  %v9178_v0 = vpop.f32.mrf.mxu0 }
 0xcde   :  { %v8965_v30 = vadd.f32 %v10960_v36, %v8953_v49 }
 0xcdf   :  { %v8955_v56 = vpop.f32.mrf.mxu1  ;;  %v9180_v20 = vpop.f32.mrf.mxu0 }
 0xce0   :  { %v10961_v34 = vmul.f32 -1.442695, %v8965_v30  ;;  %v8956_v50 = vadd.f32 %v8955_v56, %v13350_v6 }
 0xce1   :  { %v11212_v26 = vpop.f32.mrf.mxu1  ;;  %v9182_v5 = vpop.f32.mrf.mxu0 }
 0xce2   :  { %12325 = vpow2.f32 %v10961_v34  ;;  %v8966_v18 = vadd.f32 %v10960_v36, %v8956_v50 }
 0xce4   :  { %v10962_v44 = vmul.f32 -1.442695, %v8966_v18 }
 0xce6   :  { %12327 = vpow2.f32 %v10962_v44 }
 0xcef   :  { %v12326_v39 = vpop.eup %12325 }
 0xcf0   :  { %v8973_v63 = vadd.f32 1.0, %v12326_v39 }
 0xcf2   :  { %12329 = vrcp.f32 %v8973_v63 }
 0xcf3   :  { %v12328_v12 = vpop.eup %12327 }
 0xcf4   :  { %v8974_v4 = vadd.f32 1.0, %v12328_v12 }
 0xcf6   :  { %12331 = vrcp.f32 %v8974_v4 }
 0xcfb   :  { %v9219_v2 = vpop.f32.mrf.mxu1 }
 0xcfc   :  { %v9454_v1 = vmul.f32 %v9219_v2, %v9178_v0  ;;  %v9442_v8 = vmul.f32 %v9219_v2, %v9176_v40 }
 0xcfd   :  { %v9221_v3 = vpop.f32.mrf.mxu1 }
 0xcfe   :  { %9456 = vadd.xlane.f32.xlu0 %v9454_v1  ;;  %v9460_v13 = vmul.f32 %v9221_v3, %v9178_v0  ;;  %v9448_v15 = vmul.f32 %v9221_v3, %v9176_v40 }
 0xcff   :  { %v9223_v6 = vpop.f32.mrf.mxu1  ;;  %v12330_v10 = vpop.eup %12329 }
 0xd00   :  { %v9455_v9 = vmul.f32 %v9223_v6, %v9182_v5  ;;  %v9443_v7 = vmul.f32 %v9223_v6, %v9180_v20  ;;  %v8979_v46 = vmul.f32 %v12330_v10, %v13353_v57  ;;  %v12247_v57 = vld [vmem:[#allocation31 + $0x70] sm:$0xff]  }
 0xd01   :  { %v9225_v47 = vpop.f32.mrf.mxu1 }
 0xd02   :  { %9444 = vadd.xlane.f32.xlu0 %v9442_v8  ;;  %9458 = vadd.xlane.f32.xlu1 %v9455_v9  ;;  %v9461_v27 = vmul.f32 %v9225_v47, %v9182_v5  ;;  %v9449_v58 = vmul.f32 %v9225_v47, %v9180_v20 }
 0xd03   :  { %v12332_v11 = vpop.eup %12331 }
 0xd04   :  { %v8980_v14 = vmul.f32 %v12332_v11, %v13356_v62  ;;  %v12248_v62 = vld [vmem:[#allocation31 + $0x30] sm:$0xff]  }
 0xd06   :  { %9462 = vadd.xlane.f32.xlu0 %v9460_v13  ;;  %9446 = vadd.xlane.f32.xlu1 %v9443_v7  ;;  %v8981_v43 = vpack.c.bf16 %v8980_v14, %v8979_v46 }
 0xd08   :  { %9389 = vmatmul.mubr.bf16.vlgmr.msra.gmra.mxu0 %v8981_v43  ;;  %11230 = vmatmul.mubr.bf16.vlgmr.msra.gmra.mxu1 %v8981_v43 }
 0xd09   :  { %11249 = vmatprep.mubr.msk.bf16.mxu1 %vm12846_vm0, %v12845_v24  ;;  %11114 = vmatpush3.bf16.msra.mxu0 %v12246_v29 }
 0xd0a   :  { %9450 = vadd.xlane.f32.xlu0 %v9448_v15  ;;  %9464 = vadd.xlane.f32.xlu1 %v9461_v27 }
 0xd0b   :  { %11115 = vmatprep.subr.bf16.mxu0 %v12247_v57  ;;  %11234 = vmatpush3.bf16.msra.mxu1 %v12261_v52 }
 0xd0c   :  { %11235 = vmatprep.subr.bf16.mxu1 %v12845_v24 }
 0xd0d   :  { %11116 = vmatpush3.bf16.msra.mxu0 %v12248_v62 }
 0xd0e   :  { %9452 = vadd.xlane.f32.xlu1 %v9449_v58  ;;  %11117 = vmatprep.subr.bf16.mxu0 %v12249_v35 }
 0xd0f   :  { %11236 = vmatpush3.bf16.msra.mxu1 %v12262_v16 }
 0xd10   :  { %11237 = vmatprep.subr.bf16.mxu1 %v12845_v24 }
 0xd11   :  { %11118 = vmatpush3.bf16.msra.mxu0 %v12250_v51 }
 0xd12   :  { %11119 = vmatprep.subr.bf16.mxu0 %v12251_v61  ;;  %v12266_v61 = vld [vmem:[#allocation32 + $0x10] sm:$0xff]  }
 0xd13   :  { %11238 = vmatpush3.bf16.msra.mxu1 %v12263_v22 }
 0xd14   :  { %11239 = vmatprep.subr.bf16.mxu1 %v12845_v24 }
 0xd15   :  { %11120 = vmatpush3.bf16.msra.mxu0 %v12252_v54  ;;  %v12267_v54 = vld [vmem:[#allocation32 + $0x8] sm:$0xff]  }
 0xd16   :  { %11121 = vmatprep.subr.bf16.mxu0 %v12253_v48  ;;  %v12268_v48 = vld [vmem:[#allocation32] sm:$0xff]  }
 0xd17   :  { %11240 = vmatpush3.bf16.msra.mxu1 %v12264_v45 }
 0xd18   :  { %11241 = vmatprep.subr.bf16.mxu1 %v12845_v24 }
 0xd19   :  { %11122 = vmatpush3.bf16.msra.mxu0 %v12254_v21  ;;  %v12269_v21 = vld [vmem:[#allocation34 + $0x38] sm:$0xff]  }
 0xd1a   :  { %11123 = vmatprep.subr.bf16.mxu0 %v12255_v60  ;;  %v12270_v60 = vld [vmem:[#allocation34 + $0x30] sm:$0xff]  }
 0xd1b   :  { %11242 = vmatpush3.bf16.msra.mxu1 %v12265_v59 }
 0xd1c   :  { %11243 = vmatprep.subr.bf16.mxu1 %v12845_v24 }
 0xd1d   :  { %11124 = vmatpush3.bf16.msra.mxu0 %v12256_v32  ;;  %v12271_v32 = vld [vmem:[#allocation34 + $0x28] sm:$0xff]  }
 0xd1e   :  { %11125 = vmatprep.subr.bf16.mxu0 %v12257_v41  ;;  %v12272_v41 = vld [vmem:[#allocation34 + $0x20] sm:$0xff]  }
 0xd1f   :  { %11244 = vmatpush3.bf16.msra.mxu1 %v12266_v61 }
 0xd20   :  { %11245 = vmatprep.subr.bf16.mxu1 %v12845_v24 }
 0xd21   :  { %11126 = vmatpush3.bf16.msra.mxu0 %v12258_v25  ;;  %v12273_v25 = vld [vmem:[#allocation34 + $0x18] sm:$0xff]  }
 0xd22   :  { %11127 = vmatprep.subr.bf16.mxu0 %v12259_v42  ;;  %v12274_v42 = vld [vmem:[#allocation34 + $0x10] sm:$0xff]  }
 0xd23   :  { %11246 = vmatpush3.bf16.msra.mxu1 %v12267_v54 }
 0xd24   :  { %11247 = vmatprep.subr.bf16.mxu1 %v12845_v24 }
 0xd25   :  { %11128 = vmatpush3.bf16.msra.mxu0 %v12260_v38 }
 0xd26   :  { %11253 = vmatprep.subr.bf16.mxu0 %v12845_v24 }
 0xd27   :  { %11248 = vmatpush3.bf16.msra.mxu1 %v12268_v48 }
 0xd87   :  { %v9457_v53 = vpop.xlane.xlu0 %9456 }
 0xd8b   :  { %v9459_v37 = vpop.xlane.xlu1 %9458  ;;  %v9445_v31 = vpop.xlane.xlu0 %9444 }
 0xd8f   :  { %v9447_v19 = vpop.xlane.xlu1 %9446  ;;  %v9463_v23 = vpop.xlane.xlu0 %9462 }
 0xd90   :  { %v9480_v55 = vsub.f32 %v9463_v23, %v9457_v53  ;;  %v12276_v23 = vld [vmem:[#allocation34] sm:$0xff]  }
 0xd92   :  { %v11021_v34 = vmul.f32 -1.442695, %v9480_v55 }
 0xd93   :  { %v9465_v17 = vpop.xlane.xlu1 %9464  ;;  %v9451_v36 = vpop.xlane.xlu0 %9450 }
 0xd94   :  { %v9466_v33 = vsub.f32 %v9451_v36, %v9445_v31  ;;  %v9481_v30 = vsub.f32 %v9465_v17, %v9459_v37  ;;  %12333 = vpow2.f32 %v11021_v34 }
 0xd96   :  { %v11019_v50 = vmul.f32 -1.442695, %v9466_v33  ;;  %v11022_v26 = vmul.f32 -1.442695, %v9481_v30 }
 0xd97   :  { %v9453_v49 = vpop.xlane.xlu1 %9452 }
 0xd98   :  { %v9467_v56 = vsub.f32 %v9453_v49, %v9447_v19  ;;  %12335 = vpow2.f32 %v11019_v50  ;;  %v12275_v19 = vld [vmem:[#allocation34 + $0x8] sm:$0xff]  }
 0xd99   :  { %12337 = vpow2.f32 %v11022_v26 }
 0xd9a   :  { %v11020_v18 = vmul.f32 -1.442695, %v9467_v56 }
 0xd9c   :  { %12339 = vpow2.f32 %v11020_v18 }
 0xda1   :  { %v12334_v44 = vpop.eup %12333 }
 0xda2   :  { %v9488_v40 = vadd.f32 1.0, %v12334_v44 }
 0xda4   :  { %12341 = vrcp.f32 %v9488_v40 }
 0xda5   :  { %v12336_v39 = vpop.eup %12335 }
 0xda6   :  { %v12338_v63 = vpop.eup %12337  ;;  %v9474_v4 = vadd.f32 1.0, %v12336_v39 }
 0xda7   :  { %v9489_v0 = vadd.f32 1.0, %v12338_v63 }
 0xda8   :  { %12343 = vrcp.f32 %v9474_v4 }
 0xda9   :  { %v12340_v12 = vpop.eup %12339  ;;  %12345 = vrcp.f32 %v9489_v0 }
 0xdaa   :  { %v9475_v20 = vadd.f32 1.0, %v12340_v12 }
 0xdac   :  { %12347 = vrcp.f32 %v9475_v20 }
 0xdb1   :  { %v12342_v10 = vpop.eup %12341 }
 0xdb5   :  { %v12344_v11 = vpop.eup %12343 }
 0xdb6   :  { %v12346_v46 = vpop.eup %12345 }
 0xdb9   :  { %v12348_v15 = vpop.eup %12347 }
 0xdc8   :  { %v9390_v2 = vpop.f32.mrf.mxu0  ;;  %v9433_v1 = vpop.f32.mrf.mxu1 }
 0xdca   :  { %v9392_v3 = vpop.f32.mrf.mxu0  ;;  %v11231_v5 = vpop.f32.mrf.mxu1 }
 0xdcb   :  { %v9440_v6 = vsub.f32 %v9392_v3, %v9390_v2 }
 0xdcc   :  { %v9394_v8 = vpop.f32.mrf.mxu0  ;;  %v9436_v9 = vpop.f32.mrf.mxu1 }
 0xdcd   :  { %v9494_v14 = vmul.f32 %v12344_v11, %v9440_v6  ;;  %v9498_v47 = vmul.f32 %v12342_v10, %v9440_v6 }
 0xdce   :  { %v9396_v13 = vpop.f32.mrf.mxu0  ;;  %v11232_v7 = vpop.f32.mrf.mxu1 }
 0xdcf   :  { %v9441_v43 = vsub.f32 %v9396_v13, %v9394_v8  ;;  %v9496_v28 = vadd.f32 %v9494_v14, %v9390_v2  ;;  %v9500_v29 = vadd.f32 %v9498_v47, %v9390_v2 }
 0xdd1   :  { %v9495_v27 = vmul.f32 %v12348_v15, %v9441_v43  ;;  %v9499_v58 = vmul.f32 %v12346_v46, %v9441_v43 }
 0xdd3   :  { %v9497_v57 = vadd.f32 %v9495_v27, %v9394_v8  ;;  %v9501_v62 = vadd.f32 %v9499_v58, %v9394_v8 }
 0xdd5   :  { %v9502_v35 = vpack.c.bf16 %v9497_v57, %v9496_v28  ;;  %v9503_v51 = vpack.c.bf16 %v9501_v62, %v9500_v29 }
 0xdd7   :  { %9632 = vmatprep.mubr.bf16.mxu0 %v9503_v51 }
 0xdd8   :  { %9633 = vmatmul.mubr.bf16.vlgmr.msra.gmra.mxu0 %v9502_v35 }
 0xdd9   :  { %11269 = vmatprep.mubr.msk.bf16.mxu0 %vm12846_vm0, %v12845_v24  ;;  %11254 = vmatpush3.bf16.msra.mxu0 %v12269_v21 }
 0xdda   :  { %11255 = vmatprep.subr.bf16.mxu0 %v12845_v24 }
 0xddd   :  { %11256 = vmatpush3.bf16.msra.mxu0 %v12270_v60 }
 0xdde   :  { %11257 = vmatprep.subr.bf16.mxu0 %v12845_v24 }
 0xde1   :  { %11258 = vmatpush3.bf16.msra.mxu0 %v12271_v32 }
 0xde2   :  { %11259 = vmatprep.subr.bf16.mxu0 %v12845_v24 }
 0xde5   :  { %11260 = vmatpush3.bf16.msra.mxu0 %v12272_v41 }
 0xde6   :  { %11261 = vmatprep.subr.bf16.mxu0 %v12845_v24 }
 0xde9   :  { %11262 = vmatpush3.bf16.msra.mxu0 %v12273_v25 }
 0xdea   :  { %11263 = vmatprep.subr.bf16.mxu0 %v12845_v24 }
 0xded   :  { %11264 = vmatpush3.bf16.msra.mxu0 %v12274_v42 }
 0xdee   :  { %11265 = vmatprep.subr.bf16.mxu0 %v12845_v24 }
 0xdf1   :  { %11266 = vmatpush3.bf16.msra.mxu0 %v12275_v19 }
 0xdf2   :  { %11267 = vmatprep.subr.bf16.mxu0 %v12845_v24 }
 0xdf5   :  { %11268 = vmatpush3.bf16.msra.mxu0 %v12276_v23 }
 0xe98   :  { %v11129_v38 = vpop.f32.mrf.mxu0 }
 0xe9a   :  { %v11130_v52 = vpop.f32.mrf.mxu0 }
 0xe9b   :  { %v11131_v22 = vadd.f32 %v11130_v52, %v11129_v38 }
 0xe9c   :  { %v11132_v16 = vpop.f32.mrf.mxu0 }
 0xe9d   :  { %v9635_v53 = vadd.f32 %v11131_v22, %v9433_v1 }
 0xe9e   :  { %v11133_v45 = vpop.f32.mrf.mxu0 }
 0xe9f   :  { %v11134_v59 = vadd.f32 %v11133_v45, %v11132_v16 }
 0xea1   :  { %v9638_v37 = vadd.f32 %v11134_v59, %v9436_v9 }
 0xea3   :  { %v9641_v31 = vpack.c.bf16 %v9638_v37, %v9635_v53 }
 0xea5   :  { %11250 = vmatmul.mubr.bf16.vlgmr.msra.gmra.mxu1 %v9641_v31 }
 0xf65   :  { %v9724_v17 = vpop.f32.mrf.mxu1 }
 0xf66   :  { %v9731_v49 = vmax.f32 %v9724_v17, 0.0 }
 0xf67   :  { %v11251_v36 = vpop.f32.mrf.mxu1 }
 0xf69   :  { %v9727_v55 = vpop.f32.mrf.mxu1 }
 0xf6a   :  { %v9732_v33 = vmax.f32 %v9727_v55, 0.0 }
 0xf6b   :  { %v11252_v30 = vpop.f32.mrf.mxu1 }
 0xf6c   :  { %v9733_v56 = vpack.c.bf16 %v9732_v33, %v9731_v49 }
 0xf6e   :  { %11270 = vmatmul.mubr.bf16.vlgmr.msra.gmra.mxu0 %v9733_v56 }
0x102e   :  { %v9816_v34 = vpop.f32.mrf.mxu0 }
0x102f   :  { %v9817_v50 = vadd.f32 %v9816_v34, %v9635_v53 }
0x1030   :  { %v11271_v26 = vpop.f32.mrf.mxu0 }
0x1031   :  { %9823 = vst [vmem:[#allocation35] sm:$0xff] %v9817_v50 }
0x1032   :  { %v9819_v18 = vpop.f32.mrf.mxu0 }
0x1033   :  { %v9820_v44 = vadd.f32 %v9819_v18, %v9638_v37 }
0x1034   :  { %v11272_v24 = vpop.f32.mrf.mxu0 }
0x1035   :  { %9824 = vst [vmem:[#allocation35 + $0x8] sm:$0xff] %v9820_v44 }
0x1036   :  { %12780 = shalt.err (!%p12777_p11)
}
0x1037   :  { %s13435_s29 = sld [smem:[#allocation54_spill]] }
0x103d   :  { %9836 = dma.vmem_to_hbm [thread:$0]  %s9831_s20, 256, %s13435_s29, [#allocation4], %s12821_s0, %s12821_s0, %s12822_s4  }
0x103e   :  { %12811 = dma.done.wait [#allocation4], 256  }
0x103f   :  { %12812 = vsyncadd [#allocation4], 4294967040 }
0x1040   :  { %9840 = vsyncpa [#allocation3], 1 }
0x1041   :  { %9841 = vsyncpa [#allocation6], 1 }
0x1042   :  { %9842 = vsyncpa [#allocation9], 1 }
0x1043   :  { %9843 = vsyncpa [#allocation12], 1 }
0x1044   :  { %9844 = vsyncpa [#allocation15], 1 }
0x1045   :  { %9845 = vsyncpa [#allocation18], 1 }
0x1046   :  { %9846 = vsyncpa [#allocation21], 1 }
0x1047   :  { %9847 = vsyncpa [#allocation24], 1 }
0x1048   :  { %9848 = vsyncpa [#allocation27], 1 }
0x1049   :  { %9849 = vsyncpa [#allocation30], 1 }
0x104a   :  { %9850 = vsyncpa [#allocation33], 1 }
0x104b   :  { %9851 = vsyncpa [#allocation4], 1 }

</bundles_post_ra>
